<compile_context>
chip_gen: v6e
topology: v6e:2x2x1
jax: 0.10.0
libtpu: 0.0.40
codegen_flags: <defaults>
</compile_context>

<pallas_src>
import functools

import jax
import jax.numpy as jnp
from jax import lax
from jax.experimental import pallas as pl
from jax.experimental.pallas import tpu as pltpu

BN_EPS = 1e-3                    # nn.BatchNorm2d(eps=0.001)
WGT_DTYPE = jnp.bfloat16         # MXU weight dtype
ACT_DTYPE = jnp.bfloat16         # inter-kernel activation dtype (f32 accumulate)


# --------------------------- small config helpers ----------------------------

@functools.lru_cache(maxsize=None)
def _vmem_limit():
    """Scoped VMEM budget: half of physical VMEM, capped, safe fallback."""
    try:
        cap = int(pltpu.get_tpu_info().vmem_capacity_bytes)
        return int(min(cap // 2, 96 * 1024 * 1024))
    except Exception:
        return 32 * 1024 * 1024


def _row_tile(m, target=512):
    """Row tile for the pointwise matmul: ~512, multiple of 8, >=2 grid steps."""
    if m <= target:
        half = -(-m // 2)
        tm = max(8, ((half + 7) // 8) * 8)
        return min(tm, m)
    return target


def _divisor_tile(n, target):
    """Largest divisor of n that is <= target (row-tile for the conv kernels)."""
    for d in range(min(n, target), 0, -1):
        if n % d == 0:
            return d
    return n


# ----------------------------- Pallas kernels -------------------------------

def _fused_pointwise_kernel(x_ref, w_ref, b_ref, o1_ref, o5_ref, o3_ref, op_ref):
    # x_ref: (TM, Cin) bf16   w_ref: (Cin, Ct) bf16   b_ref: (1, Ct) f32
    # outputs: (TM, 64) f32, (TM, 48) bf16, (TM, 64) bf16, (TM, Cp) bf16
    y = jnp.dot(x_ref[...], w_ref[...], preferred_element_type=jnp.float32)
    y = y + b_ref[...]
    c1 = o1_ref.shape[-1]
    c5 = o5_ref.shape[-1]
    c3 = o3_ref.shape[-1]
    o1_ref[...] = y[:, :c1].astype(o1_ref.dtype)
    o5_ref[...] = y[:, c1:c1 + c5].astype(o5_ref.dtype)
    o3_ref[...] = y[:, c1 + c5:c1 + c5 + c3].astype(o3_ref.dtype)
    op_ref[...] = y[:, c1 + c5 + c3:].astype(op_ref.dtype)


def _make_conv_kernel(K, TH):
    """KxK stride-1 conv: per row tile, build an im2col block in VMEM and do a
    single deep-contraction MXU matmul (tap sum lives in the contraction dim)."""

    def kernel(xpad_ref, w_ref, b_ref, o_ref):
        # xpad_ref: (1, Hp, Wp, Cin) bf16 (resident across the row-tile axis)
        # w_ref   : (K*K*Cin, Cout) bf16, rows ordered (ky, kx, cin)
        # b_ref   : (1, Cout) f32
        # o_ref   : (1, TH, W, Cout)
        Cin = xpad_ref.shape[-1]
        W = o_ref.shape[2]
        y0 = pl.multiple_of(pl.program_id(1) * TH, TH)
        slabs = [xpad_ref[0, pl.ds(y0 + ky, TH), kx:kx + W, :]
                 for ky in range(K) for kx in range(K)]
        patch = jnp.concatenate(slabs, axis=-1).reshape(TH * W, K * K * Cin)
        y = jnp.dot(patch, w_ref[...], preferred_element_type=jnp.float32)
        y = y + b_ref[...]
        o_ref[0] = y.reshape(TH, W, -1).astype(o_ref.dtype)

    return kernel


def _avgpool3_bias_kernel(xpad_ref, b_ref, o_ref):
    # 3x3 stride-1 average pool (count_include_pad=True) + per-channel bias.
    # xpad_ref: (1, H+2, W+2, Cp) bf16   b_ref: (1, Cp) f32   o_ref: (1, H, W, Cp) f32
    H, W = o_ref.shape[1], o_ref.shape[2]
    acc = jnp.zeros((H, W, o_ref.shape[3]), jnp.float32)
    for ky in range(3):
        for kx in range(3):
            acc = acc + xpad_ref[0, ky:ky + H, kx:kx + W, :].astype(jnp.float32)
    o_ref[0] = (acc * (1.0 / 9.0) + b_ref[0]).astype(o_ref.dtype)


# --------------------------- wrappers (JAX glue) ----------------------------

def fused_pointwise_pallas(x_nhwc, f):
    """One lane-dense matmul producing the four 1x1-conv slabs as separate outputs."""
    N, H, W, Cin = x_nhwc.shape
    M = N * H * W
    tm = _row_tile(M)
    c1, c5, c3, cp = f["c1"], f["c5"], f["c3"], f["cp"]
    w = f["w_fused"]                                   # (Cin, Ct) bf16
    ct = w.shape[1]
    b2d = f["b_fused"].reshape(1, ct).astype(jnp.float32)
    x2d = x_nhwc.reshape(M, Cin)

    outs = pl.pallas_call(
        _fused_pointwise_kernel,
        out_shape=(
            jax.ShapeDtypeStruct((M, c1), jnp.float32),   # branch1x1 (final)
            jax.ShapeDtypeStruct((M, c5), ACT_DTYPE),     # 5x5-branch input
            jax.ShapeDtypeStruct((M, c3), ACT_DTYPE),     # 3x3-branch input
            jax.ShapeDtypeStruct((M, cp), ACT_DTYPE),     # pool branch, pre-pool
        ),
        grid=(pl.cdiv(M, tm),),
        in_specs=[
            pl.BlockSpec((tm, Cin), lambda i: (i, 0)),
            pl.BlockSpec((Cin, ct), lambda i: (0, 0)),
            pl.BlockSpec((1, ct), lambda i: (0, 0)),
        ],
        out_specs=(
            pl.BlockSpec((tm, c1), lambda i: (i, 0)),
            pl.BlockSpec((tm, c5), lambda i: (i, 0)),
            pl.BlockSpec((tm, c3), lambda i: (i, 0)),
            pl.BlockSpec((tm, cp), lambda i: (i, 0)),
        ),
        compiler_params=pltpu.CompilerParams(
            dimension_semantics=("parallel",),
            vmem_limit_bytes=_vmem_limit()),
    )(x2d, w, b2d)

    b1, b5, b3, bp = outs
    return (b1.reshape(N, H, W, c1), b5.reshape(N, H, W, c5),
            b3.reshape(N, H, W, c3), bp.reshape(N, H, W, cp))


def conv_kxk_pallas(x_nhwc, w_flat, bias, K, out_dtype):
    """KxK stride-1 'same' conv (+ per-channel bias) on an NHWC activation."""
    N, H, W, Cin = x_nhwc.shape
    Cout = w_flat.shape[-1]
    P = (K - 1) // 2
    xpad = jnp.pad(x_nhwc, ((0, 0), (P, P), (P, P), (0, 0)))
    Hp, Wp = H + 2 * P, W + 2 * P
    TH = _divisor_tile(H, 8)
    b2d = bias.reshape(1, Cout).astype(jnp.float32)

    return pl.pallas_call(
        _make_conv_kernel(K, TH),
        out_shape=jax.ShapeDtypeStruct((N, H, W, Cout), out_dtype),
        grid=(N, H // TH),
        in_specs=[
            pl.BlockSpec((1, Hp, Wp, Cin), lambda n, t: (n, 0, 0, 0)),
            pl.BlockSpec((K * K * Cin, Cout), lambda n, t: (0, 0)),
            pl.BlockSpec((1, Cout), lambda n, t: (0, 0)),
        ],
        out_specs=pl.BlockSpec((1, TH, W, Cout), lambda n, t: (n, t, 0, 0)),
        compiler_params=pltpu.CompilerParams(
            dimension_semantics=("parallel", "arbitrary"),
            vmem_limit_bytes=_vmem_limit()),
    )(xpad, w_flat, b2d)


def avgpool3_bias_pallas(x_nhwc, bias):
    """3x3 stride-1 pad-1 average pool (+ bias) over the pool-branch channels."""
    N, H, W, C = x_nhwc.shape
    xpad = jnp.pad(x_nhwc, ((0, 0), (1, 1), (1, 1), (0, 0)))
    b2d = bias.reshape(1, C).astype(jnp.float32)
    return pl.pallas_call(
        _avgpool3_bias_kernel,
        out_shape=jax.ShapeDtypeStruct((N, H, W, C), jnp.float32),
        grid=(N,),
        in_specs=[
            pl.BlockSpec((1, H + 2, W + 2, C), lambda n: (n, 0, 0, 0)),
            pl.BlockSpec((1, C), lambda n: (0, 0)),
        ],
        out_specs=pl.BlockSpec((1, H, W, C), lambda n: (n, 0, 0, 0)),
        compiler_params=pltpu.CompilerParams(
            dimension_semantics=("parallel",),
            vmem_limit_bytes=_vmem_limit()),
    )(xpad, b2d)


# -------------------- BatchNorm folding (eval-mode affine) -------------------

def _bn_affine(bn):
    gamma, beta, mean, var = bn
    s = gamma * lax.rsqrt(var + BN_EPS)
    return s, beta - mean * s


def _w_flat(w):
    """PyTorch (Cout, Cin, K, K) -> (K*K*Cin, Cout), rows ordered (ky, kx, cin)."""
    K = w.shape[-1]
    return jnp.transpose(w, (2, 3, 1, 0)).reshape(K * K * w.shape[1], w.shape[0])


def _fold_params(p):
    s_main, t_main = _bn_affine(p["bn_main"])
    s52, t52 = _bn_affine(p["bn5_2"])
    s32, t32 = _bn_affine(p["bn3_2"])
    s33, t33 = _bn_affine(p["bn3_3"])
    sp, tp = _bn_affine(p["bn_pool"])

    def fold_pw(w, s_out=None, t_out=None):
        # conv1x1(BN_main(x)) [optionally followed by an output-channel BN]
        w2 = w[:, :, 0, 0].astype(jnp.float32)        # (Cout, Cin)
        wc = (w2 * s_main[None, :]).T                 # (Cin, Cout)
        b = w2 @ t_main
        if s_out is not None:
            wc = wc * s_out[None, :]
            b = b * s_out + t_out
        return wc, b

    w1c, b1 = fold_pw(p["w1"])
    w5c, b5 = fold_pw(p["w5_1"], s52, t52)
    w3c, b3 = fold_pw(p["w3_1"], s32, t32)

    # Pool branch: conv1x1(BN_pool(avgpool(x))) == avgpool((W_p.diag(s_p)) @ x) + W_p@t_p.
    # The matmul part goes into the fused 1x1 (with ZERO bias, on RAW x, no BN_main);
    # the bias is added after pooling inside the avg-pool kernel.
    wp2 = p["w_pool"][:, :, 0, 0].astype(jnp.float32)   # (Cp, Cin)
    wpc = (wp2 * sp[None, :]).T                          # (Cin, Cp)
    b_pool = wp2 @ tp

    w_fused = jnp.concatenate([w1c, w5c, w3c, wpc], axis=1).astype(WGT_DTYPE)
    b_fused = jnp.concatenate(
        [b1, b5, b3, jnp.zeros((wp2.shape[0],), jnp.float32)], axis=0)

    # 5x5 conv (final output of branch5x5): plain conv, no bias.
    w52 = _w_flat(p["w5_2"]).astype(WGT_DTYPE)
    b52 = jnp.zeros((p["w5_2"].shape[0],), jnp.float32)

    # 3x3 conv #1 with bn3_3 folded into its epilogue (out-channel scale + bias).
    w32 = (_w_flat(p["w3_2"]) * s33[None, :]).astype(WGT_DTYPE)
    b32 = t33

    # 3x3 conv #2 (final output of branch3x3dbl).
    w33 = _w_flat(p["w3_3"]).astype(WGT_DTYPE)
    b33 = jnp.zeros((p["w3_3"].shape[0],), jnp.float32)

    return dict(w_fused=w_fused, b_fused=b_fused,
                w52=w52, b52=b52, w32=w32, b32=b32, w33=w33, b33=b33,
                b_pool=b_pool,
                c1=int(p["w1"].shape[0]), c5=int(p["w5_1"].shape[0]),
                c3=int(p["w3_1"].shape[0]), cp=int(p["w_pool"].shape[0]))


# ------------------------------ module forward -------------------------------

def inception_a_pallas(x_nchw, p):
    f = _fold_params(p)
    # TODO(synk): fold this transpose into the fused pointwise kernel (read NCHW
    #             blocks and contract on the leading dim) to save one HBM pass.
    x = jnp.transpose(x_nchw.astype(ACT_DTYPE), (0, 2, 3, 1))   # NCHW -> NHWC bf16

    b1, b5_in, b3_in, pool_pre = fused_pointwise_pallas(x, f)

    b5 = conv_kxk_pallas(b5_in, f["w52"], f["b52"], 5, jnp.float32)
    b3 = conv_kxk_pallas(b3_in, f["w32"], f["b32"], 3, ACT_DTYPE)
    b3 = conv_kxk_pallas(b3, f["w33"], f["b33"], 3, jnp.float32)
    bp = avgpool3_bias_pallas(pool_pre, f["b_pool"])

    # TODO(synk): concat + NHWC->NCHW transpose kept in XLA for PyTorch layout
    #             fidelity; an NHWC-native consumer could take the slabs directly.
    out = jnp.concatenate([b1, b5, b3, bp], axis=-1)
    return jnp.transpose(out, (0, 3, 1, 2))                      # NHWC -> NCHW


# ------------------------- pure-JAX reference (check) ------------------------

def _bn_eval(x, bn):
    gamma, beta, mean, var = bn
    return (x - mean) * (gamma * lax.rsqrt(var + BN_EPS)) + beta


def _conv_ref(x, w, pad):
    return lax.conv_general_dilated(
        x, jnp.transpose(w, (2, 3, 1, 0)),
        window_strides=(1, 1), padding=[(pad, pad), (pad, pad)],
        dimension_numbers=("NHWC", "HWIO", "NHWC"),
        precision=lax.Precision.HIGHEST)


def inception_a_reference(x_nchw, p):
    x = jnp.transpose(x_nchw, (0, 2, 3, 1))
    N, H, W, C = x.shape
    xp = jnp.pad(x, ((0, 0), (1, 1), (1, 1), (0, 0)))
    pooled = sum(xp[:, ky:ky + H, kx:kx + W, :]
                 for ky in range(3) for kx in range(3)) / 9.0
    bp = _conv_ref(_bn_eval(pooled, p["bn_pool"]), p["w_pool"], 0)
    xb = _bn_eval(x, p["bn_main"])
    b1 = _conv_ref(xb, p["w1"], 0)
    b5 = _conv_ref(_bn_eval(_conv_ref(xb, p["w5_1"], 0), p["bn5_2"]), p["w5_2"], 2)
    b3 = _conv_ref(xb, p["w3_1"], 0)
    b3 = _conv_ref(_bn_eval(b3, p["bn3_2"]), p["w3_2"], 1)
    b3 = _conv_ref(_bn_eval(b3, p["bn3_3"]), p["w3_3"], 1)
    out = jnp.concatenate([b1, b5, b3, bp], axis=-1)
    return jnp.transpose(out, (0, 3, 1, 2))


# --------------------------- deterministic params ----------------------------

def init_params(key, in_channels, pool_features):
    ks = iter(jax.random.split(key, 32))

    def conv_w(cout, cin, ksz):
        fan_in = cin * ksz * ksz
        return (jax.random.normal(next(ks), (cout, cin, ksz, ksz), jnp.float32)
                / jnp.sqrt(float(fan_in)))

    def bn(c):
        gamma = 1.0 + 0.1 * jax.random.normal(next(ks), (c,), jnp.float32)
        beta = 0.1 * jax.random.normal(next(ks), (c,), jnp.float32)
        mean = 0.1 * jax.random.normal(next(ks), (c,), jnp.float32)
        var = jax.random.uniform(next(ks), (c,), jnp.float32, 0.5, 1.5)
        return (gamma, beta, mean, var)

    return {
        "bn_main": bn(in_channels),
        "w1": conv_w(64, in_channels, 1),
        "w5_1": conv_w(48, in_channels, 1),
        "bn5_2": bn(48),
        "w5_2": conv_w(64, 48, 5),
        "w3_1": conv_w(64, in_channels, 1),
        "bn3_2": bn(64),
        "w3_2": conv_w(96, 64, 3),
        "bn3_3": bn(96),
        "w3_3": conv_w(96, 96, 3),
        "bn_pool": bn(in_channels),
        "w_pool": conv_w(pool_features, in_channels, 1),
    }


# ----------------------------------- main ------------------------------------

if __name__ == "__main__":
    key = jax.random.PRNGKey(0)
    k_x, k_p = jax.random.split(key)

    N, C, H, W = 2, 4, 16, 16
    pool_features = 16
    x = jax.random.normal(k_x, (N, C, H, W), jnp.float32)   # NCHW, like PyTorch
    params = init_params(k_p, C, pool_features)

    fwd = jax.jit(inception_a_pallas)
    out = jax.block_until_ready(fwd(x, params))

    assert out.shape == (N, 64 + 64 + 96 + pool_features, H, W), out.shape
    ref = inception_a_reference(x, params)
    # Tolerance sized for bf16 activations/weights with f32 accumulation across
    # the chained 1x1 -> 3x3 -> 3x3 path (reference runs f32 HIGHEST precision).
    assert jnp.allclose(out, ref, atol=5e-2, rtol=5e-2), (
        float(jnp.max(jnp.abs(out - ref))))

    print("KERNEL_OK")
</pallas_src>

<mosaic_0001>
module attributes {stable_mosaic.version = 11 : i64} {
  func.func @_fused_pointwise_kernel(%arg0: i32, %arg1: memref<256x4xbf16, #tpu.memory_space<vmem>>, %arg2: memref<4x192xbf16, #tpu.memory_space<vmem>>, %arg3: memref<1x192xf32, #tpu.memory_space<vmem>>, %arg4: memref<256x64xf32, #tpu.memory_space<vmem>>, %arg5: memref<256x48xbf16, #tpu.memory_space<vmem>>, %arg6: memref<256x64xbf16, #tpu.memory_space<vmem>>, %arg7: memref<256x16xbf16, #tpu.memory_space<vmem>>) attributes {dimension_semantics = [#tpu.dimension_semantics<parallel>], iteration_bounds = array<i64: 2>, scalar_prefetch = 0 : i64, scratch_operands = 0 : i64, tpu.core_type = #tpu.core_type<tc>, window_params = [{transform_indices = @transform_0, window_bounds = array<i64: 256, 4>}, {pipeline_mode = #tpu.pipeline_mode<synchronous>, transform_indices = @transform_1, window_bounds = array<i64: 4, 192>}, {pipeline_mode = #tpu.pipeline_mode<synchronous>, transform_indices = @transform_2, window_bounds = array<i64: 1, 192>}, {transform_indices = @transform_3, window_bounds = array<i64: 256, 64>}, {transform_indices = @transform_4, window_bounds = array<i64: 256, 48>}, {transform_indices = @transform_5, window_bounds = array<i64: 256, 64>}, {transform_indices = @transform_6, window_bounds = array<i64: 256, 16>}]} {
    %c0 = arith.constant 0 : index
    %c0_0 = arith.constant 0 : index
    %0 = vector.load %arg1[%c0, %c0_0] : memref<256x4xbf16, #tpu.memory_space<vmem>>, vector<256x4xbf16>
    %c0_1 = arith.constant 0 : index
    %c0_2 = arith.constant 0 : index
    %1 = vector.load %arg2[%c0_1, %c0_2] : memref<4x192xbf16, #tpu.memory_space<vmem>>, vector<4x192xbf16>
    %cst = arith.constant dense<0.000000e+00> : vector<256x192xf32>
    %2 = tpu.matmul %0, %1, %cst {dimension_numbers = #tpu.dot_dimension_numbers<[1], [0], [0], [1], [0, 0, 1, 1], [], []>} : vector<256x4xbf16>, vector<4x192xbf16>, vector<256x192xf32> -> vector<256x192xf32>
    %c0_3 = arith.constant 0 : index
    %c0_4 = arith.constant 0 : index
    %3 = vector.load %arg3[%c0_3, %c0_4] : memref<1x192xf32, #tpu.memory_space<vmem>>, vector<1x192xf32>
    %4 = vector.broadcast %3 : vector<1x192xf32> to vector<256x192xf32>
    %5 = arith.addf %2, %4 : vector<256x192xf32>
    %6 = vector.extract_strided_slice %5 {offsets = [0, 0], sizes = [256, 64], strides = [1, 1]} : vector<256x192xf32> to vector<256x64xf32>
    %c0_5 = arith.constant 0 : index
    %c0_6 = arith.constant 0 : index
    %7 = vector.load %arg4[%c0_5, %c0_6] : memref<256x64xf32, #tpu.memory_space<vmem>>, vector<256x64xf32>
    tpu.vector_store %arg4[%c0_5, %c0_6], %6 {strides = array<i32>} : memref<256x64xf32, #tpu.memory_space<vmem>>, vector<256x64xf32>,
    %8 = vector.extract_strided_slice %5 {offsets = [0, 64], sizes = [256, 48], strides = [1, 1]} : vector<256x192xf32> to vector<256x48xf32>
    %9 = arith.truncf %8 : vector<256x48xf32> to vector<256x48xbf16>
    %c0_7 = arith.constant 0 : index
    %c0_8 = arith.constant 0 : index
    %10 = vector.load %arg5[%c0_7, %c0_8] : memref<256x48xbf16, #tpu.memory_space<vmem>>, vector<256x48xbf16>
    tpu.vector_store %arg5[%c0_7, %c0_8], %9 {strides = array<i32>} : memref<256x48xbf16, #tpu.memory_space<vmem>>, vector<256x48xbf16>,
    %11 = vector.extract_strided_slice %5 {offsets = [0, 112], sizes = [256, 64], strides = [1, 1]} : vector<256x192xf32> to vector<256x64xf32>
    %12 = arith.truncf %11 : vector<256x64xf32> to vector<256x64xbf16>
    %c0_9 = arith.constant 0 : index
    %c0_10 = arith.constant 0 : index
    %13 = vector.load %arg6[%c0_9, %c0_10] : memref<256x64xbf16, #tpu.memory_space<vmem>>, vector<256x64xbf16>
    tpu.vector_store %arg6[%c0_9, %c0_10], %12 {strides = array<i32>} : memref<256x64xbf16, #tpu.memory_space<vmem>>, vector<256x64xbf16>,
    %14 = vector.extract_strided_slice %5 {offsets = [0, 176], sizes = [256, 16], strides = [1, 1]} : vector<256x192xf32> to vector<256x16xf32>
    %15 = arith.truncf %14 : vector<256x16xf32> to vector<256x16xbf16>
    %c0_11 = arith.constant 0 : index
    %c0_12 = arith.constant 0 : index
    %16 = vector.load %arg7[%c0_11, %c0_12] : memref<256x16xbf16, #tpu.memory_space<vmem>>, vector<256x16xbf16>
    tpu.vector_store %arg7[%c0_11, %c0_12], %15 {strides = array<i32>} : memref<256x16xbf16, #tpu.memory_space<vmem>>, vector<256x16xbf16>,
    return
  }
  func.func @transform_0(%arg0: i32) -> (i32, i32) {
    %c0_i32 = arith.constant 0 : i32
    %c0_i32_0 = arith.constant 0 : i32
    return %arg0, %c0_i32 : i32, i32
  }
  func.func @transform_1(%arg0: i32) -> (i32, i32) {
    %c0_i32 = arith.constant 0 : i32
    %c0_i32_0 = arith.constant 0 : i32
    %c0_i32_1 = arith.constant 0 : i32
    return %c0_i32, %c0_i32_0 : i32, i32
  }
  func.func @transform_2(%arg0: i32) -> (i32, i32) {
    %c0_i32 = arith.constant 0 : i32
    %c0_i32_0 = arith.constant 0 : i32
    %c0_i32_1 = arith.constant 0 : i32
    return %c0_i32, %c0_i32_0 : i32, i32
  }
  func.func @transform_3(%arg0: i32) -> (i32, i32) {
    %c0_i32 = arith.constant 0 : i32
    %c0_i32_0 = arith.constant 0 : i32
    return %arg0, %c0_i32 : i32, i32
  }
  func.func @transform_4(%arg0: i32) -> (i32, i32) {
    %c0_i32 = arith.constant 0 : i32
    %c0_i32_0 = arith.constant 0 : i32
    return %arg0, %c0_i32 : i32, i32
  }
  func.func @transform_5(%arg0: i32) -> (i32, i32) {
    %c0_i32 = arith.constant 0 : i32
    %c0_i32_0 = arith.constant 0 : i32
    return %arg0, %c0_i32 : i32, i32
  }
  func.func @transform_6(%arg0: i32) -> (i32, i32) {
    %c0_i32 = arith.constant 0 : i32
    %c0_i32_0 = arith.constant 0 : i32
    return %arg0, %c0_i32 : i32, i32
  }
}

module attributes {stable_mosaic.version = 11 : i64} {
  func.func @_avgpool3_bias_kernel(%arg0: i32, %arg1: memref<1x18x18x16xbf16, #tpu.memory_space<vmem>>, %arg2: memref<1x16xf32, #tpu.memory_space<vmem>>, %arg3: memref<1x16x16x16xf32, #tpu.memory_space<vmem>>) attributes {dimension_semantics = [#tpu.dimension_semantics<parallel>], iteration_bounds = array<i64: 2>, scalar_prefetch = 0 : i64, scratch_operands = 0 : i64, tpu.core_type = #tpu.core_type<tc>, window_params = [{transform_indices = @transform_0, window_bounds = array<i64: 1, 18, 18, 16>}, {pipeline_mode = #tpu.pipeline_mode<synchronous>, transform_indices = @transform_1, window_bounds = array<i64: 1, 16>}, {transform_indices = @transform_2, window_bounds = array<i64: 1, 16, 16, 16>}]} {
    %cst = arith.constant 0.000000e+00 : f32
    %0 = vector.broadcast %cst : f32 to vector<16x16x16xf32>
    %c0 = arith.constant 0 : index
    %c0_0 = arith.constant 0 : index
    %c0_1 = arith.constant 0 : index
    %c0_2 = arith.constant 0 : index
    %1 = vector.load %arg1[%c0, %c0_0, %c0_1, %c0_2] : memref<1x18x18x16xbf16, #tpu.memory_space<vmem>>, vector<1x16x16x16xbf16>
    %2 = vector.shape_cast %1 : vector<1x16x16x16xbf16> to vector<16x16x16xbf16>
    %3 = arith.extf %2 : vector<16x16x16xbf16> to vector<16x16x16xf32>
    %4 = arith.addf %0, %3 : vector<16x16x16xf32>
    %c0_3 = arith.constant 0 : index
    %c0_4 = arith.constant 0 : index
    %c1 = arith.constant 1 : index
    %c0_5 = arith.constant 0 : index
    %5 = vector.load %arg1[%c0_3, %c0_4, %c1, %c0_5] : memref<1x18x18x16xbf16, #tpu.memory_space<vmem>>, vector<1x16x16x16xbf16>
    %6 = vector.shape_cast %5 : vector<1x16x16x16xbf16> to vector<16x16x16xbf16>
    %7 = arith.extf %6 : vector<16x16x16xbf16> to vector<16x16x16xf32>
    %8 = arith.addf %4, %7 : vector<16x16x16xf32>
    %c0_6 = arith.constant 0 : index
    %c0_7 = arith.constant 0 : index
    %c2 = arith.constant 2 : index
    %c0_8 = arith.constant 0 : index
    %9 = vector.load %arg1[%c0_6, %c0_7, %c2, %c0_8] : memref<1x18x18x16xbf16, #tpu.memory_space<vmem>>, vector<1x16x16x16xbf16>
    %10 = vector.shape_cast %9 : vector<1x16x16x16xbf16> to vector<16x16x16xbf16>
    %11 = arith.extf %10 : vector<16x16x16xbf16> to vector<16x16x16xf32>
    %12 = arith.addf %8, %11 : vector<16x16x16xf32>
    %c0_9 = arith.constant 0 : index
    %c1_10 = arith.constant 1 : index
    %c0_11 = arith.constant 0 : index
    %c0_12 = arith.constant 0 : index
    %13 = vector.load %arg1[%c0_9, %c1_10, %c0_11, %c0_12] : memref<1x18x18x16xbf16, #tpu.memory_space<vmem>>, vector<1x16x16x16xbf16>
    %14 = vector.shape_cast %13 : vector<1x16x16x16xbf16> to vector<16x16x16xbf16>
    %15 = arith.extf %14 : vector<16x16x16xbf16> to vector<16x16x16xf32>
    %16 = arith.addf %12, %15 : vector<16x16x16xf32>
    %c0_13 = arith.constant 0 : index
    %c1_14 = arith.constant 1 : index
    %c1_15 = arith.constant 1 : index
    %c0_16 = arith.constant 0 : index
    %17 = vector.load %arg1[%c0_13, %c1_14, %c1_15, %c0_16] : memref<1x18x18x16xbf16, #tpu.memory_space<vmem>>, vector<1x16x16x16xbf16>
    %18 = vector.shape_cast %17 : vector<1x16x16x16xbf16> to vector<16x16x16xbf16>
    %19 = arith.extf %18 : vector<16x16x16xbf16> to vector<16x16x16xf32>
    %20 = arith.addf %16, %19 : vector<16x16x16xf32>
    %c0_17 = arith.constant 0 : index
    %c1_18 = arith.constant 1 : index
    %c2_19 = arith.constant 2 : index
    %c0_20 = arith.constant 0 : index
    %21 = vector.load %arg1[%c0_17, %c1_18, %c2_19, %c0_20] : memref<1x18x18x16xbf16, #tpu.memory_space<vmem>>, vector<1x16x16x16xbf16>
    %22 = vector.shape_cast %21 : vector<1x16x16x16xbf16> to vector<16x16x16xbf16>
    %23 = arith.extf %22 : vector<16x16x16xbf16> to vector<16x16x16xf32>
    %24 = arith.addf %20, %23 : vector<16x16x16xf32>
    %c0_21 = arith.constant 0 : index
    %c2_22 = arith.constant 2 : index
    %c0_23 = arith.constant 0 : index
    %c0_24 = arith.constant 0 : index
    %25 = vector.load %arg1[%c0_21, %c2_22, %c0_23, %c0_24] : memref<1x18x18x16xbf16, #tpu.memory_space<vmem>>, vector<1x16x16x16xbf16>
    %26 = vector.shape_cast %25 : vector<1x16x16x16xbf16> to vector<16x16x16xbf16>
    %27 = arith.extf %26 : vector<16x16x16xbf16> to vector<16x16x16xf32>
    %28 = arith.addf %24, %27 : vector<16x16x16xf32>
    %c0_25 = arith.constant 0 : index
    %c2_26 = arith.constant 2 : index
    %c1_27 = arith.constant 1 : index
    %c0_28 = arith.constant 0 : index
    %29 = vector.load %arg1[%c0_25, %c2_26, %c1_27, %c0_28] : memref<1x18x18x16xbf16, #tpu.memory_space<vmem>>, vector<1x16x16x16xbf16>
    %30 = vector.shape_cast %29 : vector<1x16x16x16xbf16> to vector<16x16x16xbf16>
    %31 = arith.extf %30 : vector<16x16x16xbf16> to vector<16x16x16xf32>
    %32 = arith.addf %28, %31 : vector<16x16x16xf32>
    %c0_29 = arith.constant 0 : index
    %c2_30 = arith.constant 2 : index
    %c2_31 = arith.constant 2 : index
    %c0_32 = arith.constant 0 : index
    %33 = vector.load %arg1[%c0_29, %c2_30, %c2_31, %c0_32] : memref<1x18x18x16xbf16, #tpu.memory_space<vmem>>, vector<1x16x16x16xbf16>
    %34 = vector.shape_cast %33 : vector<1x16x16x16xbf16> to vector<16x16x16xbf16>
    %35 = arith.extf %34 : vector<16x16x16xbf16> to vector<16x16x16xf32>
    %36 = arith.addf %32, %35 : vector<16x16x16xf32>
    %cst_33 = arith.constant 0.111111112 : f32
    %37 = vector.broadcast %cst_33 : f32 to vector<16x16x16xf32>
    %38 = arith.mulf %36, %37 : vector<16x16x16xf32>
    %c0_34 = arith.constant 0 : index
    %c0_35 = arith.constant 0 : index
    %39 = vector.load %arg2[%c0_34, %c0_35] : memref<1x16xf32, #tpu.memory_space<vmem>>, vector<1x16xf32>
    %40 = vector.shape_cast %39 : vector<1x16xf32> to vector<16xf32>
    %41 = vector.shape_cast %40 : vector<16xf32> to vector<1x1x16xf32>
    %42 = vector.broadcast %41 : vector<1x1x16xf32> to vector<16x16x16xf32>
    %43 = arith.addf %38, %42 : vector<16x16x16xf32>
    %c0_36 = arith.constant 0 : index
    %c0_37 = arith.constant 0 : index
    %c0_38 = arith.constant 0 : index
    %c0_39 = arith.constant 0 : index
    %44 = vector.load %arg3[%c0_36, %c0_37, %c0_38, %c0_39] : memref<1x16x16x16xf32, #tpu.memory_space<vmem>>, vector<1x16x16x16xf32>
    %45 = vector.shape_cast %44 : vector<1x16x16x16xf32> to vector<16x16x16xf32>
    %46 = vector.shape_cast %43 : vector<16x16x16xf32> to vector<1x16x16x16xf32>
    tpu.vector_store %arg3[%c0_36, %c0_37, %c0_38, %c0_39], %46 {strides = array<i32>} : memref<1x16x16x16xf32, #tpu.memory_space<vmem>>, vector<1x16x16x16xf32>,
    return
  }
  func.func @transform_0(%arg0: i32) -> (i32, i32, i32, i32) {
    %c0_i32 = arith.constant 0 : i32
    %c0_i32_0 = arith.constant 0 : i32
    %c0_i32_1 = arith.constant 0 : i32
    %c0_i32_2 = arith.constant 0 : i32
    return %arg0, %c0_i32, %c0_i32_0, %c0_i32_1 : i32, i32, i32, i32
  }
  func.func @transform_1(%arg0: i32) -> (i32, i32) {
    %c0_i32 = arith.constant 0 : i32
    %c0_i32_0 = arith.constant 0 : i32
    %c0_i32_1 = arith.constant 0 : i32
    return %c0_i32, %c0_i32_0 : i32, i32
  }
  func.func @transform_2(%arg0: i32) -> (i32, i32, i32, i32) {
    %c0_i32 = arith.constant 0 : i32
    %c0_i32_0 = arith.constant 0 : i32
    %c0_i32_1 = arith.constant 0 : i32
    %c0_i32_2 = arith.constant 0 : i32
    return %arg0, %c0_i32, %c0_i32_0, %c0_i32_1 : i32, i32, i32, i32
  }
}

module attributes {stable_mosaic.version = 11 : i64} {
  func.func @kernel(%arg0: i32, %arg1: i32, %arg2: memref<1x18x18x64xbf16, #tpu.memory_space<vmem>>, %arg3: memref<576x96xbf16, #tpu.memory_space<vmem>>, %arg4: memref<1x96xf32, #tpu.memory_space<vmem>>, %arg5: memref<1x8x16x96xbf16, #tpu.memory_space<vmem>>) attributes {dimension_semantics = [#tpu.dimension_semantics<parallel>, #tpu.dimension_semantics<arbitrary>], iteration_bounds = array<i64: 2, 2>, scalar_prefetch = 0 : i64, scratch_operands = 0 : i64, tpu.core_type = #tpu.core_type<tc>, window_params = [{transform_indices = @transform_0, window_bounds = array<i64: 1, 18, 18, 64>}, {pipeline_mode = #tpu.pipeline_mode<synchronous>, transform_indices = @transform_1, window_bounds = array<i64: 576, 96>}, {pipeline_mode = #tpu.pipeline_mode<synchronous>, transform_indices = @transform_2, window_bounds = array<i64: 1, 96>}, {transform_indices = @transform_3, window_bounds = array<i64: 1, 8, 16, 96>}]} {
    %c8_i32 = arith.constant 8 : i32
    %0 = arith.muli %arg1, %c8_i32 : i32
    %1 = tpu.assume_multiple %0, 8 : i32
    %c0_i32 = arith.constant 0 : i32
    %2 = arith.addi %1, %c0_i32 : i32
    %c0 = arith.constant 0 : index
    %3 = arith.index_cast %2 : i32 to index
    %c0_0 = arith.constant 0 : index
    %c0_1 = arith.constant 0 : index
    %4 = vector.load %arg2[%c0, %3, %c0_0, %c0_1] : memref<1x18x18x64xbf16, #tpu.memory_space<vmem>>, vector<1x8x16x64xbf16>
    %5 = vector.shape_cast %4 : vector<1x8x16x64xbf16> to vector<8x16x64xbf16>
    %c0_i32_2 = arith.constant 0 : i32
    %6 = arith.addi %1, %c0_i32_2 : i32
    %c0_3 = arith.constant 0 : index
    %7 = arith.index_cast %6 : i32 to index
    %c1 = arith.constant 1 : index
    %c0_4 = arith.constant 0 : index
    %8 = vector.load %arg2[%c0_3, %7, %c1, %c0_4] : memref<1x18x18x64xbf16, #tpu.memory_space<vmem>>, vector<1x8x16x64xbf16>
    %9 = vector.shape_cast %8 : vector<1x8x16x64xbf16> to vector<8x16x64xbf16>
    %c0_i32_5 = arith.constant 0 : i32
    %10 = arith.addi %1, %c0_i32_5 : i32
    %c0_6 = arith.constant 0 : index
    %11 = arith.index_cast %10 : i32 to index
    %c2 = arith.constant 2 : index
    %c0_7 = arith.constant 0 : index
    %12 = vector.load %arg2[%c0_6, %11, %c2, %c0_7] : memref<1x18x18x64xbf16, #tpu.memory_space<vmem>>, vector<1x8x16x64xbf16>
    %13 = vector.shape_cast %12 : vector<1x8x16x64xbf16> to vector<8x16x64xbf16>
    %c1_i32 = arith.constant 1 : i32
    %14 = arith.addi %1, %c1_i32 : i32
    %c0_8 = arith.constant 0 : index
    %15 = arith.index_cast %14 : i32 to index
    %c0_9 = arith.constant 0 : index
    %c0_10 = arith.constant 0 : index
    %16 = vector.load %arg2[%c0_8, %15, %c0_9, %c0_10] : memref<1x18x18x64xbf16, #tpu.memory_space<vmem>>, vector<1x8x16x64xbf16>
    %17 = vector.shape_cast %16 : vector<1x8x16x64xbf16> to vector<8x16x64xbf16>
    %c1_i32_11 = arith.constant 1 : i32
    %18 = arith.addi %1, %c1_i32_11 : i32
    %c0_12 = arith.constant 0 : index
    %19 = arith.index_cast %18 : i32 to index
    %c1_13 = arith.constant 1 : index
    %c0_14 = arith.constant 0 : index
    %20 = vector.load %arg2[%c0_12, %19, %c1_13, %c0_14] : memref<1x18x18x64xbf16, #tpu.memory_space<vmem>>, vector<1x8x16x64xbf16>
    %21 = vector.shape_cast %20 : vector<1x8x16x64xbf16> to vector<8x16x64xbf16>
    %c1_i32_15 = arith.constant 1 : i32
    %22 = arith.addi %1, %c1_i32_15 : i32
    %c0_16 = arith.constant 0 : index
    %23 = arith.index_cast %22 : i32 to index
    %c2_17 = arith.constant 2 : index
    %c0_18 = arith.constant 0 : index
    %24 = vector.load %arg2[%c0_16, %23, %c2_17, %c0_18] : memref<1x18x18x64xbf16, #tpu.memory_space<vmem>>, vector<1x8x16x64xbf16>
    %25 = vector.shape_cast %24 : vector<1x8x16x64xbf16> to vector<8x16x64xbf16>
    %c2_i32 = arith.constant 2 : i32
    %26 = arith.addi %1, %c2_i32 : i32
    %c0_19 = arith.constant 0 : index
    %27 = arith.index_cast %26 : i32 to index
    %c0_20 = arith.constant 0 : index
    %c0_21 = arith.constant 0 : index
    %28 = vector.load %arg2[%c0_19, %27, %c0_20, %c0_21] : memref<1x18x18x64xbf16, #tpu.memory_space<vmem>>, vector<1x8x16x64xbf16>
    %29 = vector.shape_cast %28 : vector<1x8x16x64xbf16> to vector<8x16x64xbf16>
    %c2_i32_22 = arith.constant 2 : i32
    %30 = arith.addi %1, %c2_i32_22 : i32
    %c0_23 = arith.constant 0 : index
    %31 = arith.index_cast %30 : i32 to index
    %c1_24 = arith.constant 1 : index
    %c0_25 = arith.constant 0 : index
    %32 = vector.load %arg2[%c0_23, %31, %c1_24, %c0_25] : memref<1x18x18x64xbf16, #tpu.memory_space<vmem>>, vector<1x8x16x64xbf16>
    %33 = vector.shape_cast %32 : vector<1x8x16x64xbf16> to vector<8x16x64xbf16>
    %c2_i32_26 = arith.constant 2 : i32
    %34 = arith.addi %1, %c2_i32_26 : i32
    %c0_27 = arith.constant 0 : index
    %35 = arith.index_cast %34 : i32 to index
    %c2_28 = arith.constant 2 : index
    %c0_29 = arith.constant 0 : index
    %36 = vector.load %arg2[%c0_27, %35, %c2_28, %c0_29] : memref<1x18x18x64xbf16, #tpu.memory_space<vmem>>, vector<1x8x16x64xbf16>
    %37 = vector.shape_cast %36 : vector<1x8x16x64xbf16> to vector<8x16x64xbf16>
    %38 = tpu.concatenate %5, %9, %13, %17, %21, %25, %29, %33, %37 in 2 : vector<8x16x64xbf16>, vector<8x16x64xbf16>, vector<8x16x64xbf16>, vector<8x16x64xbf16>, vector<8x16x64xbf16>, vector<8x16x64xbf16>, vector<8x16x64xbf16>, vector<8x16x64xbf16>, vector<8x16x64xbf16> -> vector<8x16x576xbf16>
    %39 = vector.shape_cast %38 : vector<8x16x576xbf16> to vector<128x576xbf16>
    %c0_30 = arith.constant 0 : index
    %c0_31 = arith.constant 0 : index
    %40 = vector.load %arg3[%c0_30, %c0_31] : memref<576x96xbf16, #tpu.memory_space<vmem>>, vector<576x96xbf16>
    %cst = arith.constant dense<0.000000e+00> : vector<128x96xf32>
    %41 = tpu.matmul %39, %40, %cst {dimension_numbers = #tpu.dot_dimension_numbers<[1], [0], [0], [1], [0, 0, 1, 1], [], []>} : vector<128x576xbf16>, vector<576x96xbf16>, vector<128x96xf32> -> vector<128x96xf32>
    %c0_32 = arith.constant 0 : index
    %c0_33 = arith.constant 0 : index
    %42 = vector.load %arg4[%c0_32, %c0_33] : memref<1x96xf32, #tpu.memory_space<vmem>>, vector<1x96xf32>
    %43 = vector.broadcast %42 : vector<1x96xf32> to vector<128x96xf32>
    %44 = arith.addf %41, %43 : vector<128x96xf32>
    %45 = vector.shape_cast %44 : vector<128x96xf32> to vector<8x16x96xf32>
    %46 = arith.truncf %45 : vector<8x16x96xf32> to vector<8x16x96xbf16>
    %c0_34 = arith.constant 0 : index
    %c0_35 = arith.constant 0 : index
    %c0_36 = arith.constant 0 : index
    %c0_37 = arith.constant 0 : index
    %47 = vector.load %arg5[%c0_34, %c0_35, %c0_36, %c0_37] : memref<1x8x16x96xbf16, #tpu.memory_space<vmem>>, vector<1x8x16x96xbf16>
    %48 = vector.shape_cast %47 : vector<1x8x16x96xbf16> to vector<8x16x96xbf16>
    %49 = vector.shape_cast %46 : vector<8x16x96xbf16> to vector<1x8x16x96xbf16>
    tpu.vector_store %arg5[%c0_34, %c0_35, %c0_36, %c0_37], %49 {strides = array<i32>} : memref<1x8x16x96xbf16, #tpu.memory_space<vmem>>, vector<1x8x16x96xbf16>,
    return
  }
  func.func @transform_0(%arg0: i32, %arg1: i32) -> (i32, i32, i32, i32) {
    %c0_i32 = arith.constant 0 : i32
    %c0_i32_0 = arith.constant 0 : i32
    %c0_i32_1 = arith.constant 0 : i32
    %c0_i32_2 = arith.constant 0 : i32
    return %arg0, %c0_i32, %c0_i32_0, %c0_i32_1 : i32, i32, i32, i32
  }
  func.func @transform_1(%arg0: i32, %arg1: i32) -> (i32, i32) {
    %c0_i32 = arith.constant 0 : i32
    %c0_i32_0 = arith.constant 0 : i32
    %c0_i32_1 = arith.constant 0 : i32
    return %c0_i32, %c0_i32_0 : i32, i32
  }
  func.func @transform_2(%arg0: i32, %arg1: i32) -> (i32, i32) {
    %c0_i32 = arith.constant 0 : i32
    %c0_i32_0 = arith.constant 0 : i32
    %c0_i32_1 = arith.constant 0 : i32
    return %c0_i32, %c0_i32_0 : i32, i32
  }
  func.func @transform_3(%arg0: i32, %arg1: i32) -> (i32, i32, i32, i32) {
    %c0_i32 = arith.constant 0 : i32
    %c0_i32_0 = arith.constant 0 : i32
    %c0_i32_1 = arith.constant 0 : i32
    return %arg0, %arg1, %c0_i32, %c0_i32_0 : i32, i32, i32, i32
  }
}

module attributes {stable_mosaic.version = 11 : i64} {
  func.func @kernel(%arg0: i32, %arg1: i32, %arg2: memref<1x18x18x96xbf16, #tpu.memory_space<vmem>>, %arg3: memref<864x96xbf16, #tpu.memory_space<vmem>>, %arg4: memref<1x96xf32, #tpu.memory_space<vmem>>, %arg5: memref<1x8x16x96xf32, #tpu.memory_space<vmem>>) attributes {dimension_semantics = [#tpu.dimension_semantics<parallel>, #tpu.dimension_semantics<arbitrary>], iteration_bounds = array<i64: 2, 2>, scalar_prefetch = 0 : i64, scratch_operands = 0 : i64, tpu.core_type = #tpu.core_type<tc>, window_params = [{transform_indices = @transform_0, window_bounds = array<i64: 1, 18, 18, 96>}, {pipeline_mode = #tpu.pipeline_mode<synchronous>, transform_indices = @transform_1, window_bounds = array<i64: 864, 96>}, {pipeline_mode = #tpu.pipeline_mode<synchronous>, transform_indices = @transform_2, window_bounds = array<i64: 1, 96>}, {transform_indices = @transform_3, window_bounds = array<i64: 1, 8, 16, 96>}]} {
    %c8_i32 = arith.constant 8 : i32
    %0 = arith.muli %arg1, %c8_i32 : i32
    %1 = tpu.assume_multiple %0, 8 : i32
    %c0_i32 = arith.constant 0 : i32
    %2 = arith.addi %1, %c0_i32 : i32
    %c0 = arith.constant 0 : index
    %3 = arith.index_cast %2 : i32 to index
    %c0_0 = arith.constant 0 : index
    %c0_1 = arith.constant 0 : index
    %4 = vector.load %arg2[%c0, %3, %c0_0, %c0_1] : memref<1x18x18x96xbf16, #tpu.memory_space<vmem>>, vector<1x8x16x96xbf16>
    %5 = vector.shape_cast %4 : vector<1x8x16x96xbf16> to vector<8x16x96xbf16>
    %c0_i32_2 = arith.constant 0 : i32
    %6 = arith.addi %1, %c0_i32_2 : i32
    %c0_3 = arith.constant 0 : index
    %7 = arith.index_cast %6 : i32 to index
    %c1 = arith.constant 1 : index
    %c0_4 = arith.constant 0 : index
    %8 = vector.load %arg2[%c0_3, %7, %c1, %c0_4] : memref<1x18x18x96xbf16, #tpu.memory_space<vmem>>, vector<1x8x16x96xbf16>
    %9 = vector.shape_cast %8 : vector<1x8x16x96xbf16> to vector<8x16x96xbf16>
    %c0_i32_5 = arith.constant 0 : i32
    %10 = arith.addi %1, %c0_i32_5 : i32
    %c0_6 = arith.constant 0 : index
    %11 = arith.index_cast %10 : i32 to index
    %c2 = arith.constant 2 : index
    %c0_7 = arith.constant 0 : index
    %12 = vector.load %arg2[%c0_6, %11, %c2, %c0_7] : memref<1x18x18x96xbf16, #tpu.memory_space<vmem>>, vector<1x8x16x96xbf16>
    %13 = vector.shape_cast %12 : vector<1x8x16x96xbf16> to vector<8x16x96xbf16>
    %c1_i32 = arith.constant 1 : i32
    %14 = arith.addi %1, %c1_i32 : i32
    %c0_8 = arith.constant 0 : index
    %15 = arith.index_cast %14 : i32 to index
    %c0_9 = arith.constant 0 : index
    %c0_10 = arith.constant 0 : index
    %16 = vector.load %arg2[%c0_8, %15, %c0_9, %c0_10] : memref<1x18x18x96xbf16, #tpu.memory_space<vmem>>, vector<1x8x16x96xbf16>
    %17 = vector.shape_cast %16 : vector<1x8x16x96xbf16> to vector<8x16x96xbf16>
    %c1_i32_11 = arith.constant 1 : i32
    %18 = arith.addi %1, %c1_i32_11 : i32
    %c0_12 = arith.constant 0 : index
    %19 = arith.index_cast %18 : i32 to index
    %c1_13 = arith.constant 1 : index
    %c0_14 = arith.constant 0 : index
    %20 = vector.load %arg2[%c0_12, %19, %c1_13, %c0_14] : memref<1x18x18x96xbf16, #tpu.memory_space<vmem>>, vector<1x8x16x96xbf16>
    %21 = vector.shape_cast %20 : vector<1x8x16x96xbf16> to vector<8x16x96xbf16>
    %c1_i32_15 = arith.constant 1 : i32
    %22 = arith.addi %1, %c1_i32_15 : i32
    %c0_16 = arith.constant 0 : index
    %23 = arith.index_cast %22 : i32 to index
    %c2_17 = arith.constant 2 : index
    %c0_18 = arith.constant 0 : index
    %24 = vector.load %arg2[%c0_16, %23, %c2_17, %c0_18] : memref<1x18x18x96xbf16, #tpu.memory_space<vmem>>, vector<1x8x16x96xbf16>
    %25 = vector.shape_cast %24 : vector<1x8x16x96xbf16> to vector<8x16x96xbf16>
    %c2_i32 = arith.constant 2 : i32
    %26 = arith.addi %1, %c2_i32 : i32
    %c0_19 = arith.constant 0 : index
    %27 = arith.index_cast %26 : i32 to index
    %c0_20 = arith.constant 0 : index
    %c0_21 = arith.constant 0 : index
    %28 = vector.load %arg2[%c0_19, %27, %c0_20, %c0_21] : memref<1x18x18x96xbf16, #tpu.memory_space<vmem>>, vector<1x8x16x96xbf16>
    %29 = vector.shape_cast %28 : vector<1x8x16x96xbf16> to vector<8x16x96xbf16>
    %c2_i32_22 = arith.constant 2 : i32
    %30 = arith.addi %1, %c2_i32_22 : i32
    %c0_23 = arith.constant 0 : index
    %31 = arith.index_cast %30 : i32 to index
    %c1_24 = arith.constant 1 : index
    %c0_25 = arith.constant 0 : index
    %32 = vector.load %arg2[%c0_23, %31, %c1_24, %c0_25] : memref<1x18x18x96xbf16, #tpu.memory_space<vmem>>, vector<1x8x16x96xbf16>
    %33 = vector.shape_cast %32 : vector<1x8x16x96xbf16> to vector<8x16x96xbf16>
    %c2_i32_26 = arith.constant 2 : i32
    %34 = arith.addi %1, %c2_i32_26 : i32
    %c0_27 = arith.constant 0 : index
    %35 = arith.index_cast %34 : i32 to index
    %c2_28 = arith.constant 2 : index
    %c0_29 = arith.constant 0 : index
    %36 = vector.load %arg2[%c0_27, %35, %c2_28, %c0_29] : memref<1x18x18x96xbf16, #tpu.memory_space<vmem>>, vector<1x8x16x96xbf16>
    %37 = vector.shape_cast %36 : vector<1x8x16x96xbf16> to vector<8x16x96xbf16>
    %38 = tpu.concatenate %5, %9, %13, %17, %21, %25, %29, %33, %37 in 2 : vector<8x16x96xbf16>, vector<8x16x96xbf16>, vector<8x16x96xbf16>, vector<8x16x96xbf16>, vector<8x16x96xbf16>, vector<8x16x96xbf16>, vector<8x16x96xbf16>, vector<8x16x96xbf16>, vector<8x16x96xbf16> -> vector<8x16x864xbf16>
    %39 = vector.shape_cast %38 : vector<8x16x864xbf16> to vector<128x864xbf16>
    %c0_30 = arith.constant 0 : index
    %c0_31 = arith.constant 0 : index
    %40 = vector.load %arg3[%c0_30, %c0_31] : memref<864x96xbf16, #tpu.memory_space<vmem>>, vector<864x96xbf16>
    %cst = arith.constant dense<0.000000e+00> : vector<128x96xf32>
    %41 = tpu.matmul %39, %40, %cst {dimension_numbers = #tpu.dot_dimension_numbers<[1], [0], [0], [1], [0, 0, 1, 1], [], []>} : vector<128x864xbf16>, vector<864x96xbf16>, vector<128x96xf32> -> vector<128x96xf32>
    %c0_32 = arith.constant 0 : index
    %c0_33 = arith.constant 0 : index
    %42 = vector.load %arg4[%c0_32, %c0_33] : memref<1x96xf32, #tpu.memory_space<vmem>>, vector<1x96xf32>
    %43 = vector.broadcast %42 : vector<1x96xf32> to vector<128x96xf32>
    %44 = arith.addf %41, %43 : vector<128x96xf32>
    %45 = vector.shape_cast %44 : vector<128x96xf32> to vector<8x16x96xf32>
    %c0_34 = arith.constant 0 : index
    %c0_35 = arith.constant 0 : index
    %c0_36 = arith.constant 0 : index
    %c0_37 = arith.constant 0 : index
    %46 = vector.load %arg5[%c0_34, %c0_35, %c0_36, %c0_37] : memref<1x8x16x96xf32, #tpu.memory_space<vmem>>, vector<1x8x16x96xf32>
    %47 = vector.shape_cast %46 : vector<1x8x16x96xf32> to vector<8x16x96xf32>
    %48 = vector.shape_cast %45 : vector<8x16x96xf32> to vector<1x8x16x96xf32>
    tpu.vector_store %arg5[%c0_34, %c0_35, %c0_36, %c0_37], %48 {strides = array<i32>} : memref<1x8x16x96xf32, #tpu.memory_space<vmem>>, vector<1x8x16x96xf32>,
    return
  }
  func.func @transform_0(%arg0: i32, %arg1: i32) -> (i32, i32, i32, i32) {
    %c0_i32 = arith.constant 0 : i32
    %c0_i32_0 = arith.constant 0 : i32
    %c0_i32_1 = arith.constant 0 : i32
    %c0_i32_2 = arith.constant 0 : i32
    return %arg0, %c0_i32, %c0_i32_0, %c0_i32_1 : i32, i32, i32, i32
  }
  func.func @transform_1(%arg0: i32, %arg1: i32) -> (i32, i32) {
    %c0_i32 = arith.constant 0 : i32
    %c0_i32_0 = arith.constant 0 : i32
    %c0_i32_1 = arith.constant 0 : i32
    return %c0_i32, %c0_i32_0 : i32, i32
  }
  func.func @transform_2(%arg0: i32, %arg1: i32) -> (i32, i32) {
    %c0_i32 = arith.constant 0 : i32
    %c0_i32_0 = arith.constant 0 : i32
    %c0_i32_1 = arith.constant 0 : i32
    return %c0_i32, %c0_i32_0 : i32, i32
  }
  func.func @transform_3(%arg0: i32, %arg1: i32) -> (i32, i32, i32, i32) {
    %c0_i32 = arith.constant 0 : i32
    %c0_i32_0 = arith.constant 0 : i32
    %c0_i32_1 = arith.constant 0 : i32
    return %arg0, %arg1, %c0_i32, %c0_i32_0 : i32, i32, i32, i32
  }
}

module attributes {stable_mosaic.version = 11 : i64} {
  func.func @kernel(%arg0: i32, %arg1: i32, %arg2: memref<1x20x20x48xbf16, #tpu.memory_space<vmem>>, %arg3: memref<1200x64xbf16, #tpu.memory_space<vmem>>, %arg4: memref<1x64xf32, #tpu.memory_space<vmem>>, %arg5: memref<1x8x16x64xf32, #tpu.memory_space<vmem>>) attributes {dimension_semantics = [#tpu.dimension_semantics<parallel>, #tpu.dimension_semantics<arbitrary>], iteration_bounds = array<i64: 2, 2>, scalar_prefetch = 0 : i64, scratch_operands = 0 : i64, tpu.core_type = #tpu.core_type<tc>, window_params = [{transform_indices = @transform_0, window_bounds = array<i64: 1, 20, 20, 48>}, {pipeline_mode = #tpu.pipeline_mode<synchronous>, transform_indices = @transform_1, window_bounds = array<i64: 1200, 64>}, {pipeline_mode = #tpu.pipeline_mode<synchronous>, transform_indices = @transform_2, window_bounds = array<i64: 1, 64>}, {transform_indices = @transform_3, window_bounds = array<i64: 1, 8, 16, 64>}]} {
    %c8_i32 = arith.constant 8 : i32
    %0 = arith.muli %arg1, %c8_i32 : i32
    %1 = tpu.assume_multiple %0, 8 : i32
    %c0_i32 = arith.constant 0 : i32
    %2 = arith.addi %1, %c0_i32 : i32
    %c0 = arith.constant 0 : index
    %3 = arith.index_cast %2 : i32 to index
    %c0_0 = arith.constant 0 : index
    %c0_1 = arith.constant 0 : index
    %4 = vector.load %arg2[%c0, %3, %c0_0, %c0_1] : memref<1x20x20x48xbf16, #tpu.memory_space<vmem>>, vector<1x8x16x48xbf16>
    %5 = vector.shape_cast %4 : vector<1x8x16x48xbf16> to vector<8x16x48xbf16>
    %c0_i32_2 = arith.constant 0 : i32
    %6 = arith.addi %1, %c0_i32_2 : i32
    %c0_3 = arith.constant 0 : index
    %7 = arith.index_cast %6 : i32 to index
    %c1 = arith.constant 1 : index
    %c0_4 = arith.constant 0 : index
    %8 = vector.load %arg2[%c0_3, %7, %c1, %c0_4] : memref<1x20x20x48xbf16, #tpu.memory_space<vmem>>, vector<1x8x16x48xbf16>
    %9 = vector.shape_cast %8 : vector<1x8x16x48xbf16> to vector<8x16x48xbf16>
    %c0_i32_5 = arith.constant 0 : i32
    %10 = arith.addi %1, %c0_i32_5 : i32
    %c0_6 = arith.constant 0 : index
    %11 = arith.index_cast %10 : i32 to index
    %c2 = arith.constant 2 : index
    %c0_7 = arith.constant 0 : index
    %12 = vector.load %arg2[%c0_6, %11, %c2, %c0_7] : memref<1x20x20x48xbf16, #tpu.memory_space<vmem>>, vector<1x8x16x48xbf16>
    %13 = vector.shape_cast %12 : vector<1x8x16x48xbf16> to vector<8x16x48xbf16>
    %c0_i32_8 = arith.constant 0 : i32
    %14 = arith.addi %1, %c0_i32_8 : i32
    %c0_9 = arith.constant 0 : index
    %15 = arith.index_cast %14 : i32 to index
    %c3 = arith.constant 3 : index
    %c0_10 = arith.constant 0 : index
    %16 = vector.load %arg2[%c0_9, %15, %c3, %c0_10] : memref<1x20x20x48xbf16, #tpu.memory_space<vmem>>, vector<1x8x16x48xbf16>
    %17 = vector.shape_cast %16 : vector<1x8x16x48xbf16> to vector<8x16x48xbf16>
    %c0_i32_11 = arith.constant 0 : i32
    %18 = arith.addi %1, %c0_i32_11 : i32
    %c0_12 = arith.constant 0 : index
    %19 = arith.index_cast %18 : i32 to index
    %c4 = arith.constant 4 : index
    %c0_13 = arith.constant 0 : index
    %20 = vector.load %arg2[%c0_12, %19, %c4, %c0_13] : memref<1x20x20x48xbf16, #tpu.memory_space<vmem>>, vector<1x8x16x48xbf16>
    %21 = vector.shape_cast %20 : vector<1x8x16x48xbf16> to vector<8x16x48xbf16>
    %c1_i32 = arith.constant 1 : i32
    %22 = arith.addi %1, %c1_i32 : i32
    %c0_14 = arith.constant 0 : index
    %23 = arith.index_cast %22 : i32 to index
    %c0_15 = arith.constant 0 : index
    %c0_16 = arith.constant 0 : index
    %24 = vector.load %arg2[%c0_14, %23, %c0_15, %c0_16] : memref<1x20x20x48xbf16, #tpu.memory_space<vmem>>, vector<1x8x16x48xbf16>
    %25 = vector.shape_cast %24 : vector<1x8x16x48xbf16> to vector<8x16x48xbf16>
    %c1_i32_17 = arith.constant 1 : i32
    %26 = arith.addi %1, %c1_i32_17 : i32
    %c0_18 = arith.constant 0 : index
    %27 = arith.index_cast %26 : i32 to index
    %c1_19 = arith.constant 1 : index
    %c0_20 = arith.constant 0 : index
    %28 = vector.load %arg2[%c0_18, %27, %c1_19, %c0_20] : memref<1x20x20x48xbf16, #tpu.memory_space<vmem>>, vector<1x8x16x48xbf16>
    %29 = vector.shape_cast %28 : vector<1x8x16x48xbf16> to vector<8x16x48xbf16>
    %c1_i32_21 = arith.constant 1 : i32
    %30 = arith.addi %1, %c1_i32_21 : i32
    %c0_22 = arith.constant 0 : index
    %31 = arith.index_cast %30 : i32 to index
    %c2_23 = arith.constant 2 : index
    %c0_24 = arith.constant 0 : index
    %32 = vector.load %arg2[%c0_22, %31, %c2_23, %c0_24] : memref<1x20x20x48xbf16, #tpu.memory_space<vmem>>, vector<1x8x16x48xbf16>
    %33 = vector.shape_cast %32 : vector<1x8x16x48xbf16> to vector<8x16x48xbf16>
    %c1_i32_25 = arith.constant 1 : i32
    %34 = arith.addi %1, %c1_i32_25 : i32
    %c0_26 = arith.constant 0 : index
    %35 = arith.index_cast %34 : i32 to index
    %c3_27 = arith.constant 3 : index
    %c0_28 = arith.constant 0 : index
    %36 = vector.load %arg2[%c0_26, %35, %c3_27, %c0_28] : memref<1x20x20x48xbf16, #tpu.memory_space<vmem>>, vector<1x8x16x48xbf16>
    %37 = vector.shape_cast %36 : vector<1x8x16x48xbf16> to vector<8x16x48xbf16>
    %c1_i32_29 = arith.constant 1 : i32
    %38 = arith.addi %1, %c1_i32_29 : i32
    %c0_30 = arith.constant 0 : index
    %39 = arith.index_cast %38 : i32 to index
    %c4_31 = arith.constant 4 : index
    %c0_32 = arith.constant 0 : index
    %40 = vector.load %arg2[%c0_30, %39, %c4_31, %c0_32] : memref<1x20x20x48xbf16, #tpu.memory_space<vmem>>, vector<1x8x16x48xbf16>
    %41 = vector.shape_cast %40 : vector<1x8x16x48xbf16> to vector<8x16x48xbf16>
    %c2_i32 = arith.constant 2 : i32
    %42 = arith.addi %1, %c2_i32 : i32
    %c0_33 = arith.constant 0 : index
    %43 = arith.index_cast %42 : i32 to index
    %c0_34 = arith.constant 0 : index
    %c0_35 = arith.constant 0 : index
    %44 = vector.load %arg2[%c0_33, %43, %c0_34, %c0_35] : memref<1x20x20x48xbf16, #tpu.memory_space<vmem>>, vector<1x8x16x48xbf16>
    %45 = vector.shape_cast %44 : vector<1x8x16x48xbf16> to vector<8x16x48xbf16>
    %c2_i32_36 = arith.constant 2 : i32
    %46 = arith.addi %1, %c2_i32_36 : i32
    %c0_37 = arith.constant 0 : index
    %47 = arith.index_cast %46 : i32 to index
    %c1_38 = arith.constant 1 : index
    %c0_39 = arith.constant 0 : index
    %48 = vector.load %arg2[%c0_37, %47, %c1_38, %c0_39] : memref<1x20x20x48xbf16, #tpu.memory_space<vmem>>, vector<1x8x16x48xbf16>
    %49 = vector.shape_cast %48 : vector<1x8x16x48xbf16> to vector<8x16x48xbf16>
    %c2_i32_40 = arith.constant 2 : i32
    %50 = arith.addi %1, %c2_i32_40 : i32
    %c0_41 = arith.constant 0 : index
    %51 = arith.index_cast %50 : i32 to index
    %c2_42 = arith.constant 2 : index
    %c0_43 = arith.constant 0 : index
    %52 = vector.load %arg2[%c0_41, %51, %c2_42, %c0_43] : memref<1x20x20x48xbf16, #tpu.memory_space<vmem>>, vector<1x8x16x48xbf16>
    %53 = vector.shape_cast %52 : vector<1x8x16x48xbf16> to vector<8x16x48xbf16>
    %c2_i32_44 = arith.constant 2 : i32
    %54 = arith.addi %1, %c2_i32_44 : i32
    %c0_45 = arith.constant 0 : index
    %55 = arith.index_cast %54 : i32 to index
    %c3_46 = arith.constant 3 : index
    %c0_47 = arith.constant 0 : index
    %56 = vector.load %arg2[%c0_45, %55, %c3_46, %c0_47] : memref<1x20x20x48xbf16, #tpu.memory_space<vmem>>, vector<1x8x16x48xbf16>
    %57 = vector.shape_cast %56 : vector<1x8x16x48xbf16> to vector<8x16x48xbf16>
    %c2_i32_48 = arith.constant 2 : i32
    %58 = arith.addi %1, %c2_i32_48 : i32
    %c0_49 = arith.constant 0 : index
    %59 = arith.index_cast %58 : i32 to index
    %c4_50 = arith.constant 4 : index
    %c0_51 = arith.constant 0 : index
    %60 = vector.load %arg2[%c0_49, %59, %c4_50, %c0_51] : memref<1x20x20x48xbf16, #tpu.memory_space<vmem>>, vector<1x8x16x48xbf16>
    %61 = vector.shape_cast %60 : vector<1x8x16x48xbf16> to vector<8x16x48xbf16>
    %c3_i32 = arith.constant 3 : i32
    %62 = arith.addi %1, %c3_i32 : i32
    %c0_52 = arith.constant 0 : index
    %63 = arith.index_cast %62 : i32 to index
    %c0_53 = arith.constant 0 : index
    %c0_54 = arith.constant 0 : index
    %64 = vector.load %arg2[%c0_52, %63, %c0_53, %c0_54] : memref<1x20x20x48xbf16, #tpu.memory_space<vmem>>, vector<1x8x16x48xbf16>
    %65 = vector.shape_cast %64 : vector<1x8x16x48xbf16> to vector<8x16x48xbf16>
    %c3_i32_55 = arith.constant 3 : i32
    %66 = arith.addi %1, %c3_i32_55 : i32
    %c0_56 = arith.constant 0 : index
    %67 = arith.index_cast %66 : i32 to index
    %c1_57 = arith.constant 1 : index
    %c0_58 = arith.constant 0 : index
    %68 = vector.load %arg2[%c0_56, %67, %c1_57, %c0_58] : memref<1x20x20x48xbf16, #tpu.memory_space<vmem>>, vector<1x8x16x48xbf16>
    %69 = vector.shape_cast %68 : vector<1x8x16x48xbf16> to vector<8x16x48xbf16>
    %c3_i32_59 = arith.constant 3 : i32
    %70 = arith.addi %1, %c3_i32_59 : i32
    %c0_60 = arith.constant 0 : index
    %71 = arith.index_cast %70 : i32 to index
    %c2_61 = arith.constant 2 : index
    %c0_62 = arith.constant 0 : index
    %72 = vector.load %arg2[%c0_60, %71, %c2_61, %c0_62] : memref<1x20x20x48xbf16, #tpu.memory_space<vmem>>, vector<1x8x16x48xbf16>
    %73 = vector.shape_cast %72 : vector<1x8x16x48xbf16> to vector<8x16x48xbf16>
    %c3_i32_63 = arith.constant 3 : i32
    %74 = arith.addi %1, %c3_i32_63 : i32
    %c0_64 = arith.constant 0 : index
    %75 = arith.index_cast %74 : i32 to index
    %c3_65 = arith.constant 3 : index
    %c0_66 = arith.constant 0 : index
    %76 = vector.load %arg2[%c0_64, %75, %c3_65, %c0_66] : memref<1x20x20x48xbf16, #tpu.memory_space<vmem>>, vector<1x8x16x48xbf16>
    %77 = vector.shape_cast %76 : vector<1x8x16x48xbf16> to vector<8x16x48xbf16>
    %c3_i32_67 = arith.constant 3 : i32
    %78 = arith.addi %1, %c3_i32_67 : i32
    %c0_68 = arith.constant 0 : index
    %79 = arith.index_cast %78 : i32 to index
    %c4_69 = arith.constant 4 : index
    %c0_70 = arith.constant 0 : index
    %80 = vector.load %arg2[%c0_68, %79, %c4_69, %c0_70] : memref<1x20x20x48xbf16, #tpu.memory_space<vmem>>, vector<1x8x16x48xbf16>
    %81 = vector.shape_cast %80 : vector<1x8x16x48xbf16> to vector<8x16x48xbf16>
    %c4_i32 = arith.constant 4 : i32
    %82 = arith.addi %1, %c4_i32 : i32
    %c0_71 = arith.constant 0 : index
    %83 = arith.index_cast %82 : i32 to index
    %c0_72 = arith.constant 0 : index
    %c0_73 = arith.constant 0 : index
    %84 = vector.load %arg2[%c0_71, %83, %c0_72, %c0_73] : memref<1x20x20x48xbf16, #tpu.memory_space<vmem>>, vector<1x8x16x48xbf16>
    %85 = vector.shape_cast %84 : vector<1x8x16x48xbf16> to vector<8x16x48xbf16>
    %c4_i32_74 = arith.constant 4 : i32
    %86 = arith.addi %1, %c4_i32_74 : i32
    %c0_75 = arith.constant 0 : index
    %87 = arith.index_cast %86 : i32 to index
    %c1_76 = arith.constant 1 : index
    %c0_77 = arith.constant 0 : index
    %88 = vector.load %arg2[%c0_75, %87, %c1_76, %c0_77] : memref<1x20x20x48xbf16, #tpu.memory_space<vmem>>, vector<1x8x16x48xbf16>
    %89 = vector.shape_cast %88 : vector<1x8x16x48xbf16> to vector<8x16x48xbf16>
    %c4_i32_78 = arith.constant 4 : i32
    %90 = arith.addi %1, %c4_i32_78 : i32
    %c0_79 = arith.constant 0 : index
    %91 = arith.index_cast %90 : i32 to index
    %c2_80 = arith.constant 2 : index
    %c0_81 = arith.constant 0 : index
    %92 = vector.load %arg2[%c0_79, %91, %c2_80, %c0_81] : memref<1x20x20x48xbf16, #tpu.memory_space<vmem>>, vector<1x8x16x48xbf16>
    %93 = vector.shape_cast %92 : vector<1x8x16x48xbf16> to vector<8x16x48xbf16>
    %c4_i32_82 = arith.constant 4 : i32
    %94 = arith.addi %1, %c4_i32_82 : i32
    %c0_83 = arith.constant 0 : index
    %95 = arith.index_cast %94 : i32 to index
    %c3_84 = arith.constant 3 : index
    %c0_85 = arith.constant 0 : index
    %96 = vector.load %arg2[%c0_83, %95, %c3_84, %c0_85] : memref<1x20x20x48xbf16, #tpu.memory_space<vmem>>, vector<1x8x16x48xbf16>
    %97 = vector.shape_cast %96 : vector<1x8x16x48xbf16> to vector<8x16x48xbf16>
    %c4_i32_86 = arith.constant 4 : i32
    %98 = arith.addi %1, %c4_i32_86 : i32
    %c0_87 = arith.constant 0 : index
    %99 = arith.index_cast %98 : i32 to index
    %c4_88 = arith.constant 4 : index
    %c0_89 = arith.constant 0 : index
    %100 = vector.load %arg2[%c0_87, %99, %c4_88, %c0_89] : memref<1x20x20x48xbf16, #tpu.memory_space<vmem>>, vector<1x8x16x48xbf16>
    %101 = vector.shape_cast %100 : vector<1x8x16x48xbf16> to vector<8x16x48xbf16>
    %102 = tpu.concatenate %5, %9, %13, %17, %21, %25, %29, %33, %37, %41, %45, %49, %53, %57, %61, %65 in 2 : vector<8x16x48xbf16>, vector<8x16x48xbf16>, vector<8x16x48xbf16>, vector<8x16x48xbf16>, vector<8x16x48xbf16>, vector<8x16x48xbf16>, vector<8x16x48xbf16>, vector<8x16x48xbf16>, vector<8x16x48xbf16>, vector<8x16x48xbf16>, vector<8x16x48xbf16>, vector<8x16x48xbf16>, vector<8x16x48xbf16>, vector<8x16x48xbf16>, vector<8x16x48xbf16>, vector<8x16x48xbf16> -> vector<8x16x768xbf16>
    %103 = tpu.concatenate %69, %73, %77, %81, %85, %89, %93, %97, %101 in 2 : vector<8x16x48xbf16>, vector<8x16x48xbf16>, vector<8x16x48xbf16>, vector<8x16x48xbf16>, vector<8x16x48xbf16>, vector<8x16x48xbf16>, vector<8x16x48xbf16>, vector<8x16x48xbf16>, vector<8x16x48xbf16> -> vector<8x16x432xbf16>
    %104 = tpu.concatenate %102, %103 in 2 : vector<8x16x768xbf16>, vector<8x16x432xbf16> -> vector<8x16x1200xbf16>
    %105 = vector.shape_cast %104 : vector<8x16x1200xbf16> to vector<128x1200xbf16>
    %c0_90 = arith.constant 0 : index
    %c0_91 = arith.constant 0 : index
    %106 = vector.load %arg3[%c0_90, %c0_91] : memref<1200x64xbf16, #tpu.memory_space<vmem>>, vector<1200x64xbf16>
    %cst = arith.constant dense<0.000000e+00> : vector<128x64xf32>
    %107 = tpu.matmul %105, %106, %cst {dimension_numbers = #tpu.dot_dimension_numbers<[1], [0], [0], [1], [0, 0, 1, 1], [], []>} : vector<128x1200xbf16>, vector<1200x64xbf16>, vector<128x64xf32> -> vector<128x64xf32>
    %c0_92 = arith.constant 0 : index
    %c0_93 = arith.constant 0 : index
    %108 = vector.load %arg4[%c0_92, %c0_93] : memref<1x64xf32, #tpu.memory_space<vmem>>, vector<1x64xf32>
    %109 = vector.broadcast %108 : vector<1x64xf32> to vector<128x64xf32>
    %110 = arith.addf %107, %109 : vector<128x64xf32>
    %111 = vector.shape_cast %110 : vector<128x64xf32> to vector<8x16x64xf32>
    %c0_94 = arith.constant 0 : index
    %c0_95 = arith.constant 0 : index
    %c0_96 = arith.constant 0 : index
    %c0_97 = arith.constant 0 : index
    %112 = vector.load %arg5[%c0_94, %c0_95, %c0_96, %c0_97] : memref<1x8x16x64xf32, #tpu.memory_space<vmem>>, vector<1x8x16x64xf32>
    %113 = vector.shape_cast %112 : vector<1x8x16x64xf32> to vector<8x16x64xf32>
    %114 = vector.shape_cast %111 : vector<8x16x64xf32> to vector<1x8x16x64xf32>
    tpu.vector_store %arg5[%c0_94, %c0_95, %c0_96, %c0_97], %114 {strides = array<i32>} : memref<1x8x16x64xf32, #tpu.memory_space<vmem>>, vector<1x8x16x64xf32>,
    return
  }
  func.func @transform_0(%arg0: i32, %arg1: i32) -> (i32, i32, i32, i32) {
    %c0_i32 = arith.constant 0 : i32
    %c0_i32_0 = arith.constant 0 : i32
    %c0_i32_1 = arith.constant 0 : i32
    %c0_i32_2 = arith.constant 0 : i32
    return %arg0, %c0_i32, %c0_i32_0, %c0_i32_1 : i32, i32, i32, i32
  }
  func.func @transform_1(%arg0: i32, %arg1: i32) -> (i32, i32) {
    %c0_i32 = arith.constant 0 : i32
    %c0_i32_0 = arith.constant 0 : i32
    %c0_i32_1 = arith.constant 0 : i32
    return %c0_i32, %c0_i32_0 : i32, i32
  }
  func.func @transform_2(%arg0: i32, %arg1: i32) -> (i32, i32) {
    %c0_i32 = arith.constant 0 : i32
    %c0_i32_0 = arith.constant 0 : i32
    %c0_i32_1 = arith.constant 0 : i32
    return %c0_i32, %c0_i32_0 : i32, i32
  }
  func.func @transform_3(%arg0: i32, %arg1: i32) -> (i32, i32, i32, i32) {
    %c0_i32 = arith.constant 0 : i32
    %c0_i32_0 = arith.constant 0 : i32
    %c0_i32_1 = arith.constant 0 : i32
    return %arg0, %arg1, %c0_i32, %c0_i32_0 : i32, i32, i32, i32
  }
}

</mosaic_0001>

<bundles_post_ra>
// kernel: inception_a_pallas.5
= control target key start
LH: loop header
LB: loop body
LE: loop exit
PB: predicated region body
PF: predicated region fallthrough
CT: control target
= control target key end

     0   :  { %s1866_s21 = smov 0   ;;  %s2740_s0 = inlined_call_operand.vmem [shape: bf16[512,4], index: 0, kind: input, shape index: {}]   ;;  %s2741_s1 = inlined_call_operand.vmem [shape: bf16[4,192], index: 1, kind: input, shape index: {}]   ;;  %s2742_s2 = inlined_call_operand.vmem [shape: f32[1,192], index: 2, kind: input, shape index: {}]   ;;  %s2743_s3 = inlined_call_operand.vmem [shape: f32[512,64], index: 3, kind: output, shape index: {0}]   ;;  %s2744_s4 = inlined_call_operand.vmem [shape: bf16[512,48], index: 4, kind: output, shape index: {1}]   ;;  %s2745_s5 = inlined_call_operand.vmem [shape: bf16[512,64], index: 5, kind: output, shape index: {2}]   ;;  %s2746_s6 = inlined_call_operand.vmem [shape: bf16[512,16], index: 6, kind: output, shape index: {3}]  }
   0x1 LB: > { %s1546_s22 = sadd.s32 4294967295, %s1825_s21   ;;  %p1550_p0 = scmp.ge.s32.totalorder %s1825_s21, 1  ;;  %s1825_s21 = sphi %s1866_s21, %s17_s21  }
   0x2   : > { %p220_p1 = scmp.lt.s32.totalorder %s1825_s21, 3 }
   0x4   : > { %p221_p2 = pnand %p1550_p0, %p220_p1 }
   0x5   : > { %s1551_s25 = sshll.u32 (!%p221_p2), %s1546_s22, 5  ;;  %s1828_s12 = smov (!%p221_p2), 64  }
   0x6   : > { %224 = sbr.rel (%p221_p2) target bundleno = 523 (0x20b), region = 32  ;;  %p266_p3 = scmp.lt.s32.totalorder (!%p221_p2), %s1551_s25, 63 }
   0x7   : > { %s1829_s13 = smov (!%p221_p2), 16   ;;  %s1830_s14 = smov (!%p221_p2), 80  }
   0xb   : > { %v1577_v0 = vld.sshfl [vmem:[%s2741_s1] sm:$0x33 pattern:$0x76325410]  ;;  %vm479_vm0 = vcmask 1041408   ;;  %v1827_v3 = vmov 0   ;;  %v331_v20 = vlaneseq }
   0xc   : > { %v429_v1 = vcombine.high %v1577_v0, %v1577_v0  ;;  %v481_v2 = vsel %vm479_vm0, %v1577_v0, 0  ;;  %518 = vmatprep.mubr.bf16.mxu0 %v1827_v3  ;;  %598 = vmatprep.mubr.bf16.mxu1 %v1827_v3  ;;  %s2752_s25 = smov (!%p266_p3, %s1551_s25), 63  ;;  %vm430_vm1 = vcmask 31744   ;;  %v329_v23 = vld [vmem:[%s2742_s2] sm:$0x3]  ;;  %vm679_vm2 = vcmask 523264  }
   0xd   : > { %s1880_s26 = sshll.u32 %s2752_s25, 2  ;;  %v332_v21 = vshrl.u32 %v331_v20, 7  ;;  %s1554_s8 = sshll.u32 %s2752_s25, 3  ;;  %vm904_vm3 = vcmask 388096   ;;  %vm1129_vm4 = vcmask 130048   ;;  %vm1194_vm5 = vcmask 519168  }
   0xe   : > { %1578 = vmatprep.subr.msk.bf16.mxu0 %vm479_vm0, %v429_v1  ;;  %1789 = vmatprep.subr.msk.bf16.mxu1 %vm479_vm0, %v429_v1  ;;  %s1886_s29 = scalar_lea.vmem %s2740_s0, %s1880_s26  ;;  %s1929_s11 = scalar_lea.vmem %s2743_s3, %s1554_s8  ;;  %vm1355_vm6 = vcmask 125952  }
   0xf   : > { %501 = vmatpush1.bf16.msra.mxu0 %v481_v2  ;;  %1790 = vmatpush1.bf16.msra.mxu1 %v481_v2  ;;  %v1803_v4 = vld [vmem:[%s1886_s29] sm:$0xff]   ;;  %v1805_v6 = vld [vmem:[%s1886_s29 + $0x8] sm:$0xff]   ;;  %v1807_v8 = vld [vmem:[%s1886_s29 + $0x10] sm:$0xff]   ;;  %v333_v22 = vsub.s32 0, %v332_v21  ;;  %v337_v25 = vsub.s32 1, %v332_v21  ;;  %s2366_s17 = scalar_lea.vmem %s2744_s4, %s1880_s26  ;;  %s2396_s20 = scalar_lea.vmem %s2745_s5, %s1880_s26 }
  0x10   : > { %v1804_v5 = vld [vmem:[%s1886_s29 + $0x40] sm:$0xff]   ;;  %v1806_v7 = vld [vmem:[%s1886_s29 + $0x48] sm:$0xff]   ;;  %v1808_v9 = vld [vmem:[%s1886_s29 + $0x50] sm:$0xff]   ;;  %s2418_s24 = scalar_lea.vmem %s2746_s6, %s1880_s26 }
  0x11   : > { %v1809_v10 = vld [vmem:[%s1886_s29 + $0x18] sm:$0xff]   ;;  %v1811_v12 = vld [vmem:[%s1886_s29 + $0x20] sm:$0xff]   ;;  %v1813_v14 = vld [vmem:[%s1886_s29 + $0x28] sm:$0xff]   ;;  %v1923_v24 = vrot.slane %v329_v23, %v333_v22  ;;  %v1935_v31 = vrot.slane %v329_v23, %v337_v25 }
  0x12   : > { %1579 = vmatmul.mubr.msk.bf16.vlgmr.msra.gmra.mxu0 %vm430_vm1, %v1803_v4  ;;  %1587 = vmatmul.mubr.msk.bf16.vlgmr.msra.gmra.mxu1 %vm430_vm1, %v1804_v5  ;;  %v1810_v11 = vld [vmem:[%s1886_s29 + $0x58] sm:$0xff]   ;;  %v1812_v13 = vld [vmem:[%s1886_s29 + $0x60] sm:$0xff]   ;;  %v1814_v15 = vld [vmem:[%s1886_s29 + $0x68] sm:$0xff]  }
  0x13   : > { %528 = vmatprep.mubr.bf16.mxu0 %v1827_v3  ;;  %608 = vmatprep.mubr.bf16.mxu1 %v1827_v3  ;;  %v1815_v16 = vld [vmem:[%s1886_s29 + $0x30] sm:$0xff]   ;;  %v1817_v18 = vld [vmem:[%s1886_s29 + $0x38] sm:$0xff]  }
  0x14   : > { %v1816_v17 = vld [vmem:[%s1886_s29 + $0x70] sm:$0xff]   ;;  %v1818_v19 = vld [vmem:[%s1886_s29 + $0x78] sm:$0xff]  }
  0x1a   : > { %1580 = vmatmul.mubr.msk.bf16.gmra.mxu0 %vm430_vm1, %v1805_v6  ;;  %1588 = vmatmul.mubr.msk.bf16.gmra.mxu1 %vm430_vm1, %v1806_v7 }
  0x1b   : > { %538 = vmatprep.mubr.bf16.mxu0 %v1827_v3  ;;  %618 = vmatprep.mubr.bf16.mxu1 %v1827_v3 }
  0x22   : > { %1581 = vmatmul.mubr.msk.bf16.gmra.mxu0 %vm430_vm1, %v1807_v8  ;;  %1589 = vmatmul.mubr.msk.bf16.gmra.mxu1 %vm430_vm1, %v1808_v9 }
  0x23   : > { %548 = vmatprep.mubr.bf16.mxu0 %v1827_v3  ;;  %628 = vmatprep.mubr.bf16.mxu1 %v1827_v3 }
  0x2a   : > { %1582 = vmatmul.mubr.msk.bf16.gmra.mxu0 %vm430_vm1, %v1809_v10  ;;  %1590 = vmatmul.mubr.msk.bf16.gmra.mxu1 %vm430_vm1, %v1810_v11 }
  0x2b   : > { %558 = vmatprep.mubr.bf16.mxu0 %v1827_v3  ;;  %638 = vmatprep.mubr.bf16.mxu1 %v1827_v3 }
  0x32   : > { %1583 = vmatmul.mubr.msk.bf16.gmra.mxu0 %vm430_vm1, %v1811_v12  ;;  %1591 = vmatmul.mubr.msk.bf16.gmra.mxu1 %vm430_vm1, %v1812_v13 }
  0x33   : > { %568 = vmatprep.mubr.bf16.mxu0 %v1827_v3  ;;  %648 = vmatprep.mubr.bf16.mxu1 %v1827_v3 }
  0x3a   : > { %1584 = vmatmul.mubr.msk.bf16.gmra.mxu0 %vm430_vm1, %v1813_v14  ;;  %1592 = vmatmul.mubr.msk.bf16.gmra.mxu1 %vm430_vm1, %v1814_v15 }
  0x3b   : > { %578 = vmatprep.mubr.bf16.mxu0 %v1827_v3  ;;  %658 = vmatprep.mubr.bf16.mxu1 %v1827_v3 }
  0x42   : > { %1585 = vmatmul.mubr.msk.bf16.gmra.mxu0 %vm430_vm1, %v1815_v16  ;;  %1593 = vmatmul.mubr.msk.bf16.gmra.mxu1 %vm430_vm1, %v1816_v17 }
  0x43   : > { %588 = vmatprep.mubr.bf16.mxu0 %v1827_v3  ;;  %668 = vmatprep.mubr.bf16.mxu1 %v1827_v3 }
  0x4a   : > { %1586 = vmatmul.mubr.msk.bf16.gmra.mxu0 %vm430_vm1, %v1817_v18  ;;  %1594 = vmatmul.mubr.msk.bf16.gmra.mxu1 %vm430_vm1, %v1818_v19 }
  0xd2   : > { %v520_v26 = vpop.f32.mrf.mxu0  ;;  %v600_v28 = vpop.f32.mrf.mxu1 }
  0xd3   : > { %v521_v27 = vadd.f32 %v520_v26, %v1923_v24  ;;  %v601_v29 = vadd.f32 %v600_v28, %v1923_v24 }
  0xd4   : > { %v522_v30 = vpop.f32.mrf.mxu0  ;;  %v602_v32 = vpop.f32.mrf.mxu1 }
  0xd5   : > { %680 = vst.msk [vmem:[%s1929_s11] sm:$0xff] %vm679_vm2, %v521_v27  ;;  %v1693_v33 = vpack.c.bf16 %v521_v27, %v521_v27  ;;  %696 = vst.msk [vmem:[%s1929_s11 + $0x80] sm:$0xff] %vm679_vm2, %v601_v29  ;;  %v523_v39 = vadd.f32 %v522_v30, %v1935_v31  ;;  %v1709_v41 = vpack.c.bf16 %v601_v29, %v601_v29 }
  0xd6   : > { %v524_v34 = vpop.f32.mrf.mxu0  ;;  %v604_v36 = vpop.f32.mrf.mxu1  ;;  %v603_v50 = vadd.f32 %v602_v32, %v1935_v31 }
  0xd7   : > { %v1940_v35 = vadd.f32 %v524_v34, %v1923_v24  ;;  %808 = vrot.lane.b32.xlu0 %v1693_v33, %s1828_s12  ;;  %v605_v37 = vadd.f32 %v604_v36, %v1923_v24  ;;  %v1725_v49 = vpack.c.bf16 %v523_v39, %v521_v27  ;;  %v1757_v3 = vpack.c.bf16 %v523_v39, %v523_v39 }
  0xd8   : > { %v526_v38 = vpop.f32.mrf.mxu0  ;;  %v606_v40 = vpop.f32.mrf.mxu1  ;;  %v1741_v59 = vpack.c.bf16 %v603_v50, %v601_v29  ;;  %v1773_v11 = vpack.c.bf16 %v603_v50, %v603_v50 }
  0xd9   : > { %681 = vst.msk [vmem:[%s1929_s11 + $0x8] sm:$0xff] %vm679_vm2, %v1940_v35  ;;  %697 = vst.msk [vmem:[%s1929_s11 + $0x88] sm:$0xff] %vm679_vm2, %v605_v37  ;;  %v527_v42 = vadd.f32 %v526_v38, %v1935_v31  ;;  %v1710_v43 = vpack.c.bf16 %v605_v37, %v605_v37  ;;  %v607_v53 = vadd.f32 %v606_v40, %v1935_v31 }
  0xda   : > { %v530_v44 = vpop.f32.mrf.mxu0  ;;  %v610_v46 = vpop.f32.mrf.mxu1  ;;  %v1694_v20 = vpack.c.bf16 %v1940_v35, %v1940_v35 }
  0xdb   : > { %840 = vrot.lane.b32.xlu0 %v1709_v41, %s1828_s12  ;;  %v1953_v45 = vadd.f32 %v530_v44, %v1923_v24  ;;  %842 = vrot.lane.b32.xlu1 %v1710_v43, %s1828_s12  ;;  %v1959_v48 = vadd.f32 %v610_v46, %v1923_v24  ;;  %v1726_v52 = vpack.c.bf16 %v527_v42, %v1940_v35 }
  0xdc   : > { %v1956_v47 = vpop.f32.mrf.mxu0  ;;  %v1965_v51 = vpop.f32.mrf.mxu1  ;;  %v1742_v61 = vpack.c.bf16 %v607_v53, %v605_v37  ;;  %v1758_v5 = vpack.c.bf16 %v527_v42, %v527_v42  ;;  %v1774_v13 = vpack.c.bf16 %v607_v53, %v607_v53 }
  0xdd   : > { %682 = vst.msk [vmem:[%s1929_s11 + $0x10] sm:$0xff] %vm679_vm2, %v1953_v45  ;;  %698 = vst.msk [vmem:[%s1929_s11 + $0x90] sm:$0xff] %vm679_vm2, %v1959_v48  ;;  %v1695_v17 = vpack.c.bf16 %v1953_v45, %v1953_v45  ;;  %v1711_v23 = vpack.c.bf16 %v1959_v48, %v1959_v48  ;;  %v533_v29 = vadd.f32 %v1956_v47, %v1935_v31 }
  0xde   : > { %v534_v54 = vpop.f32.mrf.mxu0  ;;  %v614_v56 = vpop.f32.mrf.mxu1  ;;  %v613_v39 = vadd.f32 %v1965_v51, %v1935_v31 }
  0xdf   : > { %1033 = vrot.lane.b32.xlu0 %v1725_v49, %s1829_s13  ;;  %v1974_v55 = vadd.f32 %v534_v54, %v1923_v24  ;;  %1035 = vrot.lane.b32.xlu1 %v1726_v52, %s1829_s13  ;;  %v1980_v58 = vadd.f32 %v614_v56, %v1923_v24  ;;  %v1727_v38 = vpack.c.bf16 %v533_v29, %v1953_v45 }
  0xe0   : > { %v1977_v57 = vpop.f32.mrf.mxu0  ;;  %v1985_v60 = vpop.f32.mrf.mxu1  ;;  %v1743_v53 = vpack.c.bf16 %v613_v39, %v1959_v48 }
  0xe1   : > { %683 = vst.msk [vmem:[%s1929_s11 + $0x18] sm:$0xff] %vm679_vm2, %v1974_v55  ;;  %699 = vst.msk [vmem:[%s1929_s11 + $0x98] sm:$0xff] %vm679_vm2, %v1980_v58  ;;  %v1696_v32 = vpack.c.bf16 %v1974_v55, %v1974_v55  ;;  %v537_v42 = vadd.f32 %v1977_v57, %v1935_v31  ;;  %v1712_v43 = vpack.c.bf16 %v1980_v58, %v1980_v58 }
  0xe2   : > { %v540_v62 = vpop.f32.mrf.mxu0  ;;  %v620_v0 = vpop.f32.mrf.mxu1 }
  0xe3   : > { %1065 = vrot.lane.b32.xlu0 %v1741_v59, %s1829_s13  ;;  %v1992_v63 = vadd.f32 %v540_v62, %v1923_v24  ;;  %1067 = vrot.lane.b32.xlu1 %v1742_v61, %s1829_s13  ;;  %v1998_v2 = vadd.f32 %v620_v0, %v1923_v24  ;;  %v1728_v57 = vpack.c.bf16 %v537_v42, %v1974_v55 }
  0xe4   : > { %v1995_v1 = vpop.f32.mrf.mxu0  ;;  %v2003_v4 = vpop.f32.mrf.mxu1  ;;  %v617_v59 = vadd.f32 %v1985_v60, %v1935_v31 }
  0xe5   : > { %684 = vst.msk [vmem:[%s1929_s11 + $0x20] sm:$0xff] %vm679_vm2, %v1992_v63  ;;  %700 = vst.msk [vmem:[%s1929_s11 + $0xa0] sm:$0xff] %vm679_vm2, %v1998_v2 }
  0xe6   : > { %v544_v6 = vpop.f32.mrf.mxu0  ;;  %v624_v8 = vpop.f32.mrf.mxu1 }
  0xe7   : > { %1259 = vrot.lane.b32.xlu0 %v1757_v3, %s1830_s14  ;;  %v2010_v7 = vadd.f32 %v544_v6, %v1923_v24  ;;  %1261 = vrot.lane.b32.xlu1 %v1758_v5, %s1830_s14  ;;  %v2016_v10 = vadd.f32 %v624_v8, %v1923_v24  ;;  %v1759_v6 = vpack.c.bf16 %v533_v29, %v533_v29 }
  0xe8   : > { %v2013_v9 = vpop.f32.mrf.mxu0  ;;  %v2021_v12 = vpop.f32.mrf.mxu1  ;;  %v1775_v29 = vpack.c.bf16 %v613_v39, %v613_v39  ;;  %v1697_v39 = vpack.c.bf16 %v1992_v63, %v1992_v63 }
  0xe9   : > { %685 = vst.msk [vmem:[%s1929_s11 + $0x28] sm:$0xff] %vm679_vm2, %v2010_v7  ;;  %701 = vst.msk [vmem:[%s1929_s11 + $0xa8] sm:$0xff] %vm679_vm2, %v2016_v10 }
  0xea   : > { %v550_v14 = vpop.f32.mrf.mxu0  ;;  %v630_v16 = vpop.f32.mrf.mxu1 }
  0xeb   : > { %1291 = vrot.lane.b32.xlu0 %v1773_v11, %s1830_s14  ;;  %v2028_v15 = vadd.f32 %v550_v14, %v1923_v24  ;;  %1293 = vrot.lane.b32.xlu1 %v1774_v13, %s1830_s14  ;;  %v2036_v19 = vadd.f32 %v630_v16, %v1923_v24  ;;  %v1744_v13 = vpack.c.bf16 %v617_v59, %v1980_v58 }
  0xec   : > { %v2033_v18 = vpop.f32.mrf.mxu0  ;;  %v2043_v21 = vpop.f32.mrf.mxu1 }
  0xed   : > { %686 = vst.msk [vmem:[%s1929_s11 + $0x30] sm:$0xff] %vm679_vm2, %v2028_v15  ;;  %702 = vst.msk [vmem:[%s1929_s11 + $0xb0] sm:$0xff] %vm679_vm2, %v2036_v19 }
  0xee   : > { %v554_v22 = vpop.f32.mrf.mxu0  ;;  %v634_v26 = vpop.f32.mrf.mxu1 }
  0xef   : > { %810 = vrot.lane.b32.xlu0 %v1694_v20, %s1828_s12  ;;  %v2052_v25 = vadd.f32 %v554_v22, %v1923_v24  ;;  %812 = vrot.lane.b32.xlu1 %v1695_v17, %s1828_s12  ;;  %v2058_v28 = vadd.f32 %v634_v26, %v1923_v24 }
  0xf0   : > { %v2055_v27 = vpop.f32.mrf.mxu0  ;;  %v2065_v30 = vpop.f32.mrf.mxu1 }
  0xf1   : > { %687 = vst.msk [vmem:[%s1929_s11 + $0x38] sm:$0xff] %vm679_vm2, %v2052_v25  ;;  %703 = vst.msk [vmem:[%s1929_s11 + $0xb8] sm:$0xff] %vm679_vm2, %v2058_v28 }
  0xf2   : > { %v560_v33 = vpop.f32.mrf.mxu0  ;;  %v640_v35 = vpop.f32.mrf.mxu1 }
  0xf3   : > { %844 = vrot.lane.b32.xlu0 %v1711_v23, %s1828_s12  ;;  %v2074_v34 = vadd.f32 %v560_v33, %v1923_v24  ;;  %814 = vrot.lane.b32.xlu1 %v1696_v32, %s1828_s12  ;;  %v2078_v37 = vadd.f32 %v640_v35, %v1923_v24  ;;  %v1760_v35 = vpack.c.bf16 %v537_v42, %v537_v42 }
  0xf4   : > { %v562_v36 = vpop.f32.mrf.mxu0  ;;  %v642_v41 = vpop.f32.mrf.mxu1 }
  0xf5   : > { %688 = vst.msk [vmem:[%s1929_s11 + $0x40] sm:$0xff] %vm679_vm2, %v2074_v34  ;;  %v2087_v40 = vadd.f32 %v562_v36, %v1935_v31  ;;  %704 = vst.msk [vmem:[%s1929_s11 + $0xc0] sm:$0xff] %vm679_vm2, %v2078_v37  ;;  %v2097_v45 = vadd.f32 %v642_v41, %v1935_v31 }
  0xf6   : > { %v564_v44 = vpop.f32.mrf.mxu0  ;;  %v644_v49 = vpop.f32.mrf.mxu1 }
  0xf7   : > { %1037 = vrot.lane.b32.xlu0 %v1727_v38, %s1829_s13  ;;  %v1733_v46 = vpack.c.bf16 %v2087_v40, %v2074_v34  ;;  %v2103_v47 = vadd.f32 %v564_v44, %v1923_v24  ;;  %846 = vrot.lane.b32.xlu1 %v1712_v43, %s1828_s12  ;;  %v1749_v51 = vpack.c.bf16 %v2097_v45, %v2078_v37 }
  0xf8   : > { %v566_v50 = vpop.f32.mrf.mxu0  ;;  %v2109_v52 = vadd.f32 %v644_v49, %v1923_v24  ;;  %v646_v56 = vpop.f32.mrf.mxu1 }
  0xf9   : > { %689 = vst.msk [vmem:[%s1929_s11 + $0x48] sm:$0xff] %vm679_vm2, %v2103_v47  ;;  %v2116_v54 = vadd.f32 %v566_v50, %v1935_v31  ;;  %v2125_v61 = vadd.f32 %v646_v56, %v1935_v31 }
  0xfa   : > { %705 = vst.msk [vmem:[%s1929_s11 + $0xc8] sm:$0xff] %vm679_vm2, %v2109_v52  ;;  %v570_v48 = vpop.f32.mrf.mxu0  ;;  %v650_v55 = vpop.f32.mrf.mxu1 }
  0xfb   : > { %1069 = vrot.lane.b32.xlu0 %v1743_v53, %s1829_s13  ;;  %v1734_v62 = vpack.c.bf16 %v2116_v54, %v2103_v47  ;;  %v2131_v0 = vadd.f32 %v570_v48, %v1923_v24  ;;  %1039 = vrot.lane.b32.xlu1 %v1728_v57, %s1829_s13  ;;  %v1750_v60 = vpack.c.bf16 %v2125_v61, %v2109_v52 }
  0xfc   : > { %v572_v3 = vpop.f32.mrf.mxu0  ;;  %v2137_v5 = vadd.f32 %v650_v55, %v1923_v24  ;;  %v652_v11 = vpop.f32.mrf.mxu1  ;;  %v1776_v57 = vpack.c.bf16 %v617_v59, %v617_v59 }
  0xfd   : > { %690 = vst.msk [vmem:[%s1929_s11 + $0x50] sm:$0xff] %vm679_vm2, %v2131_v0  ;;  %v2143_v8 = vadd.f32 %v572_v3, %v1935_v31  ;;  %v2150_v16 = vadd.f32 %v652_v11, %v1935_v31  ;;  %v1713_v3 = vpack.c.bf16 %v1998_v2, %v1998_v2 }
  0xfe   : > { %v574_v14 = vpop.f32.mrf.mxu0  ;;  %706 = vst.msk [vmem:[%s1929_s11 + $0xd0] sm:$0xff] %vm679_vm2, %v2137_v5  ;;  %v654_v22 = vpop.f32.mrf.mxu1 }
  0xff   : > { %1263 = vrot.lane.b32.xlu0 %v1759_v6, %s1830_s14  ;;  %v1735_v17 = vpack.c.bf16 %v2143_v8, %v2131_v0  ;;  %v2156_v20 = vadd.f32 %v574_v14, %v1923_v24  ;;  %1071 = vrot.lane.b32.xlu1 %v1744_v13, %s1829_s13  ;;  %v1751_v23 = vpack.c.bf16 %v2150_v16, %v2137_v5 }
 0x100   : > { %v576_v58 = vpop.f32.mrf.mxu0  ;;  %v2162_v26 = vadd.f32 %v654_v22, %v1923_v24  ;;  %v656_v33 = vpop.f32.mrf.mxu1 }
 0x101   : > { %691 = vst.msk [vmem:[%s1929_s11 + $0x58] sm:$0xff] %vm679_vm2, %v2156_v20  ;;  %v2168_v32 = vadd.f32 %v576_v58, %v1935_v31  ;;  %v2174_v36 = vadd.f32 %v656_v33, %v1935_v31  ;;  %v543_v58 = vadd.f32 %v1995_v1, %v1935_v31 }
 0x102   : > { %707 = vst.msk [vmem:[%s1929_s11 + $0xd8] sm:$0xff] %vm679_vm2, %v2162_v26  ;;  %v580_v38 = vpop.f32.mrf.mxu0  ;;  %v660_v42 = vpop.f32.mrf.mxu1 }
 0x103   : > { %1295 = vrot.lane.b32.xlu0 %v1775_v29, %s1830_s14  ;;  %v1736_v41 = vpack.c.bf16 %v2168_v32, %v2156_v20  ;;  %v2182_v43 = vadd.f32 %v580_v38, %v1923_v24  ;;  %1265 = vrot.lane.b32.xlu1 %v1760_v35, %s1830_s14  ;;  %v1752_v44 = vpack.c.bf16 %v2174_v36, %v2162_v26 }
 0x104   : > { %v582_v49 = vpop.f32.mrf.mxu0  ;;  %v2188_v50 = vadd.f32 %v660_v42, %v1923_v24  ;;  %v662_v56 = vpop.f32.mrf.mxu1  ;;  %v1698_v35 = vpack.c.bf16 %v2010_v7, %v2010_v7 }
 0x105   : > { %692 = vst.msk [vmem:[%s1929_s11 + $0x60] sm:$0xff] %vm679_vm2, %v2182_v43  ;;  %v2194_v53 = vadd.f32 %v582_v49, %v1935_v31  ;;  %v2200_v55 = vadd.f32 %v662_v56, %v1935_v31 }
 0x106   : > { %v584_v48 = vpop.f32.mrf.mxu0  ;;  %708 = vst.msk [vmem:[%s1929_s11 + $0xe0] sm:$0xff] %vm679_vm2, %v2188_v50  ;;  %v664_v59 = vpop.f32.mrf.mxu1 }
 0x107   : > { %816 = vrot.lane.b32.xlu0 %v1697_v39, %s1828_s12  ;;  %v1737_v6 = vpack.c.bf16 %v2194_v53, %v2182_v43  ;;  %v2208_v11 = vadd.f32 %v584_v48, %v1923_v24  ;;  %1297 = vrot.lane.b32.xlu1 %v1776_v57, %s1830_s14  ;;  %v2214_v22 = vadd.f32 %v664_v59, %v1923_v24 }
 0x108   : > { %v586_v13 = vpop.f32.mrf.mxu0  ;;  %v666_v33 = vpop.f32.mrf.mxu1  ;;  %v1729_v59 = vpack.c.bf16 %v543_v58, %v1992_v63 }
 0x109   : > { %693 = vst.msk [vmem:[%s1929_s11 + $0x68] sm:$0xff] %vm679_vm2, %v2208_v11  ;;  %v2222_v29 = vadd.f32 %v586_v13, %v1935_v31  ;;  %709 = vst.msk [vmem:[%s1929_s11 + $0xe8] sm:$0xff] %vm679_vm2, %v2214_v22  ;;  %v2230_v38 = vadd.f32 %v666_v33, %v1935_v31 }
 0x10a   : > { %v590_v39 = vpop.f32.mrf.mxu0  ;;  %v670_v49 = vpop.f32.mrf.mxu1 }
 0x10b   : > { %848 = vrot.lane.b32.xlu0 %v1713_v3, %s1828_s12  ;;  %v2236_v42 = vadd.f32 %v590_v39, %v1923_v24  ;;  %818 = vrot.lane.b32.xlu1 %v1698_v35, %s1828_s12  ;;  %v2242_v48 = vadd.f32 %v670_v49, %v1923_v24  ;;  %v623_v3 = vadd.f32 %v2003_v4, %v1935_v31 }
 0x10c   : > { %v592_v57 = vpop.f32.mrf.mxu0  ;;  %v672_v33 = vpop.f32.mrf.mxu1  ;;  %v547_v35 = vadd.f32 %v2013_v9, %v1935_v31  ;;  %v1714_v39 = vpack.c.bf16 %v2016_v10, %v2016_v10 }
 0x10d   : > { %694 = vst.msk [vmem:[%s1929_s11 + $0x70] sm:$0xff] %vm679_vm2, %v2236_v42  ;;  %v2251_v13 = vadd.f32 %v592_v57, %v1935_v31  ;;  %710 = vst.msk [vmem:[%s1929_s11 + $0xf0] sm:$0xff] %vm679_vm2, %v2242_v48  ;;  %v2261_v63 = vadd.f32 %v672_v33, %v1935_v31  ;;  %v1745_v33 = vpack.c.bf16 %v623_v3, %v1998_v2 }
 0x10e   : > { %v594_v49 = vpop.f32.mrf.mxu0  ;;  %v674_v9 = vpop.f32.mrf.mxu1  ;;  %v1730_v4 = vpack.c.bf16 %v547_v35, %v2010_v7  ;;  %v1761_v7 = vpack.c.bf16 %v543_v58, %v543_v58  ;;  %v1715_v58 = vpack.c.bf16 %v2036_v19, %v2036_v19 }
 0x10f   : > { %1041 = vrot.lane.b32.xlu0 %v1729_v59, %s1829_s13  ;;  %v2267_v57 = vadd.f32 %v594_v49, %v1923_v24  ;;  %850 = vrot.lane.b32.xlu1 %v1714_v39, %s1828_s12  ;;  %v1755_v1 = vpack.c.bf16 %v2261_v63, %v2242_v48  ;;  %v2273_v14 = vadd.f32 %v674_v9, %v1923_v24 }
 0x110   : > { %v596_v56 = vpop.f32.mrf.mxu0  ;;  %v676_v49 = vpop.f32.mrf.mxu1  ;;  %v627_v39 = vadd.f32 %v2021_v12, %v1935_v31  ;;  %v1777_v12 = vpack.c.bf16 %v623_v3, %v623_v3  ;;  %v1700_v3 = vpack.c.bf16 %v2052_v25, %v2052_v25 }
 0x111   : > { %695 = vst.msk [vmem:[%s1929_s11 + $0x78] sm:$0xff] %vm679_vm2, %v2267_v57  ;;  %v2280_v59 = vadd.f32 %v596_v56, %v1935_v31  ;;  %711 = vst.msk [vmem:[%s1929_s11 + $0xf8] sm:$0xff] %vm679_vm2, %v2273_v14  ;;  %v2289_v24 = vadd.f32 %v676_v49, %v1935_v31  ;;  %v1762_v49 = vpack.c.bf16 %v547_v35, %v547_v35 }
 0x112   : > { %v1746_v9 = vpack.c.bf16 %v627_v39, %v2016_v10  ;;  %v553_v10 = vadd.f32 %v2033_v18, %v1935_v31 }
 0x113   : > { %1073 = vrot.lane.b32.xlu0 %v1745_v33, %s1829_s13  ;;  %v1740_v2 = vpack.c.bf16 %v2280_v59, %v2267_v57  ;;  %1043 = vrot.lane.b32.xlu1 %v1730_v4, %s1829_s13  ;;  %v1756_v56 = vpack.c.bf16 %v2289_v24, %v2273_v14  ;;  %v1699_v33 = vpack.c.bf16 %v2028_v15, %v2028_v15 }
 0x114   : > { %v1778_v4 = vpack.c.bf16 %v627_v39, %v627_v39  ;;  %v1731_v35 = vpack.c.bf16 %v553_v10, %v2028_v15  ;;  %v633_v39 = vadd.f32 %v2043_v21, %v1935_v31  ;;  %v637_v15 = vadd.f32 %v2065_v30, %v1935_v31 }
 0x115   : > { %v1763_v21 = vpack.c.bf16 %v553_v10, %v553_v10  ;;  %v1718_v30 = vpack.c.bf16 %v2109_v52, %v2109_v52 }
 0x116   : > { %v1747_v18 = vpack.c.bf16 %v633_v39, %v2036_v19  ;;  %v1701_v19 = vpack.c.bf16 %v2074_v34, %v2074_v34  ;;  %v1781_v34 = vpack.c.bf16 %v2097_v45, %v2097_v45  ;;  %v1719_v45 = vpack.c.bf16 %v2137_v5, %v2137_v5 }
 0x117   : > { %1267 = vrot.lane.b32.xlu0 %v1761_v7, %s1830_s14  ;;  %1075 = vrot.lane.b32.xlu1 %v1746_v9, %s1829_s13  ;;  %v557_v7 = vadd.f32 %v2055_v27, %v1935_v31  ;;  %v1716_v9 = vpack.c.bf16 %v2058_v28, %v2058_v28  ;;  %v1748_v27 = vpack.c.bf16 %v637_v15, %v2058_v28 }
 0x118   : > { %v1780_v31 = vpack.c.bf16 %v637_v15, %v637_v15  ;;  %v1702_v28 = vpack.c.bf16 %v2103_v47, %v2103_v47  ;;  %v1783_v5 = vpack.c.bf16 %v2150_v16, %v2150_v16  ;;  %v1784_v16 = vpack.c.bf16 %v2174_v36, %v2174_v36 }
 0x11b   : > { %1299 = vrot.lane.b32.xlu0 %v1777_v12, %s1830_s14  ;;  %1269 = vrot.lane.b32.xlu1 %v1762_v49, %s1830_s14  ;;  %v1732_v12 = vpack.c.bf16 %v557_v7, %v2052_v25  ;;  %v1779_v49 = vpack.c.bf16 %v633_v39, %v633_v39  ;;  %v1717_v25 = vpack.c.bf16 %v2078_v37, %v2078_v37 }
 0x11f   : > { %820 = vrot.lane.b32.xlu0 %v1699_v33, %s1828_s12  ;;  %1301 = vrot.lane.b32.xlu1 %v1778_v4, %s1830_s14  ;;  %v1764_v33 = vpack.c.bf16 %v557_v7, %v557_v7  ;;  %v1765_v4 = vpack.c.bf16 %v2087_v40, %v2087_v40  ;;  %v1766_v40 = vpack.c.bf16 %v2116_v54, %v2116_v54 }
 0x123   : > { %852 = vrot.lane.b32.xlu0 %v1715_v58, %s1828_s12  ;;  %822 = vrot.lane.b32.xlu1 %v1700_v3, %s1828_s12 }
 0x127   : > { %1045 = vrot.lane.b32.xlu0 %v1731_v35, %s1829_s13  ;;  %854 = vrot.lane.b32.xlu1 %v1716_v9, %s1828_s12  ;;  %v1720_v9 = vpack.c.bf16 %v2162_v26, %v2162_v26 }
 0x12b   : > { %1077 = vrot.lane.b32.xlu0 %v1747_v18, %s1829_s13  ;;  %1047 = vrot.lane.b32.xlu1 %v1732_v12, %s1829_s13 }
 0x12f   : > { %1271 = vrot.lane.b32.xlu0 %v1763_v21, %s1830_s14  ;;  %1079 = vrot.lane.b32.xlu1 %v1748_v27, %s1829_s13  ;;  %v1767_v21 = vpack.c.bf16 %v2143_v8, %v2143_v8  ;;  %v1768_v8 = vpack.c.bf16 %v2168_v32, %v2168_v32  ;;  %v1721_v32 = vpack.c.bf16 %v2188_v50, %v2188_v50 }
 0x133   : > { %1303 = vrot.lane.b32.xlu0 %v1779_v49, %s1830_s14  ;;  %1273 = vrot.lane.b32.xlu1 %v1764_v33, %s1830_s14 }
 0x137   : > { %824 = vrot.lane.b32.xlu0 %v1701_v19, %s1828_s12  ;;  %1305 = vrot.lane.b32.xlu1 %v1780_v31, %s1830_s14 }
 0x13b   : > { %856 = vrot.lane.b32.xlu0 %v1717_v25, %s1828_s12  ;;  %826 = vrot.lane.b32.xlu1 %v1702_v28, %s1828_s12  ;;  %v1706_v25 = vpack.c.bf16 %v2208_v11, %v2208_v11 }
 0x13f   : > { %1049 = vrot.lane.b32.xlu0 %v1733_v46, %s1829_s13  ;;  %858 = vrot.lane.b32.xlu1 %v1718_v30, %s1828_s12  ;;  %v1703_v46 = vpack.c.bf16 %v2131_v0, %v2131_v0 }
 0x143   : > { %1081 = vrot.lane.b32.xlu0 %v1749_v51, %s1829_s13  ;;  %1051 = vrot.lane.b32.xlu1 %v1734_v62, %s1829_s13  ;;  %v1782_v51 = vpack.c.bf16 %v2125_v61, %v2125_v61 }
 0x147   : > { %1275 = vrot.lane.b32.xlu0 %v1765_v4, %s1830_s14  ;;  %1083 = vrot.lane.b32.xlu1 %v1750_v60, %s1829_s13  ;;  %v1704_v60 = vpack.c.bf16 %v2156_v20, %v2156_v20 }
 0x149   : > { %v809_v37 = vpop.permute.xlu0 %808 }
 0x14a   : > { %905 = vst.msk [vmem:[%s2366_s17] sm:$0xf] %vm904_vm3, %v809_v37 }
 0x14b   : > { %1307 = vrot.lane.b32.xlu0 %v1781_v34, %s1830_s14  ;;  %1277 = vrot.lane.b32.xlu1 %v1766_v40, %s1830_s14  ;;  %v1722_v34 = vpack.c.bf16 %v2214_v22, %v2214_v22 }
 0x14d   : > { %v841_v47 = vpop.permute.xlu0 %840  ;;  %v843_v52 = vpop.permute.xlu1 %842 }
 0x14e   : > { %921 = vst.msk [vmem:[%s2366_s17 + $0x40] sm:$0xf] %vm904_vm3, %v841_v47  ;;  %922 = vst.msk [vmem:[%s2366_s17 + $0x44] sm:$0xf] %vm904_vm3, %v843_v52 }
 0x14f   : > { %828 = vrot.lane.b32.xlu0 %v1703_v46, %s1828_s12  ;;  %1309 = vrot.lane.b32.xlu1 %v1782_v51, %s1830_s14 }
 0x151   : > { %v1034_v54 = vpop.permute.xlu0 %1033  ;;  %v1036_v61 = vpop.permute.xlu1 %1035 }
 0x152   : > { %v1097_v62 = vrot.slane %v1034_v54, 4  ;;  %v1098_v58 = vrot.slane %v1036_v61, 4 }
 0x153   : > { %860 = vrot.lane.b32.xlu0 %v1719_v45, %s1828_s12  ;;  %830 = vrot.lane.b32.xlu1 %v1704_v60, %s1828_s12  ;;  %v1769_v45 = vpack.c.bf16 %v2194_v53, %v2194_v53  ;;  %v1785_v53 = vpack.c.bf16 %v2200_v55, %v2200_v55  ;;  %v1770_v60 = vpack.c.bf16 %v2222_v29, %v2222_v29 }
 0x154   : > { %v1130_v10 = vsel %vm1129_vm4, %v1034_v54, %v1097_v62  ;;  %v1131_v3 = vsel %vm1129_vm4, %v1036_v61, %v1098_v58 }
 0x155   : > { %1195 = vst.msk [vmem:[%s2396_s20] sm:$0xf] %vm1194_vm5, %v1130_v10  ;;  %v1066_v35 = vpop.permute.xlu0 %1065  ;;  %1196 = vst.msk [vmem:[%s2396_s20 + $0x4] sm:$0xf] %vm1194_vm5, %v1131_v3  ;;  %v1068_v39 = vpop.permute.xlu1 %1067  ;;  %v1707_v10 = vpack.c.bf16 %v2236_v42, %v2236_v42 }
 0x156   : > { %v1113_v7 = vrot.slane %v1066_v35, 4  ;;  %v1114_v18 = vrot.slane %v1068_v39, 4 }
 0x157   : > { %1053 = vrot.lane.b32.xlu0 %v1735_v17, %s1829_s13  ;;  %862 = vrot.lane.b32.xlu1 %v1720_v9, %s1828_s12  ;;  %v1708_v9 = vpack.c.bf16 %v2267_v57, %v2267_v57 }
 0x158   : > { %v1146_v12 = vsel %vm1129_vm4, %v1066_v35, %v1113_v7  ;;  %v1147_v15 = vsel %vm1129_vm4, %v1068_v39, %v1114_v18 }
 0x159   : > { %1211 = vst.msk [vmem:[%s2396_s20 + $0x40] sm:$0xf] %vm1194_vm5, %v1146_v12  ;;  %v1260_v0 = vpop.permute.xlu0 %1259  ;;  %1212 = vst.msk [vmem:[%s2396_s20 + $0x44] sm:$0xf] %vm1194_vm5, %v1147_v15  ;;  %v1262_v17 = vpop.permute.xlu1 %1261 }
 0x15a   : > { %1356 = vst.msk [vmem:[%s2418_s24] sm:$0xf] %vm1355_vm6, %v1260_v0  ;;  %1357 = vst.msk [vmem:[%s2418_s24 + $0x4] sm:$0xf] %vm1355_vm6, %v1262_v17  ;;  %v1724_v0 = vpack.c.bf16 %v2273_v14, %v2273_v14 }
 0x15b   : > { %1085 = vrot.lane.b32.xlu0 %v1751_v23, %s1829_s13  ;;  %1055 = vrot.lane.b32.xlu1 %v1736_v41, %s1829_s13  ;;  %v1705_v41 = vpack.c.bf16 %v2182_v43, %v2182_v43  ;;  %v2747_v43 = vpack.c.bf16 %v2200_v55, %v2188_v50  ;;  %v2749_v50 = vpack.c.bf16 %v2230_v38, %v2214_v22 }
 0x15c   : > { %v1786_v55 = vpack.c.bf16 %v2230_v38, %v2230_v38 }
 0x15d   : > { %v1292_v27 = vpop.permute.xlu0 %1291  ;;  %v1294_v49 = vpop.permute.xlu1 %1293 }
 0x15e   : > { %1372 = vst.msk [vmem:[%s2418_s24 + $0x40] sm:$0xf] %vm1355_vm6, %v1292_v27  ;;  %1373 = vst.msk [vmem:[%s2418_s24 + $0x44] sm:$0xf] %vm1355_vm6, %v1294_v49 }
 0x15f   : > { %1279 = vrot.lane.b32.xlu0 %v1767_v21, %s1830_s14  ;;  %1087 = vrot.lane.b32.xlu1 %v1752_v44, %s1829_s13  ;;  %v2750_v21 = vpack.c.bf16 %v2251_v13, %v2236_v42  ;;  %v1771_v42 = vpack.c.bf16 %v2251_v13, %v2251_v13  ;;  %v1772_v13 = vpack.c.bf16 %v2280_v59, %v2280_v59 }
 0x161   : > { %v811_v20 = vpop.permute.xlu0 %810  ;;  %v813_v23 = vpop.permute.xlu1 %812 }
 0x162   : > { %906 = vst.msk [vmem:[%s2366_s17 + $0x4] sm:$0xf] %vm904_vm3, %v811_v20  ;;  %907 = vst.msk [vmem:[%s2366_s17 + $0x8] sm:$0xf] %vm904_vm3, %v813_v23 }
 0x163   : > { %1311 = vrot.lane.b32.xlu0 %v1783_v5, %s1830_s14  ;;  %1281 = vrot.lane.b32.xlu1 %v1768_v8, %s1830_s14 }
 0x165   : > { %v845_v26 = vpop.permute.xlu0 %844  ;;  %v815_v44 = vpop.permute.xlu1 %814 }
 0x166   : > { %923 = vst.msk [vmem:[%s2366_s17 + $0x48] sm:$0xf] %vm904_vm3, %v845_v26  ;;  %908 = vst.msk [vmem:[%s2366_s17 + $0xc] sm:$0xf] %vm904_vm3, %v815_v44 }
 0x167   : > { %832 = vrot.lane.b32.xlu0 %v1705_v41, %s1828_s12  ;;  %1313 = vrot.lane.b32.xlu1 %v1784_v16, %s1830_s14 }
 0x169   : > { %v1038_v33 = vpop.permute.xlu0 %1037  ;;  %v847_v19 = vpop.permute.xlu1 %846 }
 0x16a   : > { %v1099_v31 = vrot.slane %v1038_v33, 4  ;;  %924 = vst.msk [vmem:[%s2366_s17 + $0x4c] sm:$0xf] %vm904_vm3, %v847_v19 }
 0x16b   : > { %864 = vrot.lane.b32.xlu0 %v1721_v32, %s1828_s12  ;;  %834 = vrot.lane.b32.xlu1 %v1706_v25, %s1828_s12 }
 0x16c   : > { %v1132_v36 = vsel %vm1129_vm4, %v1038_v33, %v1099_v31 }
 0x16d   : > { %1197 = vst.msk [vmem:[%s2396_s20 + $0x8] sm:$0xf] %vm1194_vm5, %v1132_v36  ;;  %v1070_v28 = vpop.permute.xlu0 %1069  ;;  %v1040_v30 = vpop.permute.xlu1 %1039 }
 0x16e   : > { %v1115_v4 = vrot.slane %v1070_v28, 4  ;;  %v1100_v37 = vrot.slane %v1040_v30, 4 }
 0x16f   : > { %1057 = vrot.lane.b32.xlu0 %v1737_v6, %s1829_s13  ;;  %866 = vrot.lane.b32.xlu1 %v1722_v34, %s1828_s12  ;;  %v2748_v6 = vpack.c.bf16 %v2222_v29, %v2208_v11  ;;  %v1723_v29 = vpack.c.bf16 %v2242_v48, %v2242_v48 }
 0x170   : > { %v1148_v40 = vsel %vm1129_vm4, %v1070_v28, %v1115_v4  ;;  %v1133_v46 = vsel %vm1129_vm4, %v1040_v30, %v1100_v37 }
 0x171   : > { %1213 = vst.msk [vmem:[%s2396_s20 + $0x48] sm:$0xf] %vm1194_vm5, %v1148_v40  ;;  %v1264_v47 = vpop.permute.xlu0 %1263  ;;  %1198 = vst.msk [vmem:[%s2396_s20 + $0xc] sm:$0xf] %vm1194_vm5, %v1133_v46  ;;  %v1072_v51 = vpop.permute.xlu1 %1071 }
 0x172   : > { %1358 = vst.msk [vmem:[%s2418_s24 + $0x8] sm:$0xf] %vm1355_vm6, %v1264_v47  ;;  %v1116_v52 = vrot.slane %v1072_v51, 4 }
 0x173   : > { %1089 = vrot.lane.b32.xlu0 %v2747_v43, %s1829_s13  ;;  %1059 = vrot.lane.b32.xlu1 %v2748_v6, %s1829_s13 }
 0x174   : > { %v1149_v54 = vsel %vm1129_vm4, %v1072_v51, %v1116_v52 }
 0x175   : > { %v1296_v61 = vpop.permute.xlu0 %1295  ;;  %1214 = vst.msk [vmem:[%s2396_s20 + $0x4c] sm:$0xf] %vm1194_vm5, %v1149_v54  ;;  %v1266_v62 = vpop.permute.xlu1 %1265 }
 0x176   : > { %1374 = vst.msk [vmem:[%s2418_s24 + $0x48] sm:$0xf] %vm1355_vm6, %v1296_v61  ;;  %1359 = vst.msk [vmem:[%s2418_s24 + $0xc] sm:$0xf] %vm1355_vm6, %v1266_v62 }
 0x177   : > { %1283 = vrot.lane.b32.xlu0 %v1769_v45, %s1830_s14  ;;  %1091 = vrot.lane.b32.xlu1 %v2749_v50, %s1829_s13 }
 0x179   : > { %v817_v11 = vpop.permute.xlu0 %816  ;;  %v1298_v58 = vpop.permute.xlu1 %1297 }
 0x17a   : > { %909 = vst.msk [vmem:[%s2366_s17 + $0x10] sm:$0xf] %vm904_vm3, %v817_v11 }
 0x17b   : > { %1375 = vst.msk [vmem:[%s2418_s24 + $0x4c] sm:$0xf] %vm1355_vm6, %v1298_v58  ;;  %1315 = vrot.lane.b32.xlu0 %v1785_v53, %s1830_s14  ;;  %1285 = vrot.lane.b32.xlu1 %v1770_v60, %s1830_s14 }
 0x17d   : > { %v849_v22 = vpop.permute.xlu0 %848  ;;  %v819_v3 = vpop.permute.xlu1 %818 }
 0x17e   : > { %925 = vst.msk [vmem:[%s2366_s17 + $0x50] sm:$0xf] %vm904_vm3, %v849_v22  ;;  %910 = vst.msk [vmem:[%s2366_s17 + $0x14] sm:$0xf] %vm904_vm3, %v819_v3 }
 0x17f   : > { %836 = vrot.lane.b32.xlu0 %v1707_v10, %s1828_s12  ;;  %1317 = vrot.lane.b32.xlu1 %v1786_v55, %s1830_s14 }
 0x181   : > { %v1042_v35 = vpop.permute.xlu0 %1041  ;;  %v851_v39 = vpop.permute.xlu1 %850 }
 0x182   : > { %v1101_v7 = vrot.slane %v1042_v35, 4  ;;  %926 = vst.msk [vmem:[%s2366_s17 + $0x54] sm:$0xf] %vm904_vm3, %v851_v39 }
 0x183   : > { %868 = vrot.lane.b32.xlu0 %v1723_v29, %s1828_s12  ;;  %838 = vrot.lane.b32.xlu1 %v1708_v9, %s1828_s12 }
 0x184   : > { %v1134_v38 = vsel %vm1129_vm4, %v1042_v35, %v1101_v7 }
 0x185   : > { %1199 = vst.msk [vmem:[%s2396_s20 + $0x10] sm:$0xf] %vm1194_vm5, %v1134_v38  ;;  %v1074_v18 = vpop.permute.xlu0 %1073  ;;  %v1044_v12 = vpop.permute.xlu1 %1043 }
 0x186   : > { %v1117_v15 = vrot.slane %v1074_v18, 4  ;;  %v1102_v17 = vrot.slane %v1044_v12, 4 }
 0x187   : > { %1061 = vrot.lane.b32.xlu0 %v2750_v21, %s1829_s13  ;;  %870 = vrot.lane.b32.xlu1 %v1724_v0, %s1828_s12 }
 0x188   : > { %v1150_v27 = vsel %vm1129_vm4, %v1074_v18, %v1117_v15  ;;  %v1135_v49 = vsel %vm1129_vm4, %v1044_v12, %v1102_v17 }
 0x189   : > { %1215 = vst.msk [vmem:[%s2396_s20 + $0x50] sm:$0xf] %vm1194_vm5, %v1150_v27  ;;  %v1268_v5 = vpop.permute.xlu0 %1267  ;;  %1200 = vst.msk [vmem:[%s2396_s20 + $0x14] sm:$0xf] %vm1194_vm5, %v1135_v49  ;;  %v1076_v20 = vpop.permute.xlu1 %1075 }
 0x18a   : > { %1360 = vst.msk [vmem:[%s2418_s24 + $0x10] sm:$0xf] %vm1355_vm6, %v1268_v5  ;;  %v1118_v8 = vrot.slane %v1076_v20, 4 }
 0x18b   : > { %1093 = vrot.lane.b32.xlu0 %v1755_v1, %s1829_s13  ;;  %1063 = vrot.lane.b32.xlu1 %v1740_v2, %s1829_s13  ;;  %v1787_v1 = vpack.c.bf16 %v2261_v63, %v2261_v63  ;;  %v1788_v2 = vpack.c.bf16 %v2289_v24, %v2289_v24 }
 0x18c   : > { %v1151_v23 = vsel %vm1129_vm4, %v1076_v20, %v1118_v8 }
 0x18d   : > { %v1300_v41 = vpop.permute.xlu0 %1299  ;;  %1216 = vst.msk [vmem:[%s2396_s20 + $0x54] sm:$0xf] %vm1194_vm5, %v1151_v23  ;;  %v1270_v26 = vpop.permute.xlu1 %1269 }
 0x18e   : > { %1376 = vst.msk [vmem:[%s2418_s24 + $0x50] sm:$0xf] %vm1355_vm6, %v1300_v41  ;;  %1361 = vst.msk [vmem:[%s2418_s24 + $0x14] sm:$0xf] %vm1355_vm6, %v1270_v26 }
 0x18f   : > { %1287 = vrot.lane.b32.xlu0 %v1771_v42, %s1830_s14  ;;  %1095 = vrot.lane.b32.xlu1 %v1756_v56, %s1829_s13 }
 0x191   : > { %v821_v48 = vpop.permute.xlu0 %820  ;;  %v1302_v57 = vpop.permute.xlu1 %1301 }
 0x192   : > { %911 = vst.msk [vmem:[%s2366_s17 + $0x18] sm:$0xf] %vm904_vm3, %v821_v48 }
 0x193   : > { %1377 = vst.msk [vmem:[%s2418_s24 + $0x54] sm:$0xf] %vm1355_vm6, %v1302_v57  ;;  %1319 = vrot.lane.b32.xlu0 %v1787_v1, %s1830_s14  ;;  %1289 = vrot.lane.b32.xlu1 %v1772_v13, %s1830_s14 }
 0x195   : > { %v853_v14 = vpop.permute.xlu0 %852  ;;  %v823_v63 = vpop.permute.xlu1 %822 }
 0x196   : > { %927 = vst.msk [vmem:[%s2366_s17 + $0x58] sm:$0xf] %vm904_vm3, %v853_v14  ;;  %912 = vst.msk [vmem:[%s2366_s17 + $0x1c] sm:$0xf] %vm904_vm3, %v823_v63 }
 0x197   : > { %1321 = vrot.lane.b32.xlu1 %v1788_v2, %s1830_s14 }
 0x199   : > { %v1046_v59 = vpop.permute.xlu0 %1045  ;;  %v855_v56 = vpop.permute.xlu1 %854 }
 0x19a   : > { %v1103_v16 = vrot.slane %v1046_v59, 4  ;;  %928 = vst.msk [vmem:[%s2366_s17 + $0x5c] sm:$0xf] %vm904_vm3, %v855_v56 }
 0x19c   : > { %v1136_v44 = vsel %vm1129_vm4, %v1046_v59, %v1103_v16 }
 0x19d   : > { %1201 = vst.msk [vmem:[%s2396_s20 + $0x18] sm:$0xf] %vm1194_vm5, %v1136_v44  ;;  %v1078_v24 = vpop.permute.xlu0 %1077  ;;  %v1048_v32 = vpop.permute.xlu1 %1047 }
 0x19e   : > { %v1119_v33 = vrot.slane %v1078_v24, 4  ;;  %v1104_v19 = vrot.slane %v1048_v32, 4 }
 0x1a0   : > { %v1152_v31 = vsel %vm1129_vm4, %v1078_v24, %v1119_v33  ;;  %v1137_v25 = vsel %vm1129_vm4, %v1048_v32, %v1104_v19 }
 0x1a1   : > { %1217 = vst.msk [vmem:[%s2396_s20 + $0x58] sm:$0xf] %vm1194_vm5, %v1152_v31  ;;  %v1272_v36 = vpop.permute.xlu0 %1271  ;;  %1202 = vst.msk [vmem:[%s2396_s20 + $0x1c] sm:$0xf] %vm1194_vm5, %v1137_v25  ;;  %v1080_v28 = vpop.permute.xlu1 %1079 }
 0x1a2   : > { %1362 = vst.msk [vmem:[%s2418_s24 + $0x18] sm:$0xf] %vm1355_vm6, %v1272_v36  ;;  %v1120_v30 = vrot.slane %v1080_v28, 4 }
 0x1a4   : > { %v1153_v4 = vsel %vm1129_vm4, %v1080_v28, %v1120_v30 }
 0x1a5   : > { %v1304_v34 = vpop.permute.xlu0 %1303  ;;  %1218 = vst.msk [vmem:[%s2396_s20 + $0x5c] sm:$0xf] %vm1194_vm5, %v1153_v4  ;;  %v1274_v37 = vpop.permute.xlu1 %1273 }
 0x1a6   : > { %1378 = vst.msk [vmem:[%s2418_s24 + $0x58] sm:$0xf] %vm1355_vm6, %v1304_v34  ;;  %1363 = vst.msk [vmem:[%s2418_s24 + $0x1c] sm:$0xf] %vm1355_vm6, %v1274_v37 }
 0x1a9   : > { %v825_v40 = vpop.permute.xlu0 %824  ;;  %v1306_v46 = vpop.permute.xlu1 %1305 }
 0x1aa   : > { %913 = vst.msk [vmem:[%s2366_s17 + $0x20] sm:$0xf] %vm904_vm3, %v825_v40 }
 0x1ab   : > { %1379 = vst.msk [vmem:[%s2418_s24 + $0x5c] sm:$0xf] %vm1355_vm6, %v1306_v46 }
 0x1ad   : > { %v857_v47 = vpop.permute.xlu0 %856  ;;  %v827_v51 = vpop.permute.xlu1 %826 }
 0x1ae   : > { %929 = vst.msk [vmem:[%s2366_s17 + $0x60] sm:$0xf] %vm904_vm3, %v857_v47  ;;  %914 = vst.msk [vmem:[%s2366_s17 + $0x24] sm:$0xf] %vm904_vm3, %v827_v51 }
 0x1b1   : > { %v1050_v52 = vpop.permute.xlu0 %1049  ;;  %v859_v43 = vpop.permute.xlu1 %858 }
 0x1b2   : > { %v1105_v6 = vrot.slane %v1050_v52, 4  ;;  %930 = vst.msk [vmem:[%s2366_s17 + $0x64] sm:$0xf] %vm904_vm3, %v859_v43 }
 0x1b4   : > { %v1138_v45 = vsel %vm1129_vm4, %v1050_v52, %v1105_v6 }
 0x1b5   : > { %1203 = vst.msk [vmem:[%s2396_s20 + $0x20] sm:$0xf] %vm1194_vm5, %v1138_v45  ;;  %v1082_v54 = vpop.permute.xlu0 %1081  ;;  %v1052_v61 = vpop.permute.xlu1 %1051 }
 0x1b6   : > { %v1121_v62 = vrot.slane %v1082_v54, 4  ;;  %v1106_v50 = vrot.slane %v1052_v61, 4 }
 0x1b8   : > { %v1154_v53 = vsel %vm1129_vm4, %v1082_v54, %v1121_v62  ;;  %v1139_v11 = vsel %vm1129_vm4, %v1052_v61, %v1106_v50 }
 0x1b9   : > { %1219 = vst.msk [vmem:[%s2396_s20 + $0x60] sm:$0xf] %vm1194_vm5, %v1154_v53  ;;  %v1276_v60 = vpop.permute.xlu0 %1275  ;;  %1204 = vst.msk [vmem:[%s2396_s20 + $0x24] sm:$0xf] %vm1194_vm5, %v1139_v11  ;;  %v1084_v58 = vpop.permute.xlu1 %1083 }
 0x1ba   : > { %1364 = vst.msk [vmem:[%s2418_s24 + $0x20] sm:$0xf] %vm1355_vm6, %v1276_v60  ;;  %v1122_v10 = vrot.slane %v1084_v58, 4 }
 0x1bc   : > { %v1155_v22 = vsel %vm1129_vm4, %v1084_v58, %v1122_v10 }
 0x1bd   : > { %v1308_v55 = vpop.permute.xlu0 %1307  ;;  %1220 = vst.msk [vmem:[%s2396_s20 + $0x64] sm:$0xf] %vm1194_vm5, %v1155_v22  ;;  %v1278_v3 = vpop.permute.xlu1 %1277 }
 0x1be   : > { %1380 = vst.msk [vmem:[%s2418_s24 + $0x60] sm:$0xf] %vm1355_vm6, %v1308_v55  ;;  %1365 = vst.msk [vmem:[%s2418_s24 + $0x24] sm:$0xf] %vm1355_vm6, %v1278_v3 }
 0x1c1   : > { %v829_v29 = vpop.permute.xlu0 %828  ;;  %v1310_v35 = vpop.permute.xlu1 %1309 }
 0x1c2   : > { %915 = vst.msk [vmem:[%s2366_s17 + $0x28] sm:$0xf] %vm904_vm3, %v829_v29 }
 0x1c3   : > { %1381 = vst.msk [vmem:[%s2418_s24 + $0x64] sm:$0xf] %vm1355_vm6, %v1310_v35 }
 0x1c5   : > { %v861_v39 = vpop.permute.xlu0 %860  ;;  %v831_v7 = vpop.permute.xlu1 %830 }
 0x1c6   : > { %931 = vst.msk [vmem:[%s2366_s17 + $0x68] sm:$0xf] %vm904_vm3, %v861_v39  ;;  %916 = vst.msk [vmem:[%s2366_s17 + $0x2c] sm:$0xf] %vm904_vm3, %v831_v7 }
 0x1c9   : > { %v1054_v9 = vpop.permute.xlu0 %1053  ;;  %v863_v38 = vpop.permute.xlu1 %862 }
 0x1ca   : > { %v1107_v18 = vrot.slane %v1054_v9, 4  ;;  %932 = vst.msk [vmem:[%s2366_s17 + $0x6c] sm:$0xf] %vm904_vm3, %v863_v38 }
 0x1cc   : > { %v1140_v12 = vsel %vm1129_vm4, %v1054_v9, %v1107_v18 }
 0x1cd   : > { %1205 = vst.msk [vmem:[%s2396_s20 + $0x28] sm:$0xf] %vm1194_vm5, %v1140_v12  ;;  %v1086_v15 = vpop.permute.xlu0 %1085  ;;  %v1056_v0 = vpop.permute.xlu1 %1055 }
 0x1ce   : > { %v1123_v17 = vrot.slane %v1086_v15, 4  ;;  %v1108_v21 = vrot.slane %v1056_v0, 4 }
 0x1d0   : > { %v1156_v27 = vsel %vm1129_vm4, %v1086_v15, %v1123_v17  ;;  %v1141_v49 = vsel %vm1129_vm4, %v1056_v0, %v1108_v21 }
 0x1d1   : > { %1221 = vst.msk [vmem:[%s2396_s20 + $0x68] sm:$0xf] %vm1194_vm5, %v1156_v27  ;;  %v1280_v5 = vpop.permute.xlu0 %1279  ;;  %1206 = vst.msk [vmem:[%s2396_s20 + $0x2c] sm:$0xf] %vm1194_vm5, %v1141_v49  ;;  %v1088_v20 = vpop.permute.xlu1 %1087 }
 0x1d2   : > { %1366 = vst.msk [vmem:[%s2418_s24 + $0x28] sm:$0xf] %vm1355_vm6, %v1280_v5  ;;  %v1124_v8 = vrot.slane %v1088_v20, 4 }
 0x1d4   : > { %v1157_v42 = vsel %vm1129_vm4, %v1088_v20, %v1124_v8 }
 0x1d5   : > { %v1312_v23 = vpop.permute.xlu0 %1311  ;;  %1222 = vst.msk [vmem:[%s2396_s20 + $0x6c] sm:$0xf] %vm1194_vm5, %v1157_v42  ;;  %v1282_v41 = vpop.permute.xlu1 %1281 }
 0x1d6   : > { %1382 = vst.msk [vmem:[%s2418_s24 + $0x68] sm:$0xf] %vm1355_vm6, %v1312_v23  ;;  %1367 = vst.msk [vmem:[%s2418_s24 + $0x2c] sm:$0xf] %vm1355_vm6, %v1282_v41 }
 0x1d9   : > { %v833_v26 = vpop.permute.xlu0 %832  ;;  %v1314_v1 = vpop.permute.xlu1 %1313 }
 0x1da   : > { %917 = vst.msk [vmem:[%s2366_s17 + $0x30] sm:$0xf] %vm904_vm3, %v833_v26 }
 0x1db   : > { %1383 = vst.msk [vmem:[%s2418_s24 + $0x6c] sm:$0xf] %vm1355_vm6, %v1314_v1 }
 0x1dd   : > { %v865_v48 = vpop.permute.xlu0 %864  ;;  %v835_v13 = vpop.permute.xlu1 %834 }
 0x1de   : > { %933 = vst.msk [vmem:[%s2366_s17 + $0x70] sm:$0xf] %vm904_vm3, %v865_v48  ;;  %918 = vst.msk [vmem:[%s2366_s17 + $0x34] sm:$0xf] %vm904_vm3, %v835_v13 }
 0x1e1   : > { %v1058_v57 = vpop.permute.xlu0 %1057  ;;  %v867_v14 = vpop.permute.xlu1 %866 }
 0x1e2   : > { %v1109_v2 = vrot.slane %v1058_v57, 4  ;;  %934 = vst.msk [vmem:[%s2366_s17 + $0x74] sm:$0xf] %vm904_vm3, %v867_v14 }
 0x1e4   : > { %v1142_v63 = vsel %vm1129_vm4, %v1058_v57, %v1109_v2 }
 0x1e5   : > { %1207 = vst.msk [vmem:[%s2396_s20 + $0x30] sm:$0xf] %vm1194_vm5, %v1142_v63  ;;  %v1090_v59 = vpop.permute.xlu0 %1089  ;;  %v1060_v56 = vpop.permute.xlu1 %1059 }
 0x1e6   : > { %v1125_v16 = vrot.slane %v1090_v59, 4  ;;  %v1110_v44 = vrot.slane %v1060_v56, 4 }
 0x1e8   : > { %v1158_v24 = vsel %vm1129_vm4, %v1090_v59, %v1125_v16  ;;  %v1143_v32 = vsel %vm1129_vm4, %v1060_v56, %v1110_v44 }
 0x1e9   : > { %1223 = vst.msk [vmem:[%s2396_s20 + $0x70] sm:$0xf] %vm1194_vm5, %v1158_v24  ;;  %v1284_v33 = vpop.permute.xlu0 %1283  ;;  %1208 = vst.msk [vmem:[%s2396_s20 + $0x34] sm:$0xf] %vm1194_vm5, %v1143_v32  ;;  %v1092_v19 = vpop.permute.xlu1 %1091 }
 0x1ea   : > { %1368 = vst.msk [vmem:[%s2418_s24 + $0x30] sm:$0xf] %vm1355_vm6, %v1284_v33  ;;  %v1126_v31 = vrot.slane %v1092_v19, 4 }
 0x1ec   : > { %v1159_v25 = vsel %vm1129_vm4, %v1092_v19, %v1126_v31 }
 0x1ed   : > { %v1316_v36 = vpop.permute.xlu0 %1315  ;;  %1224 = vst.msk [vmem:[%s2396_s20 + $0x74] sm:$0xf] %vm1194_vm5, %v1159_v25  ;;  %v1286_v28 = vpop.permute.xlu1 %1285 }
 0x1ee   : > { %1384 = vst.msk [vmem:[%s2418_s24 + $0x70] sm:$0xf] %vm1355_vm6, %v1316_v36  ;;  %1369 = vst.msk [vmem:[%s2418_s24 + $0x34] sm:$0xf] %vm1355_vm6, %v1286_v28 }
 0x1f1   : > { %v837_v30 = vpop.permute.xlu0 %836  ;;  %v1318_v4 = vpop.permute.xlu1 %1317 }
 0x1f2   : > { %919 = vst.msk [vmem:[%s2366_s17 + $0x38] sm:$0xf] %vm904_vm3, %v837_v30 }
 0x1f3   : > { %1385 = vst.msk [vmem:[%s2418_s24 + $0x74] sm:$0xf] %vm1355_vm6, %v1318_v4 }
 0x1f5   : > { %v869_v34 = vpop.permute.xlu0 %868  ;;  %v839_v37 = vpop.permute.xlu1 %838 }
 0x1f6   : > { %935 = vst.msk [vmem:[%s2366_s17 + $0x78] sm:$0xf] %vm904_vm3, %v869_v34  ;;  %920 = vst.msk [vmem:[%s2366_s17 + $0x3c] sm:$0xf] %vm904_vm3, %v839_v37 }
 0x1f9   : > { %v1062_v40 = vpop.permute.xlu0 %1061  ;;  %v871_v46 = vpop.permute.xlu1 %870 }
 0x1fa   : > { %v1111_v47 = vrot.slane %v1062_v40, 4  ;;  %936 = vst.msk [vmem:[%s2366_s17 + $0x7c] sm:$0xf] %vm904_vm3, %v871_v46 }
 0x1fc   : > { %v1144_v51 = vsel %vm1129_vm4, %v1062_v40, %v1111_v47 }
 0x1fd   : > { %1209 = vst.msk [vmem:[%s2396_s20 + $0x38] sm:$0xf] %vm1194_vm5, %v1144_v51  ;;  %v1094_v52 = vpop.permute.xlu0 %1093  ;;  %v1064_v43 = vpop.permute.xlu1 %1063 }
 0x1fe   : > { %v1127_v6 = vrot.slane %v1094_v52, 4  ;;  %v1112_v45 = vrot.slane %v1064_v43, 4 }
 0x200   : > { %v1160_v54 = vsel %vm1129_vm4, %v1094_v52, %v1127_v6  ;;  %v1145_v61 = vsel %vm1129_vm4, %v1064_v43, %v1112_v45 }
 0x201   : > { %1225 = vst.msk [vmem:[%s2396_s20 + $0x78] sm:$0xf] %vm1194_vm5, %v1160_v54  ;;  %v1288_v62 = vpop.permute.xlu0 %1287  ;;  %1210 = vst.msk [vmem:[%s2396_s20 + $0x3c] sm:$0xf] %vm1194_vm5, %v1145_v61  ;;  %v1096_v50 = vpop.permute.xlu1 %1095 }
 0x202   : > { %1370 = vst.msk [vmem:[%s2418_s24 + $0x38] sm:$0xf] %vm1355_vm6, %v1288_v62  ;;  %v1128_v53 = vrot.slane %v1096_v50, 4 }
 0x204   : > { %v1161_v11 = vsel %vm1129_vm4, %v1096_v50, %v1128_v53 }
 0x205   : > { %v1320_v60 = vpop.permute.xlu0 %1319  ;;  %1226 = vst.msk [vmem:[%s2396_s20 + $0x7c] sm:$0xf] %vm1194_vm5, %v1161_v11  ;;  %v1290_v58 = vpop.permute.xlu1 %1289 }
 0x206   : > { %1386 = vst.msk [vmem:[%s2418_s24 + $0x78] sm:$0xf] %vm1355_vm6, %v1320_v60  ;;  %1371 = vst.msk [vmem:[%s2418_s24 + $0x3c] sm:$0xf] %vm1355_vm6, %v1290_v58 }
 0x209   : > { %v1322_v10 = vpop.permute.xlu1 %1321 }
 0x20a   : > { %1387 = vst.msk [vmem:[%s2418_s24 + $0x7c] sm:$0xf] %vm1355_vm6, %v1322_v10 }
 0x20b PF: > { %s17_s21 = sadd.s32 1, %s1825_s21  }
 0x20c   : > { %p14_p4 = scmp.ge.s32.totalorder %s17_s21, 4  }
 0x20e   :  { %16 = sbr.rel (!%p14_p4) target bundleno = 1 (0x1), region = 98 }

// kernel: inception_a_pallas.9
= control target key start
LH: loop header
LB: loop body
LE: loop exit
PB: predicated region body
PF: predicated region fallthrough
CT: control target
= control target key end

     0   :  { %s2135_s9 = smov 0   ;;  %s2978_s0 = inlined_call_operand.vmem [shape: bf16[2,18,18,16], index: 0, kind: input, shape index: {}]   ;;  %s2979_s1 = inlined_call_operand.vmem [shape: f32[1,16], index: 1, kind: input, shape index: {}]   ;;  %s2980_s2 = inlined_call_operand.vmem [shape: f32[2,16,16,16], index: 2, kind: output, shape index: {}]  }
   0x1 LB: > { %s1843_s10 = sadd.s32 4294967295, %s2118_s9   ;;  %p1847_p0 = scmp.ge.s32.totalorder %s2118_s9, 1  ;;  %s2118_s9 = sphi %s2135_s9, %s12_s9  }
   0x2   : > { %p112_p1 = scmp.lt.s32.totalorder %s2118_s9, 3 }
   0x4   : > { %p113_p2 = pnand %p1847_p0, %p112_p1 }
   0x5   : > { %p134_p3 = scmp.lt.s32.totalorder (!%p113_p2), %s1843_s10, 1 }
   0x6   : > { %116 = sbr.rel (%p113_p2) target bundleno = 256 (0x100), region = 28 }
   0xb   : > { %s2982_s10 = smov (!%p134_p3, %s1843_s10), 1  ;;  %vm320_vm0 = vcmask 1046528   ;;  %vm513_vm1 = vcmask 1045504   ;;  %vm1755_vm2 = vcmask 130048  }
   0xc   : > { %s2102_s11 = smul.u32 216, %s2982_s10  ;;  %s1982_s15 = sshll.u32 %s2982_s10, 8 }
   0xd   : > { %s2232_s20 = scalar_lea.vmem %s2980_s2, %s1982_s15 }
   0xe   : > { %s2149_s14 = scalar_lea.vmem %s2978_s0, %s2102_s11 }
   0xf   : > { %v1984_v0 = vld [vmem:[%s2149_s14] sm:$0xff]   ;;  %v1851_v2 = vld [vmem:[%s2149_s14 + $0xc] sm:$0xff]   ;;  %v2094_v8 = vld [vmem:[%s2149_s14 + $0x18] sm:$0xff]  }
  0x10   : > { %v465_v1 = vld [vmem:[%s2149_s14] sm:$0xe]  ;;  %v1985_v3 = vunpack.c.l.bf16 %v1984_v0  ;;  %v1986_v4 = vunpack.c.h.bf16 %v1984_v0  ;;  %v691_v6 = vunpack.c.l.bf16 %v1851_v2  ;;  %v1899_v7 = vld [vmem:[%s2149_s14 + $0xc] sm:$0xe]  ;;  %v2156_v9 = vunpack.c.h.bf16 %v1851_v2  ;;  %v1963_v17 = vld [vmem:[%s2149_s14 + $0x18] sm:$0xe] }
  0x11   : > { %v481_v5 = vunpack.c.l.bf16 %v465_v1  ;;  %v995_v10 = vunpack.c.l.bf16 %v1899_v7  ;;  %v2158_v11 = vunpack.c.l.bf16 %v2094_v8  ;;  %v2160_v12 = vunpack.c.h.bf16 %v2094_v8  ;;  %v240_v20 = vld [vmem:[%s2149_s14 + $0x8] sm:$0x1]  ;;  %v1883_v21 = vld [vmem:[%s2149_s14 + $0x14] sm:$0x1]  ;;  %v1947_v26 = vld [vmem:[%s2149_s14 + $0x20] sm:$0x1] }
  0x12   : > { %v321_v13 = vrot.slane %v1985_v3, 1  ;;  %v322_v14 = vrot.slane %v1986_v4, 1  ;;  %v515_v16 = vrot.slane %v1986_v4, 2  ;;  %v835_v18 = vrot.slane %v691_v6, 1  ;;  %v146_v27 = vld [vmem:[%s2149_s14 + $0xc] sm:$0xff]   ;;  %v2191_v54 = vld [vmem:[%s2149_s14 + $0x24] sm:$0xff]  }
  0x13   : > { %v514_v15 = vrot.slane %v481_v5, 2  ;;  %v836_v19 = vrot.slane %v2156_v9, 1  ;;  %v1027_v24 = vrot.slane %v995_v10, 2  ;;  %v1028_v25 = vrot.slane %v2156_v9, 2  ;;  %v466_v48 = vld [vmem:[%s2149_s14 + $0xc] sm:$0xe] }
  0x14   : > { %v323_v22 = vsel %vm320_vm0, %v321_v13, %v322_v14  ;;  %v1348_v29 = vrot.slane %v2158_v11, 1  ;;  %v2173_v30 = vrot.slane %v2160_v12, 1  ;;  %v1508_v31 = vunpack.c.l.bf16 %v1963_v17  ;;  %v1900_v49 = vld [vmem:[%s2149_s14 + $0x18] sm:$0xe] }
  0x15   : > { %v516_v23 = vsel %vm513_vm1, %v514_v15, %v515_v16  ;;  %v433_v28 = vadd.f32 %v1985_v3, %v323_v22  ;;  %v837_v32 = vsel %vm320_vm0, %v835_v18, %v836_v19  ;;  %v2177_v33 = vrot.slane %v2160_v12, 2  ;;  %v1964_v3 = vld [vmem:[%s2149_s14 + $0x24] sm:$0xe]  ;;  %v241_v15 = vld [vmem:[%s2149_s14 + $0x14] sm:$0x1] }
  0x16   : > { %v256_v34 = vunpack.c.l.bf16 %v240_v20  ;;  %v771_v35 = vunpack.c.l.bf16 %v1883_v21  ;;  %v1540_v37 = vrot.slane %v1508_v31, 2  ;;  %v1284_v38 = vunpack.c.l.bf16 %v1947_v26  ;;  %v2213_v21 = vld [vmem:[%s2149_s14 + $0x2c] sm:$0x1] }
  0x17   : > { %v626_v36 = vadd.f32 %v516_v23, %v433_v28  ;;  %v178_v39 = vunpack.c.l.bf16 %v146_v27  ;;  %v1029_v45 = vsel %vm513_vm1, %v1027_v24, %v1028_v25  ;;  %v2182_v46 = vsel %vm320_vm0, %v1348_v29, %v2173_v30 }
  0x18   : > { %v324_v40 = vrot.slane %v256_v34, 1  ;;  %v517_v41 = vrot.slane %v256_v34, 2  ;;  %v838_v42 = vrot.slane %v771_v35, 1  ;;  %v1030_v43 = vrot.slane %v771_v35, 2  ;;  %v2224_v35 = vld [vmem:[%s2979_s1] ss:$0 sm:$0xff] }
  0x19   : > { %v723_v44 = vadd.f32 %v691_v6, %v626_v36  ;;  %v1542_v47 = vsel %vm513_vm1, %v1540_v37, %v2177_v33  ;;  %v1351_v52 = vrot.slane %v1284_v38, 1  ;;  %v1543_v53 = vrot.slane %v1284_v38, 2 }
  0x1a   : > { %v325_v50 = vsel %vm320_vm0, %v322_v14, %v324_v40  ;;  %v518_v51 = vsel %vm513_vm1, %v515_v16, %v517_v41  ;;  %v839_v57 = vsel %vm320_vm0, %v836_v19, %v838_v42  ;;  %v1031_v58 = vsel %vm513_vm1, %v1028_v25, %v1030_v43  ;;  %v1884_v16 = vld [vmem:[%s2149_s14 + $0x20] sm:$0x1] }
  0x1b   : > { %v947_v55 = vadd.f32 %v837_v32, %v723_v44  ;;  %v434_v56 = vadd.f32 %v1986_v4, %v325_v50  ;;  %v179_v59 = vunpack.c.h.bf16 %v146_v27  ;;  %v326_v60 = vrot.slane %v178_v39, 1 }
  0x1c   : > { %v482_v61 = vunpack.c.l.bf16 %v466_v48  ;;  %v996_v62 = vunpack.c.l.bf16 %v1900_v49  ;;  %v1206_v1 = vunpack.c.l.bf16 %v2191_v54  ;;  %v2197_v2 = vunpack.c.h.bf16 %v2191_v54  ;;  %v467_v49 = vld [vmem:[%s2149_s14 + $0x18] sm:$0xe] }
  0x1d   : > { %v1139_v63 = vadd.f32 %v1029_v45, %v947_v55  ;;  %v627_v0 = vadd.f32 %v518_v51, %v434_v56  ;;  %v327_v4 = vrot.slane %v179_v59, 1  ;;  %v520_v6 = vrot.slane %v179_v59, 2  ;;  %v1855_v55 = vld [vmem:[%s2149_s14 + $0x24] sm:$0xff]  }
  0x1e   : > { %v519_v5 = vrot.slane %v482_v61, 2  ;;  %v1032_v7 = vrot.slane %v996_v62, 2  ;;  %v1352_v13 = vsel %vm320_vm0, %v2173_v30, %v1351_v52  ;;  %v1544_v14 = vsel %vm513_vm1, %v2177_v33, %v1543_v53  ;;  %v1901_v56 = vld [vmem:[%s2149_s14 + $0x24] sm:$0xe] }
  0x1f   : > { %v1236_v8 = vadd.f32 %v2158_v11, %v1139_v63  ;;  %v724_v10 = vadd.f32 %v2156_v9, %v627_v0  ;;  %v328_v17 = vsel %vm320_vm0, %v326_v60, %v327_v4  ;;  %v1353_v19 = vrot.slane %v1206_v1, 1 }
  0x20   : > { %v521_v18 = vsel %vm513_vm1, %v519_v5, %v520_v6  ;;  %v1509_v20 = vunpack.c.l.bf16 %v1964_v3  ;;  %v435_v23 = vadd.f32 %v328_v17, %v178_v39  ;;  %v1354_v24 = vrot.slane %v2197_v2, 1 }
  0x21   : > { %v1460_v9 = vadd.f32 %v2182_v46, %v1236_v8  ;;  %v948_v22 = vadd.f32 %v839_v57, %v724_v10  ;;  %v1034_v25 = vsel %vm513_vm1, %v1032_v7, %v2177_v33  ;;  %v257_v27 = vunpack.c.l.bf16 %v241_v15 }
  0x22   : > { %v1545_v26 = vrot.slane %v1509_v20, 2  ;;  %v772_v28 = vunpack.c.l.bf16 %v1884_v16  ;;  %v628_v32 = vadd.f32 %v521_v18, %v435_v23  ;;  %v1285_v34 = vunpack.c.l.bf16 %v2213_v21  ;;  %v1885_v21 = vld [vmem:[%s2149_s14 + $0x2c] sm:$0x1] }
  0x23   : > { %v1652_v29 = vadd.f32 %v1542_v47, %v1460_v9  ;;  %v1140_v31 = vadd.f32 %v1031_v58, %v948_v22  ;;  %v1546_v36 = vrot.slane %v2197_v2, 2  ;;  %v329_v37 = vrot.slane %v257_v27, 1 }
  0x24   : > { %v522_v38 = vrot.slane %v257_v27, 2  ;;  %v843_v39 = vrot.slane %v772_v28, 1  ;;  %v725_v42 = vadd.f32 %v2158_v11, %v628_v32  ;;  %v1035_v43 = vrot.slane %v772_v28, 2 }
  0x25   : > { %v1684_v40 = vmul.f32 0.11111111, %v1652_v29  ;;  %v1237_v41 = vadd.f32 %v2160_v12, %v1140_v31  ;;  %v1355_v44 = vsel %vm320_vm0, %v1353_v19, %v1354_v24  ;;  %v330_v45 = vsel %vm320_vm0, %v327_v4, %v329_v37 }
  0x26   : > { %v523_v47 = vsel %vm513_vm1, %v520_v6, %v522_v38  ;;  %v1356_v48 = vrot.slane %v1285_v34, 1  ;;  %v949_v52 = vadd.f32 %v2182_v46, %v725_v42  ;;  %v436_v53 = vadd.f32 %v330_v45, %v179_v59 }
  0x27   : > { %v1723_v50 = vadd.f32 %v2224_v35, %v1684_v40  ;;  %v1461_v51 = vadd.f32 %v1352_v13, %v1237_v41  ;;  %v1547_v57 = vsel %vm513_vm1, %v1545_v26, %v1546_v36  ;;  %v844_v58 = vsel %vm320_vm0, %v2173_v30, %v843_v39 }
  0x28   : > { %v1036_v60 = vsel %vm513_vm1, %v2177_v33, %v1035_v43  ;;  %v1357_v61 = vsel %vm320_vm0, %v1354_v24, %v1356_v48  ;;  %v1141_v63 = vadd.f32 %v1034_v25, %v949_v52  ;;  %v629_v59 = vadd.f32 %v523_v47, %v436_v53 }
  0x29   : > { %1756 = vst.msk [vmem:[%s2232_s20] sm:$0xff] %vm1755_vm2, %v1723_v50  ;;  %v1653_v62 = vadd.f32 %v1544_v14, %v1461_v51  ;;  %v483_v0 = vunpack.c.l.bf16 %v467_v49  ;;  %v437_v3 = vadd.f32 %v2158_v11, %v2182_v46  ;;  %v695_v4 = vunpack.c.l.bf16 %v1855_v55  ;;  %v2095_v14 = vld [vmem:[%s2149_s14 + $0x30] sm:$0xff]   ;;  %v1949_v50 = vld [vmem:[%s2149_s14 + $0x38] sm:$0x1]  ;;  %v150_v51 = vld [vmem:[%s2149_s14 + $0x24] sm:$0xff]  }
  0x2a   : > { %v2254_v5 = vunpack.c.h.bf16 %v1855_v55  ;;  %v997_v6 = vunpack.c.l.bf16 %v1901_v56  ;;  %v1238_v8 = vadd.f32 %v1206_v1, %v1141_v63  ;;  %v726_v10 = vadd.f32 %v2160_v12, %v629_v59  ;;  %v1965_v46 = vld [vmem:[%s2149_s14 + $0x30] sm:$0xe]  ;;  %v242_v1 = vld [vmem:[%s2149_s14 + $0x20] sm:$0x1]  ;;  %v468_v55 = vld [vmem:[%s2149_s14 + $0x24] sm:$0xe] }
  0x2b   : > { %v1685_v7 = vmul.f32 0.11111111, %v1653_v62  ;;  %v524_v13 = vrot.slane %v483_v0, 2  ;;  %v845_v15 = vrot.slane %v695_v4, 1  ;;  %v1548_v9 = vrot.slane %v1285_v34, 2 }
  0x2c   : > { %v846_v16 = vrot.slane %v2254_v5, 1  ;;  %v1037_v17 = vrot.slane %v997_v6, 2  ;;  %v1038_v11 = vrot.slane %v2254_v5, 2  ;;  %v1462_v19 = vadd.f32 %v1355_v44, %v1238_v8  ;;  %v1902_v8 = vld [vmem:[%s2149_s14 + $0x30] sm:$0xe] }
  0x2d   : > { %v1724_v18 = vadd.f32 %v2224_v35, %v1685_v7  ;;  %v950_v20 = vadd.f32 %v844_v58, %v726_v10  ;;  %v526_v54 = vsel %vm513_vm1, %v524_v13, %v2177_v33  ;;  %v2269_v24 = vunpack.c.l.bf16 %v2095_v14  ;;  %v2313_v10 = vld [vmem:[%s2149_s14 + $0x3c] sm:$0xff]  }
  0x2e   : > { %v630_v22 = vadd.f32 %v526_v54, %v437_v3  ;;  %v847_v23 = vsel %vm320_vm0, %v845_v15, %v846_v16  ;;  %v1654_v25 = vadd.f32 %v1547_v57, %v1462_v19  ;;  %v2273_v27 = vunpack.c.h.bf16 %v2095_v14 }
  0x2f   : > { %1757 = vst.msk [vmem:[%s2232_s20 + $0x8] sm:$0xff] %vm1755_vm2, %v1724_v18  ;;  %v1142_v26 = vadd.f32 %v1036_v60, %v950_v20  ;;  %v1510_v28 = vunpack.c.l.bf16 %v1965_v46  ;;  %v1039_v31 = vsel %vm513_vm1, %v1037_v17, %v1038_v11  ;;  %v258_v32 = vunpack.c.l.bf16 %v242_v1  ;;  %v1966_v20 = vld [vmem:[%s2149_s14 + $0x3c] sm:$0xe] }
  0x30   : > { %v727_v29 = vadd.f32 %v695_v4, %v630_v22  ;;  %v773_v34 = vunpack.c.l.bf16 %v1885_v21  ;;  %v1686_v37 = vmul.f32 0.11111111, %v1654_v25  ;;  %v1358_v39 = vrot.slane %v2269_v24, 1  ;;  %v243_v25 = vld [vmem:[%s2149_s14 + $0x2c] sm:$0x1] }
  0x31   : > { %v1239_v38 = vadd.f32 %v2197_v2, %v1142_v26  ;;  %v2281_v40 = vrot.slane %v2273_v27, 1  ;;  %v1549_v41 = vsel %vm513_vm1, %v1546_v36, %v1548_v9  ;;  %v334_v43 = vrot.slane %v258_v32, 1 }
  0x32   : > { %v951_v42 = vadd.f32 %v847_v23, %v727_v29  ;;  %v527_v44 = vrot.slane %v258_v32, 2  ;;  %v1725_v45 = vadd.f32 %v2224_v35, %v1686_v37  ;;  %v1550_v48 = vrot.slane %v1510_v28, 2  ;;  %v1886_v32 = vld [vmem:[%s2149_s14 + $0x38] sm:$0x1] }
  0x33   : > { %v1463_v47 = vadd.f32 %v1357_v61, %v1239_v38  ;;  %v2288_v49 = vrot.slane %v2273_v27, 2  ;;  %v335_v53 = vsel %vm320_vm0, %v2173_v30, %v334_v43  ;;  %v848_v36 = vrot.slane %v773_v34, 1 }
  0x34   : > { %v1143_v52 = vadd.f32 %v1039_v31, %v951_v42  ;;  %v528_v2 = vsel %vm513_vm1, %v2177_v33, %v527_v44  ;;  %1758 = vst.msk [vmem:[%s2232_s20 + $0x10] sm:$0xff] %vm1755_vm2, %v1725_v45  ;;  %v2301_v57 = vsel %vm320_vm0, %v1358_v39, %v2281_v40  ;;  %v438_v58 = vadd.f32 %v2160_v12, %v335_v53 }
  0x35   : > { %v1655_v56 = vadd.f32 %v1549_v41, %v1463_v47  ;;  %v1040_v60 = vrot.slane %v773_v34, 2  ;;  %v1286_v30 = vunpack.c.l.bf16 %v1949_v50  ;;  %v182_v62 = vunpack.c.l.bf16 %v150_v51  ;;  %v1950_v34 = vld [vmem:[%s2149_s14 + $0x44] sm:$0x1] }
  0x36   : > { %v1240_v61 = vadd.f32 %v2269_v24, %v1143_v52  ;;  %v2305_v63 = vunpack.c.h.bf16 %v150_v51  ;;  %v1552_v59 = vsel %vm513_vm1, %v1550_v48, %v2288_v49  ;;  %v631_v0 = vadd.f32 %v528_v2, %v438_v58 }
  0x37   : > { %v1687_v33 = vmul.f32 0.11111111, %v1655_v56  ;;  %v484_v3 = vunpack.c.l.bf16 %v468_v55  ;;  %v849_v6 = vsel %vm320_vm0, %v846_v16, %v848_v36  ;;  %v1361_v12 = vrot.slane %v1286_v30, 1 }
  0x38   : > { %v1464_v4 = vadd.f32 %v2301_v57, %v1240_v61  ;;  %v336_v7 = vrot.slane %v182_v62, 1  ;;  %v728_v14 = vadd.f32 %v2254_v5, %v631_v0  ;;  %v337_v15 = vrot.slane %v2305_v63, 1  ;;  %v1859_v0 = vld [vmem:[%s2149_s14 + $0x3c] sm:$0xff]  }
  0x39   : > { %v1726_v13 = vadd.f32 %v2224_v35, %v1687_v33  ;;  %v529_v17 = vrot.slane %v484_v3, 2  ;;  %v1041_v18 = vsel %vm513_vm1, %v1038_v11, %v1040_v60  ;;  %v1553_v19 = vrot.slane %v1286_v30, 2 }
  0x3a   : > { %v1656_v46 = vadd.f32 %v1552_v59, %v1464_v4  ;;  %v530_v16 = vrot.slane %v2305_v63, 2  ;;  %v952_v54 = vadd.f32 %v849_v6, %v728_v14  ;;  %v338_v1 = vsel %vm320_vm0, %v336_v7, %v337_v15  ;;  %v469_v59 = vld [vmem:[%s2149_s14 + $0x30] sm:$0xe]  ;;  %v1903_v7 = vld [vmem:[%s2149_s14 + $0x3c] sm:$0xe] }
  0x3b   : > { %1759 = vst.msk [vmem:[%s2232_s20 + $0x18] sm:$0xff] %vm1755_vm2, %v1726_v13  ;;  %v998_v21 = vunpack.c.l.bf16 %v1902_v8  ;;  %v1210_v9 = vunpack.c.l.bf16 %v2313_v10  ;;  %v439_v23 = vadd.f32 %v338_v1, %v182_v62  ;;  %v2329_v11 = vunpack.c.h.bf16 %v2313_v10  ;;  %v2096_v8 = vld [vmem:[%s2149_s14 + $0x48] sm:$0xff]  }
  0x3c   : > { %v1688_v22 = vmul.f32 0.11111111, %v1656_v46  ;;  %v531_v5 = vsel %vm513_vm1, %v529_v17, %v530_v16  ;;  %v1144_v26 = vadd.f32 %v1041_v18, %v952_v54  ;;  %v1362_v28 = vsel %vm320_vm0, %v2281_v40, %v1361_v12 }
  0x3d   : > { %v1042_v29 = vrot.slane %v998_v21, 2  ;;  %v1511_v31 = vunpack.c.l.bf16 %v1966_v20  ;;  %v632_v38 = vadd.f32 %v531_v5, %v439_v23  ;;  %v1363_v39 = vrot.slane %v1210_v9, 1 }
  0x3e   : > { %v1727_v37 = vadd.f32 %v2224_v35, %v1688_v22  ;;  %v1364_v41 = vrot.slane %v2329_v11, 1  ;;  %v1241_v42 = vadd.f32 %v2273_v27, %v1144_v26  ;;  %v1556_v44 = vrot.slane %v2329_v11, 2 }
  0x3f   : > { %v1555_v43 = vrot.slane %v1511_v31, 2  ;;  %v259_v45 = vunpack.c.l.bf16 %v243_v25  ;;  %v1554_v47 = vsel %vm513_vm1, %v2288_v49, %v1553_v19  ;;  %v729_v48 = vadd.f32 %v2269_v24, %v632_v38  ;;  %v1967_v25 = vld [vmem:[%s2149_s14 + $0x48] sm:$0xe] }
  0x40   : > { %1760 = vst.msk [vmem:[%s2232_s20 + $0x20] sm:$0xff] %vm1755_vm2, %v1727_v37  ;;  %v774_v50 = vunpack.c.l.bf16 %v1886_v32  ;;  %v1287_v51 = vunpack.c.l.bf16 %v1950_v34  ;;  %v1465_v52 = vadd.f32 %v1362_v28, %v1241_v42  ;;  %v1044_v53 = vsel %vm513_vm1, %v1042_v29, %v2288_v49  ;;  %v244_v32 = vld [vmem:[%s2149_s14 + $0x38] sm:$0x1]  ;;  %v1887_v34 = vld [vmem:[%s2149_s14 + $0x44] sm:$0x1] }
  0x41   : > { %v339_v2 = vrot.slane %v259_v45, 1  ;;  %v532_v36 = vrot.slane %v259_v45, 2  ;;  %v953_v55 = vadd.f32 %v2301_v57, %v729_v48  ;;  %v1365_v56 = vsel %vm320_vm0, %v1363_v39, %v1364_v41 }
  0x42   : > { %v853_v58 = vrot.slane %v774_v50, 1  ;;  %v1045_v60 = vrot.slane %v774_v50, 2  ;;  %v1657_v61 = vadd.f32 %v1554_v47, %v1465_v52  ;;  %v1557_v30 = vsel %vm513_vm1, %v1555_v43, %v1556_v44  ;;  %v1951_v43 = vld [vmem:[%s2149_s14 + $0x50] sm:$0x1] }
  0x43   : > { %v340_v62 = vsel %vm320_vm0, %v337_v15, %v339_v2  ;;  %v533_v33 = vsel %vm513_vm1, %v530_v16, %v532_v36  ;;  %v1145_v3 = vadd.f32 %v1044_v53, %v953_v55  ;;  %v1366_v6 = vrot.slane %v1287_v51, 1 }
  0x44   : > { %v440_v4 = vadd.f32 %v340_v62, %v2305_v63  ;;  %v1558_v12 = vrot.slane %v1287_v51, 2  ;;  %v1689_v10 = vmul.f32 0.11111111, %v1657_v61  ;;  %v854_v13 = vsel %vm320_vm0, %v2281_v40, %v853_v58 }
  0x45   : > { %v1046_v14 = vsel %vm513_vm1, %v2288_v49, %v1045_v60  ;;  %v441_v15 = vadd.f32 %v2269_v24, %v2301_v57  ;;  %v1242_v17 = vadd.f32 %v1210_v9, %v1145_v3  ;;  %v485_v18 = vunpack.c.l.bf16 %v469_v59 }
  0x46   : > { %v633_v46 = vadd.f32 %v533_v33, %v440_v4  ;;  %v699_v63 = vunpack.c.l.bf16 %v1859_v0  ;;  %v1728_v19 = vadd.f32 %v2224_v35, %v1689_v10  ;;  %v2364_v16 = vunpack.c.h.bf16 %v1859_v0  ;;  %v154_v0 = vld [vmem:[%s2149_s14 + $0x3c] sm:$0xff]  }
  0x47   : > { %v999_v20 = vunpack.c.l.bf16 %v1903_v7  ;;  %v2366_v54 = vunpack.c.l.bf16 %v2096_v8  ;;  %v1466_v1 = vadd.f32 %v1365_v56, %v1242_v17  ;;  %v534_v22 = vrot.slane %v485_v18, 2 }
  0x48   : > { %v730_v21 = vadd.f32 %v2273_v27, %v633_v46  ;;  %v855_v23 = vrot.slane %v699_v63, 1  ;;  %1761 = vst.msk [vmem:[%s2232_s20 + $0x28] sm:$0xff] %vm1755_vm2, %v1728_v19  ;;  %v856_v24 = vrot.slane %v2364_v16, 1  ;;  %v1048_v9 = vrot.slane %v2364_v16, 2 }
  0x49   : > { %v1047_v57 = vrot.slane %v999_v20, 2  ;;  %v2373_v5 = vunpack.c.h.bf16 %v2096_v8  ;;  %v1658_v26 = vadd.f32 %v1557_v30, %v1466_v1  ;;  %v1367_v29 = vsel %vm320_vm0, %v1364_v41, %v1366_v6  ;;  %v2416_v20 = vld [vmem:[%s2149_s14 + $0x54] sm:$0xff]  }
  0x4a   : > { %v954_v28 = vadd.f32 %v854_v13, %v730_v21  ;;  %v536_v31 = vsel %vm513_vm1, %v534_v22, %v2288_v49  ;;  %v1559_v37 = vsel %vm513_vm1, %v1556_v44, %v1558_v12  ;;  %v857_v39 = vsel %vm320_vm0, %v855_v23, %v856_v24  ;;  %v470_v12 = vld [vmem:[%s2149_s14 + $0x3c] sm:$0xe] }
  0x4b   : > { %v634_v38 = vadd.f32 %v536_v31, %v441_v15  ;;  %v1368_v42 = vrot.slane %v2366_v54, 1  ;;  %v1690_v45 = vmul.f32 0.11111111, %v1658_v26  ;;  %v1049_v48 = vsel %vm513_vm1, %v1047_v57, %v1048_v9 }
  0x4c   : > { %v1146_v47 = vadd.f32 %v1046_v14, %v954_v28  ;;  %v1512_v50 = vunpack.c.l.bf16 %v1967_v25  ;;  %v2387_v51 = vrot.slane %v2373_v5, 1  ;;  %v260_v52 = vunpack.c.l.bf16 %v244_v32  ;;  %v1904_v14 = vld [vmem:[%s2149_s14 + $0x48] sm:$0xe]  ;;  %v1968_v25 = vld [vmem:[%s2149_s14 + $0x54] sm:$0xe] }
  0x4d   : > { %v731_v41 = vadd.f32 %v699_v63, %v634_v38  ;;  %v775_v53 = vunpack.c.l.bf16 %v1887_v34  ;;  %v1729_v44 = vadd.f32 %v2224_v35, %v1690_v45  ;;  %v1288_v55 = vunpack.c.l.bf16 %v1951_v43 }
  0x4e   : > { %v1243_v2 = vadd.f32 %v2329_v11, %v1146_v47  ;;  %v1560_v36 = vrot.slane %v1512_v50, 2  ;;  %v344_v58 = vrot.slane %v260_v52, 1  ;;  %v537_v60 = vrot.slane %v260_v52, 2 }
  0x4f   : > { %v955_v56 = vadd.f32 %v857_v39, %v731_v41  ;;  %v858_v61 = vrot.slane %v775_v53, 1  ;;  %1762 = vst.msk [vmem:[%s2232_s20 + $0x30] sm:$0xff] %vm1755_vm2, %v1729_v44  ;;  %v2394_v62 = vrot.slane %v2373_v5, 2  ;;  %v1050_v33 = vrot.slane %v775_v53, 2  ;;  %v1888_v39 = vld [vmem:[%s2149_s14 + $0x50] sm:$0x1] }
  0x50   : > { %v1467_v30 = vadd.f32 %v1367_v29, %v1243_v2  ;;  %v1371_v59 = vrot.slane %v1288_v55, 1  ;;  %v2399_v11 = vsel %vm320_vm0, %v1368_v42, %v2387_v51  ;;  %v345_v4 = vsel %vm320_vm0, %v2281_v40, %v344_v58 }
  0x51   : > { %v1147_v3 = vadd.f32 %v1049_v48, %v955_v56  ;;  %v538_v6 = vsel %vm513_vm1, %v2288_v49, %v537_v60  ;;  %v1562_v8 = vsel %vm513_vm1, %v1560_v36, %v2394_v62  ;;  %v442_v10 = vadd.f32 %v2273_v27, %v345_v4  ;;  %v1952_v48 = vld [vmem:[%s2149_s14 + $0x5c] sm:$0x1] }
  0x52   : > { %v1659_v7 = vadd.f32 %v1559_v37, %v1467_v30  ;;  %v859_v13 = vsel %vm320_vm0, %v856_v24, %v858_v61  ;;  %v1051_v17 = vsel %vm513_vm1, %v1048_v9, %v1050_v33  ;;  %v186_v40 = vunpack.c.l.bf16 %v154_v0 }
  0x53   : > { %v1244_v15 = vadd.f32 %v2366_v54, %v1147_v3  ;;  %v187_v46 = vunpack.c.h.bf16 %v154_v0  ;;  %v635_v63 = vadd.f32 %v538_v6, %v442_v10  ;;  %v1372_v49 = vsel %vm320_vm0, %v2387_v51, %v1371_v59 }
  0x54   : > { %v1691_v18 = vmul.f32 0.11111111, %v1659_v7  ;;  %v486_v19 = vunpack.c.l.bf16 %v470_v12  ;;  %v346_v1 = vrot.slane %v186_v40, 1  ;;  %v1000_v22 = vunpack.c.l.bf16 %v1904_v14  ;;  %v471_v7 = vld [vmem:[%s2149_s14 + $0x48] sm:$0xe] }
  0x55   : > { %v1468_v27 = vadd.f32 %v2399_v11, %v1244_v15  ;;  %v347_v21 = vrot.slane %v187_v46, 1  ;;  %v732_v24 = vadd.f32 %v2364_v16, %v635_v63  ;;  %v540_v9 = vrot.slane %v187_v46, 2  ;;  %v245_v16 = vld [vmem:[%s2149_s14 + $0x44] sm:$0x1]  ;;  %v1863_v15 = vld [vmem:[%s2149_s14 + $0x54] sm:$0xff]  }
  0x56   : > { %v1730_v23 = vadd.f32 %v2224_v35, %v1691_v18  ;;  %v539_v57 = vrot.slane %v486_v19, 2  ;;  %v1563_v28 = vrot.slane %v1288_v55, 2  ;;  %v1214_v31 = vunpack.c.l.bf16 %v2416_v20  ;;  %v2097_v19 = vld [vmem:[%s2149_s14 + $0x60] sm:$0xff]  }
  0x57   : > { %v1660_v26 = vadd.f32 %v1562_v8, %v1468_v27  ;;  %v348_v29 = vsel %vm320_vm0, %v346_v1, %v347_v21  ;;  %v956_v32 = vadd.f32 %v859_v13, %v732_v24  ;;  %v2428_v38 = vunpack.c.h.bf16 %v2416_v20 }
  0x58   : > { %1763 = vst.msk [vmem:[%s2232_s20 + $0x38] sm:$0xff] %vm1755_vm2, %v1730_v23  ;;  %v443_v34 = vadd.f32 %v348_v29, %v186_v40  ;;  %v541_v37 = vsel %vm513_vm1, %v539_v57, %v540_v9  ;;  %v1052_v43 = vrot.slane %v1000_v22, 2  ;;  %v1373_v45 = vrot.slane %v1214_v31, 1 }
  0x59   : > { %v1692_v42 = vmul.f32 0.11111111, %v1660_v26  ;;  %v1513_v47 = vunpack.c.l.bf16 %v1968_v25  ;;  %v1148_v50 = vadd.f32 %v1051_v17, %v956_v32  ;;  %v1374_v52 = vrot.slane %v2428_v38, 1 }
  0x5a   : > { %v636_v41 = vadd.f32 %v541_v37, %v443_v34  ;;  %v1566_v53 = vrot.slane %v2428_v38, 2  ;;  %v261_v36 = vunpack.c.l.bf16 %v245_v16  ;;  %v776_v55 = vunpack.c.l.bf16 %v1888_v39 }
  0x5b   : > { %v1731_v44 = vadd.f32 %v2224_v35, %v1692_v42  ;;  %v1565_v2 = vrot.slane %v1513_v47, 2  ;;  %v1245_v56 = vadd.f32 %v2373_v5, %v1148_v50  ;;  %v1564_v58 = vsel %vm513_vm1, %v2394_v62, %v1563_v28  ;;  %v246_v47 = vld [vmem:[%s2149_s14 + $0x50] sm:$0x1] }
  0x5c   : > { %v733_v60 = vadd.f32 %v2366_v54, %v636_v41  ;;  %v1289_v61 = vunpack.c.l.bf16 %v1952_v48  ;;  %v1054_v30 = vsel %vm513_vm1, %v1052_v43, %v2394_v62  ;;  %v349_v33 = vrot.slane %v261_v36, 1  ;;  %v1889_v48 = vld [vmem:[%s2149_s14 + $0x5c] sm:$0x1] }
  0x5d   : > { %1764 = vst.msk [vmem:[%s2232_s20 + $0x40] sm:$0xff] %vm1755_vm2, %v1731_v44  ;;  %v542_v59 = vrot.slane %v261_v36, 2  ;;  %v863_v0 = vrot.slane %v776_v55, 1  ;;  %v1469_v3 = vadd.f32 %v1372_v49, %v1245_v56  ;;  %v1375_v6 = vsel %vm320_vm0, %v1373_v45, %v1374_v52  ;;  %v1905_v49 = vld [vmem:[%s2149_s14 + $0x54] sm:$0xe] }
  0x5e   : > { %v957_v4 = vadd.f32 %v2399_v11, %v733_v60  ;;  %v1055_v12 = vrot.slane %v776_v55, 2  ;;  %v1567_v8 = vsel %vm513_vm1, %v1565_v2, %v1566_v53  ;;  %v350_v10 = vsel %vm320_vm0, %v347_v21, %v349_v33 }
  0x5f   : > { %v543_v13 = vsel %vm513_vm1, %v540_v9, %v542_v59  ;;  %v1376_v14 = vrot.slane %v1289_v61, 1  ;;  %v1661_v17 = vadd.f32 %v1564_v58, %v1469_v3  ;;  %v444_v18 = vadd.f32 %v350_v10, %v187_v46 }
  0x60   : > { %v1149_v40 = vadd.f32 %v1054_v30, %v957_v4  ;;  %v864_v63 = vsel %vm320_vm0, %v2387_v51, %v863_v0  ;;  %v1056_v20 = vsel %vm513_vm1, %v2394_v62, %v1055_v12  ;;  %v1568_v27 = vrot.slane %v1289_v61, 2  ;;  %v1953_v4 = vld [vmem:[%s2149_s14 + $0x68] sm:$0x1] }
  0x61   : > { %v445_v1 = vadd.f32 %v2366_v54, %v2399_v11  ;;  %v487_v21 = vunpack.c.l.bf16 %v471_v7  ;;  %v1693_v22 = vmul.f32 0.11111111, %v1661_v17  ;;  %v637_v24 = vadd.f32 %v543_v13, %v444_v18  ;;  %v1969_v11 = vld [vmem:[%s2149_s14 + $0x60] sm:$0xe] }
  0x62   : > { %v1246_v23 = vadd.f32 %v1214_v31, %v1149_v40  ;;  %v703_v57 = vunpack.c.l.bf16 %v1863_v15  ;;  %v2461_v9 = vunpack.c.h.bf16 %v1863_v15  ;;  %v1001_v25 = vunpack.c.l.bf16 %v1905_v49 }
  0x63   : > { %v544_v46 = vrot.slane %v487_v21, 2  ;;  %v2463_v26 = vunpack.c.l.bf16 %v2097_v19  ;;  %v1732_v28 = vadd.f32 %v2224_v35, %v1693_v22  ;;  %v734_v32 = vadd.f32 %v2373_v5, %v637_v24 }
  0x64   : > { %v1470_v29 = vadd.f32 %v1375_v6, %v1246_v23  ;;  %v865_v54 = vrot.slane %v703_v57, 1  ;;  %v866_v34 = vrot.slane %v2461_v9, 1  ;;  %v1057_v37 = vrot.slane %v1001_v25, 2  ;;  %v158_v6 = vld [vmem:[%s2149_s14 + $0x54] sm:$0xff]   ;;  %v2515_v25 = vld [vmem:[%s2149_s14 + $0x6c] sm:$0xff]  }
  0x65   : > { %v546_v31 = vsel %vm513_vm1, %v544_v46, %v2394_v62  ;;  %v1058_v16 = vrot.slane %v2461_v9, 2  ;;  %1765 = vst.msk [vmem:[%s2232_s20 + $0x48] sm:$0xff] %vm1755_vm2, %v1732_v28  ;;  %v958_v42 = vadd.f32 %v864_v63, %v734_v32  ;;  %v2474_v45 = vunpack.c.h.bf16 %v2097_v19  ;;  %v472_v63 = vld [vmem:[%s2149_s14 + $0x54] sm:$0xe]  ;;  %v1906_v46 = vld [vmem:[%s2149_s14 + $0x60] sm:$0xe] }
  0x66   : > { %v1662_v39 = vadd.f32 %v1567_v8, %v1470_v29  ;;  %v638_v43 = vadd.f32 %v546_v31, %v445_v1  ;;  %v1377_v50 = vsel %vm320_vm0, %v1374_v52, %v1376_v14  ;;  %v867_v41 = vsel %vm320_vm0, %v865_v54, %v866_v34 }
  0x67   : > { %v1378_v44 = vrot.slane %v2463_v26, 1  ;;  %v1514_v2 = vunpack.c.l.bf16 %v1969_v11  ;;  %v1150_v55 = vadd.f32 %v1056_v20, %v958_v42  ;;  %v2482_v58 = vrot.slane %v2474_v45, 1 }
  0x68   : > { %v1694_v36 = vmul.f32 0.11111111, %v1662_v39  ;;  %v735_v56 = vadd.f32 %v703_v57, %v638_v43  ;;  %v1569_v60 = vsel %vm513_vm1, %v1566_v53, %v1568_v27  ;;  %v1059_v52 = vsel %vm513_vm1, %v1057_v37, %v1058_v16  ;;  %v1970_v37 = vld [vmem:[%s2149_s14 + $0x6c] sm:$0xe] }
  0x69   : > { %v262_v61 = vunpack.c.l.bf16 %v246_v47  ;;  %v777_v30 = vunpack.c.l.bf16 %v1889_v48  ;;  %v1247_v59 = vadd.f32 %v2428_v38, %v1150_v55  ;;  %v1570_v3 = vrot.slane %v1514_v2, 2 }
  0x6a   : > { %v1733_v33 = vadd.f32 %v2224_v35, %v1694_v36  ;;  %v959_v0 = vadd.f32 %v867_v41, %v735_v56  ;;  %v2493_v12 = vrot.slane %v2474_v45, 2  ;;  %v2499_v14 = vsel %vm320_vm0, %v1378_v44, %v2482_v58  ;;  %v1890_v44 = vld [vmem:[%s2149_s14 + $0x68] sm:$0x1] }
  0x6b   : > { %v354_v7 = vrot.slane %v262_v61, 1  ;;  %v547_v8 = vrot.slane %v262_v61, 2  ;;  %v868_v10 = vrot.slane %v777_v30, 1  ;;  %v1471_v53 = vadd.f32 %v1377_v50, %v1247_v59 }
  0x6c   : > { %1766 = vst.msk [vmem:[%s2232_s20 + $0x50] sm:$0xff] %vm1755_vm2, %v1733_v33  ;;  %v1151_v13 = vadd.f32 %v1059_v52, %v959_v0  ;;  %v1060_v38 = vrot.slane %v777_v30, 2  ;;  %v1290_v40 = vunpack.c.l.bf16 %v1953_v4  ;;  %v190_v18 = vunpack.c.l.bf16 %v158_v6 }
  0x6d   : > { %v355_v15 = vsel %vm320_vm0, %v2387_v51, %v354_v7  ;;  %v548_v17 = vsel %vm513_vm1, %v2394_v62, %v547_v8  ;;  %v1663_v49 = vadd.f32 %v1569_v60, %v1471_v53  ;;  %v1572_v20 = vsel %vm513_vm1, %v1570_v3, %v2493_v12  ;;  %v1954_v60 = vld [vmem:[%s2149_s14 + $0x74] sm:$0x1] }
  0x6e   : > { %v1248_v19 = vadd.f32 %v2463_v26, %v1151_v13  ;;  %v446_v27 = vadd.f32 %v2373_v5, %v355_v15  ;;  %v869_v1 = vsel %vm320_vm0, %v866_v34, %v868_v10  ;;  %v1061_v51 = vsel %vm513_vm1, %v1058_v16, %v1060_v38 }
  0x6f   : > { %v191_v21 = vunpack.c.h.bf16 %v158_v6  ;;  %v356_v62 = vrot.slane %v190_v18, 1  ;;  %v1695_v22 = vmul.f32 0.11111111, %v1663_v49  ;;  %v488_v57 = vunpack.c.l.bf16 %v472_v63  ;;  %v473_v49 = vld [vmem:[%s2149_s14 + $0x60] sm:$0xe] }
  0x70   : > { %v1472_v23 = vadd.f32 %v2499_v14, %v1248_v19  ;;  %v639_v24 = vadd.f32 %v548_v17, %v446_v27  ;;  %v1381_v28 = vrot.slane %v1290_v40, 1  ;;  %v1573_v29 = vrot.slane %v1290_v40, 2 }
  0x71   : > { %v357_v32 = vrot.slane %v191_v21, 1  ;;  %v550_v5 = vrot.slane %v191_v21, 2  ;;  %v1734_v54 = vadd.f32 %v2224_v35, %v1695_v22  ;;  %v549_v34 = vrot.slane %v488_v57, 2  ;;  %v1907_v57 = vld [vmem:[%s2149_s14 + $0x6c] sm:$0xe] }
  0x72   : > { %v1664_v11 = vadd.f32 %v1572_v20, %v1472_v23  ;;  %v736_v31 = vadd.f32 %v2461_v9, %v639_v24  ;;  %v1002_v39 = vunpack.c.l.bf16 %v1906_v46  ;;  %v1218_v42 = vunpack.c.l.bf16 %v2515_v25  ;;  %v247_v9 = vld [vmem:[%s2149_s14 + $0x5c] sm:$0x1] }
  0x73   : > { %v358_v16 = vsel %vm320_vm0, %v356_v62, %v357_v32  ;;  %v2523_v43 = vunpack.c.h.bf16 %v2515_v25  ;;  %1767 = vst.msk [vmem:[%s2232_s20 + $0x58] sm:$0xff] %vm1755_vm2, %v1734_v54  ;;  %v551_v41 = vsel %vm513_vm1, %v549_v34, %v550_v5  ;;  %v1515_v56 = vunpack.c.l.bf16 %v1970_v37  ;;  %v2098_v46 = vld [vmem:[%s2149_s14 + $0x78] sm:$0xff]  }
  0x74   : > { %v1696_v47 = vmul.f32 0.11111111, %v1664_v11  ;;  %v960_v48 = vadd.f32 %v869_v1, %v736_v31  ;;  %v447_v50 = vadd.f32 %v358_v16, %v190_v18  ;;  %v1062_v2 = vrot.slane %v1002_v39, 2 }
  0x75   : > { %v1383_v36 = vrot.slane %v1218_v42, 1  ;;  %v1384_v55 = vrot.slane %v2523_v43, 1  ;;  %v1382_v30 = vsel %vm320_vm0, %v2482_v58, %v1381_v28  ;;  %v1574_v59 = vsel %vm513_vm1, %v2493_v12, %v1573_v29 }
  0x76   : > { %v1735_v52 = vadd.f32 %v2224_v35, %v1696_v47  ;;  %v1152_v61 = vadd.f32 %v1061_v51, %v960_v48  ;;  %v640_v33 = vadd.f32 %v551_v41, %v447_v50  ;;  %v1575_v0 = vrot.slane %v1515_v56, 2  ;;  %v1867_v51 = vld [vmem:[%s2149_s14 + $0x6c] sm:$0xff]   ;;  %v1971_v48 = vld [vmem:[%s2149_s14 + $0x78] sm:$0xe] }
  0x77   : > { %v1576_v3 = vrot.slane %v2523_v43, 2  ;;  %v263_v4 = vunpack.c.l.bf16 %v247_v9  ;;  %v778_v8 = vunpack.c.l.bf16 %v1890_v44  ;;  %v1291_v10 = vunpack.c.l.bf16 %v1954_v60  ;;  %v248_v60 = vld [vmem:[%s2149_s14 + $0x68] sm:$0x1] }
  0x78   : > { %1768 = vst.msk [vmem:[%s2232_s20 + $0x60] sm:$0xff] %vm1755_vm2, %v1735_v52  ;;  %v1249_v6 = vadd.f32 %v2474_v45, %v1152_v61  ;;  %v737_v7 = vadd.f32 %v2463_v26, %v640_v33  ;;  %v1064_v53 = vsel %vm513_vm1, %v1062_v2, %v2493_v12  ;;  %v1385_v13 = vsel %vm320_vm0, %v1383_v36, %v1384_v55  ;;  %v1891_v52 = vld [vmem:[%s2149_s14 + $0x74] sm:$0x1] }
  0x79   : > { %v359_v38 = vrot.slane %v263_v4, 1  ;;  %v552_v15 = vrot.slane %v263_v4, 2  ;;  %v873_v18 = vrot.slane %v778_v8, 1  ;;  %v1065_v63 = vrot.slane %v778_v8, 2 }
  0x7a   : > { %v1473_v17 = vadd.f32 %v1382_v30, %v1249_v6  ;;  %v961_v40 = vadd.f32 %v2499_v14, %v737_v7  ;;  %v1577_v19 = vsel %vm513_vm1, %v1575_v0, %v1576_v3  ;;  %v449_v1 = vadd.f32 %v2463_v26, %v2499_v14 }
  0x7b   : > { %v360_v20 = vsel %vm320_vm0, %v357_v32, %v359_v38  ;;  %v553_v27 = vsel %vm513_vm1, %v550_v5, %v552_v15  ;;  %v1386_v24 = vrot.slane %v1291_v10, 1  ;;  %v874_v25 = vsel %vm320_vm0, %v2482_v58, %v873_v18  ;;  %v162_v18 = vld [vmem:[%s2149_s14 + $0x6c] sm:$0xff]  }
  0x7c   : > { %v1665_v62 = vadd.f32 %v1574_v59, %v1473_v17  ;;  %v1153_v22 = vadd.f32 %v1064_v53, %v961_v40  ;;  %v448_v23 = vadd.f32 %v360_v20, %v191_v21  ;;  %v1066_v28 = vsel %vm513_vm1, %v2493_v12, %v1065_v63  ;;  %v1955_v40 = vld [vmem:[%s2149_s14 + $0x80] sm:$0x1] }
  0x7d   : > { %v1578_v29 = vrot.slane %v1291_v10, 2  ;;  %v489_v32 = vunpack.c.l.bf16 %v473_v49  ;;  %v707_v14 = vunpack.c.l.bf16 %v1867_v51  ;;  %v2563_v31 = vunpack.c.h.bf16 %v1867_v51 }
  0x7e   : > { %v1697_v5 = vmul.f32 0.11111111, %v1665_v62  ;;  %v1250_v54 = vadd.f32 %v1218_v42, %v1153_v22  ;;  %v641_v26 = vadd.f32 %v553_v27, %v448_v23  ;;  %v1003_v21 = vunpack.c.l.bf16 %v1907_v57 }
  0x7f   : > { %v554_v11 = vrot.slane %v489_v32, 2  ;;  %v2565_v34 = vunpack.c.l.bf16 %v2098_v46  ;;  %v875_v47 = vrot.slane %v707_v14, 1  ;;  %v876_v50 = vrot.slane %v2563_v31, 1 }
  0x80   : > { %v1736_v37 = vadd.f32 %v2224_v35, %v1697_v5  ;;  %v1474_v16 = vadd.f32 %v1385_v13, %v1250_v54  ;;  %v738_v39 = vadd.f32 %v2474_v45, %v641_v26  ;;  %v1067_v41 = vrot.slane %v1003_v21, 2  ;;  %v2621_v21 = vld [vmem:[%s2149_s14 + $0x84] sm:$0xff]  }
  0x81   : > { %v556_v42 = vsel %vm513_vm1, %v554_v11, %v2493_v12  ;;  %v1068_v9 = vrot.slane %v2563_v31, 2  ;;  %v2576_v56 = vunpack.c.h.bf16 %v2098_v46  ;;  %v1387_v61 = vsel %vm320_vm0, %v1384_v55, %v1386_v24  ;;  %v474_v24 = vld [vmem:[%s2149_s14 + $0x6c] sm:$0xe]  ;;  %v1908_v11 = vld [vmem:[%s2149_s14 + $0x78] sm:$0xe] }
  0x82   : > { %1769 = vst.msk [vmem:[%s2232_s20 + $0x68] sm:$0xff] %vm1755_vm2, %v1736_v37  ;;  %v1666_v44 = vadd.f32 %v1577_v19, %v1474_v16  ;;  %v962_v2 = vadd.f32 %v874_v25, %v738_v39  ;;  %v642_v36 = vadd.f32 %v556_v42, %v449_v1  ;;  %v877_v30 = vsel %vm320_vm0, %v875_v47, %v876_v50 }
  0x83   : > { %v1388_v33 = vrot.slane %v2565_v34, 1  ;;  %v1516_v59 = vunpack.c.l.bf16 %v1971_v48  ;;  %v2586_v7 = vrot.slane %v2576_v56, 1  ;;  %v1579_v8 = vsel %vm513_vm1, %v1576_v3, %v1578_v29 }
  0x84   : > { %v1698_v0 = vmul.f32 0.11111111, %v1666_v44  ;;  %v1154_v4 = vadd.f32 %v1066_v28, %v962_v2  ;;  %v739_v6 = vadd.f32 %v707_v14, %v642_v36  ;;  %v1069_v55 = vsel %vm513_vm1, %v1067_v41, %v1068_v9  ;;  %v1972_v41 = vld [vmem:[%s2149_s14 + $0x84] sm:$0xe] }
  0x85   : > { %v264_v10 = vunpack.c.l.bf16 %v248_v60  ;;  %v779_v53 = vunpack.c.l.bf16 %v1891_v52  ;;  %v1580_v17 = vrot.slane %v1516_v59, 2  ;;  %v2597_v63 = vrot.slane %v2576_v56, 2 }
  0x86   : > { %v1737_v13 = vadd.f32 %v2224_v35, %v1698_v0  ;;  %v1251_v38 = vadd.f32 %v2523_v43, %v1154_v4  ;;  %v963_v15 = vadd.f32 %v877_v30, %v739_v6  ;;  %v2603_v1 = vsel %vm320_vm0, %v1388_v33, %v2586_v7  ;;  %v249_v30 = vld [vmem:[%s2149_s14 + $0x74] sm:$0x1]  ;;  %v1956_v6 = vld [vmem:[%s2149_s14 + $0x8c] sm:$0x1] }
  0x87   : > { %v364_v49 = vrot.slane %v264_v10, 1  ;;  %v557_v19 = vrot.slane %v264_v10, 2  ;;  %v878_v20 = vrot.slane %v779_v53, 1  ;;  %v1070_v43 = vrot.slane %v779_v53, 2 }
  0x88   : > { %1770 = vst.msk [vmem:[%s2232_s20 + $0x70] sm:$0xff] %vm1755_vm2, %v1737_v13  ;;  %v1475_v3 = vadd.f32 %v1387_v61, %v1251_v38  ;;  %v1155_v27 = vadd.f32 %v1069_v55, %v963_v15  ;;  %v1292_v22 = vunpack.c.l.bf16 %v1955_v40  ;;  %v194_v23 = vunpack.c.l.bf16 %v162_v18 }
  0x89   : > { %v365_v51 = vsel %vm320_vm0, %v2482_v58, %v364_v49  ;;  %v558_v62 = vsel %vm513_vm1, %v2493_v12, %v557_v19  ;;  %v1582_v25 = vsel %vm513_vm1, %v1580_v17, %v2597_v63  ;;  %v879_v29 = vsel %vm320_vm0, %v876_v50, %v878_v20 }
  0x8a   : > { %v1667_v57 = vadd.f32 %v1579_v8, %v1475_v3  ;;  %v1252_v46 = vadd.f32 %v2565_v34, %v1155_v27  ;;  %v450_v28 = vadd.f32 %v2474_v45, %v365_v51  ;;  %v1071_v58 = vsel %vm513_vm1, %v1068_v9, %v1070_v43  ;;  %v2643_v8 = vld [vmem:[%s2979_s1] ss:$0 sm:$0xff] }
  0x8b   : > { %v2616_v32 = vunpack.c.h.bf16 %v162_v18  ;;  %v366_v12 = vrot.slane %v194_v23, 1  ;;  %v490_v14 = vunpack.c.l.bf16 %v474_v24  ;;  %v1391_v37 = vrot.slane %v1292_v22, 1 }
  0x8c   : > { %v1699_v5 = vmul.f32 0.11111111, %v1667_v57  ;;  %v1476_v54 = vadd.f32 %v2603_v1, %v1252_v46  ;;  %v643_v26 = vadd.f32 %v558_v62, %v450_v28  ;;  %v1583_v16 = vrot.slane %v1292_v22, 2  ;;  %v475_v57 = vld [vmem:[%s2149_s14 + $0x78] sm:$0xe] }
  0x8d   : > { %v367_v45 = vrot.slane %v2616_v32, 1  ;;  %v560_v39 = vrot.slane %v2616_v32, 2  ;;  %v559_v50 = vrot.slane %v490_v14, 2  ;;  %v1004_v44 = vunpack.c.l.bf16 %v1908_v11  ;;  %v1909_v14 = vld [vmem:[%s2149_s14 + $0x84] sm:$0xe]  ;;  %v2099_v11 = vld [vmem:[%s2149_s14 + $0x90] sm:$0xff]  }
  0x8e   : > { %v1738_v47 = vadd.f32 %v2224_v35, %v1699_v5  ;;  %v1668_v48 = vadd.f32 %v1582_v25, %v1476_v54  ;;  %v740_v42 = vadd.f32 %v2563_v31, %v643_v26  ;;  %v1222_v2 = vunpack.c.l.bf16 %v2621_v21  ;;  %v1892_v31 = vld [vmem:[%s2149_s14 + $0x80] sm:$0x1] }
  0x8f   : > { %v368_v9 = vsel %vm320_vm0, %v366_v12, %v367_v45  ;;  %v2631_v36 = vunpack.c.h.bf16 %v2621_v21  ;;  %v561_v35 = vsel %vm513_vm1, %v559_v50, %v560_v39  ;;  %v1072_v33 = vrot.slane %v1004_v44, 2 }
  0x90   : > { %1771 = vst.msk [vmem:[%s2232_s20 + $0x78] sm:$0xff] %vm1755_vm2, %v1738_v47  ;;  %v1700_v60 = vmul.f32 0.11111111, %v1668_v48  ;;  %v964_v52 = vadd.f32 %v879_v29, %v740_v42  ;;  %v451_v61 = vadd.f32 %v368_v9, %v194_v23  ;;  %v1393_v59 = vrot.slane %v1222_v2, 1 }
  0x91   : > { %v1394_v0 = vrot.slane %v2631_v36, 1  ;;  %v1517_v4 = vunpack.c.l.bf16 %v1972_v41  ;;  %v1392_v53 = vsel %vm320_vm0, %v2586_v7, %v1391_v37  ;;  %v1584_v38 = vsel %vm513_vm1, %v2597_v63, %v1583_v16 }
  0x92   : > { %v1739_v55 = vadd.f32 %v2643_v8, %v1700_v60  ;;  %v1156_v10 = vadd.f32 %v1071_v58, %v964_v52  ;;  %v644_v13 = vadd.f32 %v561_v35, %v451_v61  ;;  %v1586_v17 = vrot.slane %v2631_v36, 2  ;;  %v1871_v58 = vld [vmem:[%s2149_s14 + $0x84] sm:$0xff]   ;;  %v1973_v52 = vld [vmem:[%s2149_s14 + $0x90] sm:$0xe] }
  0x93   : > { %v1585_v15 = vrot.slane %v1517_v4, 2  ;;  %v265_v40 = vunpack.c.l.bf16 %v249_v30  ;;  %v780_v19 = vunpack.c.l.bf16 %v1892_v31  ;;  %v1293_v20 = vunpack.c.l.bf16 %v1956_v6  ;;  %v250_v6 = vld [vmem:[%s2149_s14 + $0x80] sm:$0x1] }
  0x94   : > { %1772 = vst.msk [vmem:[%s2232_s20 + $0x80] sm:$0xff] %vm1755_vm2, %v1739_v55  ;;  %v1253_v18 = vadd.f32 %v2576_v56, %v1156_v10  ;;  %v741_v49 = vadd.f32 %v2565_v34, %v644_v13  ;;  %v1074_v3 = vsel %vm513_vm1, %v1072_v33, %v2597_v63  ;;  %v1395_v27 = vsel %vm320_vm0, %v1393_v59, %v1394_v0  ;;  %v1893_v55 = vld [vmem:[%s2149_s14 + $0x8c] sm:$0x1] }
  0x95   : > { %v369_v43 = vrot.slane %v265_v40, 1  ;;  %v562_v51 = vrot.slane %v265_v40, 2  ;;  %v883_v23 = vrot.slane %v780_v19, 1  ;;  %v1075_v24 = vrot.slane %v780_v19, 2 }
  0x96   : > { %v1477_v62 = vadd.f32 %v1392_v53, %v1253_v18  ;;  %v965_v22 = vadd.f32 %v2603_v1, %v741_v49  ;;  %v1587_v46 = vsel %vm513_vm1, %v1585_v15, %v1586_v17  ;;  %v453_v29 = vadd.f32 %v2565_v34, %v2603_v1 }
  0x97   : > { %v370_v25 = vsel %vm320_vm0, %v367_v45, %v369_v43  ;;  %v563_v28 = vsel %vm513_vm1, %v560_v39, %v562_v51  ;;  %v1396_v26 = vrot.slane %v1293_v20, 1  ;;  %v884_v21 = vsel %vm320_vm0, %v2586_v7, %v883_v23  ;;  %v166_v23 = vld [vmem:[%s2149_s14 + $0x84] sm:$0xff]  }
  0x98   : > { %v1669_v12 = vadd.f32 %v1584_v38, %v1477_v62  ;;  %v1157_v5 = vadd.f32 %v1074_v3, %v965_v22  ;;  %v452_v54 = vadd.f32 %v370_v25, %v2616_v32  ;;  %v1076_v37 = vsel %vm513_vm1, %v2597_v63, %v1075_v24  ;;  %v1957_v22 = vld [vmem:[%s2149_s14 + $0x98] sm:$0x1] }
  0x99   : > { %v1588_v16 = vrot.slane %v1293_v20, 2  ;;  %v491_v45 = vunpack.c.l.bf16 %v475_v57  ;;  %v711_v1 = vunpack.c.l.bf16 %v1871_v58  ;;  %v2677_v42 = vunpack.c.h.bf16 %v1871_v58 }
  0x9a   : > { %v1701_v39 = vmul.f32 0.11111111, %v1669_v12  ;;  %v1254_v47 = vadd.f32 %v1222_v2, %v1157_v5  ;;  %v645_v34 = vadd.f32 %v563_v28, %v452_v54  ;;  %v1005_v32 = vunpack.c.l.bf16 %v1909_v14 }
  0x9b   : > { %v564_v48 = vrot.slane %v491_v45, 2  ;;  %v2679_v50 = vunpack.c.l.bf16 %v2099_v11  ;;  %v885_v60 = vrot.slane %v711_v1, 1  ;;  %v886_v61 = vrot.slane %v2677_v42, 1 }
  0x9c   : > { %v1740_v41 = vadd.f32 %v2643_v8, %v1701_v39  ;;  %v1478_v9 = vadd.f32 %v1395_v27, %v1254_v47  ;;  %v742_v44 = vadd.f32 %v2576_v56, %v645_v34  ;;  %v1077_v35 = vrot.slane %v1005_v32, 2  ;;  %v2733_v32 = vld [vmem:[%s2149_s14 + $0x9c] sm:$0xff]  }
  0x9d   : > { %v566_v2 = vsel %vm513_vm1, %v564_v48, %v2597_v63  ;;  %v1078_v30 = vrot.slane %v2677_v42, 2  ;;  %v2690_v4 = vunpack.c.h.bf16 %v2099_v11  ;;  %v1397_v10 = vsel %vm320_vm0, %v1394_v0, %v1396_v26  ;;  %v476_v26 = vld [vmem:[%s2149_s14 + $0x84] sm:$0xe]  ;;  %v1910_v48 = vld [vmem:[%s2149_s14 + $0x90] sm:$0xe] }
  0x9e   : > { %1773 = vst.msk [vmem:[%s2232_s20 + $0x88] sm:$0xff] %vm1755_vm2, %v1740_v41  ;;  %v1670_v31 = vadd.f32 %v1587_v46, %v1478_v9  ;;  %v966_v33 = vadd.f32 %v884_v21, %v742_v44  ;;  %v646_v59 = vadd.f32 %v566_v2, %v453_v29  ;;  %v887_v53 = vsel %vm320_vm0, %v885_v60, %v886_v61 }
  0x9f   : > { %v1398_v13 = vrot.slane %v2679_v50, 1  ;;  %v1518_v38 = vunpack.c.l.bf16 %v1973_v52  ;;  %v2700_v49 = vrot.slane %v2690_v4, 1  ;;  %v1589_v19 = vsel %vm513_vm1, %v1586_v17, %v1588_v16 }
  0xa0   : > { %v1702_v15 = vmul.f32 0.11111111, %v1670_v31  ;;  %v1158_v40 = vadd.f32 %v1076_v37, %v966_v33  ;;  %v743_v18 = vadd.f32 %v711_v1, %v646_v59  ;;  %v1079_v0 = vsel %vm513_vm1, %v1077_v35, %v1078_v30  ;;  %v1974_v35 = vld [vmem:[%s2149_s14 + $0x9c] sm:$0xe] }
  0xa1   : > { %v266_v20 = vunpack.c.l.bf16 %v250_v6  ;;  %v781_v3 = vunpack.c.l.bf16 %v1893_v55  ;;  %v1590_v62 = vrot.slane %v1518_v38, 2  ;;  %v2711_v24 = vrot.slane %v2690_v4, 2 }
  0xa2   : > { %v1741_v27 = vadd.f32 %v2643_v8, %v1702_v15  ;;  %v1255_v43 = vadd.f32 %v2631_v36, %v1158_v40  ;;  %v967_v51 = vadd.f32 %v887_v53, %v743_v18  ;;  %v2717_v29 = vsel %vm320_vm0, %v1398_v13, %v2700_v49  ;;  %v1894_v13 = vld [vmem:[%s2149_s14 + $0x98] sm:$0x1] }
  0xa3   : > { %v374_v57 = vrot.slane %v266_v20, 1  ;;  %v567_v46 = vrot.slane %v266_v20, 2  ;;  %v888_v25 = vrot.slane %v781_v3, 1  ;;  %v1080_v36 = vrot.slane %v781_v3, 2 }
  0xa4   : > { %1774 = vst.msk [vmem:[%s2232_s20 + $0x90] sm:$0xff] %vm1755_vm2, %v1741_v27  ;;  %v1479_v17 = vadd.f32 %v1397_v10, %v1255_v43  ;;  %v1159_v28 = vadd.f32 %v1079_v0, %v967_v51  ;;  %v1294_v5 = vunpack.c.l.bf16 %v1957_v22  ;;  %v198_v54 = vunpack.c.l.bf16 %v166_v23 }
  0xa5   : > { %v375_v58 = vsel %vm320_vm0, %v2586_v7, %v374_v57  ;;  %v568_v12 = vsel %vm513_vm1, %v2597_v63, %v567_v46  ;;  %v1592_v21 = vsel %vm513_vm1, %v1590_v62, %v2711_v24  ;;  %v889_v16 = vsel %vm320_vm0, %v886_v61, %v888_v25 }
  0xa6   : > { %v1671_v14 = vadd.f32 %v1589_v19, %v1479_v17  ;;  %v1256_v11 = vadd.f32 %v2679_v50, %v1159_v28  ;;  %v454_v37 = vadd.f32 %v2576_v56, %v375_v58  ;;  %v1081_v7 = vsel %vm513_vm1, %v1078_v30, %v1080_v36  ;;  %v1958_v19 = vld [vmem:[%s2149_s14 + $0xa4] sm:$0x1] }
  0xa7   : > { %v199_v45 = vunpack.c.h.bf16 %v166_v23  ;;  %v376_v63 = vrot.slane %v198_v54, 1  ;;  %v492_v1 = vunpack.c.l.bf16 %v476_v26  ;;  %v1401_v41 = vrot.slane %v1294_v5, 1 }
  0xa8   : > { %v1703_v39 = vmul.f32 0.11111111, %v1671_v14  ;;  %v1480_v47 = vadd.f32 %v2717_v29, %v1256_v11  ;;  %v647_v34 = vadd.f32 %v568_v12, %v454_v37  ;;  %v1593_v9 = vrot.slane %v1294_v5, 2  ;;  %v477_v14 = vld [vmem:[%s2149_s14 + $0x90] sm:$0xe] }
  0xa9   : > { %v377_v44 = vrot.slane %v199_v45, 1  ;;  %v570_v56 = vrot.slane %v199_v45, 2  ;;  %v569_v61 = vrot.slane %v492_v1, 2  ;;  %v1006_v31 = vunpack.c.l.bf16 %v1910_v48  ;;  %v1911_v1 = vld [vmem:[%s2149_s14 + $0x9c] sm:$0xe]  ;;  %v2100_v48 = vld [vmem:[%s2149_s14 + $0xa8] sm:$0xff]  }
  0xaa   : > { %v1742_v60 = vadd.f32 %v2643_v8, %v1703_v39  ;;  %v1672_v52 = vadd.f32 %v1592_v21, %v1480_v47  ;;  %v744_v2 = vadd.f32 %v2677_v42, %v647_v34  ;;  %v1226_v33 = vunpack.c.l.bf16 %v2733_v32  ;;  %v251_v42 = vld [vmem:[%s2149_s14 + $0x8c] sm:$0x1] }
  0xab   : > { %v378_v30 = vsel %vm320_vm0, %v376_v63, %v377_v44  ;;  %v2741_v59 = vunpack.c.h.bf16 %v2733_v32  ;;  %v571_v53 = vsel %vm513_vm1, %v569_v61, %v570_v56  ;;  %v1082_v38 = vrot.slane %v1006_v31, 2 }
  0xac   : > { %1775 = vst.msk [vmem:[%s2232_s20 + $0x98] sm:$0xff] %vm1755_vm2, %v1742_v60  ;;  %v1704_v6 = vmul.f32 0.11111111, %v1672_v52  ;;  %v968_v55 = vadd.f32 %v889_v16, %v744_v2  ;;  %v455_v10 = vadd.f32 %v378_v30, %v198_v54  ;;  %v1403_v15 = vrot.slane %v1226_v33, 1 }
  0xad   : > { %v1404_v40 = vrot.slane %v2741_v59, 1  ;;  %v1519_v18 = vunpack.c.l.bf16 %v1974_v35  ;;  %v1402_v3 = vsel %vm320_vm0, %v2700_v49, %v1401_v41  ;;  %v1594_v43 = vsel %vm513_vm1, %v2711_v24, %v1593_v9 }
  0xae   : > { %v1743_v0 = vadd.f32 %v2643_v8, %v1704_v6  ;;  %v1160_v20 = vadd.f32 %v1081_v7, %v968_v55  ;;  %v648_v27 = vadd.f32 %v571_v53, %v455_v10  ;;  %v1596_v62 = vrot.slane %v2741_v59, 2  ;;  %v1875_v7 = vld [vmem:[%s2149_s14 + $0x9c] sm:$0xff]   ;;  %v1975_v55 = vld [vmem:[%s2149_s14 + $0xa8] sm:$0xe] }
  0xaf   : > { %v1595_v51 = vrot.slane %v1519_v18, 2  ;;  %v267_v22 = vunpack.c.l.bf16 %v251_v42  ;;  %v782_v46 = vunpack.c.l.bf16 %v1894_v13  ;;  %v1295_v25 = vunpack.c.l.bf16 %v1958_v19  ;;  %v252_v19 = vld [vmem:[%s2149_s14 + $0x98] sm:$0x1] }
  0xb0   : > { %1776 = vst.msk [vmem:[%s2232_s20 + $0xa0] sm:$0xff] %vm1755_vm2, %v1743_v0  ;;  %v1257_v23 = vadd.f32 %v2690_v4, %v1160_v20  ;;  %v745_v57 = vadd.f32 %v2679_v50, %v648_v27  ;;  %v1084_v17 = vsel %vm513_vm1, %v1082_v38, %v2711_v24  ;;  %v1405_v28 = vsel %vm320_vm0, %v1403_v15, %v1404_v40  ;;  %v1895_v0 = vld [vmem:[%s2149_s14 + $0xa4] sm:$0x1] }
  0xb1   : > { %v379_v36 = vrot.slane %v267_v22, 1  ;;  %v572_v58 = vrot.slane %v267_v22, 2  ;;  %v893_v54 = vrot.slane %v782_v46, 1  ;;  %v1085_v26 = vrot.slane %v782_v46, 2 }
  0xb2   : > { %v1481_v12 = vadd.f32 %v1402_v3, %v1257_v23  ;;  %v969_v5 = vadd.f32 %v2717_v29, %v745_v57  ;;  %v1597_v11 = vsel %vm513_vm1, %v1595_v51, %v1596_v62  ;;  %v457_v16 = vadd.f32 %v2679_v50, %v2717_v29 }
  0xb3   : > { %v380_v21 = vsel %vm320_vm0, %v377_v44, %v379_v36  ;;  %v573_v37 = vsel %vm513_vm1, %v570_v56, %v572_v58  ;;  %v1406_v34 = vrot.slane %v1295_v25, 1  ;;  %v894_v32 = vsel %vm320_vm0, %v2700_v49, %v893_v54  ;;  %v170_v54 = vld [vmem:[%s2149_s14 + $0x9c] sm:$0xff]  }
  0xb4   : > { %v1673_v63 = vadd.f32 %v1594_v43, %v1481_v12  ;;  %v1161_v39 = vadd.f32 %v1084_v17, %v969_v5  ;;  %v456_v47 = vadd.f32 %v380_v21, %v199_v45  ;;  %v1086_v41 = vsel %vm513_vm1, %v2711_v24, %v1085_v26  ;;  %v1959_v5 = vld [vmem:[%s2149_s14 + $0xb0] sm:$0x1] }
  0xb5   : > { %v1598_v9 = vrot.slane %v1295_v25, 2  ;;  %v493_v44 = vunpack.c.l.bf16 %v477_v14  ;;  %v715_v29 = vunpack.c.l.bf16 %v1875_v7  ;;  %v2781_v2 = vunpack.c.h.bf16 %v1875_v7 }
  0xb6   : > { %v1705_v56 = vmul.f32 0.11111111, %v1673_v63  ;;  %v1258_v60 = vadd.f32 %v1226_v33, %v1161_v39  ;;  %v649_v50 = vadd.f32 %v573_v37, %v456_v47  ;;  %v1007_v45 = vunpack.c.l.bf16 %v1911_v1 }
  0xb7   : > { %v574_v52 = vrot.slane %v493_v44, 2  ;;  %v2783_v61 = vunpack.c.l.bf16 %v2100_v48  ;;  %v895_v6 = vrot.slane %v715_v29, 1  ;;  %v896_v10 = vrot.slane %v2781_v2, 1 }
  0xb8   : > { %v1744_v35 = vadd.f32 %v2643_v8, %v1705_v56  ;;  %v1482_v30 = vadd.f32 %v1405_v28, %v1258_v60  ;;  %v746_v31 = vadd.f32 %v2690_v4, %v649_v50  ;;  %v1087_v53 = vrot.slane %v1007_v45, 2  ;;  %v2837_v45 = vld [vmem:[%s2149_s14 + $0xb4] sm:$0xff]  }
  0xb9   : > { %v576_v33 = vsel %vm513_vm1, %v574_v52, %v2711_v24  ;;  %v1088_v42 = vrot.slane %v2781_v2, 2  ;;  %v2794_v18 = vunpack.c.h.bf16 %v2100_v48  ;;  %v1407_v20 = vsel %vm320_vm0, %v1404_v40, %v1406_v34  ;;  %v478_v34 = vld [vmem:[%s2149_s14 + $0x9c] sm:$0xe]  ;;  %v1912_v52 = vld [vmem:[%s2149_s14 + $0xa8] sm:$0xe] }
  0xba   : > { %1777 = vst.msk [vmem:[%s2232_s20 + $0xa8] sm:$0xff] %vm1755_vm2, %v1744_v35  ;;  %v1674_v13 = vadd.f32 %v1597_v11, %v1482_v30  ;;  %v970_v38 = vadd.f32 %v894_v32, %v746_v31  ;;  %v650_v15 = vadd.f32 %v576_v33, %v457_v16  ;;  %v897_v3 = vsel %vm320_vm0, %v895_v6, %v896_v10 }
  0xbb   : > { %v1408_v27 = vrot.slane %v2783_v61, 1  ;;  %v1520_v43 = vunpack.c.l.bf16 %v1975_v55  ;;  %v2804_v57 = vrot.slane %v2794_v18, 1  ;;  %v1599_v46 = vsel %vm513_vm1, %v1596_v62, %v1598_v9 }
  0xbc   : > { %v1706_v51 = vmul.f32 0.11111111, %v1674_v13  ;;  %v1162_v22 = vadd.f32 %v1086_v41, %v970_v38  ;;  %v747_v23 = vadd.f32 %v715_v29, %v650_v15  ;;  %v1089_v40 = vsel %vm513_vm1, %v1087_v53, %v1088_v42  ;;  %v1976_v53 = vld [vmem:[%s2149_s14 + $0xb4] sm:$0xe] }
  0xbd   : > { %v268_v25 = vunpack.c.l.bf16 %v252_v19  ;;  %v783_v17 = vunpack.c.l.bf16 %v1895_v0  ;;  %v1600_v12 = vrot.slane %v1520_v43, 2  ;;  %v2815_v26 = vrot.slane %v2794_v18, 2 }
  0xbe   : > { %v1745_v28 = vadd.f32 %v2643_v8, %v1706_v51  ;;  %v1259_v36 = vadd.f32 %v2741_v59, %v1162_v22  ;;  %v971_v58 = vadd.f32 %v897_v3, %v747_v23  ;;  %v2821_v16 = vsel %vm320_vm0, %v1408_v27, %v2804_v57  ;;  %v1896_v27 = vld [vmem:[%s2149_s14 + $0xb0] sm:$0x1] }
  0xbf   : > { %v384_v14 = vrot.slane %v268_v25, 1  ;;  %v577_v11 = vrot.slane %v268_v25, 2  ;;  %v898_v21 = vrot.slane %v783_v17, 1  ;;  %v1090_v59 = vrot.slane %v783_v17, 2 }
  0xc0   : > { %1778 = vst.msk [vmem:[%s2232_s20 + $0xb0] sm:$0xff] %vm1755_vm2, %v1745_v28  ;;  %v1483_v62 = vadd.f32 %v1407_v20, %v1259_v36  ;;  %v1163_v37 = vadd.f32 %v1089_v40, %v971_v58  ;;  %v1296_v39 = vunpack.c.l.bf16 %v1959_v5  ;;  %v202_v47 = vunpack.c.l.bf16 %v170_v54 }
  0xc1   : > { %v385_v7 = vsel %vm320_vm0, %v2700_v49, %v384_v14  ;;  %v578_v63 = vsel %vm513_vm1, %v2711_v24, %v577_v11  ;;  %v1602_v32 = vsel %vm513_vm1, %v1600_v12, %v2815_v26  ;;  %v899_v9 = vsel %vm320_vm0, %v896_v10, %v898_v21 }
  0xc2   : > { %v1675_v1 = vadd.f32 %v1599_v46, %v1483_v62  ;;  %v1260_v48 = vadd.f32 %v2783_v61, %v1163_v37  ;;  %v458_v41 = vadd.f32 %v2690_v4, %v385_v7  ;;  %v1091_v49 = vsel %vm513_vm1, %v1088_v42, %v1090_v59  ;;  %v1960_v46 = vld [vmem:[%s2149_s14 + $0xbc] sm:$0x1] }
  0xc3   : > { %v203_v44 = vunpack.c.h.bf16 %v170_v54  ;;  %v386_v24 = vrot.slane %v202_v47, 1  ;;  %v494_v29 = vunpack.c.l.bf16 %v478_v34  ;;  %v1411_v35 = vrot.slane %v1296_v39, 1 }
  0xc4   : > { %v1707_v56 = vmul.f32 0.11111111, %v1675_v1  ;;  %v1484_v60 = vadd.f32 %v2821_v16, %v1260_v48  ;;  %v651_v50 = vadd.f32 %v578_v63, %v458_v41  ;;  %v1603_v30 = vrot.slane %v1296_v39, 2  ;;  %v479_v1 = vld [vmem:[%s2149_s14 + $0xa8] sm:$0xe] }
  0xc5   : > { %v387_v31 = vrot.slane %v203_v44, 1  ;;  %v580_v4 = vrot.slane %v203_v44, 2  ;;  %v579_v10 = vrot.slane %v494_v29, 2  ;;  %v1008_v13 = vunpack.c.l.bf16 %v1912_v52  ;;  %v1913_v29 = vld [vmem:[%s2149_s14 + $0xb4] sm:$0xe]  ;;  %v2101_v52 = vld [vmem:[%s2149_s14 + $0xc0] sm:$0xff]  }
  0xc6   : > { %v1746_v6 = vadd.f32 %v2643_v8, %v1707_v56  ;;  %v1676_v55 = vadd.f32 %v1602_v32, %v1484_v60  ;;  %v748_v33 = vadd.f32 %v2781_v2, %v651_v50  ;;  %v1230_v38 = vunpack.c.l.bf16 %v2837_v45  ;;  %v253_v2 = vld [vmem:[%s2149_s14 + $0xa4] sm:$0x1] }
  0xc7   : > { %v388_v42 = vsel %vm320_vm0, %v386_v24, %v387_v31  ;;  %v2845_v15 = vunpack.c.h.bf16 %v2837_v45  ;;  %v581_v3 = vsel %vm513_vm1, %v579_v10, %v580_v4  ;;  %v1092_v43 = vrot.slane %v1008_v13, 2 }
  0xc8   : > { %1779 = vst.msk [vmem:[%s2232_s20 + $0xb8] sm:$0xff] %vm1755_vm2, %v1746_v6  ;;  %v1708_v19 = vmul.f32 0.11111111, %v1676_v55  ;;  %v972_v0 = vadd.f32 %v899_v9, %v748_v33  ;;  %v459_v20 = vadd.f32 %v388_v42, %v202_v47  ;;  %v1413_v51 = vrot.slane %v1230_v38, 1 }
  0xc9   : > { %v1414_v22 = vrot.slane %v2845_v15, 1  ;;  %v1521_v23 = vunpack.c.l.bf16 %v1976_v53  ;;  %v1412_v17 = vsel %vm320_vm0, %v2804_v57, %v1411_v35  ;;  %v1604_v36 = vsel %vm513_vm1, %v2815_v26, %v1603_v30 }
  0xca   : > { %v1747_v40 = vadd.f32 %v2643_v8, %v1708_v19  ;;  %v1164_v25 = vadd.f32 %v1091_v49, %v972_v0  ;;  %v652_v28 = vadd.f32 %v581_v3, %v459_v20  ;;  %v1606_v12 = vrot.slane %v2845_v15, 2  ;;  %v1879_v49 = vld [vmem:[%s2149_s14 + $0xb4] sm:$0xff]   ;;  %v1977_v0 = vld [vmem:[%s2149_s14 + $0xc0] sm:$0xe] }
  0xcb   : > { %v1605_v58 = vrot.slane %v1521_v23, 2  ;;  %v269_v5 = vunpack.c.l.bf16 %v253_v2  ;;  %v784_v11 = vunpack.c.l.bf16 %v1896_v27  ;;  %v1297_v21 = vunpack.c.l.bf16 %v1960_v46  ;;  %v254_v46 = vld [vmem:[%s2149_s14 + $0xb0] sm:$0x1] }
  0xcc   : > { %1780 = vst.msk [vmem:[%s2232_s20 + $0xc0] sm:$0xff] %vm1755_vm2, %v1747_v40  ;;  %v1261_v54 = vadd.f32 %v2794_v18, %v1164_v25  ;;  %v749_v14 = vadd.f32 %v2783_v61, %v652_v28  ;;  %v1094_v62 = vsel %vm513_vm1, %v1092_v43, %v2815_v26  ;;  %v1415_v37 = vsel %vm320_vm0, %v1413_v51, %v1414_v22  ;;  %v1897_v40 = vld [vmem:[%s2149_s14 + $0xbc] sm:$0x1] }
  0xcd   : > { %v389_v59 = vrot.slane %v269_v5, 1  ;;  %v582_v7 = vrot.slane %v269_v5, 2  ;;  %v903_v47 = vrot.slane %v784_v11, 1  ;;  %v1095_v34 = vrot.slane %v784_v11, 2 }
  0xce   : > { %v1485_v63 = vadd.f32 %v1412_v17, %v1261_v54  ;;  %v973_v39 = vadd.f32 %v2821_v16, %v749_v14  ;;  %v1607_v48 = vsel %vm513_vm1, %v1605_v58, %v1606_v12  ;;  %v461_v9 = vadd.f32 %v2783_v61, %v2821_v16 }
  0xcf   : > { %v390_v32 = vsel %vm320_vm0, %v387_v31, %v389_v59  ;;  %v583_v41 = vsel %vm513_vm1, %v580_v4, %v582_v7  ;;  %v1416_v50 = vrot.slane %v1297_v21, 1  ;;  %v904_v45 = vsel %vm320_vm0, %v2804_v57, %v903_v47 }
  0xd0   : > { %v1677_v24 = vadd.f32 %v1604_v36, %v1485_v63  ;;  %v1165_v56 = vadd.f32 %v1094_v62, %v973_v39  ;;  %v460_v60 = vadd.f32 %v390_v32, %v203_v44  ;;  %v1096_v35 = vsel %vm513_vm1, %v2815_v26, %v1095_v34  ;;  %v1961_v63 = vld [vmem:[%s2149_s14 + $0xc8] sm:$0x1]  ;;  %v174_v39 = vld [vmem:[%s2149_s14 + $0xb4] sm:$0xff]  }
  0xd1   : > { %v1608_v30 = vrot.slane %v1297_v21, 2  ;;  %v495_v31 = vunpack.c.l.bf16 %v479_v1  ;;  %v719_v16 = vunpack.c.l.bf16 %v1879_v49  ;;  %v2883_v33 = vunpack.c.h.bf16 %v1879_v49 }
  0xd2   : > { %v1709_v4 = vmul.f32 0.11111111, %v1677_v24  ;;  %v1262_v6 = vadd.f32 %v1230_v38, %v1165_v56  ;;  %v653_v61 = vadd.f32 %v583_v41, %v460_v60  ;;  %v1009_v44 = vunpack.c.l.bf16 %v1913_v29  ;;  %v480_v60 = vld [vmem:[%s2149_s14 + $0xb4] sm:$0xe] }
  0xd3   : > { %v584_v55 = vrot.slane %v495_v31, 2  ;;  %v2885_v10 = vunpack.c.l.bf16 %v2101_v52  ;;  %v905_v19 = vrot.slane %v719_v16, 1  ;;  %v906_v20 = vrot.slane %v2883_v33, 1 }
  0xd4   : > { %v1748_v53 = vadd.f32 %v2643_v8, %v1709_v4  ;;  %v1486_v42 = vadd.f32 %v1415_v37, %v1262_v6  ;;  %v750_v13 = vadd.f32 %v2794_v18, %v653_v61  ;;  %v1097_v3 = vrot.slane %v1009_v44, 2 }
  0xd5   : > { %v586_v38 = vsel %vm513_vm1, %v584_v55, %v2815_v26  ;;  %v1098_v2 = vrot.slane %v2883_v33, 2  ;;  %v2896_v23 = vunpack.c.h.bf16 %v2101_v52  ;;  %v1417_v25 = vsel %vm320_vm0, %v1414_v22, %v1416_v50  ;;  %v1945_v55 = vld [vmem:[%s2149_s14 + $0xcc] sm:$0xff]  }
  0xd6   : > { %1781 = vst.msk [vmem:[%s2232_s20 + $0xc8] sm:$0xff] %vm1755_vm2, %v1748_v53  ;;  %v1678_v27 = vadd.f32 %v1607_v48, %v1486_v42  ;;  %v974_v43 = vadd.f32 %v904_v45, %v750_v13  ;;  %v654_v51 = vadd.f32 %v586_v38, %v461_v9  ;;  %v907_v17 = vsel %vm320_vm0, %v905_v19, %v906_v20 }
  0xd7   : > { %v1522_v28 = vunpack.c.l.bf16 %v1977_v0  ;;  %v1609_v5 = vsel %vm513_vm1, %v1606_v12, %v1608_v30  ;;  %v1099_v14 = vsel %vm513_vm1, %v1097_v3, %v1098_v2  ;;  %v1418_v11 = vrot.slane %v2885_v10, 1 }
  0xd8   : > { %v1710_v36 = vmul.f32 0.11111111, %v1678_v27  ;;  %v1166_v58 = vadd.f32 %v1096_v35, %v974_v43  ;;  %v751_v54 = vadd.f32 %v719_v16, %v654_v51  ;;  %v270_v21 = vunpack.c.l.bf16 %v254_v46  ;;  %v1914_v16 = vld [vmem:[%s2149_s14 + $0xc0] sm:$0xe] }
  0xd9   : > { %v785_v62 = vunpack.c.l.bf16 %v1897_v40  ;;  %v2910_v7 = vrot.slane %v2896_v23, 1  ;;  %v1610_v12 = vrot.slane %v1522_v28, 2  ;;  %v2917_v41 = vrot.slane %v2896_v23, 2 }
  0xda   : > { %v1749_v37 = vadd.f32 %v2643_v8, %v1710_v36  ;;  %v1263_v22 = vadd.f32 %v2845_v15, %v1166_v58  ;;  %v975_v59 = vadd.f32 %v907_v17, %v751_v54  ;;  %v394_v47 = vrot.slane %v270_v21, 1  ;;  %v255_v17 = vld [vmem:[%s2149_s14 + $0xbc] sm:$0x1]  ;;  %v1898_v58 = vld [vmem:[%s2149_s14 + $0xc8] sm:$0x1] }
  0xdb   : > { %v587_v34 = vrot.slane %v270_v21, 2  ;;  %v908_v1 = vrot.slane %v785_v62, 1  ;;  %v1100_v9 = vrot.slane %v785_v62, 2  ;;  %v1298_v24 = vunpack.c.l.bf16 %v1961_v63 }
  0xdc   : > { %1782 = vst.msk [vmem:[%s2232_s20 + $0xd0] sm:$0xff] %vm1755_vm2, %v1749_v37  ;;  %v1487_v48 = vadd.f32 %v1417_v25, %v1263_v22  ;;  %v1167_v32 = vadd.f32 %v1099_v14, %v975_v59  ;;  %v395_v15 = vsel %vm320_vm0, %v2804_v57, %v394_v47  ;;  %v206_v56 = vunpack.c.l.bf16 %v174_v39  ;;  %v1978_v25 = vld [vmem:[%s2149_s14 + $0xcc] sm:$0xe] }
  0xdd   : > { %v588_v49 = vsel %vm513_vm1, %v2815_v26, %v587_v34  ;;  %v1420_v52 = vsel %vm320_vm0, %v1418_v11, %v2910_v7  ;;  %v462_v45 = vadd.f32 %v2794_v18, %v395_v15  ;;  %v1612_v35 = vsel %vm513_vm1, %v1610_v12, %v2917_v41 }
  0xde   : > { %v1679_v50 = vadd.f32 %v1609_v5, %v1487_v48  ;;  %v1264_v29 = vadd.f32 %v2885_v10, %v1167_v32  ;;  %v909_v57 = vsel %vm320_vm0, %v906_v20, %v908_v1  ;;  %v207_v30 = vunpack.c.h.bf16 %v174_v39 }
  0xdf   : > { %v396_v26 = vrot.slane %v206_v56, 1  ;;  %v655_v6 = vadd.f32 %v588_v49, %v462_v45  ;;  %v496_v61 = vunpack.c.l.bf16 %v480_v60  ;;  %v1101_v44 = vsel %vm513_vm1, %v1098_v2, %v1100_v9  ;;  %v1962_v9 = vld [vmem:[%s2149_s14 + $0xd4] sm:$0x1] }
  0xe0   : > { %v1711_v31 = vmul.f32 0.11111111, %v1679_v50  ;;  %v1488_v4 = vadd.f32 %v1420_v52, %v1264_v29  ;;  %v1421_v53 = vrot.slane %v1298_v24, 1  ;;  %v397_v42 = vrot.slane %v207_v30, 1 }
  0xe1   : > { %v590_v18 = vrot.slane %v207_v30, 2  ;;  %v752_v0 = vadd.f32 %v2883_v33, %v655_v6  ;;  %v589_v38 = vrot.slane %v496_v61, 2  ;;  %v1613_v20 = vrot.slane %v1298_v24, 2 }
  0xe2   : > { %v1750_v13 = vadd.f32 %v2643_v8, %v1711_v31  ;;  %v1680_v19 = vadd.f32 %v1612_v35, %v1488_v4  ;;  %v398_v3 = vsel %vm320_vm0, %v396_v26, %v397_v42  ;;  %v1010_v27 = vunpack.c.l.bf16 %v1914_v16 }
  0xe3   : > { %v1234_v43 = vunpack.c.l.bf16 %v1945_v55  ;;  %v976_v51 = vadd.f32 %v909_v57, %v752_v0  ;;  %v463_v46 = vadd.f32 %v398_v3, %v206_v56  ;;  %v591_v40 = vsel %vm513_vm1, %v589_v38, %v590_v18 }
  0xe4   : > { %1783 = vst.msk [vmem:[%s2232_s20 + $0xd8] sm:$0xff] %vm1755_vm2, %v1750_v13  ;;  %v1712_v2 = vmul.f32 0.11111111, %v1680_v19  ;;  %v1102_v28 = vrot.slane %v1010_v27, 2  ;;  %v1235_v36 = vunpack.c.h.bf16 %v1945_v55  ;;  %v1422_v14 = vsel %vm320_vm0, %v2910_v7, %v1421_v53 }
  0xe5   : > { %v1168_v5 = vadd.f32 %v1101_v44, %v976_v51  ;;  %v656_v54 = vadd.f32 %v591_v40, %v463_v46  ;;  %v1614_v11 = vsel %vm513_vm1, %v2917_v41, %v1613_v20  ;;  %v1523_v21 = vunpack.c.l.bf16 %v1978_v25 }
  0xe6   : > { %v1751_v33 = vadd.f32 %v2643_v8, %v1712_v2  ;;  %v271_v62 = vunpack.c.l.bf16 %v255_v17  ;;  %v1423_v59 = vrot.slane %v1234_v43, 1  ;;  %v786_v63 = vunpack.c.l.bf16 %v1898_v58 }
  0xe7   : > { %v1265_v37 = vadd.f32 %v2896_v23, %v1168_v5  ;;  %v753_v22 = vadd.f32 %v2885_v10, %v656_v54  ;;  %v1104_v39 = vsel %vm513_vm1, %v1102_v28, %v2917_v41  ;;  %v1424_v12 = vrot.slane %v1235_v36, 1 }
  0xe8   : > { %1784 = vst.msk [vmem:[%s2232_s20 + $0xe0] sm:$0xff] %vm1755_vm2, %v1751_v33  ;;  %v399_v47 = vrot.slane %v271_v62, 1  ;;  %v592_v34 = vrot.slane %v271_v62, 2  ;;  %v1616_v32 = vrot.slane %v1235_v36, 2  ;;  %v1615_v15 = vrot.slane %v1523_v21, 2 }
  0xe9   : > { %v1489_v1 = vadd.f32 %v1422_v14, %v1265_v37  ;;  %v977_v48 = vadd.f32 %v1420_v52, %v753_v22  ;;  %v913_v56 = vrot.slane %v786_v63, 1  ;;  %v1425_v29 = vsel %vm320_vm0, %v1423_v59, %v1424_v12 }
  0xea   : > { %v400_v49 = vsel %vm320_vm0, %v397_v42, %v399_v47  ;;  %v593_v24 = vsel %vm513_vm1, %v590_v18, %v592_v34  ;;  %v1105_v45 = vrot.slane %v786_v63, 2  ;;  %v1299_v35 = vunpack.c.l.bf16 %v1962_v9 }
  0xeb   : > { %v1681_v60 = vadd.f32 %v1614_v11, %v1489_v1  ;;  %v1169_v10 = vadd.f32 %v1104_v39, %v977_v48  ;;  %v464_v50 = vadd.f32 %v400_v49, %v207_v30  ;;  %v1617_v52 = vsel %vm513_vm1, %v1615_v15, %v1616_v32 }
  0xec   : > { %v914_v4 = vsel %vm320_vm0, %v2910_v7, %v913_v56  ;;  %v1106_v30 = vsel %vm513_vm1, %v2917_v41, %v1105_v45  ;;  %v1426_v55 = vrot.slane %v1299_v35, 1  ;;  %v1618_v42 = vrot.slane %v1299_v35, 2 }
  0xed   : > { %v1713_v57 = vmul.f32 0.11111111, %v1681_v60  ;;  %v1266_v26 = vadd.f32 %v1234_v43, %v1169_v10  ;;  %v657_v31 = vadd.f32 %v593_v24, %v464_v50 }
  0xee   : > { %v1427_v7 = vsel %vm320_vm0, %v1424_v12, %v1426_v55  ;;  %v1619_v38 = vsel %vm513_vm1, %v1616_v32, %v1618_v42 }
  0xef   : > { %v1752_v6 = vadd.f32 %v2643_v8, %v1713_v57  ;;  %v1490_v61 = vadd.f32 %v1425_v29, %v1266_v26  ;;  %v754_v16 = vadd.f32 %v2896_v23, %v657_v31 }
  0xf1   : > { %1785 = vst.msk [vmem:[%s2232_s20 + $0xe8] sm:$0xff] %vm1755_vm2, %v1752_v6  ;;  %v1682_v44 = vadd.f32 %v1617_v52, %v1490_v61  ;;  %v978_v53 = vadd.f32 %v914_v4, %v754_v16 }
  0xf3   : > { %v1714_v18 = vmul.f32 0.11111111, %v1682_v44  ;;  %v1170_v13 = vadd.f32 %v1106_v30, %v978_v53 }
  0xf5   : > { %v1753_v19 = vadd.f32 %v2643_v8, %v1714_v18  ;;  %v1267_v0 = vadd.f32 %v1235_v36, %v1170_v13 }
  0xf7   : > { %1786 = vst.msk [vmem:[%s2232_s20 + $0xf0] sm:$0xff] %vm1755_vm2, %v1753_v19  ;;  %v1491_v23 = vadd.f32 %v1427_v7, %v1267_v0 }
  0xf9   : > { %v1683_v41 = vadd.f32 %v1619_v38, %v1491_v23 }
  0xfb   : > { %v1715_v20 = vmul.f32 0.11111111, %v1683_v41 }
  0xfd   : > { %v1754_v3 = vadd.f32 %v2643_v8, %v1715_v20 }
  0xff   : > { %1787 = vst.msk [vmem:[%s2232_s20 + $0xf8] sm:$0xff] %vm1755_vm2, %v1754_v3 }
 0x100 PF: > { %s12_s9 = sadd.s32 1, %s2118_s9  }
 0x101   : > { %p9_p4 = scmp.ge.s32.totalorder %s12_s9, 4  }
 0x103   :  { %11 = sbr.rel (!%p9_p4) target bundleno = 1 (0x1), region = 60 }

// kernel: inception_a_pallas.7
= control target key start
LH: loop header
LB: loop body
LE: loop exit
PB: predicated region body
PF: predicated region fallthrough
CT: control target
= control target key end

     0   :  { %s2524_s12 = smov 0   ;;  %s2526_s13 = smov 0   ;;  %s3379_s0 = inlined_call_operand.vmem [shape: bf16[2,18,18,64], index: 0, kind: input, shape index: {}]   ;;  %s3380_s1 = inlined_call_operand.vmem [shape: bf16[576,96], index: 1, kind: input, shape index: {}]   ;;  %s3381_s2 = inlined_call_operand.vmem [shape: f32[1,96], index: 2, kind: input, shape index: {}]   ;;  %s3382_s3 = inlined_call_operand.vmem [shape: bf16[2,16,16,96], index: 3, kind: output, shape index: {}]  }
   0x1   :  { %s2528_s14 = smov 0   ;;  %s2530_s15 = smov 0  }
   0x2   :  { %s2532_s16 = smov 0  }
   0x3 LB: > { %s22_s17 = sadd.s32 1, %s2493_s14  ;;  %s25_s18 = sadd.s32 1, %s2497_s15  ;;  %s2501_s16 = sphi %s2532_s16, %s13_s16   ;;  %s2497_s15 = sphi %s2530_s15, %s3426_s15   ;;  %s2493_s14 = sphi %s2528_s14, %s3425_s14   ;;  %s2489_s13 = sphi %s2526_s13, %s3424_s13   ;;  %s2485_s12 = sphi %s2524_s12, %s3423_s12  }
   0x4   : > { %p23_p0 = scmp.ge.s32.totalorder %s22_s17, 2  ;;  %p1903_p1 = scmp.ge.s32.totalorder %s2501_s16, 1 }
   0x5   : > { %p151_p2 = scmp.lt.s32.totalorder %s2501_s16, 5 }
   0x6   : > { %s3428_s17 = smov (%p23_p0, %s22_s17), 0  ;;  %s3430_s18 = smov (!%p23_p0, %s25_s18), %s2497_s15 }
   0x7   : > { %p152_p3 = pnand %p1903_p1, %p151_p2  ;;  %p27_p4 = scmp.ge.s32.totalorder %s3430_s18, 2 }
   0x9   : > { %s3432_s18 = smov (%p27_p4, %s3430_s18), 0  ;;  %155 = sbr.rel (%p152_p3) target bundleno = 426 (0x1aa), region = 32 }
   0xe   : > { %p180_p5 = scmp.lt.s32.totalorder %s2489_s13, 1  ;;  %v2402_v0 = vld [vmem:[%s3380_s1 + $0x78] sm:$0xff]   ;;  %s2115_s21 = smul.u32 96, %s2485_s12  ;;  %v2406_v4 = vld [vmem:[%s3380_s1 + $0x70] sm:$0xff]   ;;  %vm506_vm0 = vcmask 1046528   ;;  %v2410_v20 = vld [vmem:[%s3380_s1 + $0x68] sm:$0xff]  }
   0xf   : > { %v2403_v1 = vld [vmem:[%s3380_s1 + $0xf8] sm:$0xff]   ;;  %2132 = vmatprep.subr.bf16.mxu0 %v2402_v0  ;;  %v2407_v5 = vld [vmem:[%s3380_s1 + $0xf0] sm:$0xff]   ;;  %s2503_s23 = smov 64   ;;  %v2411_v27 = vld [vmem:[%s3380_s1 + $0xe8] sm:$0xff]   ;;  %vm369_vm1 = vsmask.f32 7424 }
  0x10   : > { %s3434_s13 = smov (!%p180_p5, %s2489_s13), 1  ;;  %v2404_v2 = vld [vmem:[%s3380_s1 + $0x38] sm:$0xff]   ;;  %2196 = vmatprep.subr.bf16.mxu1 %v2403_v1  ;;  %v2408_v6 = vld [vmem:[%s3380_s1 + $0x30] sm:$0xff]   ;;  %v2412_v39 = vld [vmem:[%s3380_s1 + $0x28] sm:$0xff]   ;;  %vm995_vm2 = vcmask 523264   ;;  %vm1782_vm3 = vcmask 781312  }
  0x11   : > { %s2304_s26 = smul.u32 216, %s3434_s13  ;;  %2133 = vmatpush3.bf16.msra.mxu0 %v2404_v2  ;;  %v2405_v3 = vld [vmem:[%s3380_s1 + $0xb8] sm:$0xff]   ;;  %v2409_v12 = vld [vmem:[%s3380_s1 + $0xb0] sm:$0xff]   ;;  %s1907_s25 = sshll.u32 %s3434_s13, 5 }
  0x12   : > { %2197 = vmatpush3.bf16.msra.mxu1 %v2405_v3  ;;  %2134 = vmatprep.subr.bf16.mxu0 %v2406_v4 }
  0x13   : > { %s184_s6 = scalar_lea.vmem %s3379_s0, %s2304_s26  ;;  %2198 = vmatprep.subr.bf16.mxu1 %v2407_v5 }
  0x14   : > { %s2581_s9 = scalar_lea.vmem %s184_s6, %s2115_s21 }
  0x15   : > { %v1915_v7 = vld [vmem:[%s2581_s9 + $0x10] sm:$0xf]  ;;  %v1938_v8 = vld [vmem:[%s2581_s9 + $0xc] sm:$0xe]  ;;  %2135 = vmatpush3.bf16.msra.mxu0 %v2408_v6  ;;  %v1948_v14 = vld [vmem:[%s2581_s9 + $0x18] sm:$0xf] }
  0x16   : > { %v2346_v9 = vld [vmem:[%s2581_s9 + $0x14] ss:$0 sps:$4 sm:$0x11]   ;;  %v2020_v10 = vcombine.low %v1938_v8, %v1915_v7  ;;  %v1914_v11 = vld [vmem:[%s2581_s9 + $0xc] sm:$0xf]  ;;  %2199 = vmatpush3.bf16.msra.mxu1 %v2409_v12  ;;  %2136 = vmatprep.subr.bf16.mxu0 %v2410_v20 }
  0x17   : > { %v2593_v13 = vcombine.low %v1914_v11, %v1915_v7  ;;  %v1949_v15 = vld [vmem:[%s2581_s9 + $0x1c] sm:$0xf]  ;;  %v732_v17 = vrot.slane %v2346_v9, 1  ;;  %v2350_v19 = vld [vmem:[%s2581_s9 + $0x20] ss:$0 sps:$4 sm:$0x11]   ;;  %2200 = vmatprep.subr.bf16.mxu1 %v2411_v27 }
  0x18   : > { %v731_v16 = vrot.slane %v2020_v10, 1  ;;  %v2597_v18 = vcombine.low %v1948_v14, %v1949_v15  ;;  %v201_v21 = vld [vmem:[%s2581_s9] sm:$0xf]  ;;  %v2607_v22 = vld [vmem:[%s2581_s9 + $0x4] sm:$0xf]  ;;  %v843_v26 = vshll.u32 %v2350_v19, 16 }
  0x19   : > { %571 = vrot.lane.b32.xlu0 %v2593_v13, %s2503_s23  ;;  %v2617_v28 = vcombine.low %v201_v21, %v2607_v22  ;;  %v2620_v29 = vld [vmem:[%s2581_s9 + $0x8] ss:$0 sps:$4 sm:$0x11]   ;;  %v1916_v32 = vld [vmem:[%s2581_s9 + $0x18] sm:$0xf]  ;;  %2137 = vmatpush3.bf16.msra.mxu0 %v2412_v39  ;;  %v2415_v27 = vld [vmem:[%s3380_s1 + $0xe0] sm:$0xff]  }
  0x1a   : > { %v733_v23 = vsel %vm506_vm0, %v731_v16, %v732_v17  ;;  %v836_v24 = vshrl.u32 %v2597_v18, 16  ;;  %v838_v25 = vshll.u32 %v2597_v18, 16  ;;  %v845_v31 = vrot.slane %v843_v26, 1  ;;  %v1917_v33 = vld [vmem:[%s2581_s9 + $0x1c] sm:$0xf]  ;;  %v2413_v8 = vld [vmem:[%s3380_s1 + $0xa8] sm:$0xff]  }
  0x1b   : > { %755 = vrot.lane.b32.xlu1 %v733_v23, %s2503_s23  ;;  %v1939_v34 = vld [vmem:[%s2581_s9 + $0x18] sm:$0xe]  ;;  %v371_v35 = vshrl.u32 %v2617_v28, 16  ;;  %v373_v36 = vshll.u32 %v2617_v28, 16  ;;  %v378_v37 = vshll.u32 %v2620_v29, 16  ;;  %v2645_v52 = vcombine.low %v1916_v32, %v1917_v33  ;;  %2201 = vmatpush3.bf16.msra.mxu1 %v2413_v8  ;;  %v2414_v16 = vld [vmem:[%s3380_s1 + $0x60] sm:$0xff]  }
  0x1c   : > { %v840_v30 = vrot.slane %v838_v25, 1  ;;  %v1950_v38 = vld [vmem:[%s2581_s9 + $0x24] sm:$0xf]  ;;  %v2021_v41 = vcombine.low %v1939_v34, %v1917_v33  ;;  %v1951_v42 = vld [vmem:[%s2581_s9 + $0x28] sm:$0xf]  ;;  %2138 = vmatprep.subr.bf16.mxu0 %v2414_v16  ;;  %2202 = vmatprep.subr.bf16.mxu1 %v2415_v27  ;;  %v2418_v16 = vld [vmem:[%s3380_s1 + $0x58] sm:$0xff]  }
  0x1d   : > { %v203_v43 = vld [vmem:[%s2581_s9 + $0xc] sm:$0xf]  ;;  %v375_v44 = vrot.slane %v373_v36, 1  ;;  %v380_v45 = vrot.slane %v378_v37, 1  ;;  %v2635_v46 = vld [vmem:[%s2581_s9 + $0x10] sm:$0xf]  ;;  %v2638_v48 = vcombine.low %v1950_v38, %v1951_v42 }
  0x1e   : > { %v841_v40 = vor.u32 %v840_v30, %v836_v24  ;;  %v2356_v49 = vld [vmem:[%s2581_s9 + $0x2c] ss:$0 sps:$4 sm:$0x11]   ;;  %v2642_v50 = vcombine.low %v203_v43, %v2635_v46  ;;  %v2648_v53 = vld [vmem:[%s2581_s9 + $0x14] ss:$0 sps:$4 sm:$0x11]  }
  0x1f   : > { %v376_v51 = vor.u32 %v375_v44, %v371_v35  ;;  %v848_v54 = vshrl.u32 %v2638_v48, 16  ;;  %v850_v55 = vshll.u32 %v2638_v48, 16  ;;  %v855_v56 = vshll.u32 %v2356_v49, 16  ;;  %v2657_v62 = vld [vmem:[%s2581_s9 + $0x20] ss:$0 sps:$4 sm:$0x11]  }
  0x20   : > { %v846_v47 = vsel %vm369_vm1, %v841_v40, %v845_v31  ;;  %3395 = vst [vmem:[#allocation2_spill] sm:$0xff] %v2642_v50  ;;  %v734_v57 = vrot.slane %v2021_v41, 1  ;;  %v383_v59 = vshrl.u32 %v2642_v50, 16  ;;  %v385_v60 = vshll.u32 %v2642_v50, 16  ;;  %v1918_v1 = vld [vmem:[%s2581_s9 + $0x24] sm:$0xf] }
  0x21   : > { %931 = vrot.lane.b32.xlu0 %v846_v47, %s2503_s23  ;;  %v381_v58 = vsel %vm369_vm1, %v376_v51, %v380_v45  ;;  %v390_v61 = vshll.u32 %v2648_v53, 16  ;;  %v852_v63 = vrot.slane %v850_v55, 1  ;;  %v857_v0 = vrot.slane %v855_v56, 1  ;;  %v1919_v2 = vld [vmem:[%s2581_s9 + $0x28] sm:$0xf]  ;;  %v2416_v55 = vld [vmem:[%s3380_s1 + $0x20] sm:$0xff]  }
  0x22   : > { %466 = vrot.lane.b32.xlu1 %v381_v58, %s2503_s23  ;;  %v1940_v3 = vld [vmem:[%s2581_s9 + $0x24] sm:$0xe]  ;;  %v387_v4 = vrot.slane %v385_v60, 1  ;;  %v735_v6 = vrot.slane %v2657_v62, 1  ;;  %v1952_v7 = vld [vmem:[%s2581_s9 + $0x30] sm:$0xf]  ;;  %v2684_v23 = vcombine.low %v1918_v1, %v1919_v2  ;;  %2139 = vmatpush3.bf16.msra.mxu0 %v2416_v55 }
  0x23   : > { %v392_v5 = vrot.slane %v390_v61, 1  ;;  %v853_v9 = vor.u32 %v852_v63, %v848_v54  ;;  %v2022_v10 = vcombine.low %v1940_v3, %v1919_v2  ;;  %v1953_v11 = vld [vmem:[%s2581_s9 + $0x34] sm:$0xf]  ;;  %v205_v12 = vld [vmem:[%s2581_s9 + $0x18] sm:$0xf]  ;;  %v2417_v2 = vld [vmem:[%s3380_s1 + $0xa0] sm:$0xff]   ;;  %2140 = vmatprep.subr.bf16.mxu0 %v2418_v16 }
  0x24   : > { %v388_v14 = vor.u32 %v387_v4, %v383_v59  ;;  %v2363_v15 = vld [vmem:[%s2581_s9 + $0x38] ss:$0 sps:$4 sm:$0x11]   ;;  %v2677_v19 = vcombine.low %v1952_v7, %v1953_v11  ;;  %v2680_v20 = vld [vmem:[%s2581_s9 + $0x1c] sm:$0xf]  ;;  %v736_v30 = vsel %vm506_vm0, %v734_v57, %v735_v6  ;;  %2203 = vmatpush3.bf16.msra.mxu1 %v2417_v2 }
  0x25   : > { %573 = vrot.lane.b32.xlu0 %v2645_v52, %s2503_s23  ;;  %v858_v17 = vsel %vm369_vm1, %v853_v9, %v857_v0  ;;  %v867_v24 = vshll.u32 %v2363_v15, 16  ;;  %v2687_v25 = vcombine.low %v205_v12, %v2680_v20  ;;  %v2690_v26 = vld [vmem:[%s2581_s9 + $0x20] ss:$0 sps:$4 sm:$0x11]   ;;  %v737_v34 = vrot.slane %v2022_v10, 1  ;;  %v2421_v55 = vld [vmem:[%s3380_s1 + $0x98] sm:$0xff]  }
  0x26   : > { %3396 = vst [vmem:[#allocation3_spill] sm:$0xff] %v2677_v19  ;;  %933 = vrot.lane.b32.xlu1 %v858_v17, %s2503_s23  ;;  %v393_v21 = vsel %vm369_vm1, %v388_v14, %v392_v5  ;;  %v860_v31 = vshrl.u32 %v2677_v19, 16  ;;  %v862_v32 = vshll.u32 %v2677_v19, 16  ;;  %v2700_v33 = vld [vmem:[%s2581_s9 + $0x2c] ss:$0 sps:$4 sm:$0x11]  }
  0x27   : > { %3397 = vst [vmem:[#allocation4_spill] sm:$0xff] %v2687_v25  ;;  %v869_v35 = vrot.slane %v867_v24, 1  ;;  %v395_v36 = vshrl.u32 %v2687_v25, 16  ;;  %v397_v37 = vshll.u32 %v2687_v25, 16  ;;  %v402_v38 = vshll.u32 %v2690_v26, 16 }
  0x28   : > { %v864_v39 = vrot.slane %v862_v32, 1  ;;  %v738_v40 = vrot.slane %v2700_v33, 1  ;;  %v1921_v41 = vld [vmem:[%s2581_s9 + $0x34] sm:$0xf]  ;;  %v1941_v42 = vld [vmem:[%s2581_s9 + $0x30] sm:$0xe] }
  0x29   : > { %468 = vrot.lane.b32.xlu0 %v393_v21, %s2503_s23  ;;  %v399_v43 = vrot.slane %v397_v37, 1  ;;  %v404_v44 = vrot.slane %v402_v38, 1  ;;  %v1954_v45 = vld [vmem:[%s2581_s9 + $0x3c] sm:$0xf]  ;;  %v1955_v47 = vld [vmem:[%s2581_s9 + $0x40] sm:$0xf]  ;;  %v2023_v58 = vcombine.low %v1941_v42, %v1921_v41 }
  0x2a   : > { %757 = vrot.lane.b32.xlu1 %v736_v30, %s2503_s23  ;;  %v865_v49 = vor.u32 %v864_v39, %v860_v31  ;;  %v2713_v51 = vcombine.low %v1954_v45, %v1955_v47  ;;  %v2370_v54 = vld [vmem:[%s2581_s9 + $0x44] ss:$0 sps:$4 sm:$0x11]   ;;  %v1920_v57 = vld [vmem:[%s2581_s9 + $0x30] sm:$0xf]  ;;  %v739_v6 = vsel %vm506_vm0, %v737_v34, %v738_v40  ;;  %v2419_v31 = vld [vmem:[%s3380_s1 + $0xd8] sm:$0xff]  }
  0x2b   : > { %v400_v56 = vor.u32 %v399_v43, %v395_v36  ;;  %v207_v59 = vld [vmem:[%s2581_s9 + $0x24] sm:$0xf]  ;;  %v2722_v60 = vld [vmem:[%s2581_s9 + $0x28] sm:$0xf]  ;;  %v879_v1 = vshll.u32 %v2370_v54, 16  ;;  %v2740_v7 = vcombine.low %v1920_v57, %v1921_v41  ;;  %v740_v15 = vrot.slane %v2023_v58, 1  ;;  %2204 = vmatprep.subr.bf16.mxu1 %v2419_v31 }
  0x2c   : > { %3398 = vst [vmem:[#allocation5_spill] sm:$0xff] %v2713_v51  ;;  %v870_v61 = vsel %vm369_vm1, %v865_v49, %v869_v35  ;;  %v872_v63 = vshrl.u32 %v2713_v51, 16  ;;  %v874_v0 = vshll.u32 %v2713_v51, 16  ;;  %v2733_v4 = vcombine.low %v207_v59, %v2722_v60  ;;  %v2736_v5 = vld [vmem:[%s2581_s9 + $0x2c] ss:$0 sps:$4 sm:$0x11]   ;;  %2205 = vmatpush3.bf16.msra.mxu1 %v2421_v55 }
  0x2d   : > { %575 = vrot.lane.b32.xlu0 %v2684_v23, %s2503_s23  ;;  %v405_v3 = vsel %vm369_vm1, %v400_v56, %v404_v44  ;;  %v881_v9 = vrot.slane %v879_v1, 1  ;;  %v2743_v10 = vld [vmem:[%s2581_s9 + $0x38] ss:$0 sps:$4 sm:$0x11]   ;;  %v414_v14 = vshll.u32 %v2736_v5, 16  ;;  %v638_v56 = vshll.u32 %v2684_v23, 16 }
  0x2e   : > { %935 = vrot.lane.b32.xlu1 %v870_v61, %s2503_s23  ;;  %3399 = vst [vmem:[#allocation6_spill] sm:$0xff] %v2733_v4  ;;  %v876_v8 = vrot.slane %v874_v0, 1  ;;  %v407_v11 = vshrl.u32 %v2733_v4, 16  ;;  %v409_v12 = vshll.u32 %v2733_v4, 16  ;;  %v741_v21 = vrot.slane %v2743_v10, 1  ;;  %v2420_v40 = vld [vmem:[%s3380_s1 + $0x18] sm:$0xff]  }
  0x2f   : > { %v1922_v24 = vld [vmem:[%s2581_s9 + $0x3c] sm:$0xf]  ;;  %v1923_v27 = vld [vmem:[%s2581_s9 + $0x40] sm:$0xf]  ;;  %v416_v34 = vrot.slane %v414_v14, 1  ;;  %2141 = vmatpush3.bf16.msra.mxu0 %v2420_v40  ;;  %v2424_v40 = vld [vmem:[%s3380_s1 + $0x10] sm:$0xff]  }
  0x30   : > { %v877_v17 = vor.u32 %v876_v8, %v872_v63  ;;  %v1942_v30 = vld [vmem:[%s2581_s9 + $0x3c] sm:$0xe]  ;;  %v411_v32 = vrot.slane %v409_v12, 1  ;;  %v1956_v35 = vld [vmem:[%s2581_s9 + $0x48] sm:$0xf]  ;;  %v742_v58 = vsel %vm506_vm0, %v740_v15, %v741_v21  ;;  %v2792_v59 = vcombine.low %v1922_v24, %v1923_v27 }
  0x31   : > { %470 = vrot.lane.b32.xlu0 %v405_v3, %s2503_s23  ;;  %v2761_v36 = vld [vmem:[%s2581_s9 + $0x4c] sm:$0xf]  ;;  %v2770_v39 = vld [vmem:[%s2581_s9 + $0x50] ss:$0 sps:$4 sm:$0x11]   ;;  %v2024_v42 = vcombine.low %v1942_v30, %v1923_v27 }
  0x32   : > { %759 = vrot.lane.b32.xlu1 %v739_v6, %s2503_s23  ;;  %v882_v37 = vsel %vm369_vm1, %v877_v17, %v881_v9  ;;  %v2767_v38 = vcombine.low %v1956_v35, %v2761_v36  ;;  %v412_v41 = vor.u32 %v411_v32, %v407_v11  ;;  %v209_v43 = vld [vmem:[%s2581_s9 + $0x30] sm:$0xf]  ;;  %v2777_v44 = vld [vmem:[%s2581_s9 + $0x34] sm:$0xf]  ;;  %v891_v49 = vshll.u32 %v2770_v39, 16 }
  0x33   : > { %v2783_v54 = vcombine.low %v209_v43, %v2777_v44  ;;  %v2795_v61 = vld [vmem:[%s2581_s9 + $0x38] ss:$0 sps:$4 sm:$0x11]   ;;  %v2802_v6 = vld [vmem:[%s2581_s9 + $0x44] ss:$0 sps:$4 sm:$0x11]  }
  0x34   : > { %3400 = vst [vmem:[#allocation7_spill] sm:$0xff] %v2767_v38  ;;  %v884_v45 = vshrl.u32 %v2767_v38, 16  ;;  %v886_v47 = vshll.u32 %v2767_v38, 16  ;;  %v417_v57 = vsel %vm369_vm1, %v412_v41, %v416_v34  ;;  %v893_v0 = vrot.slane %v891_v49, 1  ;;  %v2422_v9 = vld [vmem:[%s3380_s1 + $0x50] sm:$0xff]  }
  0x35   : > { %577 = vrot.lane.b32.xlu0 %v2740_v7, %s2503_s23  ;;  %3401 = vst [vmem:[#allocation8_spill] sm:$0xff] %v2783_v54  ;;  %v419_v1 = vshrl.u32 %v2783_v54, 16  ;;  %v421_v2 = vshll.u32 %v2783_v54, 16  ;;  %v426_v3 = vshll.u32 %v2795_v61, 16  ;;  %v743_v8 = vrot.slane %v2024_v42, 1  ;;  %v2423_v17 = vld [vmem:[%s3380_s1 + $0xd0] sm:$0xff]   ;;  %2142 = vmatprep.subr.bf16.mxu0 %v2422_v9 }
  0x36   : > { %937 = vrot.lane.b32.xlu1 %v882_v37, %s2503_s23  ;;  %v888_v63 = vrot.slane %v886_v47, 1  ;;  %v1924_v14 = vld [vmem:[%s2581_s9 + $0x48] sm:$0xf]  ;;  %v1925_v15 = vld [vmem:[%s2581_s9 + $0x4c] sm:$0xf]  ;;  %v744_v24 = vrot.slane %v2802_v6, 1  ;;  %2206 = vmatprep.subr.bf16.mxu1 %v2423_v17 }
  0x37   : > { %v423_v12 = vrot.slane %v421_v2, 1  ;;  %v1943_v16 = vld [vmem:[%s2581_s9 + $0x48] sm:$0xe]  ;;  %v428_v21 = vrot.slane %v426_v3, 1  ;;  %v1958_v30 = vld [vmem:[%s2581_s9 + $0x54] sm:$0xf]  ;;  %2143 = vmatpush3.bf16.msra.mxu0 %v2424_v40 }
  0x38   : > { %v889_v11 = vor.u32 %v888_v63, %v884_v45  ;;  %v2025_v27 = vcombine.low %v1943_v16, %v1925_v15  ;;  %v2817_v31 = vld [vmem:[%s2581_s9 + $0x58] sm:$0xf]  ;;  %v2826_v37 = vld [vmem:[%s2581_s9 + $0x5c] ss:$0 sps:$4 sm:$0x11]   ;;  %v2832_v42 = vrot.slane %v638_v56, 1  ;;  %v745_v3 = vsel %vm506_vm0, %v743_v8, %v744_v24 }
  0x39   : > { %472 = vrot.lane.b32.xlu0 %v417_v57, %s2503_s23  ;;  %v424_v34 = vor.u32 %v423_v12, %v419_v1  ;;  %v2823_v35 = vcombine.low %v1958_v30, %v2817_v31  ;;  %v211_v43 = vld [vmem:[%s2581_s9 + $0x3c] sm:$0xf]  ;;  %v2836_v45 = vld [vmem:[%s2581_s9 + $0x40] sm:$0xf]  ;;  %v903_v57 = vshll.u32 %v2826_v37, 16  ;;  %v650_v63 = vshll.u32 %v2740_v7, 16 }
  0x3a   : > { %761 = vrot.lane.b32.xlu1 %v742_v58, %s2503_s23  ;;  %v894_v32 = vsel %vm369_vm1, %v889_v11, %v893_v0  ;;  %v2425_v58 = vld [vmem:[%s3380_s1 + $0x90] sm:$0xff]   ;;  %v2848_v0 = vcombine.low %v1924_v14, %v1925_v15  ;;  %v2851_v1 = vcombine.low %v211_v43, %v2836_v45  ;;  %v2854_v2 = vld [vmem:[%s2581_s9 + $0x44] ss:$0 sps:$4 sm:$0x11]   ;;  %v746_v12 = vrot.slane %v2025_v27, 1 }
  0x3b   : > { %3402 = vst [vmem:[#allocation9_spill] sm:$0xff] %v2823_v35  ;;  %v429_v47 = vsel %vm369_vm1, %v424_v34, %v428_v21  ;;  %v896_v49 = vshrl.u32 %v2823_v35, 16  ;;  %v898_v55 = vshll.u32 %v2823_v35, 16  ;;  %v905_v11 = vrot.slane %v903_v57, 1  ;;  %2207 = vmatpush3.bf16.msra.mxu1 %v2425_v58  ;;  %v1926_v30 = vld [vmem:[%s2581_s9 + $0x54] sm:$0xf] }
  0x3c   : > { %3403 = vst [vmem:[#allocation10_spill] sm:$0xff] %v2851_v1  ;;  %v431_v16 = vshrl.u32 %v2851_v1, 16  ;;  %v433_v14 = vshll.u32 %v2851_v1, 16  ;;  %v438_v15 = vshll.u32 %v2854_v2, 16  ;;  %v1944_v34 = vld [vmem:[%s2581_s9 + $0x54] sm:$0xe] }
  0x3d   : > { %579 = vrot.lane.b32.xlu0 %v2792_v59, %s2503_s23  ;;  %v900_v9 = vrot.slane %v898_v55, 1  ;;  %v2862_v17 = vld [vmem:[%s2581_s9 + $0x50] ss:$0 sps:$4 sm:$0x11]   ;;  %v1960_v8 = vld [vmem:[%s2581_s9 + $0x60] sm:$0xf] }
  0x3e   : > { %939 = vrot.lane.b32.xlu1 %v894_v32, %s2503_s23  ;;  %v1927_v32 = vld [vmem:[%s2581_s9 + $0x58] sm:$0xf]  ;;  %v435_v24 = vrot.slane %v433_v14, 1  ;;  %v440_v27 = vrot.slane %v438_v15, 1  ;;  %v747_v40 = vrot.slane %v2862_v17, 1  ;;  %v2427_v58 = vld [vmem:[%s3380_s1 + $0xc8] sm:$0xff]  }
  0x3f   : > { %v901_v21 = vor.u32 %v900_v9, %v896_v49  ;;  %v2871_v43 = vld [vmem:[%s2581_s9 + $0x64] sm:$0xf]  ;;  %v2883_v57 = vld [vmem:[%s2581_s9 + $0x68] ss:$0 sps:$4 sm:$0x11]   ;;  %2208 = vmatprep.subr.bf16.mxu1 %v2427_v58  ;;  %v2026_v9 = vcombine.low %v1944_v34, %v1927_v32 }
  0x40   : > { %v2880_v55 = vcombine.low %v1960_v8, %v2871_v43  ;;  %v436_v14 = vor.u32 %v435_v24, %v431_v16  ;;  %v213_v15 = vld [vmem:[%s2581_s9 + $0x48] sm:$0xf]  ;;  %v2893_v56 = vld [vmem:[%s2581_s9 + $0x4c] sm:$0xf]  ;;  %v915_v8 = vshll.u32 %v2883_v57, 16  ;;  %v748_v24 = vsel %vm506_vm0, %v746_v12, %v747_v40 }
  0x41   : > { %474 = vrot.lane.b32.xlu0 %v429_v47, %s2503_s23  ;;  %v2426_v47 = vld [vmem:[%s3380_s1 + $0x48] sm:$0xff]   ;;  %v906_v49 = vsel %vm369_vm1, %v901_v21, %v905_v11  ;;  %v2899_v41 = vcombine.low %v213_v15, %v2893_v56  ;;  %v2910_v15 = vld [vmem:[%s2581_s9 + $0x50] ss:$0 sps:$4 sm:$0x11]   ;;  %v662_v12 = vshll.u32 %v2792_v59, 16 }
  0x42   : > { %763 = vrot.lane.b32.xlu1 %v745_v3, %s2503_s23  ;;  %3404 = vst [vmem:[#allocation11_spill] sm:$0xff] %v2880_v55  ;;  %v2888_v3 = vrot.slane %v650_v63, 1  ;;  %2144 = vmatprep.subr.bf16.mxu0 %v2426_v47  ;;  %v908_v11 = vshrl.u32 %v2880_v55, 16  ;;  %v910_v21 = vshll.u32 %v2880_v55, 16  ;;  %v2428_v63 = vld [vmem:[%s3380_s1 + $0x8] sm:$0xff]   ;;  %v441_v16 = vsel %vm369_vm1, %v436_v14, %v440_v27 }
  0x43   : > { %3405 = vst [vmem:[#allocation12_spill] sm:$0xff] %v2899_v41  ;;  %v2907_v47 = vcombine.low %v1926_v30, %v1927_v32  ;;  %v917_v55 = vrot.slane %v915_v8, 1  ;;  %v443_v1 = vshrl.u32 %v2899_v41, 16  ;;  %2145 = vmatpush3.bf16.msra.mxu0 %v2428_v63  ;;  %v450_v30 = vshll.u32 %v2910_v15, 16  ;;  %v2429_v32 = vld [vmem:[%s3380_s1 + $0x88] sm:$0xff]   ;;  %v2430_v63 = vld [vmem:[%s3380_s1 + $0x40] sm:$0xff]  }
  0x44   : > { %v912_v58 = vrot.slane %v910_v21, 1  ;;  %v2918_v27 = vld [vmem:[%s2581_s9 + $0x5c] ss:$0 sps:$4 sm:$0x11]   ;;  %v1928_v14 = vld [vmem:[%s2581_s9 + $0x60] sm:$0xf]  ;;  %2209 = vmatpush3.bf16.msra.mxu1 %v2429_v32  ;;  %2146 = vmatprep.subr.bf16.mxu0 %v2430_v63 }
  0x45   : > { %581 = vrot.lane.b32.xlu0 %v2848_v0, %s2503_s23  ;;  %v1929_v21 = vld [vmem:[%s2581_s9 + $0x64] sm:$0xf]  ;;  %v1945_v8 = vld [vmem:[%s2581_s9 + $0x60] sm:$0xe]  ;;  %v1962_v54 = vld [vmem:[%s2581_s9 + $0x6c] sm:$0xf] }
  0x46   : > { %941 = vrot.lane.b32.xlu1 %v906_v49, %s2503_s23  ;;  %v445_v49 = vshll.u32 %v2899_v41, 16  ;;  %v913_v34 = vor.u32 %v912_v58, %v908_v11  ;;  %v749_v41 = vrot.slane %v2026_v9, 1  ;;  %v2027_v35 = vcombine.low %v1945_v8, %v1929_v21  ;;  %v2932_v38 = vld [vmem:[%s2581_s9 + $0x70] sm:$0xf]  ;;  %v215_v8 = vld [vmem:[%s2581_s9 + $0x54] sm:$0xf] }
  0x47   : > { %v2939_v4 = vcombine.low %v1962_v54, %v2932_v38  ;;  %v664_v9 = vrot.slane %v662_v12, 1  ;;  %v2947_v32 = vld [vmem:[%s2581_s9 + $0x58] sm:$0xf]  ;;  %v674_v12 = vshll.u32 %v2848_v0, 16 }
  0x48   : > { %v447_v40 = vrot.slane %v445_v49, 1  ;;  %v918_v11 = vsel %vm369_vm1, %v913_v34, %v917_v55  ;;  %v750_v49 = vrot.slane %v2918_v27, 1  ;;  %v2432_v34 = vld [vmem:[%s3380_s1 + $0xc0] sm:$0xff]   ;;  %v2959_v63 = vcombine.low %v215_v8, %v2947_v32  ;;  %v2967_v25 = vld [vmem:[%s2581_s9 + $0x68] ss:$0 sps:$4 sm:$0x11]  }
  0x49   : > { %476 = vrot.lane.b32.xlu0 %v441_v16, %s2503_s23  ;;  %v452_v16 = vrot.slane %v450_v30, 1  ;;  %3406 = vst [vmem:[#allocation13_spill] sm:$0xff] %v2939_v4  ;;  %v922_v55 = vshll.u32 %v2939_v4, 16  ;;  %v2962_v30 = vld [vmem:[%s2581_s9 + $0x5c] ss:$0 sps:$4 sm:$0x11]   ;;  %2210 = vmatprep.subr.bf16.mxu1 %v2432_v34 }
  0x4a   : > { %765 = vrot.lane.b32.xlu1 %v748_v24, %s2503_s23  ;;  %v448_v58 = vor.u32 %v447_v40, %v443_v1  ;;  %v2942_v24 = vld [vmem:[%s2581_s9 + $0x74] ss:$0 sps:$4 sm:$0x11]   ;;  %v920_v1 = vshrl.u32 %v2939_v4, 16  ;;  %v2011_v40 = vcombine.low %v1928_v14, %v1929_v21  ;;  %v752_v19 = vrot.slane %v2027_v35, 1  ;;  %v2433_v21 = vld [vmem:[%s3380_s1] sm:$0xff]  }
  0x4b   : > { %v927_v54 = vshll.u32 %v2942_v24, 16  ;;  %v455_v50 = vshrl.u32 %v2959_v63, 16  ;;  %v462_v14 = vshll.u32 %v2962_v30, 16  ;;  %2147 = vmatpush3.bf16.msra.mxu0 %v2433_v21 }
  0x4c   : > { %v453_v51 = vsel %vm369_vm1, %v448_v58, %v452_v16  ;;  %v751_v16 = vsel %vm506_vm0, %v749_v41, %v750_v49  ;;  %v924_v58 = vrot.slane %v922_v55, 1  ;;  %v2434_v41 = vld [vmem:[%s3380_s1 + $0x80] sm:$0xff]   ;;  %v696_v21 = vshrl.u32 %v2011_v40, 16 }
  0x4d   : > { %583 = vrot.lane.b32.xlu0 %v2907_v47, %s2503_s23  ;;  %v929_v4 = vrot.slane %v927_v54, 1  ;;  %v464_v49 = vrot.slane %v462_v14, 1  ;;  %2211 = vmatpush3.bf16.msra.mxu1 %v2434_v41 }
  0x4e   : > { %943 = vrot.lane.b32.xlu1 %v918_v11, %s2503_s23  ;;  %v457_v11 = vshll.u32 %v2959_v63, 16  ;;  %v925_v8 = vor.u32 %v924_v58, %v920_v1  ;;  %v698_v58 = vshll.u32 %v2011_v40, 16 }
  0x50   : > { %v459_v35 = vrot.slane %v457_v11, 1  ;;  %v930_v55 = vsel %vm369_vm1, %v925_v8, %v929_v4  ;;  %v676_v11 = vrot.slane %v674_v12, 1  ;;  %v684_v4 = vshrl.u32 %v2907_v47, 16 }
  0x51   : > { %478 = vrot.lane.b32.xlu0 %v453_v51, %s2503_s23  ;;  %v753_v51 = vrot.slane %v2967_v25, 1  ;;  %v700_v8 = vrot.slane %v698_v58, 1 }
  0x52   : > { %767 = vrot.lane.b32.xlu1 %v751_v16, %s2503_s23  ;;  %v460_v54 = vor.u32 %v459_v35, %v455_v50  ;;  %v686_v16 = vshll.u32 %v2907_v47, 16  ;;  %v2991_v50 = vld [vmem:[%s3380_s1 + $0x118] sm:$0xff]   ;;  %v514_v35 = vrot.slane %v2690_v26, 1  ;;  %v643_v47 = vshll.u32 %v2700_v33, 16 }
  0x53   : > { %v754_v34 = vsel %vm506_vm0, %v752_v19, %v753_v51  ;;  %2272 = vmatprep.subr.bf16.mxu0 %v2991_v50  ;;  %2296 = vmatprep.subr.bf16.mxu1 %v2991_v50  ;;  %v227_v19 = vld [vmem:[%s2581_s9 + $0x18] sm:$0xe]  ;;  %v3407_v51 = vshrl.u32 %v2684_v23, 16  ;;  %v655_v23 = vshll.u32 %v2743_v10, 16  ;;  %v3410_v33 = vshrl.u32 %v2848_v0, 16 }
  0x54   : > { %v465_v1 = vsel %vm369_vm1, %v460_v54, %v464_v49  ;;  %v688_v14 = vrot.slane %v686_v16, 1  ;;  %v1998_v41 = vcombine.low %v227_v19, %v2680_v20  ;;  %v228_v49 = vld [vmem:[%s2581_s9 + $0x24] sm:$0xe]  ;;  %v3409_v20 = vshrl.u32 %v2792_v59, 16 }
  0x55   : > { %585 = vrot.lane.b32.xlu0 %v2011_v40, %s2503_s23  ;;  %v641_v12 = vor.u32 %v2832_v42, %v3407_v51  ;;  %v3408_v40 = vshrl.u32 %v2740_v7, 16  ;;  %v1999_v54 = vcombine.low %v228_v49, %v2722_v60  ;;  %v229_v42 = vld [vmem:[%s2581_s9 + $0x30] sm:$0xe]  ;;  %v645_v16 = vrot.slane %v643_v47, 1  ;;  %v230_v60 = vld [vmem:[%s2581_s9 + $0x3c] sm:$0xe] }
  0x56   : > { %945 = vrot.lane.b32.xlu1 %v930_v55, %s2503_s23  ;;  %v513_v26 = vrot.slane %v1998_v41, 1  ;;  %v677_v58 = vor.u32 %v676_v11, %v3410_v33  ;;  %v689_v19 = vor.u32 %v688_v14, %v684_v4  ;;  %v657_v51 = vrot.slane %v655_v23, 1  ;;  %v231_v49 = vld [vmem:[%s2581_s9 + $0x48] sm:$0xe] }
  0x57   : > { %v653_v55 = vor.u32 %v2888_v3, %v3408_v40  ;;  %v516_v7 = vrot.slane %v1999_v54, 1  ;;  %v2000_v3 = vcombine.low %v229_v42, %v2777_v44  ;;  %v3022_v59 = vsel %vm369_vm1, %v641_v12, %v645_v16 }
  0x58   : > { %v3019_v10 = vsel %vm506_vm0, %v513_v26, %v514_v35  ;;  %v667_v0 = vshll.u32 %v2802_v6, 16  ;;  %v2001_v14 = vcombine.low %v230_v60, %v2836_v45  ;;  %v523_v41 = vrot.slane %v2854_v2, 1 }
  0x59   : > { %480 = vrot.lane.b32.xlu0 %v465_v1, %s2503_s23  ;;  %v517_v1 = vrot.slane %v2736_v5, 1  ;;  %v701_v5 = vor.u32 %v700_v8, %v696_v21  ;;  %v3030_v4 = vsel %vm369_vm1, %v653_v55, %v657_v51  ;;  %v519_v44 = vrot.slane %v2000_v3, 1  ;;  %v232_v21 = vld [vmem:[%s2581_s9 + $0x54] sm:$0xe]  ;;  %v1978_v51 = vld [vmem:[%s2581_s9 + $0x60] sm:$0xe] }
  0x5a   : > { %769 = vrot.lane.b32.xlu1 %v754_v34, %s2503_s23  ;;  %v665_v34 = vor.u32 %v664_v9, %v3409_v20  ;;  %v520_v9 = vrot.slane %v2795_v61, 1  ;;  %v669_v8 = vrot.slane %v667_v0, 1  ;;  %v679_v12 = vshll.u32 %v2862_v17, 16 }
  0x5b   : > { %v3027_v11 = vsel %vm506_vm0, %v516_v7, %v517_v1  ;;  %v2002_v61 = vcombine.low %v231_v49, %v2893_v56  ;;  %v522_v35 = vrot.slane %v2001_v14, 1  ;;  %v526_v47 = vrot.slane %v2910_v15, 1  ;;  %v1976_v15 = vld [vmem:[%s2581_s9 + $0x48] sm:$0xe] }
  0x5c   : > { %v3038_v6 = vsel %vm506_vm0, %v519_v44, %v520_v9  ;;  %v691_v40 = vshll.u32 %v2918_v27, 16  ;;  %v3043_v45 = vsel %vm369_vm1, %v665_v34, %v669_v8  ;;  %v681_v55 = vrot.slane %v679_v12, 1  ;;  %v1977_v34 = vld [vmem:[%s2581_s9 + $0x54] sm:$0xe] }
  0x5d   : > { %v525_v54 = vrot.slane %v2002_v61, 1  ;;  %v2003_v2 = vcombine.low %v232_v21, %v2947_v32  ;;  %v3047_v17 = vsel %vm506_vm0, %v522_v35, %v523_v41  ;;  %v529_v1 = vrot.slane %v2962_v30, 1  ;;  %v2454_v61 = vld [vmem:[%s2581_s9 + $0x14] ss:$0 sps:$4 sm:$0x11]  }
  0x5e   : > { %v693_v56 = vrot.slane %v691_v40, 1  ;;  %v703_v23 = vshll.u32 %v2967_v25, 16  ;;  %v3053_v27 = vsel %vm369_vm1, %v677_v58, %v681_v55  ;;  %v2048_v30 = vcombine.low %v1976_v15, %v2761_v36 }
  0x5f   : > { %v3056_v42 = vsel %vm506_vm0, %v525_v54, %v526_v47  ;;  %v528_v20 = vrot.slane %v2003_v2, 1  ;;  %v984_v25 = vrot.slane %v2770_v39, 1  ;;  %v987_v33 = vrot.slane %v2826_v37, 1  ;;  %v226_v47 = vld [vmem:[%s2581_s9 + $0xc] sm:$0xe] }
  0x60   : > { %v3060_v32 = vsel %vm369_vm1, %v689_v19, %v693_v56  ;;  %v705_v26 = vrot.slane %v703_v23, 1  ;;  %v2049_v7 = vcombine.low %v1977_v34, %v2817_v31  ;;  %v983_v3 = vrot.slane %v2048_v30, 1  ;;  %v1979_v19 = vld [vmem:[%s2581_s9 + $0x6c] sm:$0xe] }
  0x61   : > { %v3063_v16 = vsel %vm506_vm0, %v528_v20, %v529_v1  ;;  %v2050_v9 = vcombine.low %v1978_v51, %v2871_v43  ;;  %v990_v36 = vrot.slane %v2883_v57, 1  ;;  %v2051_v37 = vcombine.low %v1979_v19, %v2932_v38  ;;  %v225_v43 = vld [vmem:[%s2581_s9] sm:$0xe]  ;;  %v2441_v51 = vld [vmem:[%s3380_s1 + $0x108] sm:$0xff]  }
  0x62   : > { %v3069_v58 = vsel %vm369_vm1, %v701_v5, %v705_v26  ;;  %v986_v60 = vrot.slane %v2049_v7, 1  ;;  %v3075_v49 = vsel %vm506_vm0, %v983_v3, %v984_v25  ;;  %v993_v5 = vrot.slane %v2942_v24, 1 }
  0x63   : > { %v989_v31 = vrot.slane %v2050_v9, 1  ;;  %v992_v0 = vrot.slane %v2051_v37, 1  ;;  %v1996_v57 = vcombine.low %v225_v43, %v2607_v22  ;;  %v508_v8 = vrot.slane %v2620_v29, 1  ;;  %v2444_v9 = vld [vmem:[%s3380_s1 + $0x100] sm:$0xff]  }
  0x64   : > { %v3080_v39 = vsel %vm506_vm0, %v986_v60, %v987_v33  ;;  %v614_v41 = vshll.u32 %v2593_v13, 16  ;;  %v612_v24 = vshrl.u32 %v2593_v13, 16  ;;  %v619_v35 = vshll.u32 %v2454_v61, 16 }
  0x65   : > { %v3085_v44 = vsel %vm506_vm0, %v989_v31, %v990_v36  ;;  %v3088_v14 = vsel %vm506_vm0, %v992_v0, %v993_v5  ;;  %v507_v21 = vrot.slane %v1996_v57, 1  ;;  %v1997_v22 = vcombine.low %v226_v47, %v2635_v46  ;;  %v2438_v46 = vld [vmem:[%s3380_s1 + $0x110] sm:$0xff]   ;;  %v3411_v36 = vld [vmem:[#allocation2_spill] sm:$0xff]  ;;  %v3412_v57 = vld [vmem:[#allocation3_spill] sm:$0xff] }
  0x66   : > { %v616_v12 = vrot.slane %v614_v41, 1  ;;  %v621_v2 = vrot.slane %v619_v35, 1  ;;  %v626_v56 = vshll.u32 %v2645_v52, 16  ;;  %v511_v23 = vrot.slane %v2648_v53, 1  ;;  %v3413_v41 = vld [vmem:[#allocation4_spill] sm:$0xff]  ;;  %v3414_v47 = vld [vmem:[#allocation5_spill] sm:$0xff] }
  0x67   : > { %v509_v38 = vsel %vm506_vm0, %v507_v21, %v508_v8  ;;  %v510_v1 = vrot.slane %v1997_v22, 1  ;;  %v624_v20 = vshrl.u32 %v2645_v52, 16  ;;  %v631_v53 = vshll.u32 %v2657_v62, 16  ;;  %v3415_v22 = vld [vmem:[#allocation6_spill] sm:$0xff] }
  0x68   : > { %v617_v54 = vor.u32 %v616_v12, %v612_v24  ;;  %v628_v26 = vrot.slane %v626_v56, 1 }
  0x69   : > { %v512_v25 = vsel %vm506_vm0, %v510_v1, %v511_v23  ;;  %v633_v3 = vrot.slane %v631_v53, 1  ;;  %v3416_v1 = vld [vmem:[#allocation7_spill] sm:$0xff] }
  0x6a   : > { %v622_v13 = vsel %vm369_vm1, %v617_v54, %v621_v2  ;;  %v629_v62 = vor.u32 %v628_v26, %v624_v20 }
  0x8b   : > { %v572_v40 = vpop.permute.xlu0 %571 }
  0x8c   : > { %v1022_v55 = vsel %vm995_vm2, %v509_v38, %v572_v40 }
  0x8d   : > { %1459 = vmatprep.mubr.bf16.mxu0 %v1022_v55  ;;  %v756_v29 = vpop.permute.xlu1 %755 }
  0x8e   : > { %v1054_v30 = vsel %vm995_vm2, %v622_v13, %v756_v29 }
  0x93   : > { %v932_v15 = vpop.permute.xlu0 %931 }
  0x94   : > { %v1085_v34 = vsel %vm995_vm2, %v2597_v18, %v932_v15  ;;  %v467_v33 = vpop.permute.xlu1 %466  ;;  %v3417_v15 = vld [vmem:[#allocation8_spill] sm:$0xff] }
  0x95   : > { %1556 = vmatprep.mubr.bf16.mxu1 %v1085_v34  ;;  %v997_v52 = vsel %vm995_vm2, %v2617_v28, %v467_v33  ;;  %v3419_v33 = vld [vmem:[#allocation10_spill] sm:$0xff] }
  0x96   : > { %1557 = vmatmul.mubr.bf16.vlgmr.msra.gmra.mxu1 %v1054_v30  ;;  %1460 = vmatmul.mubr.bf16.vlgmr.msra.gmra.mxu0 %v997_v52  ;;  %v3418_v30 = vld [vmem:[#allocation9_spill] sm:$0xff] }
  0x97   : > { %2300 = vmatpush3.bf16.msra.mxu1 %v2991_v50  ;;  %v574_v18 = vpop.permute.xlu0 %573  ;;  %2273 = vmatpush3.bf16.msra.mxu0 %v2991_v50  ;;  %v634_v50 = vsel %vm369_vm1, %v629_v62, %v633_v3  ;;  %v1972_v62 = vld [vmem:[%s2581_s9 + $0x18] sm:$0xe]  ;;  %v3420_v3 = vld [vmem:[#allocation11_spill] sm:$0xff] }
  0x98   : > { %v1026_v7 = vsel %vm995_vm2, %v512_v25, %v574_v18  ;;  %2297 = vmatprep.subr.bf16.mxu1 %v2438_v46  ;;  %2274 = vmatprep.subr.bf16.mxu0 %v2438_v46  ;;  %v934_v19 = vpop.permute.xlu1 %933 }
  0x99   : > { %1467 = vmatprep.mubr.bf16.mxu0 %v1026_v7  ;;  %v1088_v28 = vsel %vm995_vm2, %v2638_v48, %v934_v19 }
  0x9a   : > { %1564 = vmatprep.mubr.bf16.mxu1 %v1088_v28 }
  0x9b   : > { %2301 = vmatpush3.bf16.msra.mxu1 %v2438_v46  ;;  %v469_v60 = vpop.permute.xlu0 %468  ;;  %2275 = vmatpush3.bf16.msra.mxu0 %v2438_v46 }
  0x9c   : > { %2298 = vmatprep.subr.bf16.mxu1 %v2441_v51  ;;  %v1000_v37 = vsel %vm995_vm2, %v3411_v36, %v469_v60  ;;  %2276 = vmatprep.subr.bf16.mxu0 %v2441_v51  ;;  %v758_v5 = vpop.permute.xlu1 %757  ;;  %v3421_v60 = vld [vmem:[#allocation12_spill] sm:$0xff] }
  0x9d   : > { %v1058_v31 = vsel %vm995_vm2, %v634_v50, %v758_v5 }
  0x9e   : > { %1468 = vmatmul.mubr.bf16.gmra.mxu0 %v1000_v37  ;;  %1565 = vmatmul.mubr.bf16.gmra.mxu1 %v1058_v31 }
  0x9f   : > { %2302 = vmatpush3.bf16.msra.mxu1 %v2441_v51  ;;  %v576_v48 = vpop.permute.xlu0 %575  ;;  %2277 = vmatpush3.bf16.msra.mxu0 %v2441_v51 }
  0xa0   : > { %2299 = vmatprep.subr.bf16.mxu1 %v2444_v9  ;;  %v1030_v0 = vsel %vm995_vm2, %v3019_v10, %v576_v48  ;;  %2278 = vmatprep.subr.bf16.mxu0 %v2444_v9  ;;  %v936_v43 = vpop.permute.xlu1 %935  ;;  %v2456_v48 = vld [vmem:[%s2581_s9 + $0x20] ss:$0 sps:$4 sm:$0x11]  }
  0xa1   : > { %1475 = vmatprep.mubr.bf16.mxu0 %v1030_v0  ;;  %v1091_v21 = vsel %vm995_vm2, %v3412_v57, %v936_v43  ;;  %v972_v0 = vrot.slane %v2456_v48, 1  ;;  %v1973_v43 = vld [vmem:[%s2581_s9 + $0x24] sm:$0xe] }
  0xa2   : > { %1572 = vmatprep.mubr.bf16.mxu1 %v1091_v21  ;;  %v1974_v21 = vld [vmem:[%s2581_s9 + $0x30] sm:$0xe] }
  0xa3   : > { %2303 = vmatpush3.bf16.msra.mxu1 %v2444_v9  ;;  %v471_v8 = vpop.permute.xlu0 %470  ;;  %2279 = vmatpush3.bf16.msra.mxu0 %v2444_v9 }
  0xa4   : > { %v1003_v38 = vsel %vm995_vm2, %v3413_v41, %v471_v8  ;;  %v760_v24 = vpop.permute.xlu1 %759  ;;  %v3422_v8 = vld [vmem:[#allocation13_spill] sm:$0xff] }
  0xa5   : > { %v1062_v12 = vsel %vm995_vm2, %v3022_v59, %v760_v24  ;;  %v2457_v24 = vld [vmem:[%s2581_s9 + $0x28] sm:$0xf] }
  0xa6   : > { %1476 = vmatmul.mubr.bf16.gmra.mxu0 %v1003_v38  ;;  %1573 = vmatmul.mubr.bf16.gmra.mxu1 %v1062_v12  ;;  %v2045_v12 = vcombine.low %v1973_v43, %v2457_v24 }
  0xa7   : > { %v578_v10 = vpop.permute.xlu0 %577 }
  0xa8   : > { %v1034_v61 = vsel %vm995_vm2, %v3027_v11, %v578_v10  ;;  %v938_v35 = vpop.permute.xlu1 %937  ;;  %v2458_v10 = vld [vmem:[%s2581_s9 + $0x34] sm:$0xf] }
  0xa9   : > { %1483 = vmatprep.mubr.bf16.mxu0 %v1034_v61  ;;  %v1094_v40 = vsel %vm995_vm2, %v3414_v47, %v938_v35  ;;  %v2046_v61 = vcombine.low %v1974_v21, %v2458_v10 }
  0xaa   : > { %1580 = vmatprep.mubr.bf16.mxu1 %v1094_v40  ;;  %v2459_v40 = vld [vmem:[%s2581_s9 + $0x2c] ss:$0 sps:$4 sm:$0x11]  }
  0xab   : > { %v473_v55 = vpop.permute.xlu0 %472 }
  0xac   : > { %v1006_v54 = vsel %vm995_vm2, %v3415_v22, %v473_v55  ;;  %v762_v2 = vpop.permute.xlu1 %761  ;;  %v975_v55 = vrot.slane %v2459_v40, 1  ;;  %v977_v22 = vrot.slane %v2046_v61, 1 }
  0xad   : > { %v1066_v59 = vsel %vm995_vm2, %v3030_v4, %v762_v2 }
  0xae   : > { %1484 = vmatmul.mubr.bf16.gmra.mxu0 %v1006_v54  ;;  %1581 = vmatmul.mubr.bf16.gmra.mxu1 %v1066_v59  ;;  %v2460_v54 = vld [vmem:[%s2581_s9 + $0x38] ss:$0 sps:$4 sm:$0x11]   ;;  %v1975_v59 = vld [vmem:[%s2581_s9 + $0x3c] sm:$0xe] }
  0xaf   : > { %v580_v29 = vpop.permute.xlu0 %579  ;;  %v978_v2 = vrot.slane %v2460_v54, 1 }
  0xb0   : > { %v1038_v11 = vsel %vm995_vm2, %v3038_v6, %v580_v29  ;;  %v940_v56 = vpop.permute.xlu1 %939 }
  0xb1   : > { %1491 = vmatprep.mubr.bf16.mxu0 %v1038_v11  ;;  %v1097_v23 = vsel %vm995_vm2, %v3416_v1, %v940_v56  ;;  %v2461_v11 = vld [vmem:[%s2581_s9 + $0x40] sm:$0xf] }
  0xb2   : > { %1588 = vmatprep.mubr.bf16.mxu1 %v1097_v23  ;;  %v2047_v56 = vcombine.low %v1975_v59, %v2461_v11  ;;  %v2462_v23 = vld [vmem:[%s2581_s9 + $0x44] ss:$0 sps:$4 sm:$0x11]  }
  0xb3   : > { %v475_v13 = vpop.permute.xlu0 %474 }
  0xb4   : > { %v1009_v20 = vsel %vm995_vm2, %v3417_v15, %v475_v13  ;;  %v764_v34 = vpop.permute.xlu1 %763  ;;  %v980_v1 = vrot.slane %v2047_v56, 1 }
  0xb5   : > { %v1070_v4 = vsel %vm995_vm2, %v3043_v45, %v764_v34 }
  0xb6   : > { %1492 = vmatmul.mubr.bf16.gmra.mxu0 %v1009_v20  ;;  %1589 = vmatmul.mubr.bf16.gmra.mxu1 %v1070_v4 }
  0xb7   : > { %v582_v46 = vpop.permute.xlu0 %581 }
  0xb8   : > { %v1042_v6 = vsel %vm995_vm2, %v3047_v17, %v582_v46  ;;  %v942_v26 = vpop.permute.xlu1 %941 }
  0xb9   : > { %1499 = vmatprep.mubr.bf16.mxu0 %v1042_v6  ;;  %v1100_v25 = vsel %vm995_vm2, %v3418_v30, %v942_v26 }
  0xba   : > { %1596 = vmatprep.mubr.bf16.mxu1 %v1100_v25 }
  0xbb   : > { %v477_v53 = vpop.permute.xlu0 %476 }
  0xbc   : > { %v1012_v52 = vsel %vm995_vm2, %v3419_v33, %v477_v53  ;;  %v766_v18 = vpop.permute.xlu1 %765 }
  0xbd   : > { %v1074_v45 = vsel %vm995_vm2, %v3053_v27, %v766_v18  ;;  %v2455_v27 = vld [vmem:[%s2581_s9 + $0x1c] sm:$0xf]  ;;  %s1905_s9 = sshll.u32 %s2485_s12, 3 }
  0xbe   : > { %1500 = vmatmul.mubr.bf16.gmra.mxu0 %v1012_v52  ;;  %1597 = vmatmul.mubr.bf16.gmra.mxu1 %v1074_v45  ;;  %v2044_v36 = vcombine.low %v1972_v62, %v2455_v27  ;;  %p188_p6 = scmp.lt.s32.totalorder %s1905_s9, 15 }
  0xbf   : > { %v584_v7 = vpop.permute.xlu0 %583 }
  0xc0   : > { %v1046_v17 = vsel %vm995_vm2, %v3056_v42, %v584_v7  ;;  %v944_v51 = vpop.permute.xlu1 %943  ;;  %v971_v31 = vrot.slane %v2044_v36, 1  ;;  %s3436_s9 = smov (!%p188_p6, %s1905_s9), 15 }
  0xc1   : > { %1507 = vmatprep.mubr.bf16.mxu0 %v1046_v17  ;;  %v1103_v19 = vsel %vm995_vm2, %v3420_v3, %v944_v51  ;;  %s1906_s12 = sshll.u32 %s3436_s9, 1 }
  0xc2   : > { %1604 = vmatprep.mubr.bf16.mxu1 %v1103_v19  ;;  %s3287_s13 = sadd.s32 %s1907_s25, %s1906_s12 }
  0xc3   : > { %v479_v28 = vpop.permute.xlu0 %478  ;;  %s1908_s26 = sshll.u32 %s3287_s13, 2 }
  0xc4   : > { %v1015_v9 = vsel %vm995_vm2, %v3421_v60, %v479_v28  ;;  %v768_v37 = vpop.permute.xlu1 %767  ;;  %s3316_s29 = scalar_lea.vmem %s3382_s3, %s1908_s26 }
  0xc5   : > { %v1078_v42 = vsel %vm995_vm2, %v3060_v32, %v768_v37 }
  0xc6   : > { %1508 = vmatmul.mubr.bf16.gmra.mxu0 %v1015_v9  ;;  %1605 = vmatmul.mubr.bf16.gmra.mxu1 %v1078_v42 }
  0xc7   : > { %v586_v50 = vpop.permute.xlu0 %585 }
  0xc8   : > { %v1050_v5 = vsel %vm995_vm2, %v3063_v16, %v586_v50  ;;  %v946_v57 = vpop.permute.xlu1 %945  ;;  %v973_v16 = vsel %vm506_vm0, %v971_v31, %v972_v0 }
  0xc9   : > { %1515 = vmatprep.mubr.bf16.mxu0 %v1050_v5  ;;  %v1106_v41 = vsel %vm995_vm2, %v3422_v8, %v946_v57 }
  0xca   : > { %1612 = vmatprep.mubr.bf16.mxu1 %v1106_v41 }
  0xcb   : > { %v481_v38 = vpop.permute.xlu0 %480 }
  0xcc   : > { %v1018_v32 = vsel %vm995_vm2, %v2959_v63, %v481_v38  ;;  %v770_v35 = vpop.permute.xlu1 %769  ;;  %v974_v63 = vrot.slane %v2045_v12, 1 }
  0xcd   : > { %v1082_v47 = vsel %vm995_vm2, %v3069_v58, %v770_v35  ;;  %v979_v58 = vsel %vm506_vm0, %v977_v22, %v978_v2  ;;  %v3261_v2 = vld [vmem:[%s3381_s2] ss:$0 sm:$0xff] }
  0xce   : > { %1516 = vmatmul.mubr.bf16.gmra.mxu0 %v1018_v32  ;;  %1613 = vmatmul.mubr.bf16.gmra.mxu1 %v1082_v47  ;;  %v976_v29 = vsel %vm506_vm0, %v974_v63, %v975_v55 }
  0xcf   : > { %2280 = vmatprep.mubr.msk.bf16.mxu0 %vm995_vm2, %v973_v16  ;;  %2288 = vmatprep.mubr.msk.bf16.mxu1 %vm995_vm2, %v3075_v49  ;;  %v981_v49 = vrot.slane %v2462_v23, 1 }
  0xd1   : > { %v982_v13 = vsel %vm506_vm0, %v980_v1, %v981_v49 }
  0xd6   : > { %2281 = vmatmul.mubr.msk.bf16.vlgmr.msra.gmra.mxu0 %vm995_vm2, %v976_v29  ;;  %2289 = vmatmul.mubr.msk.bf16.vlgmr.msra.gmra.mxu1 %vm995_vm2, %v3080_v39 }
  0xd7   : > { %2284 = vmatprep.mubr.msk.bf16.mxu0 %vm995_vm2, %v979_v58  ;;  %2292 = vmatprep.mubr.msk.bf16.mxu1 %vm995_vm2, %v3085_v44 }
  0xde   : > { %2285 = vmatmul.mubr.msk.bf16.gmra.mxu0 %vm995_vm2, %v982_v13  ;;  %2293 = vmatmul.mubr.msk.bf16.gmra.mxu1 %vm995_vm2, %v3088_v14 }
 0x156   : > { %v3205_v15 = vpop.f32.mrf.mxu1  ;;  %v2148_v20 = vpop.f32.mrf.mxu0 }
 0x158   : > { %v3207_v34 = vpop.f32.mrf.mxu1  ;;  %v2149_v39 = vpop.f32.mrf.mxu0 }
 0x159   : > { %v2150_v22 = vadd.f32 %v2149_v39, %v2148_v20  ;;  %v2214_v13 = vadd.f32 %v3207_v34, %v3205_v15 }
 0x15a   : > { %v3209_v4 = vpop.f32.mrf.mxu1  ;;  %v2151_v46 = vpop.f32.mrf.mxu0 }
 0x15b   : > { %v1462_v49 = vadd.f32 %v2150_v22, %v3261_v2 }
 0x15c   : > { %v2216_v6 = vpop.f32.mrf.mxu1  ;;  %v2152_v26 = vpop.f32.mrf.mxu0 }
 0x15d   : > { %v2153_v59 = vadd.f32 %v2152_v26, %v2151_v46  ;;  %v2217_v20 = vadd.f32 %v2216_v6, %v3209_v4 }
 0x15e   : > { %v2154_v30 = vpop.f32.mrf.mxu0  ;;  %v3211_v44 = vpop.f32.mrf.mxu1 }
 0x15f   : > { %v1465_v26 = vadd.f32 %v2153_v59, %v3261_v2 }
 0x160   : > { %v2155_v25 = vpop.f32.mrf.mxu0  ;;  %v2219_v53 = vpop.f32.mrf.mxu1 }
 0x161   : > { %v2156_v29 = vadd.f32 %v2155_v25, %v2154_v30  ;;  %v2220_v25 = vadd.f32 %v2219_v53, %v3211_v44  ;;  %v1562_v22 = vadd.f32 %v2217_v20, %v1465_v26 }
 0x162   : > { %v2157_v33 = vpop.f32.mrf.mxu0  ;;  %v3213_v52 = vpop.f32.mrf.mxu1 }
 0x163   : > { %v1470_v30 = vadd.f32 %v2156_v29, %v3261_v2 }
 0x164   : > { %v2158_v14 = vpop.f32.mrf.mxu0  ;;  %v3215_v18 = vpop.f32.mrf.mxu1 }
 0x165   : > { %v2159_v56 = vadd.f32 %v2158_v14, %v2157_v33 }
 0x166   : > { %v2160_v45 = vpop.f32.mrf.mxu0  ;;  %v3217_v7 = vpop.f32.mrf.mxu1 }
 0x168   : > { %v2161_v17 = vpop.f32.mrf.mxu0  ;;  %v3219_v51 = vpop.f32.mrf.mxu1 }
 0x169   : > { %v2162_v1 = vadd.f32 %v2161_v17, %v2160_v45  ;;  %v1473_v45 = vadd.f32 %v2159_v56, %v3261_v2  ;;  %v2223_v17 = vadd.f32 %v3215_v18, %v3213_v52  ;;  %v2226_v6 = vadd.f32 %v3219_v51, %v3217_v7 }
 0x16a   : > { %v3221_v62 = vpop.f32.mrf.mxu0  ;;  %v3223_v3 = vpop.f32.mrf.mxu1 }
 0x16b   : > { %v1478_v4 = vadd.f32 %v2162_v1, %v3261_v2 }
 0x16c   : > { %v3225_v19 = vpop.f32.mrf.mxu0  ;;  %v3227_v28 = vpop.f32.mrf.mxu1 }
 0x16e   : > { %v2166_v60 = vpop.f32.mrf.mxu0  ;;  %v3229_v9 = vpop.f32.mrf.mxu1 }
 0x170   : > { %v2167_v27 = vpop.f32.mrf.mxu0  ;;  %v3231_v36 = vpop.f32.mrf.mxu1 }
 0x171   : > { %v2168_v33 = vadd.f32 %v2167_v27, %v2166_v60  ;;  %v2232_v18 = vadd.f32 %v3231_v36, %v3229_v9  ;;  %v3301_v9 = vadd.f32 %v2226_v6, %v1478_v4 }
 0x172   : > { %v3233_v37 = vpop.f32.mrf.mxu0  ;;  %v3235_v42 = vpop.f32.mrf.mxu1 }
 0x173   : > { %v1486_v52 = vadd.f32 %v2168_v33, %v3261_v2 }
 0x174   : > { %v3237_v50 = vpop.f32.mrf.mxu0  ;;  %v3239_v5 = vpop.f32.mrf.mxu1 }
 0x175   : > { %v2171_v36 = vadd.f32 %v3237_v50, %v3233_v37  ;;  %v1583_v1 = vadd.f32 %v2232_v18, %v1486_v52 }
 0x176   : > { %v2172_v31 = vpop.f32.mrf.mxu0  ;;  %v3241_v48 = vpop.f32.mrf.mxu1 }
 0x177   : > { %v1489_v6 = vadd.f32 %v2171_v36, %v3261_v2 }
 0x178   : > { %v2173_v0 = vpop.f32.mrf.mxu0  ;;  %v2237_v43 = vpop.f32.mrf.mxu1 }
 0x179   : > { %v2174_v15 = vadd.f32 %v2173_v0, %v2172_v31  ;;  %v1567_v0 = vadd.f32 %v2220_v25, %v1470_v30  ;;  %v2238_v51 = vadd.f32 %v2237_v43, %v3241_v48 }
 0x17a   : > { %v2175_v57 = vpop.f32.mrf.mxu0  ;;  %v3243_v21 = vpop.f32.mrf.mxu1 }
 0x17b   : > { %v1494_v7 = vadd.f32 %v2174_v15, %v3261_v2 }
 0x17c   : > { %v2176_v8 = vpop.f32.mrf.mxu0  ;;  %v3245_v41 = vpop.f32.mrf.mxu1 }
 0x17d   : > { %v2177_v59 = vadd.f32 %v2176_v8, %v2175_v57 }
 0x17e   : > { %v2178_v38 = vpop.f32.mrf.mxu0  ;;  %v2242_v32 = vpop.f32.mrf.mxu1 }
 0x180   : > { %v2179_v24 = vpop.f32.mrf.mxu0  ;;  %v2243_v12 = vpop.f32.mrf.mxu1 }
 0x181   : > { %v2180_v39 = vadd.f32 %v2179_v24, %v2178_v38  ;;  %v2244_v53 = vadd.f32 %v2243_v12, %v2242_v32  ;;  %v1559_v24 = vadd.f32 %v2214_v13, %v1462_v49  ;;  %v1570_v12 = vadd.f32 %v2223_v17, %v1473_v45 }
 0x182   : > { %v2181_v16 = vpop.f32.mrf.mxu0  ;;  %v3247_v10 = vpop.f32.mrf.mxu1  ;;  %v1497_v49 = vadd.f32 %v2177_v59, %v3261_v2  ;;  %v2241_v13 = vadd.f32 %v3245_v41, %v3243_v21 }
 0x183   : > { %v1502_v44 = vadd.f32 %v2180_v39, %v3261_v2 }
 0x184   : > { %v2182_v61 = vpop.f32.mrf.mxu0  ;;  %v2246_v35 = vpop.f32.mrf.mxu1  ;;  %v1594_v4 = vadd.f32 %v2241_v13, %v1497_v49 }
 0x185   : > { %v2183_v60 = vadd.f32 %v2182_v61, %v2181_v16  ;;  %v2165_v16 = vadd.f32 %v3225_v19, %v3221_v62  ;;  %v3298_v61 = vadd.f32 %v3227_v28, %v3223_v3  ;;  %v2247_v43 = vadd.f32 %v2246_v35, %v3247_v10 }
 0x186   : > { %v3250_v47 = vpop.f32.mrf.mxu0  ;;  %v3252_v40 = vpop.f32.mrf.mxu1  ;;  %v1599_v8 = vadd.f32 %v2244_v53, %v1502_v44  ;;  %v2235_v62 = vadd.f32 %v3239_v5, %v3235_v42  ;;  %v1591_v10 = vadd.f32 %v2238_v51, %v1494_v7 }
 0x187   : > { %v1505_v48 = vadd.f32 %v2183_v60, %v3261_v2 }
 0x188   : > { %v2185_v55 = vpop.f32.mrf.mxu0  ;;  %v3254_v63 = vpop.f32.mrf.mxu1 }
 0x189   : > { %v2186_v3 = vadd.f32 %v2185_v55, %v3250_v47  ;;  %v1602_v41 = vadd.f32 %v2247_v43, %v1505_v48  ;;  %v2250_v30 = vadd.f32 %v3254_v63, %v3252_v40 }
 0x18a   : > { %v3256_v54 = vpop.f32.mrf.mxu0  ;;  %v3263_v11 = vpop.f32.mrf.mxu1 }
 0x18b   : > { %v1510_v26 = vadd.f32 %v2186_v3, %v3261_v2 }
 0x18c   : > { %v3267_v58 = vpop.f32.mrf.mxu0  ;;  %v3269_v23 = vpop.f32.mrf.mxu1 }
 0x18d   : > { %v2189_v45 = vadd.f32 %v3267_v58, %v3256_v54 }
 0x18e   : > { %v2190_v46 = vpop.f32.mrf.mxu0  ;;  %v2254_v14 = vpop.f32.mrf.mxu1 }
 0x18f   : > { %v1513_v7 = vadd.f32 %v2189_v45, %v3261_v2 }
 0x190   : > { %v2191_v34 = vpop.f32.mrf.mxu0  ;;  %v2255_v38 = vpop.f32.mrf.mxu1 }
 0x191   : > { %v2192_v29 = vadd.f32 %v2191_v34, %v2190_v46  ;;  %v2256_v5 = vadd.f32 %v2255_v38, %v2254_v14 }
 0x192   : > { %v2193_v27 = vpop.f32.mrf.mxu0  ;;  %v2257_v31 = vpop.f32.mrf.mxu1 }
 0x193   : > { %v1518_v42 = vadd.f32 %v2192_v29, %v3261_v2 }
 0x194   : > { %v2194_v32 = vpop.f32.mrf.mxu0  ;;  %v2258_v56 = vpop.f32.mrf.mxu1 }
 0x195   : > { %v2195_v20 = vadd.f32 %v2194_v32, %v2193_v27  ;;  %v1615_v44 = vadd.f32 %v2256_v5, %v1518_v42  ;;  %v2259_v60 = vadd.f32 %v2258_v56, %v2257_v31  ;;  %v2253_v31 = vadd.f32 %v3269_v23, %v3263_v11 }
 0x196   : > { %v2282_v57 = vpop.f32.mrf.mxu0  ;;  %v2290_v28 = vpop.f32.mrf.mxu1  ;;  %v1586_v56 = vadd.f32 %v2235_v62, %v1489_v6 }
 0x197   : > { %v1664_v19 = vadd.f32 %v2282_v57, %v1567_v0  ;;  %v1696_v37 = vadd.f32 %v2290_v28, %v1599_v8  ;;  %v1521_v53 = vadd.f32 %v2195_v20, %v3261_v2 }
 0x198   : > { %v1655_v50 = vpop.f32.mrf.mxu0  ;;  %v1687_v55 = vpop.f32.mrf.mxu1 }
 0x199   : > { %v2118_v35 = vpack.c.bf16 %v1664_v19, %v1664_v19  ;;  %v1656_v47 = vadd.f32 %v1655_v50, %v1559_v24  ;;  %v2126_v39 = vpack.c.bf16 %v1696_v37, %v1696_v37  ;;  %v1688_v46 = vadd.f32 %v1687_v55, %v1591_v10 }
 0x19a   : > { %v2283_v21 = vpop.f32.mrf.mxu0  ;;  %v2291_v14 = vpop.f32.mrf.mxu1  ;;  %v1481_v24 = vadd.f32 %v2165_v16, %v3261_v2  ;;  %v1618_v11 = vadd.f32 %v2259_v60, %v1521_v53  ;;  %v1610_v19 = vadd.f32 %v2253_v31, %v1513_v7 }
 0x19b   : > { %1785 = vst.msk [vmem:[%s3316_s29 + $0x8] sm:$0xf] %vm1782_vm3, %v2118_v35  ;;  %v2116_v25 = vpack.c.bf16 %v1656_v47, %v1656_v47  ;;  %v1667_v33 = vadd.f32 %v2283_v21, %v1570_v12  ;;  %1793 = vst.msk [vmem:[%s3316_s29 + $0x28] sm:$0xf] %vm1782_vm3, %v2126_v39  ;;  %v2124_v17 = vpack.c.bf16 %v1688_v46, %v1688_v46 }
 0x19c   : > { %v1699_v15 = vadd.f32 %v2291_v14, %v1602_v41  ;;  %v1658_v34 = vpop.f32.mrf.mxu0  ;;  %v1690_v38 = vpop.f32.mrf.mxu1  ;;  %v1578_v8 = vadd.f32 %v3298_v61, %v1481_v24 }
 0x19d   : > { %1783 = vst.msk [vmem:[%s3316_s29] sm:$0xf] %vm1782_vm3, %v2116_v25  ;;  %v2119_v40 = vpack.c.bf16 %v1667_v33, %v1667_v33  ;;  %v1659_v63 = vadd.f32 %v1658_v34, %v1562_v22  ;;  %1791 = vst.msk [vmem:[%s3316_s29 + $0x20] sm:$0xf] %vm1782_vm3, %v2124_v17  ;;  %v1691_v58 = vadd.f32 %v1690_v38, %v1594_v4 }
 0x19e   : > { %v2127_v54 = vpack.c.bf16 %v1699_v15, %v1699_v15  ;;  %v2286_v27 = vpop.f32.mrf.mxu0  ;;  %v2294_v0 = vpop.f32.mrf.mxu1  ;;  %v1607_v22 = vadd.f32 %v2250_v30, %v1510_v26 }
 0x19f   : > { %1786 = vst.msk [vmem:[%s3316_s29 + $0xc] sm:$0xf] %vm1782_vm3, %v2119_v40  ;;  %v2117_v52 = vpack.c.bf16 %v1659_v63, %v1659_v63  ;;  %v1680_v18 = vadd.f32 %v2286_v27, %v1583_v1  ;;  %v2125_v51 = vpack.c.bf16 %v1691_v58, %v1691_v58  ;;  %v1712_v59 = vadd.f32 %v2294_v0, %v1615_v44 }
 0x1a0   : > { %1794 = vst.msk [vmem:[%s3316_s29 + $0x2c] sm:$0xf] %vm1782_vm3, %v2127_v54  ;;  %v1671_v32 = vpop.f32.mrf.mxu0  ;;  %v1703_v29 = vpop.f32.mrf.mxu1 }
 0x1a1   : > { %1784 = vst.msk [vmem:[%s3316_s29 + $0x4] sm:$0xf] %vm1782_vm3, %v2117_v52  ;;  %v2122_v12 = vpack.c.bf16 %v1680_v18, %v1680_v18  ;;  %v1672_v16 = vadd.f32 %v1671_v32, %v3301_v9  ;;  %1792 = vst.msk [vmem:[%s3316_s29 + $0x24] sm:$0xf] %vm1782_vm3, %v2125_v51  ;;  %v2130_v2 = vpack.c.bf16 %v1712_v59, %v1712_v59 }
 0x1a2   : > { %v1704_v36 = vadd.f32 %v1703_v29, %v1607_v22  ;;  %v2287_v48 = vpop.f32.mrf.mxu0  ;;  %v2295_v57 = vpop.f32.mrf.mxu1 }
 0x1a3   : > { %1789 = vst.msk [vmem:[%s3316_s29 + $0x18] sm:$0xf] %vm1782_vm3, %v2122_v12  ;;  %v2120_v23 = vpack.c.bf16 %v1672_v16, %v1672_v16  ;;  %v1683_v43 = vadd.f32 %v2287_v48, %v1586_v56  ;;  %1797 = vst.msk [vmem:[%s3316_s29 + $0x38] sm:$0xf] %vm1782_vm3, %v2130_v2  ;;  %v1715_v62 = vadd.f32 %v2295_v57, %v1618_v11 }
 0x1a4   : > { %v2128_v9 = vpack.c.bf16 %v1704_v36, %v1704_v36  ;;  %v1674_v3 = vpop.f32.mrf.mxu0  ;;  %v1706_v49 = vpop.f32.mrf.mxu1 }
 0x1a5   : > { %1787 = vst.msk [vmem:[%s3316_s29 + $0x10] sm:$0xf] %vm1782_vm3, %v2120_v23  ;;  %v2123_v28 = vpack.c.bf16 %v1683_v43, %v1683_v43  ;;  %v1675_v1 = vadd.f32 %v1674_v3, %v1578_v8  ;;  %v2131_v13 = vpack.c.bf16 %v1715_v62, %v1715_v62  ;;  %v1707_v37 = vadd.f32 %v1706_v49, %v1610_v19 }
 0x1a6   : > { %1795 = vst.msk [vmem:[%s3316_s29 + $0x30] sm:$0xf] %vm1782_vm3, %v2128_v9 }
 0x1a7   : > { %1790 = vst.msk [vmem:[%s3316_s29 + $0x1c] sm:$0xf] %vm1782_vm3, %v2123_v28  ;;  %v2121_v61 = vpack.c.bf16 %v1675_v1, %v1675_v1  ;;  %1798 = vst.msk [vmem:[%s3316_s29 + $0x3c] sm:$0xf] %vm1782_vm3, %v2131_v13  ;;  %v2129_v50 = vpack.c.bf16 %v1707_v37, %v1707_v37 }
 0x1a9   : > { %1788 = vst.msk [vmem:[%s3316_s29 + $0x14] sm:$0xf] %vm1782_vm3, %v2121_v61  ;;  %1796 = vst.msk [vmem:[%s3316_s29 + $0x34] sm:$0xf] %vm1782_vm3, %v2129_v50 }
 0x1aa PF: > { %s13_s16 = sadd.s32 1, %s2501_s16   ;;  %s3423_s12 = smov %s2493_s14 }
 0x1ab   : > { %p10_p7 = scmp.ge.s32.totalorder %s13_s16, 6   ;;  %s3424_s13 = smov %s2497_s15 }
 0x1ac   : > { %s3425_s14 = smov %s3428_s17  ;;  %s3426_s15 = smov %s3432_s18 }
 0x1ad   :  { %12 = sbr.rel (!%p10_p7) target bundleno = 3 (0x3), region = 65 }

// kernel: inception_a_pallas.8
= control target key start
LH: loop header
LB: loop body
LE: loop exit
PB: predicated region body
PF: predicated region fallthrough
CT: control target
= control target key end

     0   :  { %s2838_s12 = smov 0   ;;  %s2840_s13 = smov 0   ;;  %s3868_s0 = inlined_call_operand.vmem [shape: bf16[2,18,18,96], index: 0, kind: input, shape index: {}]   ;;  %s3869_s1 = inlined_call_operand.vmem [shape: bf16[864,96], index: 1, kind: input, shape index: {}]   ;;  %s3870_s2 = inlined_call_operand.vmem [shape: f32[1,96], index: 2, kind: input, shape index: {}]   ;;  %s3871_s3 = inlined_call_operand.vmem [shape: f32[2,16,16,96], index: 3, kind: output, shape index: {}]  }
   0x1   :  { %s2842_s14 = smov 0   ;;  %s2844_s15 = smov 0  }
   0x2   :  { %s2846_s16 = smov 0  }
   0x3 LB: > { %s22_s17 = sadd.s32 1, %s2805_s14  ;;  %s25_s18 = sadd.s32 1, %s2809_s15  ;;  %s2813_s16 = sphi %s2846_s16, %s13_s16   ;;  %s2809_s15 = sphi %s2844_s15, %s3903_s15   ;;  %s2805_s14 = sphi %s2842_s14, %s3902_s14   ;;  %s2801_s13 = sphi %s2840_s13, %s3901_s13   ;;  %s2797_s12 = sphi %s2838_s12, %s3900_s12  }
   0x4   : > { %p23_p0 = scmp.ge.s32.totalorder %s22_s17, 2  ;;  %p2153_p1 = scmp.ge.s32.totalorder %s2813_s16, 1 }
   0x5   : > { %p151_p2 = scmp.lt.s32.totalorder %s2813_s16, 5 }
   0x6   : > { %s3905_s17 = smov (%p23_p0, %s22_s17), 0  ;;  %s3907_s18 = smov (!%p23_p0, %s25_s18), %s2809_s15 }
   0x7   : > { %p152_p3 = pnand %p2153_p1, %p151_p2  ;;  %p27_p4 = scmp.ge.s32.totalorder %s3907_s18, 2 }
   0x9   : > { %s3909_s18 = smov (%p27_p4, %s3907_s18), 0  ;;  %155 = sbr.rel (%p152_p3) target bundleno = 479 (0x1df), region = 32 }
   0xe   : > { %p180_p5 = scmp.lt.s32.totalorder %s2801_s13, 1  ;;  %v2706_v0 = vld [vmem:[%s3869_s1 + $0x78] sm:$0xff]   ;;  %s2367_s23 = smul.u32 96, %s2797_s12  ;;  %v2710_v2 = vld [vmem:[%s3869_s1 + $0x70] sm:$0xff]   ;;  %v2712_v4 = vld [vmem:[%s3869_s1 + $0x68] sm:$0xff]   ;;  %vm506_vm1 = vcmask 1046528  }
   0xf   : > { %2368 = vmatprep.subr.bf16.mxu0 %v2706_v0  ;;  %v2709_v1 = vld [vmem:[%s3869_s1 + $0x38] sm:$0xff]   ;;  %v2711_v3 = vld [vmem:[%s3869_s1 + $0x30] sm:$0xff]   ;;  %vm369_vm0 = vsmask.f32 7424  ;;  %v2715_v5 = vld [vmem:[%s3869_s1 + $0x28] sm:$0xff]   ;;  %s2815_s25 = smov 96  }
  0x10   : > { %s3911_s13 = smov (!%p180_p5, %s2801_s13), 1  ;;  %2369 = vmatpush3.bf16.msra.mxu0 %v2709_v1  ;;  %v2716_v11 = vld [vmem:[%s3869_s1 + $0x60] sm:$0xff]   ;;  %v2719_v24 = vld [vmem:[%s3869_s1 + $0x58] sm:$0xff]   ;;  %s2816_s28 = smov 64   ;;  %vm1052_vm2 = vcmask 523264   ;;  %vm1027_vm3 = vcmask 785408  }
  0x11   : > { %s2602_s26 = smul.u32 216, %s3911_s13  ;;  %2370 = vmatprep.subr.bf16.mxu0 %v2710_v2  ;;  %v2718_v14 = vld [vmem:[%s3869_s1 + $0x20] sm:$0xff]   ;;  %v2720_v34 = vld [vmem:[%s3869_s1 + $0x18] sm:$0xff]   ;;  %s2817_s22 = smov 32   ;;  %vm1077_vm4 = vcmask 261120  }
  0x12   : > { %v2721_v63 = vld [vmem:[%s3869_s1 + $0xf8] sm:$0xff]   ;;  %s2157_s24 = sshll.u32 %s3911_s13, 5 }
  0x13   : > { %s184_s6 = scalar_lea.vmem %s3868_s0, %s2602_s26  ;;  %2432 = vmatprep.subr.bf16.mxu1 %v2721_v63 }
  0x14   : > { %s2892_s7 = scalar_lea.vmem %s184_s6, %s2367_s23  ;;  %2371 = vmatpush3.bf16.msra.mxu0 %v2711_v3 }
  0x15   : > { %v203_v6 = vld [vmem:[%s2892_s7 + $0xc] sm:$0xf]  ;;  %v204_v7 = vld [vmem:[%s2892_s7 + $0x10] sm:$0xf]  ;;  %v201_v10 = vld [vmem:[%s2892_s7] sm:$0xf]  ;;  %2372 = vmatprep.subr.bf16.mxu0 %v2712_v4 }
  0x16   : > { %v2899_v8 = vcombine.low %v203_v6, %v204_v7  ;;  %v2647_v9 = vld [vmem:[%s2892_s7 + $0x14] ss:$0 sps:$4 sm:$0x11]   ;;  %v202_v12 = vld [vmem:[%s2892_s7 + $0x4] sm:$0xf] }
  0x17   : > { %v226_v13 = vld [vmem:[%s2892_s7 + $0xc] sm:$0xe]  ;;  %v390_v17 = vshll.u32 %v2647_v9, 16  ;;  %v2913_v18 = vcombine.low %v201_v10, %v202_v12  ;;  %v2649_v19 = vld [vmem:[%s2892_s7 + $0x8] ss:$0 sps:$4 sm:$0x11]  }
  0x18   : > { %v383_v15 = vshrl.u32 %v2899_v8, 16  ;;  %v385_v16 = vshll.u32 %v2899_v8, 16  ;;  %v2247_v20 = vcombine.low %v226_v13, %v204_v7  ;;  %v511_v21 = vrot.slane %v2647_v9, 1  ;;  %v225_v22 = vld [vmem:[%s2892_s7] sm:$0xe]  ;;  %2373 = vmatpush3.bf16.msra.mxu0 %v2715_v5  ;;  %v2722_v10 = vld [vmem:[%s3869_s1 + $0xb8] sm:$0xff]  }
  0x19   : > { %v205_v23 = vld [vmem:[%s2892_s7 + $0x18] sm:$0xf]  ;;  %v392_v26 = vrot.slane %v390_v17, 1  ;;  %v371_v27 = vshrl.u32 %v2913_v18, 16  ;;  %v373_v28 = vshll.u32 %v2913_v18, 16  ;;  %2374 = vmatprep.subr.bf16.mxu0 %v2716_v11  ;;  %v378_v30 = vshll.u32 %v2649_v19, 16  ;;  %2433 = vmatpush3.bf16.msra.mxu1 %v2722_v10 }
  0x1a   : > { %v387_v25 = vrot.slane %v385_v16, 1  ;;  %v206_v29 = vld [vmem:[%s2892_s7 + $0x1c] sm:$0xf]  ;;  %v510_v31 = vrot.slane %v2247_v20, 1  ;;  %v2246_v32 = vcombine.low %v225_v22, %v202_v12  ;;  %v508_v33 = vrot.slane %v2649_v19, 1  ;;  %v2729_v10 = vld [vmem:[%s3869_s1 + $0x8] sm:$0xff]  }
  0x1b   : > { %v375_v36 = vrot.slane %v373_v28, 1  ;;  %v227_v37 = vld [vmem:[%s2892_s7 + $0x18] sm:$0xe]  ;;  %v2928_v38 = vcombine.low %v205_v23, %v206_v29  ;;  %v2653_v39 = vld [vmem:[%s2892_s7 + $0x20] ss:$0 sps:$4 sm:$0x11]  }
  0x1c   : > { %v388_v35 = vor.u32 %v387_v25, %v383_v15  ;;  %v380_v40 = vrot.slane %v378_v30, 1  ;;  %v507_v41 = vrot.slane %v2246_v32, 1  ;;  %v2248_v42 = vcombine.low %v227_v37, %v206_v29  ;;  %v207_v43 = vld [vmem:[%s2892_s7 + $0x24] sm:$0xf]  ;;  %v208_v44 = vld [vmem:[%s2892_s7 + $0x28] sm:$0xf]  ;;  %2375 = vmatpush3.bf16.msra.mxu0 %v2718_v14 }
  0x1d   : > { %v376_v46 = vor.u32 %v375_v36, %v371_v27  ;;  %v514_v47 = vrot.slane %v2653_v39, 1  ;;  %v395_v48 = vshrl.u32 %v2928_v38, 16  ;;  %v228_v49 = vld [vmem:[%s2892_s7 + $0x24] sm:$0xe]  ;;  %2376 = vmatprep.subr.bf16.mxu0 %v2719_v24  ;;  %v397_v51 = vshll.u32 %v2928_v38, 16  ;;  %v2723_v24 = vld [vmem:[%s3869_s1 + $0x50] sm:$0xff]  }
  0x1e   : > { %v393_v45 = vsel %vm369_vm0, %v388_v35, %v392_v26  ;;  %v513_v50 = vrot.slane %v2248_v42, 1  ;;  %v402_v52 = vshll.u32 %v2653_v39, 16  ;;  %v2656_v53 = vld [vmem:[%s2892_s7 + $0x2c] ss:$0 sps:$4 sm:$0x11]   ;;  %v512_v55 = vsel %vm506_vm1, %v510_v31, %v511_v21  ;;  %v2725_v27 = vld [vmem:[%s3869_s1 + $0x10] sm:$0xff]  }
  0x1f   : > { %468 = vrot.lane.b32.xlu1 %v393_v45, %s2815_s25  ;;  %v381_v54 = vsel %vm369_vm0, %v376_v46, %v380_v40  ;;  %v2941_v56 = vcombine.low %v207_v43, %v208_v44  ;;  %v2249_v57 = vcombine.low %v228_v49, %v208_v44  ;;  %v209_v58 = vld [vmem:[%s2892_s7 + $0x30] sm:$0xf]  ;;  %v210_v59 = vld [vmem:[%s2892_s7 + $0x34] sm:$0xf]  ;;  %v399_v60 = vrot.slane %v397_v51, 1 }
  0x20   : > { %466 = vrot.lane.b32.xlu0 %v381_v54, %s2815_s25  ;;  %v404_v61 = vrot.slane %v402_v52, 1  ;;  %v229_v62 = vld [vmem:[%s2892_s7 + $0x30] sm:$0xe]  ;;  %2377 = vmatpush3.bf16.msra.mxu0 %v2720_v34  ;;  %v509_v0 = vsel %vm506_vm1, %v507_v41, %v508_v33  ;;  %v414_v3 = vshll.u32 %v2656_v53, 16  ;;  %v517_v6 = vrot.slane %v2656_v53, 1 }
  0x21   : > { %v407_v1 = vshrl.u32 %v2941_v56, 16  ;;  %v409_v2 = vshll.u32 %v2941_v56, 16  ;;  %v400_v4 = vor.u32 %v399_v60, %v395_v48  ;;  %v516_v5 = vrot.slane %v2249_v57, 1  ;;  %v2659_v9 = vld [vmem:[%s2892_s7 + $0x38] ss:$0 sps:$4 sm:$0x11]   ;;  %2378 = vmatprep.subr.bf16.mxu0 %v2723_v24 }
  0x22   : > { %v2954_v7 = vcombine.low %v209_v58, %v210_v59  ;;  %v515_v11 = vsel %vm506_vm1, %v513_v50, %v514_v47  ;;  %v2250_v13 = vcombine.low %v229_v62, %v210_v59  ;;  %v416_v15 = vrot.slane %v414_v3, 1  ;;  %v2165_v16 = vld [vmem:[%s2892_s7 + $0x10] sm:$0xf]  ;;  %v2188_v17 = vld [vmem:[%s2892_s7 + $0xc] sm:$0xe] }
  0x23   : > { %533 = vrot.lane.b32.xlu1 %v512_v55, %s2816_s28  ;;  %v411_v12 = vrot.slane %v409_v2, 1  ;;  %v405_v14 = vsel %vm369_vm0, %v400_v4, %v404_v61  ;;  %v426_v22 = vshll.u32 %v2659_v9, 16  ;;  %v211_v23 = vld [vmem:[%s2892_s7 + $0x3c] sm:$0xf]  ;;  %v518_v25 = vsel %vm506_vm1, %v516_v5, %v517_v6  ;;  %v212_v26 = vld [vmem:[%s2892_s7 + $0x40] sm:$0xf] }
  0x24   : > { %531 = vrot.lane.b32.xlu0 %v509_v0, %s2816_s28  ;;  %v419_v20 = vshrl.u32 %v2954_v7, 16  ;;  %v421_v21 = vshll.u32 %v2954_v7, 16  ;;  %v519_v28 = vrot.slane %v2250_v13, 1  ;;  %v520_v29 = vrot.slane %v2659_v9, 1  ;;  %v230_v34 = vld [vmem:[%s2892_s7 + $0x3c] sm:$0xe]  ;;  %2379 = vmatpush3.bf16.msra.mxu0 %v2725_v27 }
  0x25   : > { %v412_v19 = vor.u32 %v411_v12, %v407_v1  ;;  %v2978_v31 = vld [vmem:[%s2892_s7 + $0x14] ss:$0 sps:$4 sm:$0x11]   ;;  %v2980_v32 = vcombine.low %v211_v23, %v212_v26  ;;  %v2270_v33 = vcombine.low %v2188_v17, %v2165_v16  ;;  %v2665_v35 = vld [vmem:[%s2892_s7 + $0x44] ss:$0 sps:$4 sm:$0x11]   ;;  %v2251_v44 = vcombine.low %v230_v34, %v212_v26 }
  0x26   : > { %v423_v30 = vrot.slane %v421_v21, 1  ;;  %v428_v39 = vrot.slane %v426_v22, 1  ;;  %v521_v41 = vsel %vm506_vm1, %v519_v28, %v520_v29  ;;  %v2164_v42 = vld [vmem:[%s2892_s7 + $0xc] sm:$0xf]  ;;  %v748_v43 = vrot.slane %v2978_v31, 1  ;;  %v2726_v46 = vld [vmem:[%s3869_s1 + $0xf0] sm:$0xff]  }
  0x27   : > { %535 = vrot.lane.b32.xlu1 %v515_v11, %s2816_s28  ;;  %v417_v36 = vsel %vm369_vm0, %v412_v19, %v416_v15  ;;  %v433_v40 = vshll.u32 %v2980_v32, 16  ;;  %v213_v45 = vld [vmem:[%s2892_s7 + $0x48] sm:$0xf]  ;;  %v747_v47 = vrot.slane %v2270_v33, 1  ;;  %v438_v48 = vshll.u32 %v2665_v35, 16  ;;  %2434 = vmatprep.subr.bf16.mxu1 %v2726_v46  ;;  %v2727_v58 = vld [vmem:[%s3869_s1 + $0xb0] sm:$0xff]  }
  0x28   : > { %470 = vrot.lane.b32.xlu0 %v405_v14, %s2815_s25  ;;  %v424_v37 = vor.u32 %v423_v30, %v419_v20  ;;  %v214_v49 = vld [vmem:[%s2892_s7 + $0x4c] sm:$0xf]  ;;  %v431_v51 = vshrl.u32 %v2980_v32, 16  ;;  %v2167_v53 = vld [vmem:[%s2892_s7 + $0x1c] sm:$0xf]  ;;  %v3004_v57 = vcombine.low %v2164_v42, %v2165_v16  ;;  %v522_v59 = vrot.slane %v2251_v44, 1  ;;  %2435 = vmatpush3.bf16.msra.mxu1 %v2727_v58 }
  0x29   : > { %v435_v52 = vrot.slane %v433_v40, 1  ;;  %v2189_v54 = vld [vmem:[%s2892_s7 + $0x18] sm:$0xe]  ;;  %v3001_v55 = vcombine.low %v213_v45, %v214_v49  ;;  %v523_v60 = vrot.slane %v2665_v35, 1  ;;  %v2728_v62 = vld [vmem:[%s3869_s1 + $0x48] sm:$0xff]   ;;  %v440_v63 = vrot.slane %v438_v48, 1 }
  0x2a   : > { %v429_v50 = vsel %vm369_vm0, %v424_v37, %v428_v39  ;;  %v3010_v61 = vld [vmem:[%s2892_s7 + $0x20] ss:$0 sps:$4 sm:$0x11]   ;;  %v2271_v0 = vcombine.low %v2189_v54, %v2167_v53  ;;  %v231_v1 = vld [vmem:[%s2892_s7 + $0x48] sm:$0xe]  ;;  %v749_v2 = vsel %vm506_vm1, %v747_v47, %v748_v43  ;;  %2380 = vmatprep.subr.bf16.mxu0 %v2728_v62 }
  0x2b   : > { %537 = vrot.lane.b32.xlu1 %v518_v25, %s2816_s28  ;;  %v436_v3 = vor.u32 %v435_v52, %v431_v51  ;;  %v2671_v4 = vld [vmem:[%s2892_s7 + $0x50] ss:$0 sps:$4 sm:$0x11]   ;;  %v445_v5 = vshll.u32 %v3001_v55, 16  ;;  %v215_v6 = vld [vmem:[%s2892_s7 + $0x54] sm:$0xf]  ;;  %v524_v11 = vsel %vm506_vm1, %v522_v59, %v523_v60  ;;  %v2252_v13 = vcombine.low %v231_v1, %v214_v49  ;;  %2381 = vmatpush3.bf16.msra.mxu0 %v2729_v10 }
  0x2c   : > { %472 = vrot.lane.b32.xlu0 %v417_v36, %s2815_s25  ;;  %v216_v9 = vld [vmem:[%s2892_s7 + $0x58] sm:$0xf]  ;;  %v750_v14 = vrot.slane %v2271_v0, 1  ;;  %v751_v15 = vrot.slane %v3010_v61, 1  ;;  %v443_v16 = vshrl.u32 %v3001_v55, 16  ;;  %v450_v21 = vshll.u32 %v2671_v4, 16 }
  0x2d   : > { %v2166_v12 = vld [vmem:[%s2892_s7 + $0x18] sm:$0xf]  ;;  %v2169_v17 = vld [vmem:[%s2892_s7 + $0x28] sm:$0xf]  ;;  %v441_v19 = vsel %vm369_vm0, %v436_v3, %v440_v63  ;;  %v447_v20 = vrot.slane %v445_v5, 1  ;;  %v3035_v23 = vcombine.low %v215_v6, %v216_v9  ;;  %v526_v25 = vrot.slane %v2671_v4, 1 }
  0x2e   : > { %v2190_v22 = vld [vmem:[%s2892_s7 + $0x24] sm:$0xe]  ;;  %v3038_v24 = vcombine.low %v2166_v12, %v2167_v53  ;;  %v3041_v26 = vld [vmem:[%s2892_s7 + $0x2c] ss:$0 sps:$4 sm:$0x11]   ;;  %v525_v27 = vrot.slane %v2252_v13, 1  ;;  %v752_v36 = vsel %vm506_vm1, %v750_v14, %v751_v15 }
  0x2f   : > { %539 = vrot.lane.b32.xlu1 %v521_v41, %s2816_s28  ;;  %3874 = vst [vmem:[#allocation2_spill] sm:$0xff] %v3035_v23  ;;  %v232_v28 = vld [vmem:[%s2892_s7 + $0x54] sm:$0xe]  ;;  %v2198_v29 = vld [vmem:[%s2892_s7 + $0x18] sm:$0xf]  ;;  %v2730_v30 = vld [vmem:[%s3869_s1 + $0xe8] sm:$0xff]   ;;  %v2272_v33 = vcombine.low %v2190_v22, %v2169_v17  ;;  %v448_v37 = vor.u32 %v447_v20, %v443_v16 }
  0x30   : > { %474 = vrot.lane.b32.xlu0 %v429_v50, %s2815_s25  ;;  %v2199_v34 = vld [vmem:[%s2892_s7 + $0x1c] sm:$0xf]  ;;  %v2731_v35 = vld [vmem:[%s3869_s1 + $0xa8] sm:$0xff]   ;;  %v452_v39 = vrot.slane %v450_v21, 1  ;;  %v457_v41 = vshll.u32 %v3035_v23, 16  ;;  %2436 = vmatprep.subr.bf16.mxu1 %v2730_v30  ;;  %v2732_v42 = vld [vmem:[%s3869_s1 + $0x40] sm:$0xff]   ;;  %v2253_v43 = vcombine.low %v232_v28, %v216_v9  ;;  %v527_v45 = vsel %vm506_vm1, %v525_v27, %v526_v25 }
  0x31   : > { %v2677_v40 = vld [vmem:[%s2892_s7 + $0x5c] ss:$0 sps:$4 sm:$0x11]   ;;  %2437 = vmatpush3.bf16.msra.mxu1 %v2731_v35  ;;  %v2734_v44 = vld [vmem:[%s3869_s1] sm:$0xff]   ;;  %v3066_v47 = vcombine.low %v2198_v29, %v2199_v34  ;;  %2382 = vmatprep.subr.bf16.mxu0 %v2732_v42  ;;  %v753_v48 = vrot.slane %v2272_v33, 1  ;;  %v754_v49 = vrot.slane %v3041_v26, 1 }
  0x32   : > { %v2168_v46 = vld [vmem:[%s2892_s7 + $0x24] sm:$0xf]  ;;  %v2171_v50 = vld [vmem:[%s2892_s7 + $0x34] sm:$0xf]  ;;  %v2191_v51 = vld [vmem:[%s2892_s7 + $0x30] sm:$0xe]  ;;  %2383 = vmatpush3.bf16.msra.mxu0 %v2734_v44  ;;  %v453_v52 = vsel %vm369_vm0, %v448_v37, %v452_v39 }
  0x33   : > { %587 = vrot.lane.b32.xlu1 %v3004_v57, %s2817_s22  ;;  %v455_v53 = vshrl.u32 %v3035_v23, 16  ;;  %v459_v54 = vrot.slane %v457_v41, 1  ;;  %v462_v58 = vshll.u32 %v2677_v40, 16  ;;  %v2735_v59 = vld [vmem:[%s3869_s1 + $0xe0] sm:$0xff]   ;;  %v3078_v60 = vcombine.low %v2168_v46, %v2169_v17  ;;  %v2201_v1 = vld [vmem:[%s2892_s7 + $0x28] sm:$0xf] }
  0x34   : > { %771 = vrot.lane.b32.xlu0 %v749_v2, %s2815_s25  ;;  %v528_v62 = vrot.slane %v2253_v43, 1  ;;  %v529_v63 = vrot.slane %v2677_v40, 1  ;;  %v2200_v0 = vld [vmem:[%s2892_s7 + $0x24] sm:$0xf]  ;;  %v2170_v2 = vld [vmem:[%s2892_s7 + $0x30] sm:$0xf]  ;;  %2438 = vmatprep.subr.bf16.mxu1 %v2735_v59  ;;  %v2273_v6 = vcombine.low %v2191_v51, %v2171_v50 }
  0x35   : > { %v2683_v3 = vld [vmem:[%s2892_s7 + $0x20] ss:$0 sps:$4 sm:$0x11]   ;;  %v870_v4 = vshll.u32 %v3066_v47, 16  ;;  %v2192_v9 = vld [vmem:[%s2892_s7 + $0x3c] sm:$0xe]  ;;  %v460_v12 = vor.u32 %v459_v54, %v455_v53  ;;  %v3097_v15 = vcombine.low %v2200_v0, %v2201_v1  ;;  %v3110_v28 = vcombine.low %v2170_v2, %v2171_v50 }
  0x36   : > { %v3086_v5 = vld [vmem:[%s2892_s7 + $0x40] sm:$0xf]  ;;  %v464_v13 = vrot.slane %v462_v58, 1  ;;  %v3095_v14 = vld [vmem:[%s2892_s7 + $0x38] ss:$0 sps:$4 sm:$0x11]  }
  0x37   : > { %541 = vrot.lane.b32.xlu1 %v524_v11, %s2816_s28  ;;  %v2736_v10 = vld [vmem:[%s3869_s1 + $0xa0] sm:$0xff]   ;;  %v755_v11 = vsel %vm506_vm1, %v753_v48, %v754_v49  ;;  %v2737_v16 = vld [vmem:[%s3869_s1 + $0x178] sm:$0xff]   ;;  %v654_v17 = vshll.u32 %v3078_v60, 16  ;;  %v868_v20 = vshrl.u32 %v3066_v47, 16  ;;  %v872_v21 = vrot.slane %v870_v4, 1 }
  0x38   : > { %476 = vrot.lane.b32.xlu0 %v441_v19, %s2815_s25  ;;  %v530_v19 = vsel %vm506_vm1, %v528_v62, %v529_v63  ;;  %2439 = vmatpush3.bf16.msra.mxu1 %v2736_v10  ;;  %v875_v22 = vshll.u32 %v2683_v3, 16  ;;  %v2274_v25 = vcombine.low %v2192_v9, %v3086_v5  ;;  %v756_v29 = vrot.slane %v2273_v6, 1  ;;  %v3115_v34 = vld [vmem:[%s2892_s7 + $0x44] ss:$0 sps:$4 sm:$0x11]   ;;  %v2738_v37 = vld [vmem:[%s3869_s1 + $0xd8] sm:$0xff]  }
  0x39   : > { %2496 = vmatprep.subr.bf16.mxu0 %v2737_v16  ;;  %v465_v30 = vsel %vm369_vm0, %v460_v12, %v464_v13  ;;  %v757_v33 = vrot.slane %v3095_v14, 1  ;;  %v3118_v35 = vld [vmem:[%s2892_s7 + $0x2c] ss:$0 sps:$4 sm:$0x11]   ;;  %v3124_v39 = vrot.slane %v654_v17, 1  ;;  %v666_v43 = vshll.u32 %v3110_v28, 16  ;;  %2440 = vmatprep.subr.bf16.mxu1 %v2738_v37 }
  0x3a   : > { %3875 = vst [vmem:[#allocation3_spill] sm:$0xff] %v3118_v35  ;;  %v2202_v41 = vld [vmem:[%s2892_s7 + $0x30] sm:$0xf]  ;;  %v3130_v42 = vld [vmem:[%s2892_s7 + $0x34] sm:$0xf]  ;;  %v873_v44 = vor.u32 %v872_v21, %v868_v20  ;;  %v759_v46 = vrot.slane %v2274_v25, 1 }
  0x3b   : > { %589 = vrot.lane.b32.xlu1 %v3038_v24, %s2817_s22  ;;  %v2740_v48 = vld [vmem:[%s3869_s1 + $0x98] sm:$0xff]   ;;  %v880_v49 = vshrl.u32 %v3097_v15, 16  ;;  %v3139_v50 = vld [vmem:[%s2892_s7 + $0x4c] sm:$0xf]  ;;  %v758_v53 = vsel %vm506_vm1, %v756_v29, %v757_v33  ;;  %v887_v59 = vshll.u32 %v3118_v35, 16  ;;  %v3149_v62 = vcombine.low %v2202_v41, %v3130_v42  ;;  %v2742_v33 = vld [vmem:[%s3869_s1 + $0xd0] sm:$0xff]  }
  0x3c   : > { %773 = vrot.lane.b32.xlu0 %v752_v36, %s2815_s25  ;;  %v882_v36 = vshll.u32 %v3097_v15, 16  ;;  %v3142_v51 = vld [vmem:[%s2892_s7 + $0x38] ss:$0 sps:$4 sm:$0x11]   ;;  %v2172_v54 = vld [vmem:[%s2892_s7 + $0x3c] sm:$0xf]  ;;  %2441 = vmatpush3.bf16.msra.mxu1 %v2740_v48 }
  0x3d   : > { %v3152_v63 = vld [vmem:[%s2892_s7 + $0x40] sm:$0xf]  ;;  %v2193_v0 = vld [vmem:[%s2892_s7 + $0x48] sm:$0xe]  ;;  %v3158_v1 = vld [vmem:[%s2892_s7 + $0x58] sm:$0xf]  ;;  %v3184_v21 = vcombine.low %v2172_v54, %v3086_v5  ;;  %2442 = vmatprep.subr.bf16.mxu1 %v2742_v33 }
  0x3e   : > { %v884_v58 = vrot.slane %v882_v36, 1  ;;  %v2194_v2 = vld [vmem:[%s2892_s7 + $0x54] sm:$0xe]  ;;  %v760_v6 = vrot.slane %v3115_v34, 1  ;;  %v889_v13 = vrot.slane %v887_v59, 1  ;;  %v2275_v16 = vcombine.low %v2193_v0, %v3139_v50 }
  0x3f   : > { %543 = vrot.lane.b32.xlu1 %v527_v45, %s2816_s28  ;;  %v877_v45 = vrot.slane %v875_v22, 1  ;;  %v3167_v9 = vld [vmem:[%s2892_s7 + $0x44] ss:$0 sps:$4 sm:$0x11]   ;;  %v894_v17 = vshll.u32 %v3149_v62, 16  ;;  %v899_v22 = vshll.u32 %v3142_v51, 16  ;;  %v2276_v25 = vcombine.low %v2194_v2, %v3158_v1 }
  0x40   : > { %478 = vrot.lane.b32.xlu0 %v453_v52, %s2815_s25  ;;  %v2204_v52 = vld [vmem:[%s2892_s7 + $0x3c] sm:$0xf]  ;;  %v3171_v10 = vld [vmem:[%s2892_s7 + $0x50] ss:$0 sps:$4 sm:$0x11]   ;;  %v885_v12 = vor.u32 %v884_v58, %v880_v49  ;;  %v911_v36 = vshll.u32 %v3167_v9, 16 }
  0x41   : > { %v3162_v3 = vcombine.low %v2204_v52, %v3152_v63  ;;  %v878_v4 = vsel %vm369_vm0, %v873_v44, %v877_v45  ;;  %v2195_v20 = vld [vmem:[%s2892_s7 + $0x60] sm:$0xe]  ;;  %v2206_v37 = vld [vmem:[%s2892_s7 + $0x48] sm:$0xf]  ;;  %v3198_v41 = vld [vmem:[%s2892_s7 + $0x4c] sm:$0xf]  ;;  %v761_v45 = vsel %vm506_vm1, %v759_v46, %v760_v6 }
  0x42   : > { %v2743_v5 = vld [vmem:[%s3869_s1 + $0x90] sm:$0xff]   ;;  %v3203_v44 = vrot.slane %v666_v43, 1  ;;  %v763_v48 = vrot.slane %v3171_v10, 1  ;;  %v890_v52 = vsel %vm369_vm0, %v885_v12, %v889_v13  ;;  %v892_v54 = vshrl.u32 %v3149_v62, 16 }
  0x43   : > { %591 = vrot.lane.b32.xlu1 %v3078_v60, %s2817_s22  ;;  %v906_v29 = vshll.u32 %v3162_v3, 16  ;;  %v896_v58 = vrot.slane %v894_v17, 1  ;;  %2443 = vmatpush3.bf16.msra.mxu1 %v2743_v5  ;;  %v901_v43 = vrot.slane %v899_v22, 1  ;;  %v765_v46 = vrot.slane %v2276_v25, 1  ;;  %v2208_v17 = vld [vmem:[%s2892_s7 + $0x54] sm:$0xf] }
  0x44   : > { %775 = vrot.lane.b32.xlu0 %v755_v11, %s2815_s25  ;;  %v3174_v11 = vld [vmem:[%s2892_s7 + $0x5c] ss:$0 sps:$4 sm:$0x11]   ;;  %v3217_v0 = vcombine.low %v2206_v37, %v3198_v41  ;;  %v904_v2 = vshrl.u32 %v3162_v3, 16  ;;  %v913_v6 = vrot.slane %v911_v36, 1 }
  0x45   : > { %v766_v59 = vrot.slane %v3174_v11, 1  ;;  %v2210_v22 = vld [vmem:[%s2892_s7 + $0x60] sm:$0xf]  ;;  %v3236_v33 = vld [vmem:[%s2892_s7 + $0x50] ss:$0 sps:$4 sm:$0x11]   ;;  %v897_v36 = vor.u32 %v896_v58, %v892_v54 }
  0x46   : > { %v2212_v37 = vld [vmem:[%s2892_s7 + $0x6c] sm:$0xf]  ;;  %v916_v54 = vshrl.u32 %v3217_v0, 16  ;;  %v923_v40 = vshll.u32 %v3236_v33, 16 }
  0x47   : > { %545 = vrot.lane.b32.xlu1 %v530_v19, %s2816_s28  ;;  %v3179_v19 = vld [vmem:[%s2892_s7 + $0x64] sm:$0xf]  ;;  %v902_v58 = vsel %vm369_vm0, %v897_v36, %v901_v43 }
  0x48   : > { %480 = vrot.lane.b32.xlu0 %v465_v30, %s2815_s25  ;;  %v3190_v30 = vld [vmem:[%s2892_s7 + $0x68] ss:$0 sps:$4 sm:$0x11]   ;;  %v2277_v49 = vcombine.low %v2195_v20, %v3179_v19  ;;  %v3225_v20 = vld [vmem:[%s2892_s7 + $0x58] sm:$0xf]  ;;  %v925_v27 = vrot.slane %v923_v40, 1 }
  0x49   : > { %v769_v12 = vrot.slane %v3190_v30, 1  ;;  %v3242_v5 = vcombine.low %v2208_v17, %v3225_v20  ;;  %v3258_v17 = vld [vmem:[%s2892_s7 + $0x5c] ss:$0 sps:$4 sm:$0x11]  }
  0x4a   : > { %v768_v13 = vrot.slane %v2277_v49, 1  ;;  %v935_v23 = vshll.u32 %v3258_v17, 16  ;;  %v3286_v40 = vld [vmem:[%s2892_s7 + $0x68] ss:$0 sps:$4 sm:$0x11]  }
  0x4b   : > { %593 = vrot.lane.b32.xlu1 %v3110_v28, %s2817_s22  ;;  %v928_v43 = vshrl.u32 %v3242_v5, 16 }
  0x4c   : > { %777 = vrot.lane.b32.xlu0 %v758_v53, %s2815_s25  ;;  %v762_v53 = vrot.slane %v2275_v16, 1  ;;  %v918_v16 = vshll.u32 %v3217_v0, 16 }
  0x4e   : > { %v764_v49 = vsel %vm506_vm1, %v762_v53, %v763_v48 }
  0x4f   : > { %963 = vrot.lane.b32.xlu1 %v878_v4, %s2817_s22  ;;  %v908_v4 = vrot.slane %v906_v29, 1  ;;  %v3233_v29 = vld [vmem:[%s2892_s7 + $0x64] sm:$0xf] }
  0x50   : > { %827 = vrot.lane.b32.xlu0 %v3066_v47, %s2816_s28  ;;  %v2174_v47 = vld [vmem:[%s2892_s7 + $0x48] sm:$0xf] }
  0x51   : > { %v3230_v25 = vcombine.low %v2174_v47, %v3139_v50  ;;  %v930_v50 = vshll.u32 %v3242_v5, 16  ;;  %v3253_v47 = vcombine.low %v2210_v22, %v3233_v29  ;;  %v909_v36 = vor.u32 %v908_v4, %v904_v2 }
  0x53   : > { %595 = vrot.lane.b32.xlu1 %v3184_v21, %s2817_s22  ;;  %v942_v48 = vshll.u32 %v3253_v47, 16  ;;  %v932_v35 = vrot.slane %v930_v50, 1  ;;  %v914_v2 = vsel %vm369_vm0, %v909_v36, %v913_v6  ;;  %v940_v4 = vshrl.u32 %v3253_v47, 16  ;;  %v3298_v6 = vld [vmem:[%s2892_s7 + $0x74] ss:$0 sps:$4 sm:$0x11]  }
  0x54   : > { %779 = vrot.lane.b32.xlu0 %v761_v45, %s2815_s25  ;;  %v3245_v45 = vld [vmem:[%s2892_s7 + $0x70] sm:$0xf]  ;;  %v690_v36 = vshll.u32 %v3230_v25, 16 }
  0x55   : > { %v3263_v53 = vcombine.low %v2212_v37, %v3245_v45  ;;  %v2178_v37 = vld [vmem:[%s2892_s7 + $0x60] sm:$0xf] }
  0x57   : > { %965 = vrot.lane.b32.xlu1 %v890_v52, %s2817_s22  ;;  %v2176_v52 = vld [vmem:[%s2892_s7 + $0x54] sm:$0xf] }
  0x58   : > { %829 = vrot.lane.b32.xlu0 %v3097_v15, %s2816_s28  ;;  %v920_v15 = vrot.slane %v918_v16, 1  ;;  %v3268_v22 = vcombine.low %v2176_v52, %v3158_v1  ;;  %v954_v16 = vshll.u32 %v3263_v53, 16  ;;  %v2745_v1 = vld [vmem:[%s3869_s1 + $0xc8] sm:$0xff]   ;;  %v3293_v52 = vcombine.low %v2178_v37, %v3179_v19  ;;  %v2749_v19 = vld [vmem:[%s3869_s1 + $0x80] sm:$0xff]  }
  0x59   : > { %2444 = vmatprep.subr.bf16.mxu1 %v2745_v1 }
  0x5a   : > { %v921_v50 = vor.u32 %v920_v15, %v916_v54  ;;  %v933_v54 = vor.u32 %v932_v35, %v928_v43  ;;  %v678_v15 = vshll.u32 %v3184_v21, 16  ;;  %v688_v43 = vshrl.u32 %v3230_v25, 16 }
  0x5b   : > { %597 = vrot.lane.b32.xlu1 %v3230_v25, %s2817_s22 }
  0x5c   : > { %781 = vrot.lane.b32.xlu0 %v764_v49, %s2815_s25  ;;  %v767_v49 = vsel %vm506_vm1, %v765_v46, %v766_v59  ;;  %v937_v46 = vrot.slane %v935_v23, 1  ;;  %v2747_v59 = vld [vmem:[%s3869_s1 + $0x88] sm:$0xff]   ;;  %v2748_v23 = vld [vmem:[%s3869_s1 + $0xc0] sm:$0xff]   ;;  %v680_v35 = vrot.slane %v678_v15, 1 }
  0x5d   : > { %2445 = vmatpush3.bf16.msra.mxu1 %v2747_v59  ;;  %v692_v59 = vrot.slane %v690_v36, 1 }
  0x5e   : > { %2446 = vmatprep.subr.bf16.mxu1 %v2748_v23 }
  0x5f   : > { %967 = vrot.lane.b32.xlu1 %v902_v58, %s2817_s22  ;;  %v770_v58 = vsel %vm506_vm1, %v768_v13, %v769_v12  ;;  %v952_v12 = vshrl.u32 %v3263_v53, 16  ;;  %v959_v13 = vshll.u32 %v3298_v6, 16 }
  0x60   : > { %831 = vrot.lane.b32.xlu0 %v3149_v62, %s2816_s28  ;;  %v944_v62 = vrot.slane %v942_v48, 1  ;;  %v947_v48 = vshll.u32 %v3286_v40, 16 }
  0x61   : > { %2447 = vmatpush3.bf16.msra.mxu1 %v2749_v19 }
  0x62   : > { %v945_v37 = vor.u32 %v944_v62, %v940_v4  ;;  %v949_v1 = vrot.slane %v947_v48, 1  ;;  %v714_v62 = vshll.u32 %v3293_v52, 16 }
  0x63   : > { %599 = vrot.lane.b32.xlu1 %v3268_v22, %s2817_s22 }
  0x64   : > { %783 = vrot.lane.b32.xlu0 %v767_v49, %s2815_s25  ;;  %v938_v49 = vsel %vm369_vm0, %v933_v54, %v937_v46  ;;  %v702_v46 = vshll.u32 %v3268_v22, 16  ;;  %v950_v25 = vsel %vm369_vm0, %v945_v37, %v949_v1  ;;  %v2226_v54 = vld [vmem:[%s2892_s7 + $0x48] sm:$0xe]  ;;  %v707_v1 = vshll.u32 %v3174_v11, 16 }
  0x66   : > { %v704_v48 = vrot.slane %v702_v46, 1 }
  0x67   : > { %969 = vrot.lane.b32.xlu1 %v914_v2, %s2817_s22  ;;  %v956_v2 = vrot.slane %v954_v16, 1  ;;  %v961_v16 = vrot.slane %v959_v13, 1 }
  0x68   : > { %833 = vrot.lane.b32.xlu0 %v3162_v3, %s2816_s28  ;;  %v926_v3 = vsel %vm369_vm0, %v921_v50, %v925_v27  ;;  %v676_v27 = vshrl.u32 %v3184_v21, 16  ;;  %v3876_v50 = vshrl.u32 %v3078_v60, 16  ;;  %v659_v21 = vshll.u32 %v3041_v26, 16 }
  0x69   : > { %v957_v4 = vor.u32 %v956_v2, %v952_v12  ;;  %v671_v26 = vshll.u32 %v3095_v14, 16  ;;  %v716_v12 = vrot.slane %v714_v62, 1  ;;  %v2298_v2 = vcombine.low %v2226_v54, %v3198_v41 }
  0x6a   : > { %v657_v23 = vor.u32 %v3124_v39, %v3876_v50  ;;  %v661_v60 = vrot.slane %v659_v21, 1  ;;  %v3336_v39 = vld [vmem:[%s3869_s1 + $0x1a8] sm:$0xff]   ;;  %v2225_v21 = vld [vmem:[%s2892_s7 + $0x3c] sm:$0xe] }
  0x6b   : > { %601 = vrot.lane.b32.xlu1 %v3293_v52, %s2817_s22  ;;  %v962_v15 = vsel %vm369_vm0, %v957_v4, %v961_v16  ;;  %2574 = vmatprep.subr.bf16.mxu1 %v3336_v39  ;;  %v673_v36 = vrot.slane %v671_v26, 1  ;;  %v1015_v46 = vrot.slane %v2298_v2, 1  ;;  %v2297_v4 = vcombine.low %v2225_v21, %v3152_v63  ;;  %v2753_v21 = vld [vmem:[%s3869_s1 + $0x120] sm:$0xff]  }
  0x6c   : > { %785 = vrot.lane.b32.xlu0 %v770_v58, %s2815_s25  ;;  %v700_v58 = vshrl.u32 %v3268_v22, 16  ;;  %v3344_v19 = vsel %vm369_vm0, %v657_v23, %v661_v60  ;;  %v2228_v23 = vld [vmem:[%s2892_s7 + $0x60] sm:$0xe] }
  0x6d   : > { %v2300_v62 = vcombine.low %v2228_v23, %v3233_v29  ;;  %v2752_v23 = vld [vmem:[%s3869_s1 + $0x160] sm:$0xff]  }
  0x6f   : > { %971 = vrot.lane.b32.xlu1 %v926_v3, %s2817_s22  ;;  %v681_v3 = vor.u32 %v680_v35, %v676_v27  ;;  %v709_v27 = vrot.slane %v707_v1, 1  ;;  %v2746_v1 = vld [vmem:[%s3869_s1 + $0x130] sm:$0xff]  }
  0x70   : > { %835 = vrot.lane.b32.xlu0 %v3217_v0, %s2816_s28  ;;  %v3877_v0 = vshrl.u32 %v3110_v28, 16  ;;  %v712_v28 = vshrl.u32 %v3293_v52, 16  ;;  %v705_v52 = vor.u32 %v704_v48, %v700_v58  ;;  %v2229_v58 = vld [vmem:[%s2892_s7 + $0x6c] sm:$0xe]  ;;  %v1012_v48 = vrot.slane %v2297_v4, 1 }
  0x71   : > { %v2301_v60 = vcombine.low %v2229_v58, %v3245_v45  ;;  %v1025_v45 = vrot.slane %v3298_v6, 1  ;;  %v642_v58 = vshll.u32 %v3038_v24, 16 }
  0x72   : > { %v669_v22 = vor.u32 %v3203_v44, %v3877_v0  ;;  %v2227_v44 = vld [vmem:[%s2892_s7 + $0x54] sm:$0xe]  ;;  %v3372_v50 = vsel %vm369_vm0, %v705_v52, %v709_v27  ;;  %v1016_v0 = vrot.slane %v3236_v33, 1  ;;  %v1022_v33 = vrot.slane %v3286_v40, 1 }
  0x73   : > { %973 = vrot.lane.b32.xlu1 %v938_v49, %s2817_s22  ;;  %v693_v49 = vor.u32 %v692_v59, %v688_v43  ;;  %v717_v43 = vor.u32 %v716_v12, %v712_v28  ;;  %v719_v59 = vshll.u32 %v3190_v30, 16  ;;  %v1013_v30 = vrot.slane %v3167_v9, 1 }
  0x74   : > { %837 = vrot.lane.b32.xlu0 %v3242_v5, %s2816_s28  ;;  %v683_v5 = vshll.u32 %v3115_v34, 16  ;;  %v3355_v13 = vsel %vm369_vm0, %v669_v22, %v673_v36  ;;  %v695_v34 = vshll.u32 %v3171_v10, 16  ;;  %v2299_v10 = vcombine.low %v2227_v44, %v3225_v20  ;;  %v2739_v44 = vld [vmem:[%s3869_s1 + $0x138] sm:$0xff]  }
  0x75   : > { %v721_v11 = vrot.slane %v719_v59, 1  ;;  %v1019_v22 = vrot.slane %v3258_v17, 1  ;;  %v3399_v63 = vsel %vm506_vm1, %v1012_v48, %v1013_v30  ;;  %v1021_v9 = vrot.slane %v2300_v62, 1  ;;  %v2751_v59 = vld [vmem:[%s3869_s1 + $0x128] sm:$0xff]  }
  0x76   : > { %v685_v14 = vrot.slane %v683_v5, 1  ;;  %v1018_v41 = vrot.slane %v2299_v10, 1  ;;  %v1024_v29 = vrot.slane %v2301_v60, 1  ;;  %v630_v12 = vshll.u32 %v3004_v57, 16 }
  0x77   : > { %975 = vrot.lane.b32.xlu1 %v950_v25, %s2817_s22  ;;  %v3377_v16 = vsel %vm369_vm0, %v717_v43, %v721_v11  ;;  %v1010_v25 = vrot.slane %v3142_v51, 1  ;;  %v3404_v17 = vsel %vm506_vm1, %v1021_v9, %v1022_v33  ;;  %v628_v27 = vshrl.u32 %v3004_v57, 16  ;;  %v2759_v33 = vld [vmem:[%s3869_s1 + $0x1a0] sm:$0xff]  }
  0x78   : > { %839 = vrot.lane.b32.xlu0 %v3253_v47, %s2816_s28  ;;  %v3360_v37 = vsel %vm369_vm0, %v681_v3, %v685_v14  ;;  %v697_v47 = vrot.slane %v695_v34, 1  ;;  %v3390_v3 = vsel %vm506_vm1, %v1015_v46, %v1016_v0  ;;  %v3407_v5 = vsel %vm506_vm1, %v1024_v29, %v1025_v45  ;;  %v2744_v14 = vld [vmem:[%s3869_s1 + $0x170] sm:$0xff]  }
  0x79   : > { %v635_v10 = vshll.u32 %v2978_v31, 16  ;;  %v647_v62 = vshll.u32 %v3010_v61, 16  ;;  %v2757_v61 = vld [vmem:[%s3869_s1 + $0x150] sm:$0xff]  }
  0x7a   : > { %v3368_v35 = vsel %vm369_vm0, %v693_v49, %v697_v47  ;;  %v2750_v47 = vld [vmem:[%s3869_s1 + $0x168] sm:$0xff]  }
  0x7b   : > { %977 = vrot.lane.b32.xlu1 %v962_v15, %s2817_s22  ;;  %v649_v29 = vrot.slane %v647_v62, 1 }
  0x7c   : > { %841 = vrot.lane.b32.xlu0 %v3263_v53, %s2816_s28  ;;  %v2224_v53 = vld [vmem:[%s2892_s7 + $0x30] sm:$0xe] }
  0x7d   : > { %v2296_v20 = vcombine.low %v2224_v53, %v3130_v42  ;;  %v3393_v42 = vsel %vm506_vm1, %v1018_v41, %v1019_v22  ;;  %v637_v41 = vrot.slane %v635_v10, 1  ;;  %v2766_v10 = vld [vmem:[%s3869_s1 + $0x188] sm:$0xff]  }
  0x7f   : > { %v1009_v26 = vrot.slane %v2296_v20, 1  ;;  %v2754_v20 = vld [vmem:[%s3869_s1 + $0x158] sm:$0xff]  }
  0x81   : > { %v3396_v51 = vsel %vm506_vm1, %v1009_v26, %v1010_v25  ;;  %v644_v25 = vrot.slane %v642_v58, 1  ;;  %v2755_v26 = vld [vmem:[%s3869_s1 + $0x118] sm:$0xff]  }
  0x91   : > { %v469_v54 = vpop.permute.xlu1 %468 }
  0x92   : > { %v467_v15 = vpop.permute.xlu0 %466  ;;  %v1032_v57 = vsel %vm1027_vm3, %v2899_v8, %v469_v54  ;;  %v640_v8 = vshrl.u32 %v3038_v24, 16 }
  0x93   : > { %v1029_v49 = vsel %vm1027_vm3, %v2913_v18, %v467_v15  ;;  %v632_v18 = vrot.slane %v630_v12, 1  ;;  %v2761_v12 = vld [vmem:[%s3869_s1 + $0x108] sm:$0xff]  }
  0x94   : > { %v645_v9 = vor.u32 %v644_v25, %v640_v8 }
  0x95   : > { %v3409_v36 = vpop.permute.xlu1 %533  ;;  %v633_v46 = vor.u32 %v632_v18, %v628_v27  ;;  %v2763_v27 = vld [vmem:[%s3869_s1 + $0x100] sm:$0xff]  }
  0x96   : > { %v532_v28 = vpop.permute.xlu0 %531  ;;  %v1057_v6 = vsel %vm1052_vm2, %v469_v54, %v3409_v36  ;;  %v2758_v54 = vld [vmem:[%s3869_s1 + $0x110] sm:$0xff]  }
  0x97   : > { %v1054_v40 = vsel %vm1052_vm2, %v467_v15, %v532_v28  ;;  %v638_v30 = vsel %vm369_vm0, %v633_v46, %v637_v41  ;;  %v2760_v15 = vld [vmem:[%s3869_s1 + $0x148] sm:$0xff]  }
  0x98   : > { %1677 = vmatprep.mubr.bf16.mxu0 %v1054_v40  ;;  %v2764_v40 = vld [vmem:[%s3869_s1 + $0x198] sm:$0xff]  }
  0x99   : > { %v3423_v34 = vpop.permute.xlu1 %535  ;;  %1678 = vmatmul.mubr.bf16.vlgmr.msra.gmra.mxu0 %v1029_v49 }
  0x9a   : > { %2497 = vmatpush3.bf16.msra.mxu0 %v2739_v44  ;;  %v471_v52 = vpop.permute.xlu0 %470  ;;  %1685 = vmatprep.mubr.bf16.mxu0 %v1057_v6  ;;  %v650_v44 = vsel %vm369_vm0, %v645_v9, %v649_v29 }
  0x9b   : > { %2498 = vmatprep.subr.bf16.mxu0 %v2744_v14  ;;  %v1060_v11 = vsel %vm1052_vm2, %v471_v52, %v3423_v34  ;;  %v1035_v0 = vsel %vm1027_vm3, %v2928_v38, %v471_v52 }
  0x9d   : > { %v3431_v2 = vpop.permute.xlu1 %537 }
  0x9e   : > { %v473_v43 = vpop.permute.xlu0 %472  ;;  %2499 = vmatpush3.bf16.msra.mxu0 %v2746_v1  ;;  %v2765_v1 = vld [vmem:[%s3869_s1 + $0x190] sm:$0xff]  }
  0x9f   : > { %2500 = vmatprep.subr.bf16.mxu0 %v2750_v47  ;;  %v1063_v48 = vsel %vm1052_vm2, %v473_v43, %v3431_v2  ;;  %v1038_v14 = vsel %vm1027_vm3, %v2941_v56, %v473_v43  ;;  %v2762_v56 = vld [vmem:[%s3869_s1 + $0x140] sm:$0xff]  }
  0xa1   : > { %v3446_v31 = vpop.permute.xlu1 %539  ;;  %1686 = vmatmul.mubr.bf16.gmra.mxu0 %v1032_v57 }
  0xa2   : > { %v3448_v53 = vpop.permute.xlu0 %474  ;;  %1693 = vmatprep.mubr.bf16.mxu0 %v1060_v11  ;;  %2501 = vmatpush3.bf16.msra.mxu0 %v2751_v59 }
  0xa3   : > { %2502 = vmatprep.subr.bf16.mxu0 %v2752_v23  ;;  %v1066_v52 = vsel %vm1052_vm2, %v3448_v53, %v3446_v31  ;;  %v1041_v59 = vsel %vm1027_vm3, %v2954_v7, %v3448_v53  ;;  %v2767_v7 = vld [vmem:[%s3869_s1 + $0x180] sm:$0xff]  }
  0xa5   : > { %v588_v4 = vpop.permute.xlu1 %587 }
  0xa6   : > { %v3459_v60 = vpop.permute.xlu0 %771  ;;  %v1079_v22 = vsel %vm1077_vm4, %v532_v28, %v588_v4  ;;  %2503 = vmatpush3.bf16.msra.mxu0 %v2753_v21 }
  0xa7   : > { %v1104_v24 = vsel %vm1027_vm3, %v638_v30, %v3459_v60  ;;  %2504 = vmatprep.subr.bf16.mxu0 %v2754_v20 }
  0xa8   : > { %1774 = vmatprep.mubr.bf16.mxu1 %v1104_v24 }
  0xa9   : > { %v3474_v38 = vpop.permute.xlu1 %541  ;;  %1694 = vmatmul.mubr.bf16.gmra.mxu0 %v1035_v0  ;;  %1775 = vmatmul.mubr.bf16.vlgmr.msra.gmra.mxu1 %v1079_v22 }
  0xaa   : > { %v477_v45 = vpop.permute.xlu0 %476  ;;  %1701 = vmatprep.mubr.bf16.mxu0 %v1063_v48  ;;  %2505 = vmatpush3.bf16.msra.mxu0 %v2755_v26 }
  0xab   : > { %2575 = vmatpush3.bf16.msra.mxu1 %v3336_v39  ;;  %2506 = vmatprep.subr.bf16.mxu0 %v2757_v61  ;;  %v1069_v58 = vsel %vm1052_vm2, %v477_v45, %v3474_v38  ;;  %v1044_v41 = vsel %vm1027_vm3, %v2980_v32, %v477_v45  ;;  %v2222_v45 = vld [vmem:[%s2892_s7 + $0x18] sm:$0xe] }
  0xac   : > { %2576 = vmatprep.subr.bf16.mxu1 %v2759_v33 }
  0xad   : > { %v590_v28 = vpop.permute.xlu1 %589 }
  0xae   : > { %v3490_v6 = vpop.permute.xlu0 %773  ;;  %v1082_v39 = vsel %vm1077_vm4, %v3409_v36, %v590_v28  ;;  %2507 = vmatpush3.bf16.msra.mxu0 %v2758_v54  ;;  %v2772_v28 = vld [vmem:[%s2892_s7 + $0x1c] sm:$0xf] }
  0xaf   : > { %v1108_v49 = vsel %vm1027_vm3, %v650_v44, %v3490_v6  ;;  %2508 = vmatprep.subr.bf16.mxu0 %v2760_v15  ;;  %2577 = vmatpush3.bf16.msra.mxu1 %v2759_v33  ;;  %v2294_v44 = vcombine.low %v2222_v45, %v2772_v28 }
  0xb0   : > { %1782 = vmatprep.mubr.bf16.mxu1 %v1108_v49  ;;  %2578 = vmatprep.subr.bf16.mxu1 %v2764_v40  ;;  %v2773_v49 = vld [vmem:[%s2892_s7 + $0x20] ss:$0 sps:$4 sm:$0x11]  }
  0xb1   : > { %v3507_v36 = vpop.permute.xlu1 %543  ;;  %1702 = vmatmul.mubr.bf16.gmra.mxu0 %v1038_v14  ;;  %1783 = vmatmul.mubr.bf16.gmra.mxu1 %v1082_v39 }
  0xb2   : > { %v479_v47 = vpop.permute.xlu0 %478  ;;  %1709 = vmatprep.mubr.bf16.mxu0 %v1066_v52  ;;  %2509 = vmatpush3.bf16.msra.mxu0 %v2761_v12  ;;  %v1003_v12 = vrot.slane %v2294_v44, 1  ;;  %v1004_v52 = vrot.slane %v2773_v49, 1 }
  0xb3   : > { %2510 = vmatprep.subr.bf16.mxu0 %v2762_v56  ;;  %2579 = vmatpush3.bf16.msra.mxu1 %v2764_v40  ;;  %v1072_v20 = vsel %vm1052_vm2, %v479_v47, %v3507_v36  ;;  %v1047_v32 = vsel %vm1027_vm3, %v3001_v55, %v479_v47  ;;  %v3878_v55 = vld [vmem:[#allocation2_spill] sm:$0xff]  ;;  %v2774_v47 = vld [vmem:[%s2892_s7 + $0x28] sm:$0xf] }
  0xb4   : > { %2580 = vmatprep.subr.bf16.mxu1 %v2765_v1  ;;  %v2223_v56 = vld [vmem:[%s2892_s7 + $0x24] sm:$0xe]  ;;  %s2155_s7 = sshll.u32 %s2797_s12, 3 }
  0xb5   : > { %v592_v18 = vpop.permute.xlu1 %591  ;;  %p188_p6 = scmp.lt.s32.totalorder %s2155_s7, 15 }
  0xb6   : > { %v3518_v43 = vpop.permute.xlu0 %775  ;;  %v1085_v11 = vsel %vm1077_vm4, %v3423_v34, %v592_v18  ;;  %2511 = vmatpush3.bf16.msra.mxu0 %v2763_v27  ;;  %v2295_v27 = vcombine.low %v2223_v56, %v2774_v47 }
  0xb7   : > { %v1112_v23 = vsel %vm1027_vm3, %v3344_v19, %v3518_v43  ;;  %2581 = vmatpush3.bf16.msra.mxu1 %v2765_v1  ;;  %s3913_s7 = smov (!%p188_p6, %s2155_s7), 15 }
  0xb8   : > { %1790 = vmatprep.mubr.bf16.mxu1 %v1112_v23  ;;  %2582 = vmatprep.subr.bf16.mxu1 %v2766_v10  ;;  %s2156_s12 = sshll.u32 %s3913_s7, 1 }
  0xb9   : > { %v3530_v57 = vpop.permute.xlu1 %545  ;;  %1710 = vmatmul.mubr.bf16.gmra.mxu0 %v1041_v59  ;;  %1791 = vmatmul.mubr.bf16.gmra.mxu1 %v1085_v11  ;;  %v3879_v11 = vld [vmem:[#allocation3_spill] sm:$0xff]  ;;  %s192_s29 = sadd.s32 %s2157_s24, %s2156_s12 }
  0xba   : > { %v481_v34 = vpop.permute.xlu0 %480  ;;  %1717 = vmatprep.mubr.bf16.mxu0 %v1069_v58  ;;  %v1007_v23 = vrot.slane %v3879_v11, 1  ;;  %v1006_v58 = vrot.slane %v2295_v27, 1  ;;  %s2158_s13 = sshll.u32 %s192_s29, 3 }
  0xbb   : > { %2583 = vmatpush3.bf16.msra.mxu1 %v2766_v10  ;;  %v1075_v62 = vsel %vm1052_vm2, %v481_v34, %v3530_v57  ;;  %v1005_v10 = vsel %vm506_vm1, %v1003_v12, %v1004_v52  ;;  %s3761_s5 = scalar_lea.vmem %s3871_s3, %s2158_s13 }
  0xbc   : > { %2584 = vmatprep.subr.bf16.mxu1 %v2767_v7 }
  0xbd   : > { %v594_v46 = vpop.permute.xlu1 %593 }
  0xbe   : > { %v3535_v19 = vpop.permute.xlu0 %777  ;;  %v1088_v53 = vsel %vm1077_vm4, %v3431_v2, %v594_v46 }
  0xbf   : > { %v1116_v21 = vsel %vm1027_vm3, %v3355_v13, %v3535_v19  ;;  %2585 = vmatpush3.bf16.msra.mxu1 %v2767_v7 }
  0xc0   : > { %1798 = vmatprep.mubr.bf16.mxu1 %v1116_v21 }
  0xc1   : > { %v964_v8 = vpop.permute.xlu1 %963  ;;  %1718 = vmatmul.mubr.bf16.gmra.mxu0 %v1044_v41  ;;  %1799 = vmatmul.mubr.bf16.gmra.mxu1 %v1088_v53 }
  0xc2   : > { %v828_v25 = vpop.permute.xlu0 %827  ;;  %1725 = vmatprep.mubr.bf16.mxu0 %v1072_v20 }
  0xc3   : > { %v1159_v61 = vsel %vm1077_vm4, %v828_v25, %v964_v8  ;;  %v1135_v40 = vsel %vm1052_vm2, %v3459_v60, %v828_v25 }
  0xc5   : > { %v596_v4 = vpop.permute.xlu1 %595 }
  0xc6   : > { %v3546_v30 = vpop.permute.xlu0 %779  ;;  %v1091_v2 = vsel %vm1077_vm4, %v3446_v31, %v596_v4  ;;  %v1050_v31 = vsel %vm1027_vm3, %v3878_v55, %v481_v34 }
  0xc7   : > { %v1120_v13 = vsel %vm1027_vm3, %v3360_v37, %v3546_v30 }
  0xc8   : > { %1806 = vmatprep.mubr.bf16.mxu1 %v1120_v13 }
  0xc9   : > { %v966_v0 = vpop.permute.xlu1 %965  ;;  %1726 = vmatmul.mubr.bf16.gmra.mxu0 %v1047_v32  ;;  %1807 = vmatmul.mubr.bf16.gmra.mxu1 %v1091_v2 }
  0xca   : > { %v830_v22 = vpop.permute.xlu0 %829  ;;  %1733 = vmatprep.mubr.bf16.mxu0 %v1075_v62 }
  0xcb   : > { %v1162_v15 = vsel %vm1077_vm4, %v830_v22, %v966_v0  ;;  %v1138_v59 = vsel %vm1052_vm2, %v3490_v6, %v830_v22 }
  0xcd   : > { %v598_v26 = vpop.permute.xlu1 %597 }
  0xce   : > { %v3557_v24 = vpop.permute.xlu0 %781  ;;  %v1094_v37 = vsel %vm1077_vm4, %v3474_v38, %v598_v26 }
  0xcf   : > { %v1124_v48 = vsel %vm1027_vm3, %v3368_v35, %v3557_v24 }
  0xd0   : > { %1814 = vmatprep.mubr.bf16.mxu1 %v1124_v48 }
  0xd1   : > { %v968_v9 = vpop.permute.xlu1 %967  ;;  %1734 = vmatmul.mubr.bf16.gmra.mxu0 %v1050_v31  ;;  %1815 = vmatmul.mubr.bf16.gmra.mxu1 %v1094_v37 }
  0xd2   : > { %v832_v29 = vpop.permute.xlu0 %831  ;;  %1871 = vmatprep.mubr.bf16.mxu0 %v1159_v61 }
  0xd3   : > { %v1165_v18 = vsel %vm1077_vm4, %v832_v29, %v968_v9  ;;  %v1141_v7 = vsel %vm1052_vm2, %v3518_v43, %v832_v29 }
  0xd5   : > { %v600_v33 = vpop.permute.xlu1 %599 }
  0xd6   : > { %v3568_v54 = vpop.permute.xlu0 %783  ;;  %v1097_v38 = vsel %vm1077_vm4, %v3507_v36, %v600_v33 }
  0xd7   : > { %v1128_v35 = vsel %vm1027_vm3, %v3372_v50, %v3568_v54 }
  0xd8   : > { %1822 = vmatprep.mubr.bf16.mxu1 %v1128_v35 }
  0xd9   : > { %v970_v14 = vpop.permute.xlu1 %969  ;;  %1823 = vmatmul.mubr.bf16.gmra.mxu1 %v1097_v38  ;;  %1872 = vmatmul.mubr.bf16.vlgmr.msra.gmra.mxu0 %v1135_v40 }
  0xda   : > { %v834_v39 = vpop.permute.xlu0 %833  ;;  %1879 = vmatprep.mubr.bf16.mxu0 %v1162_v15 }
  0xdb   : > { %v1144_v41 = vsel %vm1052_vm2, %v3535_v19, %v834_v39 }
  0xdd   : > { %v602_v36 = vpop.permute.xlu1 %601 }
  0xde   : > { %v786_v50 = vpop.permute.xlu0 %785  ;;  %v1100_v1 = vsel %vm1077_vm4, %v3530_v57, %v602_v36  ;;  %v1008_v57 = vsel %vm506_vm1, %v1006_v58, %v1007_v23 }
  0xdf   : > { %v1132_v60 = vsel %vm1027_vm3, %v3377_v16, %v786_v50  ;;  %v1168_v16 = vsel %vm1077_vm4, %v834_v39, %v970_v14 }
  0xe0   : > { %1830 = vmatprep.mubr.bf16.mxu1 %v1132_v60 }
  0xe1   : > { %1831 = vmatmul.mubr.bf16.gmra.mxu1 %v1100_v1  ;;  %1880 = vmatmul.mubr.bf16.gmra.mxu0 %v1138_v59  ;;  %v972_v6 = vpop.permute.xlu1 %971 }
  0xe2   : > { %1887 = vmatprep.mubr.bf16.mxu0 %v1165_v18  ;;  %2586 = vmatprep.mubr.msk.bf16.mxu1 %vm1027_vm3, %v1005_v10  ;;  %v836_v34 = vpop.permute.xlu0 %835 }
  0xe3   : > { %v1171_v46 = vsel %vm1077_vm4, %v836_v34, %v972_v6 }
  0xe5   : > { %v974_v43 = vpop.permute.xlu1 %973 }
  0xe6   : > { %v838_v53 = vpop.permute.xlu0 %837 }
  0xe7   : > { %v1174_v21 = vsel %vm1077_vm4, %v838_v53, %v974_v43 }
  0xe9   : > { %1888 = vmatmul.mubr.bf16.gmra.mxu0 %v1141_v7  ;;  %2587 = vmatmul.mubr.msk.bf16.vlgmr.msra.gmra.mxu1 %vm1027_vm3, %v1008_v57 }
  0xea   : > { %1895 = vmatprep.mubr.bf16.mxu0 %v1168_v16  ;;  %2590 = vmatprep.mubr.msk.bf16.mxu1 %vm1027_vm3, %v3396_v51  ;;  %v1147_v51 = vsel %vm1052_vm2, %v3546_v30, %v836_v34  ;;  %v840_v19 = vpop.permute.xlu0 %839 }
  0xeb   : > { %v1153_v4 = vsel %vm1052_vm2, %v3568_v54, %v840_v19 }
  0xee   : > { %v842_v25 = vpop.permute.xlu0 %841 }
  0xf1   : > { %1896 = vmatmul.mubr.bf16.gmra.mxu0 %v1144_v41  ;;  %2591 = vmatmul.mubr.msk.bf16.gmra.mxu1 %vm1027_vm3, %v3399_v63  ;;  %v976_v63 = vpop.permute.xlu1 %975 }
  0xf2   : > { %1903 = vmatprep.mubr.bf16.mxu0 %v1171_v46  ;;  %2594 = vmatprep.mubr.msk.bf16.mxu1 %vm1027_vm3, %v3390_v3  ;;  %v1177_v20 = vsel %vm1077_vm4, %v840_v19, %v976_v63  ;;  %v1150_v3 = vsel %vm1052_vm2, %v3557_v24, %v838_v53 }
  0xf5   : > { %v978_v8 = vpop.permute.xlu1 %977 }
  0xf9   : > { %1904 = vmatmul.mubr.bf16.gmra.mxu0 %v1147_v51  ;;  %2595 = vmatmul.mubr.msk.bf16.gmra.mxu1 %vm1027_vm3, %v3393_v42  ;;  %v1180_v42 = vsel %vm1077_vm4, %v842_v25, %v978_v8 }
  0xfa   : > { %1911 = vmatprep.mubr.bf16.mxu0 %v1174_v21  ;;  %2598 = vmatprep.mubr.msk.bf16.mxu1 %vm1027_vm3, %v3404_v17  ;;  %v1156_v17 = vsel %vm1052_vm2, %v786_v50, %v842_v25 }
 0x101   : > { %1912 = vmatmul.mubr.bf16.gmra.mxu0 %v1150_v3  ;;  %2599 = vmatmul.mubr.msk.bf16.gmra.mxu1 %vm1027_vm3, %v3407_v5 }
 0x102   : > { %1919 = vmatprep.mubr.bf16.mxu0 %v1177_v20 }
 0x109   : > { %1920 = vmatmul.mubr.bf16.gmra.mxu0 %v1153_v4 }
 0x10a   : > { %1927 = vmatprep.mubr.bf16.mxu0 %v1180_v42 }
 0x111   : > { %1928 = vmatmul.mubr.bf16.gmra.mxu0 %v1156_v17 }
 0x159   : > { %v2384_v30 = vpop.f32.mrf.mxu0 }
 0x15b   : > { %v2385_v32 = vpop.f32.mrf.mxu0 }
 0x15c   : > { %v3622_v2 = vadd.f32 %v2385_v32, %v2384_v30 }
 0x15d   : > { %v2387_v13 = vpop.f32.mrf.mxu0 }
 0x15f   : > { %v2388_v62 = vpop.f32.mrf.mxu0 }
 0x160   : > { %v3624_v5 = vadd.f32 %v2388_v62, %v2387_v13 }
 0x161   : > { %v3626_v0 = vpop.f32.mrf.mxu0 }
 0x163   : > { %v3628_v22 = vpop.f32.mrf.mxu0 }
 0x165   : > { %v3630_v26 = vpop.f32.mrf.mxu0 }
 0x167   : > { %v3632_v24 = vpop.f32.mrf.mxu0 }
 0x169   : > { %v2396_v55 = vpop.f32.mrf.mxu0  ;;  %v3634_v31 = vpop.f32.mrf.mxu1 }
 0x16b   : > { %v2397_v37 = vpop.f32.mrf.mxu0  ;;  %v3636_v48 = vpop.f32.mrf.mxu1 }
 0x16c   : > { %v3638_v61 = vadd.f32 %v2397_v37, %v2396_v55  ;;  %v2392_v55 = vadd.f32 %v3628_v22, %v3626_v0  ;;  %v2450_v22 = vadd.f32 %v3636_v48, %v3634_v31 }
 0x16d   : > { %v2399_v9 = vpop.f32.mrf.mxu0  ;;  %v3640_v29 = vpop.f32.mrf.mxu1 }
 0x16f   : > { %v2400_v33 = vpop.f32.mrf.mxu0  ;;  %v3642_v45 = vpop.f32.mrf.mxu1 }
 0x170   : > { %v3644_v54 = vadd.f32 %v2400_v33, %v2399_v9  ;;  %v2453_v31 = vadd.f32 %v3642_v45, %v3640_v29 }
 0x171   : > { %v3646_v38 = vpop.f32.mrf.mxu0  ;;  %v2454_v35 = vpop.f32.mrf.mxu1 }
 0x173   : > { %v3648_v15 = vpop.f32.mrf.mxu0  ;;  %v2455_v28 = vpop.f32.mrf.mxu1 }
 0x174   : > { %v2456_v33 = vadd.f32 %v2455_v28, %v2454_v35 }
 0x175   : > { %v3650_v44 = vpop.f32.mrf.mxu0  ;;  %v3652_v40 = vpop.f32.mrf.mxu1 }
 0x177   : > { %v3654_v14 = vpop.f32.mrf.mxu0  ;;  %v2458_v39 = vpop.f32.mrf.mxu1 }
 0x179   : > { %v3656_v12 = vpop.f32.mrf.mxu0  ;;  %v3658_v49 = vpop.f32.mrf.mxu1 }
 0x17b   : > { %v3660_v52 = vpop.f32.mrf.mxu0  ;;  %v3662_v56 = vpop.f32.mrf.mxu1 }
 0x17d   : > { %v3664_v36 = vpop.f32.mrf.mxu0  ;;  %v3666_v50 = vpop.f32.mrf.mxu1 }
 0x17f   : > { %v3668_v1 = vpop.f32.mrf.mxu0  ;;  %v3670_v47 = vpop.f32.mrf.mxu1 }
 0x181   : > { %v3672_v27 = vpop.f32.mrf.mxu0  ;;  %v3674_v60 = vpop.f32.mrf.mxu1 }
 0x183   : > { %v3676_v18 = vpop.f32.mrf.mxu0  ;;  %v3678_v10 = vpop.f32.mrf.mxu1 }
 0x185   : > { %v3680_v59 = vpop.f32.mrf.mxu0  ;;  %v3682_v11 = vpop.f32.mrf.mxu1 }
 0x187   : > { %v3684_v23 = vpop.f32.mrf.mxu0  ;;  %v3686_v58 = vpop.f32.mrf.mxu1 }
 0x189   : > { %v3688_v57 = vpop.f32.mrf.mxu0  ;;  %v3690_v16 = vpop.f32.mrf.mxu1 }
 0x18b   : > { %v3692_v7 = vpop.f32.mrf.mxu0  ;;  %v3694_v6 = vpop.f32.mrf.mxu1 }
 0x18d   : > { %v3696_v34 = vpop.f32.mrf.mxu0  ;;  %v3698_v46 = vpop.f32.mrf.mxu1 }
 0x18e   : > { %3880 = vst [vmem:[#allocation2_spill] sm:$0xff] %v3696_v34 }
 0x18f   : > { %v3700_v41 = vpop.f32.mrf.mxu0  ;;  %v3702_v43 = vpop.f32.mrf.mxu1 }
 0x190   : > { %3881 = vst [vmem:[#allocation3_spill] sm:$0xff] %v3700_v41  ;;  %v2459_v41 = vadd.f32 %v2458_v39, %v3652_v40 }
 0x191   : > { %v3704_v53 = vpop.f32.mrf.mxu0  ;;  %v3706_v21 = vpop.f32.mrf.mxu1 }
 0x192   : > { %3882 = vst [vmem:[#allocation4_spill] sm:$0xff] %v3704_v53 }
 0x193   : > { %v3708_v51 = vpop.f32.mrf.mxu0  ;;  %v3710_v63 = vpop.f32.mrf.mxu1 }
 0x194   : > { %3883 = vst [vmem:[#allocation5_spill] sm:$0xff] %v3708_v51 }
 0x195   : > { %v3712_v19 = vpop.f32.mrf.mxu0  ;;  %v3714_v20 = vpop.f32.mrf.mxu1 }
 0x196   : > { %3884 = vst [vmem:[#allocation6_spill] sm:$0xff] %v3712_v19  ;;  %v2395_v19 = vadd.f32 %v3632_v24, %v3630_v26 }
 0x197   : > { %v3717_v3 = vpop.f32.mrf.mxu0  ;;  %v3719_v8 = vpop.f32.mrf.mxu1 }
 0x198   : > { %3885 = vst [vmem:[#allocation7_spill] sm:$0xff] %v3717_v3  ;;  %v3737_v3 = vld [vmem:[%s3870_s2] ss:$0 sm:$0xff] }
 0x199   : > { %v3721_v25 = vpop.f32.mrf.mxu1  ;;  %v2512_v42 = vpop.f32.mrf.mxu0  ;;  %v1688_v0 = vadd.f32 %v2392_v55, %v3737_v3  ;;  %v1680_v28 = vadd.f32 %v3622_v2, %v3737_v3  ;;  %v1691_v24 = vadd.f32 %v2395_v19, %v3737_v3 }
 0x19b   : > { %v3723_v4 = vpop.f32.mrf.mxu1  ;;  %v2513_v17 = vpop.f32.mrf.mxu0  ;;  %v1777_v34 = vadd.f32 %v2450_v22, %v1680_v28  ;;  %v1788_v39 = vadd.f32 %v2459_v41, %v1691_v24 }
 0x19c   : > { %v2514_v26 = vadd.f32 %v2513_v17, %v2512_v42 }
 0x19d   : > { %v3725_v30 = vpop.f32.mrf.mxu1  ;;  %v2515_v32 = vpop.f32.mrf.mxu0 }
 0x19e   : > { %3886 = vst [vmem:[#allocation8_spill] sm:$0xff] %v3725_v30  ;;  %v1785_v30 = vadd.f32 %v2456_v33, %v1688_v0  ;;  %v1874_v17 = vadd.f32 %v2514_v26, %v1777_v34  ;;  %v1696_v0 = vadd.f32 %v3638_v61, %v3737_v3  ;;  %v2465_v26 = vadd.f32 %v3670_v47, %v3666_v50 }
 0x19f   : > { %v3727_v13 = vpop.f32.mrf.mxu1  ;;  %v2516_v62 = vpop.f32.mrf.mxu0  ;;  %v2468_v61 = vadd.f32 %v3678_v10, %v3674_v60  ;;  %v2471_v47 = vadd.f32 %v3686_v58, %v3682_v11 }
 0x1a0   : > { %3887 = vst [vmem:[#allocation9_spill] sm:$0xff] %v3727_v13  ;;  %v2517_v19 = vadd.f32 %v2516_v62, %v2515_v32  ;;  %v2404_v32 = vadd.f32 %v3648_v15, %v3646_v38  ;;  %v2407_v38 = vadd.f32 %v3654_v14, %v3650_v44 }
 0x1a1   : > { %v3732_v37 = vpop.f32.mrf.mxu1  ;;  %v2518_v9 = vpop.f32.mrf.mxu0 }
 0x1a2   : > { %3888 = vst [vmem:[#allocation10_spill] sm:$0xff] %v3732_v37 }
 0x1a3   : > { %v3741_v51 = vpop.f32.mrf.mxu1  ;;  %v2519_v53 = vpop.f32.mrf.mxu0 }
 0x1a4   : > { %3889 = vst [vmem:[#allocation11_spill] sm:$0xff] %v3741_v51  ;;  %v2520_v37 = vadd.f32 %v2519_v53, %v2518_v9  ;;  %v1683_v9 = vadd.f32 %v3624_v5, %v3737_v3 }
 0x1a5   : > { %v3746_v13 = vpop.f32.mrf.mxu1  ;;  %v2521_v35 = vpop.f32.mrf.mxu0 }
 0x1a6   : > { %v1882_v53 = vadd.f32 %v2520_v37, %v1785_v30  ;;  %v1780_v45 = vadd.f32 %v2453_v31, %v1683_v9  ;;  %v2462_v30 = vadd.f32 %v3662_v56, %v3658_v49  ;;  %v1699_v31 = vadd.f32 %v3644_v54, %v3737_v3 }
 0x1a7   : > { %v3752_v51 = vpop.f32.mrf.mxu1  ;;  %v2522_v55 = vpop.f32.mrf.mxu0 }
 0x1a8   : > { %v2523_v48 = vadd.f32 %v2522_v55, %v2521_v35  ;;  %v1877_v35 = vadd.f32 %v2517_v19, %v1780_v45  ;;  %v1793_v28 = vadd.f32 %v2462_v30, %v1696_v0  ;;  %v1796_v9 = vadd.f32 %v2465_v26, %v1699_v31 }
 0x1a9   : > { %v2524_v2 = vpop.f32.mrf.mxu0  ;;  %v2588_v40 = vpop.f32.mrf.mxu1  ;;  %v2410_v19 = vadd.f32 %v3660_v52, %v3656_v12  ;;  %v2413_v12 = vadd.f32 %v3668_v1, %v3664_v36  ;;  %v2416_v36 = vadd.f32 %v3676_v18, %v3672_v27 }
 0x1aa   : > { %v1979_v42 = vadd.f32 %v2588_v40, %v1882_v53  ;;  %v1885_v37 = vadd.f32 %v2523_v48, %v1788_v39  ;;  %v1704_v48 = vadd.f32 %v2404_v32, %v3737_v3  ;;  %v1707_v40 = vadd.f32 %v2407_v38, %v3737_v3 }
 0x1ab   : > { %v2525_v33 = vpop.f32.mrf.mxu0  ;;  %v1970_v29 = vpop.f32.mrf.mxu1 }
 0x1ac   : > { %2035 = vst.msk [vmem:[%s3761_s5 + $0x10] sm:$0xff] %vm1027_vm3, %v1979_v42  ;;  %v1971_v5 = vadd.f32 %v1970_v29, %v1874_v17  ;;  %v2526_v34 = vadd.f32 %v2525_v33, %v2524_v2  ;;  %v1801_v2 = vadd.f32 %v2468_v61, %v1704_v48  ;;  %v1804_v11 = vadd.f32 %v2471_v47, %v1707_v40  ;;  %v3890_v40 = vld [vmem:[#allocation2_spill] sm:$0xff] }
 0x1ad   : > { %v2527_v22 = vpop.f32.mrf.mxu0  ;;  %v2589_v41 = vpop.f32.mrf.mxu1  ;;  %v2474_v29 = vadd.f32 %v3694_v6, %v3690_v16  ;;  %v2477_v16 = vadd.f32 %v3702_v43, %v3698_v46  ;;  %v2480_v61 = vadd.f32 %v3710_v63, %v3706_v21  ;;  %v2483_v48 = vadd.f32 %v3719_v8, %v3714_v20 }
 0x1ae   : > { %2033 = vst.msk [vmem:[%s3761_s5] sm:$0xff] %vm1027_vm3, %v1971_v5  ;;  %v1982_v62 = vadd.f32 %v2589_v41, %v1885_v37  ;;  %v1890_v50 = vadd.f32 %v2526_v34, %v1793_v28 }
 0x1af   : > { %v2528_v49 = vpop.f32.mrf.mxu0  ;;  %v1973_v56 = vpop.f32.mrf.mxu1 }
 0x1b0   : > { %2036 = vst.msk [vmem:[%s3761_s5 + $0x18] sm:$0xff] %vm1027_vm3, %v1982_v62  ;;  %v1974_v24 = vadd.f32 %v1973_v56, %v1877_v35  ;;  %v2529_v53 = vadd.f32 %v2528_v49, %v2527_v22  ;;  %v1712_v22 = vadd.f32 %v2410_v19, %v3737_v3  ;;  %v1715_v56 = vadd.f32 %v2413_v12, %v3737_v3  ;;  %v3896_v12 = vld [vmem:[#allocation10_spill] sm:$0xff] }
 0x1b1   : > { %v2530_v15 = vpop.f32.mrf.mxu0  ;;  %v2592_v55 = vpop.f32.mrf.mxu1 }
 0x1b2   : > { %2034 = vst.msk [vmem:[%s3761_s5 + $0x8] sm:$0xff] %vm1027_vm3, %v1974_v24  ;;  %v1893_v17 = vadd.f32 %v2529_v53, %v1796_v9  ;;  %v1809_v34 = vadd.f32 %v2474_v29, %v1712_v22  ;;  %v1812_v26 = vadd.f32 %v2477_v16, %v1715_v56  ;;  %v2486_v9 = vadd.f32 %v3723_v4, %v3721_v25 }
 0x1b3   : > { %v2531_v60 = vpop.f32.mrf.mxu0  ;;  %v1986_v10 = vpop.f32.mrf.mxu1 }
 0x1b4   : > { %v2532_v44 = vadd.f32 %v2531_v60, %v2530_v15  ;;  %v1987_v14 = vadd.f32 %v1986_v10, %v1890_v50  ;;  %v1720_v15 = vadd.f32 %v2416_v36, %v3737_v3  ;;  %v2422_v60 = vadd.f32 %v3692_v7, %v3688_v57 }
 0x1b5   : > { %v2533_v39 = vpop.f32.mrf.mxu0  ;;  %v2593_v54 = vpop.f32.mrf.mxu1 }
 0x1b6   : > { %v1898_v42 = vadd.f32 %v2532_v44, %v1801_v2  ;;  %2037 = vst.msk [vmem:[%s3761_s5 + $0x20] sm:$0xff] %vm1027_vm3, %v1987_v14  ;;  %v1817_v31 = vadd.f32 %v2480_v61, %v1720_v15  ;;  %v1728_v14 = vadd.f32 %v2422_v60, %v3737_v3 }
 0x1b7   : > { %v2534_v58 = vpop.f32.mrf.mxu0  ;;  %v1989_v33 = vpop.f32.mrf.mxu1 }
 0x1b8   : > { %v1995_v45 = vadd.f32 %v2592_v55, %v1898_v42  ;;  %v2535_v30 = vadd.f32 %v2534_v58, %v2533_v39  ;;  %v1990_v5 = vadd.f32 %v1989_v33, %v1893_v17  ;;  %v2419_v55 = vadd.f32 %v3684_v23, %v3680_v59  ;;  %v3891_v39 = vld [vmem:[#allocation3_spill] sm:$0xff]  ;;  %v3892_v42 = vld [vmem:[#allocation8_spill] sm:$0xff]  ;;  %v3893_v17 = vld [vmem:[#allocation9_spill] sm:$0xff] }
 0x1b9   : > { %v2536_v37 = vpop.f32.mrf.mxu0  ;;  %v2596_v0 = vpop.f32.mrf.mxu1  ;;  %v1825_v19 = vadd.f32 %v2486_v9, %v1728_v14 }
 0x1ba   : > { %2039 = vst.msk [vmem:[%s3761_s5 + $0x30] sm:$0xff] %vm1027_vm3, %v1995_v45  ;;  %v1901_v52 = vadd.f32 %v2535_v30, %v1804_v11  ;;  %2038 = vst.msk [vmem:[%s3761_s5 + $0x28] sm:$0xff] %vm1027_vm3, %v1990_v5  ;;  %v1723_v47 = vadd.f32 %v2419_v55, %v3737_v3  ;;  %v2489_v11 = vadd.f32 %v3893_v17, %v3892_v42  ;;  %v3894_v45 = vld [vmem:[#allocation4_spill] sm:$0xff]  ;;  %v3895_v30 = vld [vmem:[#allocation5_spill] sm:$0xff] }
 0x1bb   : > { %v2537_v41 = vpop.f32.mrf.mxu0  ;;  %v2002_v32 = vpop.f32.mrf.mxu1  ;;  %v2428_v5 = vadd.f32 %v3895_v30, %v3894_v45 }
 0x1bc   : > { %v1998_v6 = vadd.f32 %v2593_v54, %v1901_v52  ;;  %v2538_v62 = vadd.f32 %v2537_v41, %v2536_v37  ;;  %v1820_v23 = vadd.f32 %v2483_v48, %v1723_v47  ;;  %v2425_v54 = vadd.f32 %v3891_v39, %v3890_v40  ;;  %v3897_v52 = vld [vmem:[#allocation11_spill] sm:$0xff] }
 0x1bd   : > { %v2539_v35 = vpop.f32.mrf.mxu0  ;;  %v2597_v49 = vpop.f32.mrf.mxu1  ;;  %v2492_v41 = vadd.f32 %v3897_v52, %v3896_v12 }
 0x1be   : > { %2040 = vst.msk [vmem:[%s3761_s5 + $0x38] sm:$0xff] %vm1027_vm3, %v1998_v6  ;;  %v1906_v1 = vadd.f32 %v2538_v62, %v1809_v34  ;;  %v1731_v29 = vadd.f32 %v2425_v54, %v3737_v3  ;;  %v1736_v62 = vadd.f32 %v2428_v5, %v3737_v3 }
 0x1bf   : > { %v2540_v28 = vpop.f32.mrf.mxu0  ;;  %v2005_v38 = vpop.f32.mrf.mxu1 }
 0x1c0   : > { %v2541_v24 = vadd.f32 %v2540_v28, %v2539_v35  ;;  %v2003_v46 = vadd.f32 %v2002_v32, %v1906_v1  ;;  %v1828_v22 = vadd.f32 %v2489_v11, %v1731_v29  ;;  %v3898_v35 = vld [vmem:[#allocation6_spill] sm:$0xff]  ;;  %v1833_v28 = vadd.f32 %v2492_v41, %v1736_v62 }
 0x1c1   : > { %v2542_v43 = vpop.f32.mrf.mxu0  ;;  %v2600_v50 = vpop.f32.mrf.mxu1 }
 0x1c2   : > { %2041 = vst.msk [vmem:[%s3761_s5 + $0x40] sm:$0xff] %vm1027_vm3, %v2003_v46  ;;  %v1909_v27 = vadd.f32 %v2541_v24, %v1812_v26  ;;  %v2495_v26 = vadd.f32 %v3752_v51, %v3746_v13 }
 0x1c3   : > { %v2543_v18 = vpop.f32.mrf.mxu0  ;;  %v2018_v44 = vpop.f32.mrf.mxu1 }
 0x1c4   : > { %v2544_v53 = vadd.f32 %v2543_v18, %v2542_v43  ;;  %v2006_v21 = vadd.f32 %v2005_v38, %v1909_v27 }
 0x1c5   : > { %v2545_v63 = vpop.f32.mrf.mxu0  ;;  %v2601_v33 = vpop.f32.mrf.mxu1 }
 0x1c6   : > { %v1914_v10 = vadd.f32 %v2544_v53, %v1817_v31  ;;  %2042 = vst.msk [vmem:[%s3761_s5 + $0x48] sm:$0xff] %vm1027_vm3, %v2006_v21 }
 0x1c7   : > { %v2546_v59 = vpop.f32.mrf.mxu0  ;;  %v2021_v6 = vpop.f32.mrf.mxu1 }
 0x1c8   : > { %v2011_v2 = vadd.f32 %v2596_v0, %v1914_v10  ;;  %v2547_v20 = vadd.f32 %v2546_v59, %v2545_v63 }
 0x1c9   : > { %v2548_v8 = vpop.f32.mrf.mxu0 }
 0x1ca   : > { %2043 = vst.msk [vmem:[%s3761_s5 + $0x50] sm:$0xff] %vm1027_vm3, %v2011_v2  ;;  %v1917_v57 = vadd.f32 %v2547_v20, %v1820_v23 }
 0x1cb   : > { %v2549_v7 = vpop.f32.mrf.mxu0 }
 0x1cc   : > { %v2014_v58 = vadd.f32 %v2597_v49, %v1917_v57  ;;  %v2550_v25 = vadd.f32 %v2549_v7, %v2548_v8  ;;  %v3899_v49 = vld [vmem:[#allocation7_spill] sm:$0xff] }
 0x1cd   : > { %v2551_v4 = vpop.f32.mrf.mxu0  ;;  %v2431_v56 = vadd.f32 %v3899_v49, %v3898_v35 }
 0x1ce   : > { %2044 = vst.msk [vmem:[%s3761_s5 + $0x58] sm:$0xff] %vm1027_vm3, %v2014_v58  ;;  %v1922_v37 = vadd.f32 %v2550_v25, %v1825_v19 }
 0x1cf   : > { %v2552_v0 = vpop.f32.mrf.mxu0  ;;  %v1739_v43 = vadd.f32 %v2431_v56, %v3737_v3 }
 0x1d0   : > { %v2553_v32 = vadd.f32 %v2552_v0, %v2551_v4  ;;  %v2019_v34 = vadd.f32 %v2018_v44, %v1922_v37 }
 0x1d1   : > { %v2554_v16 = vpop.f32.mrf.mxu0  ;;  %v1836_v55 = vadd.f32 %v2495_v26, %v1739_v43 }
 0x1d2   : > { %2045 = vst.msk [vmem:[%s3761_s5 + $0x60] sm:$0xff] %vm1027_vm3, %v2019_v34  ;;  %v1925_v36 = vadd.f32 %v2553_v32, %v1828_v22 }
 0x1d3   : > { %v2555_v1 = vpop.f32.mrf.mxu0 }
 0x1d4   : > { %v2556_v61 = vadd.f32 %v2555_v1, %v2554_v16  ;;  %v2022_v24 = vadd.f32 %v2021_v6, %v1925_v36 }
 0x1d5   : > { %v2557_v46 = vpop.f32.mrf.mxu0 }
 0x1d6   : > { %v1930_v38 = vadd.f32 %v2556_v61, %v1833_v28  ;;  %2046 = vst.msk [vmem:[%s3761_s5 + $0x68] sm:$0xff] %vm1027_vm3, %v2022_v24 }
 0x1d7   : > { %v2558_v15 = vpop.f32.mrf.mxu0 }
 0x1d8   : > { %v2027_v27 = vadd.f32 %v2600_v50, %v1930_v38  ;;  %v2559_v18 = vadd.f32 %v2558_v15, %v2557_v46 }
 0x1da   : > { %2047 = vst.msk [vmem:[%s3761_s5 + $0x70] sm:$0xff] %vm1027_vm3, %v2027_v27  ;;  %v1933_v31 = vadd.f32 %v2559_v18, %v1836_v55 }
 0x1dc   : > { %v2030_v48 = vadd.f32 %v2601_v33, %v1933_v31 }
 0x1de   : > { %2048 = vst.msk [vmem:[%s3761_s5 + $0x78] sm:$0xff] %vm1027_vm3, %v2030_v48 }
 0x1df PF: > { %s13_s16 = sadd.s32 1, %s2813_s16   ;;  %s3900_s12 = smov %s2805_s14 }
 0x1e0   : > { %p10_p7 = scmp.ge.s32.totalorder %s13_s16, 6   ;;  %s3901_s13 = smov %s2809_s15 }
 0x1e1   : > { %s3902_s14 = smov %s3905_s17  ;;  %s3903_s15 = smov %s3909_s18 }
 0x1e2   :  { %12 = sbr.rel (!%p10_p7) target bundleno = 3 (0x3), region = 65 }

// kernel: inception_a_pallas.6
= control target key start
LH: loop header
LB: loop body
LE: loop exit
PB: predicated region body
PF: predicated region fallthrough
CT: control target
= control target key end

     0   :  { %s6348_s12 = smov 0   ;;  %s6350_s13 = smov 0   ;;  %s9059_s0 = inlined_call_operand.vmem [shape: bf16[2,20,20,48], index: 0, kind: input, shape index: {}]   ;;  %s9060_s1 = inlined_call_operand.vmem [shape: bf16[1200,64], index: 1, kind: input, shape index: {}]   ;;  %s9061_s2 = inlined_call_operand.vmem [shape: f32[1,64], index: 2, kind: input, shape index: {}]   ;;  %s9062_s3 = inlined_call_operand.vmem [shape: f32[2,16,16,64], index: 3, kind: output, shape index: {}]  }
   0x1   :  { %s6352_s14 = smov 0   ;;  %s6354_s15 = smov 0  }
   0x2   :  { %s6356_s16 = smov 0  }
   0x3 LB: > { %s22_s17 = sadd.s32 1, %s6310_s14  ;;  %s25_s18 = sadd.s32 1, %s6314_s15  ;;  %s6318_s16 = sphi %s6356_s16, %s13_s16   ;;  %s6314_s15 = sphi %s6354_s15, %s9096_s15   ;;  %s6310_s14 = sphi %s6352_s14, %s9095_s14   ;;  %s6306_s13 = sphi %s6350_s13, %s9094_s13   ;;  %s6302_s12 = sphi %s6348_s12, %s9093_s12  }
   0x4   : > { %p23_p0 = scmp.ge.s32.totalorder %s22_s17, 2  ;;  %p5152_p1 = scmp.ge.s32.totalorder %s6318_s16, 1 }
   0x5   : > { %p151_p2 = scmp.lt.s32.totalorder %s6318_s16, 5 }
   0x6   : > { %s9098_s17 = smov (%p23_p0, %s22_s17), 0  ;;  %s9100_s18 = smov (!%p23_p0, %s25_s18), %s6314_s15 }
   0x7   : > { %p152_p3 = pnand %p5152_p1, %p151_p2  ;;  %p27_p4 = scmp.ge.s32.totalorder %s9100_s18, 2 }
   0x9   : > { %s9102_s18 = smov (%p27_p4, %s9100_s18), 0  ;;  %155 = sbr.rel (%p152_p3) target bundleno = 798 (0x31e), region = 32 }
   0xe   : > { %p180_p5 = scmp.lt.s32.totalorder %s6306_s13, 1  ;;  %s5647_s19 = smul.u32 96, %s6302_s12  ;;  %vm658_vm0 = vcmask 1046528   ;;  %v6050_v5 = vld [vmem:[%s9060_s1 + $0x78] sm:$0xff]   ;;  %vm521_vm1 = vsmask.f32 7424 }
   0xf   : > { %5904 = vmatprep.subr.bf16.mxu1 %v6050_v5  ;;  %5648 = vmatprep.subr.bf16.mxu0 %v6050_v5  ;;  %v6051_v19 = vld [vmem:[%s9060_s1 + $0x38] sm:$0xff]   ;;  %s6320_s29 = smov 96   ;;  %v6054_v28 = vld [vmem:[%s9060_s1 + $0x70] sm:$0xff]   ;;  %s6321_s7 = smov 48   ;;  %v6058_v63 = vld [vmem:[%s9060_s1 + $0x68] sm:$0xff]   ;;  %vm900_vm3 = vcmask 1045504  }
  0x10   : > { %s9104_s13 = smov (!%p180_p5, %s6306_s13), 1  ;;  %5912 = vmatpush3.bf16.msra.mxu1 %v6051_v19  ;;  %5649 = vmatpush3.bf16.msra.mxu0 %v6051_v19  ;;  %v6055_v57 = vld [vmem:[%s9060_s1 + $0x30] sm:$0xff]   ;;  %vm723_vm2 = vsmask.f32 6400  ;;  %s6322_s11 = smov 16   ;;  %vm2015_vm4 = vcmask 130048  }
  0x11   : > { %s5920_s20 = smul.u32 240, %s9104_s13  ;;  %5905 = vmatprep.subr.bf16.mxu1 %v6054_v28  ;;  %5650 = vmatprep.subr.bf16.mxu0 %v6054_v28  ;;  %s6323_s21 = smov 112   ;;  %vm1973_vm5 = vcmask 392192   ;;  %vm2032_vm6 = vcmask 523264   ;;  %vm2049_vm7 = vcmask 916480   ;;  %vm1990_vm8 = vcmask 785408  }
  0x12   : > { %s6324_s25 = smov 64   ;;  %s6325_s4 = smov 32   ;;  %vm2074_vm9 = vcmask 261120   ;;  %vm2091_vm10 = vcmask 654336  }
  0x13   : > { %s184_s23 = scalar_lea.vmem %s9059_s0, %s5920_s20  ;;  %s6326_s5 = smov 80  }
  0x14   : > { %s6387_s24 = scalar_lea.vmem %s184_s23, %s5647_s19  ;;  %5913 = vmatpush3.bf16.msra.mxu1 %v6055_v57  ;;  %5651 = vmatpush3.bf16.msra.mxu0 %v6055_v57 }
  0x15   : > { %v6390_v0 = vld [vmem:[%s6387_s24 + $0x10] sm:$0xf]  ;;  %v226_v1 = vld [vmem:[%s6387_s24 + $0xc] sm:$0xe]  ;;  %v6400_v4 = vld [vmem:[%s6387_s24 + $0x4] sm:$0xf]  ;;  %5906 = vmatprep.subr.bf16.mxu1 %v6058_v63  ;;  %5652 = vmatprep.subr.bf16.mxu0 %v6058_v63 }
  0x16   : > { %v6394_v2 = vld [vmem:[%s6387_s24 + $0x14] ss:$0 sps:$4 sm:$0x11]   ;;  %v6397_v3 = vcombine.low %v226_v1, %v6390_v0  ;;  %v225_v6 = vld [vmem:[%s6387_s24] sm:$0xe] }
  0x17   : > { %v205_v7 = vld [vmem:[%s6387_s24 + $0x18] sm:$0xf]  ;;  %v663_v9 = vrot.slane %v6394_v2, 1  ;;  %v5971_v10 = vld [vmem:[%s6387_s24 + $0x8] ss:$0 sps:$4 sm:$0x11]   ;;  %v6411_v11 = vcombine.low %v225_v6, %v6400_v4 }
  0x18   : > { %v662_v8 = vrot.slane %v6397_v3, 1  ;;  %v6414_v12 = vld [vmem:[%s6387_s24 + $0x1c] sm:$0xf]  ;;  %v201_v13 = vld [vmem:[%s6387_s24] sm:$0xf]  ;;  %v660_v16 = vrot.slane %v5971_v10, 1 }
  0x19   : > { %v659_v15 = vrot.slane %v6411_v11, 1  ;;  %v6420_v17 = vcombine.low %v205_v7, %v6414_v12  ;;  %v6423_v18 = vld [vmem:[%s6387_s24 + $0x20] ss:$0 sps:$4 sm:$0x11]   ;;  %v6430_v20 = vcombine.low %v201_v13, %v6400_v4  ;;  %v530_v21 = vshll.u32 %v5971_v10, 16 }
  0x1a   : > { %v664_v14 = vsel %vm658_vm0, %v662_v8, %v663_v9  ;;  %v207_v22 = vld [vmem:[%s6387_s24 + $0x24] sm:$0xf]  ;;  %v6434_v23 = vld [vmem:[%s6387_s24 + $0x28] sm:$0xf]  ;;  %v554_v27 = vshll.u32 %v6423_v18, 16  ;;  %v542_v45 = vshll.u32 %v6394_v2, 16 }
  0x1b   : > { %685 = vrot.lane.b32.xlu1 %v664_v14, %s6320_s29  ;;  %v661_v24 = vsel %vm658_vm0, %v659_v15, %v660_v16  ;;  %v547_v25 = vshrl.u32 %v6420_v17, 16  ;;  %v549_v26 = vshll.u32 %v6420_v17, 16  ;;  %v523_v29 = vshrl.u32 %v6430_v20, 16  ;;  %v6450_v33 = vld [vmem:[%s6387_s24 + $0x2c] ss:$0 sps:$4 sm:$0x11]  }
  0x1c   : > { %683 = vrot.lane.b32.xlu0 %v661_v24, %s6320_s29  ;;  %v525_v30 = vshll.u32 %v6430_v20, 16  ;;  %v532_v31 = vrot.slane %v530_v21, 1  ;;  %v6447_v32 = vcombine.low %v207_v22, %v6434_v23  ;;  %v556_v35 = vrot.slane %v554_v27, 1  ;;  %v203_v36 = vld [vmem:[%s6387_s24 + $0xc] sm:$0xf]  ;;  %v6061_v24 = vld [vmem:[%s9060_s1 + $0x60] sm:$0xff]  }
  0x1d   : > { %v551_v34 = vrot.slane %v549_v26, 1  ;;  %v211_v37 = vld [vmem:[%s6387_s24 + $0x3c] sm:$0xf]  ;;  %v566_v41 = vshll.u32 %v6450_v33, 16  ;;  %v6458_v42 = vld [vmem:[%s6387_s24 + $0x40] sm:$0xf]  ;;  %v6461_v44 = vcombine.low %v203_v36, %v6390_v0 }
  0x1e   : > { %v527_v38 = vrot.slane %v525_v30, 1  ;;  %v559_v39 = vshrl.u32 %v6447_v32, 16  ;;  %v561_v40 = vshll.u32 %v6447_v32, 16  ;;  %v6465_v46 = vcombine.low %v211_v37, %v6458_v42  ;;  %v6468_v47 = vld [vmem:[%s6387_s24 + $0x44] ss:$0 sps:$4 sm:$0x11]  }
  0x1f   : > { %v552_v43 = vor.u32 %v551_v34, %v547_v25  ;;  %v568_v50 = vrot.slane %v566_v41, 1  ;;  %v209_v51 = vld [vmem:[%s6387_s24 + $0x30] sm:$0xf]  ;;  %v6472_v52 = vld [vmem:[%s6387_s24 + $0x34] sm:$0xf]  ;;  %v535_v54 = vshrl.u32 %v6461_v44, 16 }
  0x20   : > { %v528_v48 = vor.u32 %v527_v38, %v523_v29  ;;  %v563_v49 = vrot.slane %v561_v40, 1  ;;  %v537_v55 = vshll.u32 %v6461_v44, 16  ;;  %v583_v56 = vshrl.u32 %v6465_v46, 16  ;;  %v6486_v62 = vld [vmem:[%s6387_s24 + $0x38] ss:$0 sps:$4 sm:$0x11]  }
  0x21   : > { %v557_v53 = vsel %vm521_vm1, %v552_v43, %v556_v35  ;;  %v585_v60 = vshll.u32 %v6465_v46, 16  ;;  %v590_v61 = vshll.u32 %v6468_v47, 16  ;;  %v544_v2 = vrot.slane %v542_v45, 1  ;;  %v215_v6 = vld [vmem:[%s6387_s24 + $0x54] sm:$0xf]  ;;  %v6059_v14 = vld [vmem:[%s9060_s1 + $0x28] sm:$0xff]  }
  0x22   : > { %622 = vrot.lane.b32.xlu1 %v557_v53, %s6321_s7  ;;  %v533_v58 = vsel %vm521_vm1, %v528_v48, %v532_v31  ;;  %v564_v59 = vor.u32 %v563_v49, %v559_v39  ;;  %v539_v1 = vrot.slane %v537_v55, 1  ;;  %v6493_v5 = vcombine.low %v209_v51, %v6472_v52  ;;  %v6497_v7 = vld [vmem:[%s6387_s24 + $0x58] sm:$0xf]  ;;  %v6510_v22 = vld [vmem:[%s6387_s24 + $0x5c] ss:$0 sps:$4 sm:$0x11]   ;;  %5914 = vmatpush3.bf16.msra.mxu1 %v6059_v14 }
  0x23   : > { %618 = vrot.lane.b32.xlu0 %v533_v58, %s6321_s7  ;;  %v587_v9 = vrot.slane %v585_v60, 1  ;;  %v592_v10 = vrot.slane %v590_v61, 1  ;;  %v578_v13 = vshll.u32 %v6486_v62, 16  ;;  %v6507_v21 = vcombine.low %v215_v6, %v6497_v7  ;;  %v213_v27 = vld [vmem:[%s6387_s24 + $0x48] sm:$0xf]  ;;  %v6062_v35 = vld [vmem:[%s9060_s1 + $0x20] sm:$0xff]   ;;  %5907 = vmatprep.subr.bf16.mxu1 %v6061_v24 }
  0x24   : > { %v569_v8 = vsel %vm521_vm1, %v564_v59, %v568_v50  ;;  %v540_v15 = vor.u32 %v539_v1, %v535_v54  ;;  %v571_v16 = vshrl.u32 %v6493_v5, 16  ;;  %v573_v19 = vshll.u32 %v6493_v5, 16  ;;  %v6518_v28 = vld [vmem:[%s6387_s24 + $0x4c] sm:$0xf]  ;;  %v228_v40 = vld [vmem:[%s6387_s24 + $0x24] sm:$0xe]  ;;  %5653 = vmatpush3.bf16.msra.mxu0 %v6059_v14 }
  0x25   : > { %v588_v25 = vor.u32 %v587_v9, %v583_v56  ;;  %v580_v26 = vrot.slane %v578_v13, 1  ;;  %v607_v31 = vshrl.u32 %v6507_v21, 16  ;;  %v609_v34 = vshll.u32 %v6507_v21, 16  ;;  %v6533_v39 = vld [vmem:[%s6387_s24 + $0x50] ss:$0 sps:$4 sm:$0x11]   ;;  %5654 = vmatprep.subr.bf16.mxu0 %v6061_v24 }
  0x26   : > { %624 = vrot.lane.b32.xlu1 %v569_v8, %s6321_s7  ;;  %v545_v29 = vsel %vm521_vm1, %v540_v15, %v544_v2  ;;  %v575_v30 = vrot.slane %v573_v19, 1  ;;  %v614_v37 = vshll.u32 %v6510_v22, 16  ;;  %v6530_v38 = vcombine.low %v213_v27, %v6518_v28  ;;  %v227_v49 = vld [vmem:[%s6387_s24 + $0x18] sm:$0xe]  ;;  %v230_v50 = vld [vmem:[%s6387_s24 + $0x3c] sm:$0xe]  ;;  %5915 = vmatpush3.bf16.msra.mxu1 %v6062_v35 }
  0x27   : > { %620 = vrot.lane.b32.xlu0 %v545_v29, %s6321_s7  ;;  %v593_v36 = vsel %vm521_vm1, %v588_v25, %v592_v10  ;;  %v611_v43 = vrot.slane %v609_v34, 1  ;;  %v6537_v45 = vcombine.low %v228_v40, %v6434_v23  ;;  %v669_v48 = vrot.slane %v6450_v33, 1  ;;  %v229_v56 = vld [vmem:[%s6387_s24 + $0x30] sm:$0xe]  ;;  %v231_v19 = vld [vmem:[%s6387_s24 + $0x48] sm:$0xe] }
  0x28   : > { %v576_v41 = vor.u32 %v575_v30, %v571_v16  ;;  %v616_v51 = vrot.slane %v614_v37, 1  ;;  %v595_v53 = vshrl.u32 %v6530_v38, 16  ;;  %v597_v54 = vshll.u32 %v6530_v38, 16  ;;  %v6553_v60 = vld [vmem:[%s6387_s24 + $0x38] ss:$0 sps:$4 sm:$0x33]   ;;  %5655 = vmatpush3.bf16.msra.mxu0 %v6062_v35 }
  0x29   : > { %v602_v55 = vshll.u32 %v6533_v39, 16  ;;  %v612_v58 = vor.u32 %v611_v43, %v607_v31  ;;  %v668_v59 = vrot.slane %v6537_v45, 1  ;;  %v6550_v33 = vcombine.low %v227_v49, %v6414_v12  ;;  %v6068_v24 = vld [vmem:[%s9060_s1 + $0x58] sm:$0xff]   ;;  %v6073_v37 = vld [vmem:[%s9060_s1 + $0x50] sm:$0xff]  }
  0x2a   : > { %628 = vrot.lane.b32.xlu1 %v593_v36, %s6321_s7  ;;  %v581_v57 = vsel %vm521_vm1, %v576_v41, %v580_v26  ;;  %v599_v61 = vrot.slane %v597_v54, 1  ;;  %v6557_v1 = vcombine.low %v230_v50, %v6458_v42  ;;  %v5381_v2 = vcombine.low %v229_v56, %v6472_v52  ;;  %v6069_v27 = vld [vmem:[%s9060_s1 + $0x18] sm:$0xff]   ;;  %5908 = vmatprep.subr.bf16.mxu1 %v6068_v24  ;;  %v245_v36 = vld [vmem:[%s6387_s24 + $0x30] sm:$0xc] }
  0x2b   : > { %626 = vrot.lane.b32.xlu0 %v581_v57, %s6321_s7  ;;  %v604_v63 = vrot.slane %v602_v55, 1  ;;  %v617_v6 = vsel %vm521_vm1, %v612_v58, %v616_v51  ;;  %v666_v8 = vrot.slane %v6423_v18, 1  ;;  %v675_v9 = vrot.slane %v6468_v47, 1  ;;  %5656 = vmatprep.subr.bf16.mxu0 %v6068_v24  ;;  %v6074_v49 = vld [vmem:[%s9060_s1 + $0x10] sm:$0xff]   ;;  %v5171_v54 = vld [vmem:[%s6387_s24 + $0x3c] sm:$0xf] }
  0x2c   : > { %v801_v10 = vshrl.u32 %v6553_v60, 16  ;;  %v600_v13 = vor.u32 %v599_v61, %v595_v53  ;;  %v665_v14 = vrot.slane %v6550_v33, 1  ;;  %v674_v15 = vrot.slane %v6557_v1, 1  ;;  %5916 = vmatpush3.bf16.msra.mxu1 %v6069_v27  ;;  %5657 = vmatpush3.bf16.msra.mxu0 %v6069_v27  ;;  %v5172_v55 = vld [vmem:[%s6387_s24 + $0x40] sm:$0xf] }
  0x2d   : > { %v793_v16 = vshrl.u32 %v5381_v2, 16  ;;  %v670_v18 = vsel %vm658_vm0, %v668_v59, %v669_v48  ;;  %v796_v47 = vshll.u32 %v5381_v2, 16  ;;  %v804_v26 = vshll.u32 %v6553_v60, 16  ;;  %v6589_v48 = vld [vmem:[%s6387_s24 + $0x8] ss:$0 sps:$4 sm:$0x33]   ;;  %5909 = vmatprep.subr.bf16.mxu1 %v6073_v37  ;;  %5658 = vmatprep.subr.bf16.mxu0 %v6073_v37 }
  0x2e   : > { %632 = vrot.lane.b32.xlu1 %v617_v6, %s6321_s7  ;;  %v803_v25 = vrot.slane %v801_v10, 1  ;;  %v605_v29 = vsel %vm521_vm1, %v600_v13, %v604_v63  ;;  %v6579_v35 = vcombine.low %v231_v19, %v6518_v28  ;;  %v667_v40 = vsel %vm658_vm0, %v665_v14, %v666_v8  ;;  %v6609_v6 = vld [vmem:[%s6387_s24 + $0x44] ss:$0 sps:$4 sm:$0x33]   ;;  %v6076_v8 = vld [vmem:[%s9060_s1 + $0x48] sm:$0xff]  }
  0x2f   : > { %v795_v30 = vrot.slane %v793_v16, 1  ;;  %630 = vrot.lane.b32.xlu0 %v605_v29, %s6321_s7  ;;  %v798_v31 = vrot.slane %v796_v47, 2  ;;  %v806_v34 = vrot.slane %v804_v26, 2  ;;  %v671_v41 = vrot.slane %v5381_v2, 1  ;;  %v6077_v10 = vld [vmem:[%s9060_s1 + $0x8] sm:$0xff]  }
  0x30   : > { %v672_v43 = vrot.slane %v6486_v62, 1  ;;  %v676_v50 = vsel %vm658_vm0, %v674_v15, %v675_v9  ;;  %v5397_v56 = vcombine.low %v245_v36, %v6472_v52  ;;  %v241_v62 = vld [vmem:[%s6387_s24] sm:$0xc]  ;;  %v725_v57 = vshrl.u32 %v6411_v11, 16  ;;  %5917 = vmatpush3.bf16.msra.mxu1 %v6074_v49  ;;  %5659 = vmatpush3.bf16.msra.mxu0 %v6074_v49  ;;  %v6640_v37 = vld [vmem:[%s6387_s24 + $0x10] sm:$0xf] }
  0x31   : > { %v799_v51 = vor.u32 %v798_v31, %v795_v30  ;;  %v807_v53 = vor.u32 %v806_v34, %v803_v25  ;;  %v677_v58 = vrot.slane %v6579_v35, 1  ;;  %v678_v59 = vrot.slane %v6533_v39, 1  ;;  %5910 = vmatprep.subr.bf16.mxu1 %v6076_v8  ;;  %5660 = vmatprep.subr.bf16.mxu0 %v6076_v8  ;;  %v6631_v29 = vld [vmem:[%s6387_s24 + $0x14] ss:$0 sps:$4 sm:$0x33]   ;;  %v6080_v31 = vld [vmem:[%s9060_s1 + $0x40] sm:$0xff]  }
  0x32   : > { %689 = vrot.lane.b32.xlu1 %v670_v18, %s6320_s29  ;;  %v728_v61 = vshll.u32 %v6411_v11, 16  ;;  %v673_v63 = vsel %vm658_vm0, %v671_v41, %v672_v43  ;;  %v733_v2 = vshrl.u32 %v6589_v48, 16  ;;  %v736_v52 = vshll.u32 %v6589_v48, 16  ;;  %v5163_v30 = vld [vmem:[%s6387_s24 + $0xc] sm:$0xf] }
  0x33   : > { %687 = vrot.lane.b32.xlu0 %v667_v40, %s6320_s29  ;;  %v808_v39 = vsel %vm723_vm2, %v799_v51, %v807_v53  ;;  %v6615_v9 = vcombine.low %v5171_v54, %v5172_v55  ;;  %v5393_v11 = vcombine.low %v241_v62, %v6400_v4  ;;  %v913_v13 = vrot.slane %v5397_v56, 2  ;;  %v246_v41 = vld [vmem:[%s6387_s24 + $0x3c] sm:$0xc]  ;;  %v6081_v62 = vld [vmem:[%s9060_s1] sm:$0xff]   ;;  %v5174_v8 = vld [vmem:[%s6387_s24 + $0x4c] sm:$0xf] }
  0x34   : > { %v914_v14 = vrot.slane %v6553_v60, 2  ;;  %v902_v15 = vrot.slane %v6589_v48, 2  ;;  %v727_v16 = vrot.slane %v725_v57, 1  ;;  %v730_v19 = vrot.slane %v728_v61, 2  ;;  %5918 = vmatpush3.bf16.msra.mxu1 %v6077_v10  ;;  %5661 = vmatpush3.bf16.msra.mxu0 %v6077_v10 }
  0x35   : > { %v735_v24 = vrot.slane %v733_v2, 1  ;;  %v738_v18 = vrot.slane %v736_v52, 2  ;;  %v810_v4 = vshrl.u32 %v6557_v1, 16  ;;  %v679_v60 = vsel %vm658_vm0, %v677_v58, %v678_v59  ;;  %5911 = vmatprep.subr.bf16.mxu1 %v6080_v31  ;;  %5662 = vmatprep.subr.bf16.mxu0 %v6080_v31  ;;  %v6661_v59 = vld [vmem:[%s6387_s24 + $0x50] ss:$0 sps:$4 sm:$0x33]  }
  0x36   : > { %693 = vrot.lane.b32.xlu1 %v676_v50, %s6320_s29  ;;  %v813_v47 = vshll.u32 %v6557_v1, 16  ;;  %v818_v25 = vshrl.u32 %v6609_v6, 16  ;;  %v821_v26 = vshll.u32 %v6609_v6, 16  ;;  %v901_v27 = vrot.slane %v5393_v11, 2  ;;  %v242_v50 = vld [vmem:[%s6387_s24 + $0xc] sm:$0xc] }
  0x37   : > { %691 = vrot.lane.b32.xlu0 %v673_v63, %s6320_s29  ;;  %v915_v34 = vsel %vm900_vm3, %v913_v13, %v914_v14  ;;  %v731_v36 = vor.u32 %v730_v19, %v727_v16  ;;  %v739_v1 = vor.u32 %v738_v18, %v735_v24  ;;  %v812_v40 = vrot.slane %v810_v4, 1  ;;  %v5173_v2 = vld [vmem:[%s6387_s24 + $0x48] sm:$0xf]  ;;  %v5165_v4 = vld [vmem:[%s6387_s24 + $0x18] sm:$0xf] }
  0x38   : > { %v815_v43 = vrot.slane %v813_v47, 2  ;;  %v820_v48 = vrot.slane %v818_v25, 1  ;;  %v823_v49 = vrot.slane %v821_v26, 2  ;;  %v742_v51 = vshrl.u32 %v6397_v3, 16  ;;  %5919 = vmatpush3.bf16.msra.mxu1 %v6081_v62  ;;  %5663 = vmatpush3.bf16.msra.mxu0 %v6081_v62  ;;  %v6681_v26 = vld [vmem:[%s6387_s24 + $0x1c] sm:$0xf] }
  0x39   : > { %v903_v53 = vsel %vm900_vm3, %v901_v27, %v902_v15  ;;  %v745_v54 = vshll.u32 %v6397_v3, 16  ;;  %v750_v55 = vshrl.u32 %v6631_v29, 16  ;;  %v753_v56 = vshll.u32 %v6631_v29, 16  ;;  %v232_v27 = vld [vmem:[%s6387_s24 + $0x54] sm:$0xe] }
  0x3a   : > { %868 = vrot.lane.b32.xlu1 %v808_v39, %s6322_s11  ;;  %v740_v57 = vsel %vm723_vm2, %v731_v36, %v739_v1  ;;  %v6657_v58 = vcombine.low %v5163_v30, %v6640_v37  ;;  %v5398_v3 = vcombine.low %v246_v41, %v6458_v42  ;;  %v816_v61 = vor.u32 %v815_v43, %v812_v40  ;;  %v247_v30 = vld [vmem:[%s6387_s24 + $0x48] sm:$0xc]  ;;  %v6012_v31 = vld [vmem:[%s6387_s24 + $0x20] ss:$0 sps:$4 sm:$0x33]  }
  0x3b   : > { %695 = vrot.lane.b32.xlu0 %v679_v60, %s6320_s29  ;;  %v824_v63 = vor.u32 %v823_v49, %v820_v48  ;;  %v5394_v52 = vcombine.low %v242_v50, %v6390_v0  ;;  %v744_v39 = vrot.slane %v742_v51, 1  ;;  %v747_v11 = vrot.slane %v745_v54, 2  ;;  %v243_v40 = vld [vmem:[%s6387_s24 + $0x18] sm:$0xc] }
  0x3c   : > { %v752_v10 = vrot.slane %v750_v55, 1  ;;  %v755_v13 = vrot.slane %v753_v56, 2  ;;  %v827_v42 = vshrl.u32 %v6579_v35, 16  ;;  %v830_v14 = vshll.u32 %v6579_v35, 16  ;;  %v6098_v51 = vld [vmem:[%s9060_s1 + $0xf8] sm:$0xff]  }
  0x3d   : > { %v835_v15 = vshrl.u32 %v6661_v59, 16  ;;  %v838_v0 = vshll.u32 %v6661_v59, 16  ;;  %v825_v16 = vsel %vm723_vm2, %v816_v61, %v824_v63  ;;  %v6675_v19 = vcombine.low %v5173_v2, %v5174_v8  ;;  %v6695_v43 = vld [vmem:[%s6387_s24 + $0x5c] ss:$0 sps:$4 sm:$0x33]   ;;  %5712 = vmatprep.subr.bf16.mxu1 %v6098_v51 }
  0x3e   : > { %989 = vrot.lane.b32.xlu1 %v6615_v9, %s6323_s21  ;;  %v916_v24 = vrot.slane %v5398_v3, 2  ;;  %v917_v18 = vrot.slane %v6609_v6, 2  ;;  %v904_v60 = vrot.slane %v5394_v52, 2  ;;  %v905_v35 = vrot.slane %v6631_v29, 2  ;;  %v5176_v54 = vld [vmem:[%s6387_s24 + $0x58] sm:$0xf] }
  0x3f   : > { %933 = vrot.lane.b32.xlu0 %v915_v34, %s6324_s25  ;;  %v748_v47 = vor.u32 %v747_v11, %v744_v39  ;;  %v756_v25 = vor.u32 %v755_v13, %v752_v10  ;;  %v829_v34 = vrot.slane %v827_v42, 1  ;;  %v832_v36 = vrot.slane %v830_v14, 2 }
  0x40   : > { %v837_v1 = vrot.slane %v835_v15, 1  ;;  %v840_v6 = vrot.slane %v838_v0, 2  ;;  %v918_v29 = vsel %vm900_vm3, %v916_v24, %v917_v18  ;;  %v6692_v41 = vcombine.low %v232_v27, %v6497_v7  ;;  %v248_v24 = vld [vmem:[%s6387_s24 + $0x54] sm:$0xc] }
  0x41   : > { %v906_v48 = vsel %vm900_vm3, %v904_v60, %v905_v35  ;;  %v757_v49 = vsel %vm723_vm2, %v748_v47, %v756_v25  ;;  %v6700_v50 = vcombine.low %v5165_v4, %v6681_v26  ;;  %v5399_v55 = vcombine.low %v247_v30, %v6518_v28  ;;  %v6726_v35 = vld [vmem:[%s6387_s24 + $0x2c] ss:$0 sps:$4 sm:$0x33]  }
  0x42   : > { %925 = vrot.lane.b32.xlu1 %v903_v53, %s6324_s25  ;;  %v5175_v53 = vld [vmem:[%s6387_s24 + $0x54] sm:$0xf]  ;;  %v5395_v56 = vcombine.low %v243_v40, %v6414_v12  ;;  %v759_v62 = vshrl.u32 %v6550_v33, 16  ;;  %v833_v3 = vor.u32 %v832_v36, %v829_v34  ;;  %v841_v61 = vor.u32 %v840_v6, %v837_v1 }
  0x43   : > { %860 = vrot.lane.b32.xlu0 %v740_v57, %s6322_s11  ;;  %v762_v57 = vshll.u32 %v6550_v33, 16  ;;  %v767_v63 = vshrl.u32 %v6012_v31, 16  ;;  %v770_v2 = vshll.u32 %v6012_v31, 16  ;;  %v844_v52 = vshrl.u32 %v6692_v41, 16 }
  0x44   : > { %v847_v28 = vshll.u32 %v6692_v41, 16  ;;  %v852_v12 = vshrl.u32 %v6695_v43, 16  ;;  %v855_v8 = vshll.u32 %v6695_v43, 16  ;;  %v6717_v39 = vcombine.low %v5175_v53, %v5176_v54  ;;  %v6111_v54 = vld [vmem:[%s9060_s1 + $0x178] sm:$0xff]  }
  0x45   : > { %v920_v33 = vrot.slane %v6661_v59, 2  ;;  %v919_v11 = vrot.slane %v5399_v55, 2  ;;  %v907_v10 = vrot.slane %v5395_v56, 2  ;;  %v908_v13 = vrot.slane %v6012_v31, 2  ;;  %5776 = vmatprep.subr.bf16.mxu0 %v6111_v54 }
  0x46   : > { %981 = vrot.lane.b32.xlu1 %v6657_v58, %s6323_s21  ;;  %v761_v42 = vrot.slane %v759_v62, 1  ;;  %v842_v14 = vsel %vm723_vm2, %v833_v3, %v841_v61  ;;  %v764_v15 = vrot.slane %v762_v57, 2  ;;  %v769_v0 = vrot.slane %v767_v63, 1  ;;  %v5167_v62 = vld [vmem:[%s6387_s24 + $0x24] sm:$0xf] }
  0x47   : > { %870 = vrot.lane.b32.xlu0 %v825_v16, %s6322_s11  ;;  %v772_v16 = vrot.slane %v770_v2, 2  ;;  %v846_v18 = vrot.slane %v844_v52, 1  ;;  %v849_v4 = vrot.slane %v847_v28, 2  ;;  %v854_v60 = vrot.slane %v852_v12, 1  ;;  %v6750_v57 = vld [vmem:[%s6387_s24 + $0x28] sm:$0xf] }
  0x48   : > { %v857_v59 = vrot.slane %v855_v8, 2  ;;  %v921_v47 = vsel %vm900_vm3, %v919_v11, %v920_v33  ;;  %v909_v25 = vsel %vm900_vm3, %v907_v10, %v908_v13  ;;  %v765_v27 = vor.u32 %v764_v15, %v761_v42  ;;  %v6758_v63 = vld [vmem:[%s6387_s24 + $0x14] ss:$0 sps:$4 sm:$0x11]   ;;  %v5187_v2 = vld [vmem:[%s6387_s24 + $0xc] sm:$0xe] }
  0x49   : > { %v773_v30 = vor.u32 %v772_v16, %v769_v0  ;;  %v850_v31 = vor.u32 %v849_v4, %v846_v18  ;;  %v5400_v36 = vcombine.low %v248_v24, %v6497_v7  ;;  %v776_v1 = vshrl.u32 %v6537_v45, 16  ;;  %v5177_v8 = vld [vmem:[%s6387_s24 + $0x60] sm:$0xf]  ;;  %v5178_v33 = vld [vmem:[%s6387_s24 + $0x64] sm:$0xf] }
  0x4a   : > { %991 = vrot.lane.b32.xlu1 %v6675_v19, %s6323_s21  ;;  %v858_v34 = vor.u32 %v857_v59, %v854_v60  ;;  %v779_v6 = vshll.u32 %v6537_v45, 16  ;;  %v784_v40 = vshrl.u32 %v6726_v35, 16  ;;  %v923_v53 = vrot.slane %v6695_v43, 2  ;;  %v244_v43 = vld [vmem:[%s6387_s24 + $0x24] sm:$0xc] }
  0x4b   : > { %935 = vrot.lane.b32.xlu0 %v918_v29, %s6324_s25  ;;  %v787_v29 = vshll.u32 %v6726_v35, 16  ;;  %v774_v7 = vsel %vm723_vm2, %v765_v27, %v773_v30  ;;  %v922_v45 = vrot.slane %v5400_v36, 2  ;;  %v778_v55 = vrot.slane %v776_v1, 1  ;;  %v6765_v11 = vld [vmem:[%s6387_s24 + $0x1c] sm:$0xf] }
  0x4c   : > { %v859_v51 = vsel %vm723_vm2, %v850_v31, %v858_v34  ;;  %v786_v56 = vrot.slane %v784_v40, 1  ;;  %v1024_v3 = vshll.u32 %v6657_v58, 16  ;;  %v5237_v10 = vld [vmem:[%s6387_s24 + $0x18] sm:$0xe]  ;;  %v6770_v13 = vcombine.low %v5167_v62, %v6750_v57  ;;  %v5169_v42 = vld [vmem:[%s6387_s24 + $0x30] sm:$0xf] }
  0x4d   : > { %v924_v52 = vsel %vm900_vm3, %v922_v45, %v923_v53  ;;  %v5396_v15 = vcombine.low %v244_v43, %v6434_v23  ;;  %v5203_v0 = vld [vmem:[%s6387_s24 + $0xc] sm:$0xc]  ;;  %v1022_v16 = vshrl.u32 %v6657_v58, 16  ;;  %v1029_v18 = vshll.u32 %v6758_v63, 16  ;;  %v5213_v4 = vld [vmem:[%s6387_s24 + $0x18] sm:$0xf] }
  0x4e   : > { %927 = vrot.lane.b32.xlu1 %v906_v48, %s6324_s25  ;;  %v680_v48 = vrot.slane %v6692_v41, 1  ;;  %v781_v41 = vrot.slane %v779_v6, 2  ;;  %v1026_v24 = vrot.slane %v1024_v3, 1  ;;  %v6784_v59 = vcombine.low %v5237_v10, %v6765_v11  ;;  %v6026_v23 = vld [vmem:[%s6387_s24 + $0x14] ss:$0 sps:$4 sm:$0x33]  }
  0x4f   : > { %862 = vrot.lane.b32.xlu0 %v757_v49, %s6322_s11  ;;  %v681_v49 = vrot.slane %v6510_v22, 1  ;;  %v789_v22 = vrot.slane %v787_v29, 2  ;;  %v6795_v27 = vcombine.low %v5177_v8, %v5178_v33  ;;  %v910_v30 = vrot.slane %v5396_v15, 2  ;;  %v5204_v8 = vld [vmem:[%s6387_s24 + $0x18] sm:$0xc] }
  0x50   : > { %v782_v28 = vor.u32 %v781_v41, %v778_v55  ;;  %v911_v31 = vrot.slane %v6726_v35, 2  ;;  %v1027_v34 = vor.u32 %v1026_v24, %v1022_v16  ;;  %v1031_v36 = vrot.slane %v1029_v18, 1  ;;  %v6031_v55 = vld [vmem:[%s6387_s24 + $0x20] ss:$0 sps:$4 sm:$0x11]  }
  0x51   : > { %v682_v61 = vsel %vm658_vm0, %v680_v48, %v681_v49  ;;  %v790_v12 = vor.u32 %v789_v22, %v786_v56  ;;  %v5433_v1 = vcombine.low %v5203_v0, %v6640_v37  ;;  %v5441_v6 = vcombine.low %v5213_v4, %v6765_v11  ;;  %v5215_v33 = vld [vmem:[%s6387_s24 + $0x24] sm:$0xf]  ;;  %v6825_v10 = vld [vmem:[%s6387_s24 + $0x28] sm:$0xf] }
  0x52   : > { %983 = vrot.lane.b32.xlu1 %v6700_v50, %s6323_s21  ;;  %v1702_v40 = vshrl.u32 %v6784_v59, 16  ;;  %v1705_v29 = vshll.u32 %v6784_v59, 16  ;;  %v1032_v45 = vsel %vm521_vm1, %v1027_v34, %v1031_v36  ;;  %v1637_v16 = vrot.slane %v6784_v59, 1  ;;  %v6033_v24 = vld [vmem:[%s6387_s24 + $0x20] ss:$0 sps:$4 sm:$0x33]  }
  0x53   : > { %872 = vrot.lane.b32.xlu0 %v842_v14, %s6322_s11  ;;  %v6774_v14 = vld [vmem:[%s6387_s24 + $0x34] sm:$0xf]  ;;  %v791_v60 = vsel %vm723_vm2, %v782_v28, %v790_v12  ;;  %v1381_v53 = vrot.slane %v5433_v1, 2  ;;  %v1504_v54 = vshll.u32 %v5441_v6, 16  ;;  %v1502_v3 = vshrl.u32 %v5441_v6, 16 }
  0x54   : > { %v6798_v58 = vcombine.low %v5169_v42, %v6774_v14  ;;  %v1704_v41 = vrot.slane %v1702_v40, 1  ;;  %v1707_v56 = vrot.slane %v1705_v29, 2  ;;  %v1638_v4 = vrot.slane %v6031_v55, 1  ;;  %v6040_v34 = vld [vmem:[%s6387_s24 + $0x20] ss:$0 sps:$4 sm:$0x11]  }
  0x55   : > { %v1036_v59 = vshll.u32 %v6700_v50, 16  ;;  %v6843_v1 = vld [vmem:[%s6387_s24 + $0x2c] ss:$0 sps:$4 sm:$0x11]  }
  0x56   : > { %993 = vrot.lane.b32.xlu1 %v6717_v39, %s6323_s21  ;;  %v1708_v28 = vor.u32 %v1707_v56, %v1704_v41  ;;  %v1639_v40 = vsel %vm658_vm0, %v1637_v16, %v1638_v4  ;;  %v1048_v16 = vshll.u32 %v6770_v13, 16  ;;  %v6877_v4 = vld [vmem:[%s6387_s24 + $0x2c] ss:$0 sps:$4 sm:$0x11]  }
  0x57   : > { %937 = vrot.lane.b32.xlu0 %v921_v47, %s6324_s25  ;;  %v6787_v47 = vld [vmem:[%s6387_s24 + $0x20] ss:$0 sps:$4 sm:$0x33]  }
  0x58   : > { %v1710_v48 = vshrl.u32 %v6787_v47, 16  ;;  %v1713_v49 = vshll.u32 %v6787_v47, 16 }
  0x5a   : > { %929 = vrot.lane.b32.xlu1 %v909_v25, %s6324_s25  ;;  %v6790_v25 = vcombine.low %v5187_v2, %v6640_v37  ;;  %v912_v37 = vsel %vm900_vm3, %v910_v30, %v911_v31  ;;  %v1712_v22 = vrot.slane %v1710_v48, 1  ;;  %v1715_v62 = vrot.slane %v1713_v49, 2  ;;  %v5253_v2 = vld [vmem:[%s6387_s24 + $0x18] sm:$0xc]  ;;  %v5238_v30 = vld [vmem:[%s6387_s24 + $0x24] sm:$0xe] }
  0x5b   : > { %864 = vrot.lane.b32.xlu0 %v774_v7, %s6322_s11  ;;  %v1382_v7 = vrot.slane %v6026_v23, 2  ;;  %v5473_v42 = vcombine.low %v5253_v2, %v6765_v11  ;;  %v5442_v23 = vcombine.low %v5215_v33, %v6825_v10  ;;  %v1878_v31 = vrot.slane %v6787_v47, 2 }
  0x5c   : > { %v1157_v35 = vrot.slane %v6790_v25, 1  ;;  %v1716_v12 = vor.u32 %v1715_v62, %v1712_v22  ;;  %v1385_v48 = vrot.slane %v6033_v24, 2  ;;  %v1521_v22 = vshll.u32 %v6843_v1, 16  ;;  %v5254_v62 = vld [vmem:[%s6387_s24 + $0x24] sm:$0xc] }
  0x5d   : > { %v1383_v43 = vsel %vm900_vm3, %v1381_v53, %v1382_v7  ;;  %v1877_v11 = vrot.slane %v5473_v42, 2  ;;  %v1516_v49 = vshll.u32 %v5442_v23, 16  ;;  %v6042_v7 = vld [vmem:[%s6387_s24 + $0x2c] ss:$0 sps:$4 sm:$0x33]   ;;  %v1038_v53 = vrot.slane %v1036_v59, 1 }
  0x5e   : > { %874 = vrot.lane.b32.xlu1 %v859_v51, %s6322_s11  ;;  %v1158_v51 = vrot.slane %v6758_v63, 1  ;;  %v1509_v63 = vshll.u32 %v6031_v55, 16  ;;  %v1717_v18 = vsel %vm723_vm2, %v1708_v28, %v1716_v12  ;;  %v1514_v55 = vshrl.u32 %v5442_v23, 16  ;;  %v5239_v59 = vld [vmem:[%s6387_s24 + $0x30] sm:$0xe] }
  0x5f   : > { %697 = vrot.lane.b32.xlu0 %v682_v61, %s6320_s29  ;;  %v1506_v61 = vrot.slane %v1504_v54, 1  ;;  %v1879_v47 = vsel %vm900_vm3, %v1877_v11, %v1878_v31  ;;  %v1041_v54 = vshll.u32 %v6040_v34, 16  ;;  %v1518_v56 = vrot.slane %v1516_v49, 1 }
  0x60   : > { %v1511_v0 = vrot.slane %v1509_v63, 1  ;;  %v1730_v28 = vshll.u32 %v6042_v7, 16  ;;  %v1161_v42 = vrot.slane %v6040_v34, 1  ;;  %v1881_v31 = vrot.slane %v6042_v7, 2  ;;  %v6882_v34 = vld [vmem:[%s6387_s24 + $0x34] sm:$0xf] }
  0x61   : > { %v1507_v15 = vor.u32 %v1506_v61, %v1502_v3  ;;  %v1043_v2 = vrot.slane %v1041_v54, 1  ;;  %v1519_v12 = vor.u32 %v1518_v56, %v1514_v55  ;;  %v6048_v55 = vld [vmem:[%s6387_s24 + $0x2c] ss:$0 sps:$4 sm:$0x33]   ;;  %v1641_v56 = vrot.slane %v6843_v1, 1 }
  0x62   : > { %939 = vrot.lane.b32.xlu1 %v924_v52, %s6324_s25  ;;  %v1159_v52 = vsel %vm658_vm0, %v1157_v35, %v1158_v51  ;;  %v5263_v35 = vld [vmem:[%s6387_s24 + $0x24] sm:$0xf]  ;;  %v6852_v51 = vcombine.low %v5238_v30, %v6825_v10 }
  0x63   : > { %985 = vrot.lane.b32.xlu0 %v6770_v13, %s6323_s21  ;;  %v1512_v36 = vsel %vm521_vm1, %v1507_v15, %v1511_v0 }
  0x64   : > { %v1719_v61 = vshrl.u32 %v6852_v51, 16 }
  0x66   : > { %866 = vrot.lane.b32.xlu1 %v791_v60, %s6322_s11  ;;  %v5434_v60 = vcombine.low %v5204_v8, %v6681_v26  ;;  %v1523_v8 = vrot.slane %v1521_v22, 1  ;;  %v1721_v15 = vrot.slane %v1719_v61, 1 }
  0x67   : > { %995 = vrot.lane.b32.xlu0 %v6795_v27, %s6323_s21 }
  0x68   : > { %v1384_v29 = vrot.slane %v5434_v60, 2  ;;  %v5189_v60 = vld [vmem:[%s6387_s24 + $0x24] sm:$0xe]  ;;  %v1524_v30 = vsel %vm521_vm1, %v1519_v12, %v1523_v8  ;;  %v1388_v12 = vrot.slane %v6048_v55, 2  ;;  %v5190_v55 = vld [vmem:[%s6387_s24 + $0x30] sm:$0xe] }
  0x69   : > { %v6902_v54 = vcombine.low %v5189_v60, %v6750_v57 }
  0x6a   : > { %987 = vrot.lane.b32.xlu1 %v6798_v58, %s6323_s21  ;;  %v1386_v41 = vsel %vm900_vm3, %v1384_v29, %v1385_v48  ;;  %v5266_v29 = vld [vmem:[%s6387_s24 + $0x34] sm:$0xf]  ;;  %v5205_v48 = vld [vmem:[%s6387_s24 + $0x24] sm:$0xc] }
  0x6b   : > { %931 = vrot.lane.b32.xlu0 %v912_v37, %s6324_s25  ;;  %v5264_v37 = vld [vmem:[%s6387_s24 + $0x28] sm:$0xf] }
  0x6c   : > { %v6864_v3 = vcombine.low %v5263_v35, %v5264_v37  ;;  %v5217_v35 = vld [vmem:[%s6387_s24 + $0x30] sm:$0xf] }
  0x6d   : > { %v5443_v22 = vcombine.low %v5217_v35, %v6882_v34  ;;  %v5240_v35 = vld [vmem:[%s6387_s24 + $0x3c] sm:$0xe] }
  0x6e   : > { %1117 = vrot.lane.b32.xlu1 %v1032_v45, %s6325_s4  ;;  %v1034_v45 = vshrl.u32 %v6700_v50, 16  ;;  %v1722_v50 = vshll.u32 %v6852_v51, 16 }
  0x6f   : > { %1405 = vrot.lane.b32.xlu0 %v1383_v43, %s6321_s7  ;;  %v1528_v8 = vshll.u32 %v5443_v22, 16 }
  0x70   : > { %v1039_v63 = vor.u32 %v1038_v53, %v1034_v45  ;;  %v1724_v0 = vrot.slane %v1722_v50, 2  ;;  %v6896_v45 = vcombine.low %v5239_v59, %v6882_v34  ;;  %v6899_v53 = vld [vmem:[%s6387_s24 + $0x38] ss:$0 sps:$4 sm:$0x33]   ;;  %v1526_v59 = vshrl.u32 %v5443_v22, 16 }
  0x72   : > { %1181 = vrot.lane.b32.xlu1 %v1159_v52, %s6326_s5  ;;  %v1727_v52 = vshrl.u32 %v6042_v7, 16  ;;  %v1044_v24 = vsel %vm521_vm1, %v1039_v63, %v1043_v2  ;;  %v1053_v7 = vshll.u32 %v6877_v4, 16  ;;  %v5435_v63 = vcombine.low %v5205_v48, %v6750_v57  ;;  %v6939_v48 = vld [vmem:[%s6387_s24 + $0x40] sm:$0xf] }
  0x73   : > { %1461 = vrot.lane.b32.xlu0 %v5441_v6, %s6320_s29  ;;  %v5188_v6 = vld [vmem:[%s6387_s24 + $0x18] sm:$0xe]  ;;  %v1736_v2 = vshrl.u32 %v6896_v45, 16 }
  0x74   : > { %v6861_v43 = vcombine.low %v5188_v6, %v6681_v26  ;;  %v5474_v26 = vcombine.low %v5254_v62, %v6825_v10  ;;  %v1729_v10 = vrot.slane %v1727_v52, 1  ;;  %v1046_v6 = vshrl.u32 %v6770_v13, 16 }
  0x75   : > { %v1640_v13 = vrot.slane %v6852_v51, 1  ;;  %v1055_v50 = vrot.slane %v1053_v7, 1  ;;  %v1739_v52 = vshll.u32 %v6896_v45, 16  ;;  %v1747_v51 = vshll.u32 %v6899_v53, 16 }
  0x76   : > { %1837 = vrot.lane.b32.xlu1 %v1717_v18, %s6323_s21  ;;  %v1160_v33 = vrot.slane %v6861_v43, 1  ;;  %v1732_v18 = vrot.slane %v1730_v28, 2  ;;  %v1880_v11 = vrot.slane %v5474_v26, 2  ;;  %v1744_v28 = vshrl.u32 %v6899_v53, 16 }
  0x77   : > { %1597 = vrot.lane.b32.xlu0 %v1512_v36, %s6322_s11  ;;  %v1725_v36 = vor.u32 %v1724_v0, %v1721_v15  ;;  %v1642_v1 = vsel %vm658_vm0, %v1640_v13, %v1641_v56  ;;  %v6057_v26 = vld [vmem:[%s6387_s24 + $0x38] ss:$0 sps:$4 sm:$0x11]   ;;  %v1163_v15 = vrot.slane %v6902_v54, 1  ;;  %v1164_v0 = vrot.slane %v6877_v4, 1 }
  0x78   : > { %v1733_v49 = vor.u32 %v1732_v18, %v1729_v10  ;;  %v1882_v37 = vsel %vm900_vm3, %v1880_v11, %v1881_v31  ;;  %v1741_v10 = vrot.slane %v1739_v52, 2  ;;  %v1746_v18 = vrot.slane %v1744_v28, 1  ;;  %v5206_v11 = vld [vmem:[%s6387_s24 + $0x30] sm:$0xc] }
  0x79   : > { %v1749_v60 = vrot.slane %v1747_v51, 2  ;;  %v1072_v31 = vshll.u32 %v6615_v9, 16  ;;  %v6960_v52 = vld [vmem:[%s6387_s24 + $0x44] ss:$0 sps:$4 sm:$0x11]   ;;  %v1643_v51 = vrot.slane %v6896_v45, 1 }
  0x7a   : > { %1661 = vrot.lane.b32.xlu1 %v1639_v40, %s6324_s25  ;;  %v5265_v40 = vld [vmem:[%s6387_s24 + $0x30] sm:$0xf]  ;;  %v1734_v62 = vsel %vm723_vm2, %v1725_v36, %v1733_v49  ;;  %v1533_v36 = vshll.u32 %v6057_v26, 16  ;;  %v1060_v49 = vshll.u32 %v6798_v58, 16 }
  0x7b   : > { %1901 = vrot.lane.b32.xlu0 %v1879_v47, %s6325_s4  ;;  %v1050_v47 = vrot.slane %v1048_v16, 1  ;;  %v1750_v7 = vor.u32 %v1749_v60, %v1746_v18 }
  0x7c   : > { %v1535_v56 = vrot.slane %v1533_v36, 1 }
  0x7d   : > { %v1051_v61 = vor.u32 %v1050_v47, %v1046_v6  ;;  %v1165_v6 = vsel %vm658_vm0, %v1163_v15, %v1164_v0  ;;  %v1058_v0 = vshrl.u32 %v6798_v58, 16  ;;  %v5268_v58 = vld [vmem:[%s6387_s24 + $0x40] sm:$0xf] }
  0x7e   : > { %1407 = vrot.lane.b32.xlu1 %v1386_v41, %s6321_s7  ;;  %v6906_v41 = vcombine.low %v5265_v40, %v5266_v29  ;;  %v6063_v40 = vld [vmem:[%s6387_s24 + $0x38] ss:$0 sps:$4 sm:$0x33]   ;;  %v5219_v29 = vld [vmem:[%s6387_s24 + $0x3c] sm:$0xf] }
  0x7f   : > { %1957 = vrot.lane.b32.xlu0 %v6864_v3, %s6326_s5 }
  0x82   : > { %1463 = vrot.lane.b32.xlu1 %v5442_v23, %s6320_s29  ;;  %v1162_v23 = vsel %vm658_vm0, %v1160_v33, %v1161_v42  ;;  %v1056_v33 = vsel %vm521_vm1, %v1051_v61, %v1055_v50  ;;  %v1387_v42 = vrot.slane %v5435_v63, 2  ;;  %v5436_v61 = vcombine.low %v5206_v11, %v6774_v14  ;;  %v5267_v11 = vld [vmem:[%s6387_s24 + $0x3c] sm:$0xf] }
  0x83   : > { %1119 = vrot.lane.b32.xlu0 %v1044_v24, %s6325_s4  ;;  %v1738_v24 = vrot.slane %v1736_v2, 1  ;;  %v6953_v50 = vcombine.low %v5219_v29, %v6939_v48  ;;  %v6957_v2 = vld [vmem:[%s6387_s24 + $0x38] ss:$0 sps:$4 sm:$0x11]  }
  0x84   : > { %v1389_v4 = vsel %vm900_vm3, %v1387_v42, %v1388_v12  ;;  %v6968_v12 = vcombine.low %v5190_v55, %v6774_v14  ;;  %v1391_v42 = vrot.slane %v6063_v40, 2  ;;  %v1390_v45 = vrot.slane %v5436_v61, 2 }
  0x85   : > { %v1742_v47 = vor.u32 %v1741_v10, %v1738_v24  ;;  %v6982_v10 = vld [vmem:[%s6387_s24 + $0x44] ss:$0 sps:$4 sm:$0x33]  }
  0x86   : > { %1599 = vrot.lane.b32.xlu1 %v1524_v30, %s6322_s11  ;;  %v5255_v30 = vld [vmem:[%s6387_s24 + $0x30] sm:$0xc]  ;;  %v1392_v36 = vsel %vm900_vm3, %v1390_v45, %v1391_v42  ;;  %v1166_v40 = vrot.slane %v6968_v12, 1  ;;  %v1761_v61 = vshrl.u32 %v6982_v10, 16  ;;  %v1887_v42 = vrot.slane %v6982_v10, 2 }
  0x87   : > { %1183 = vrot.lane.b32.xlu0 %v1162_v23, %s6326_s5  ;;  %v1530_v23 = vrot.slane %v1528_v8, 1  ;;  %v1751_v28 = vsel %vm723_vm2, %v1742_v47, %v1750_v7  ;;  %v1538_v47 = vshrl.u32 %v6953_v50, 16 }
  0x88   : > { %v1763_v45 = vrot.slane %v1761_v61, 1 }
  0x89   : > { %v1531_v63 = vor.u32 %v1530_v23, %v1526_v59  ;;  %v5256_v59 = vld [vmem:[%s6387_s24 + $0x3c] sm:$0xc] }
  0x8a   : > { %1903 = vrot.lane.b32.xlu1 %v1882_v37, %s6325_s4 }
  0x8b   : > { %1839 = vrot.lane.b32.xlu0 %v1734_v62, %s6323_s21  ;;  %v5475_v62 = vcombine.low %v5255_v30, %v6882_v34  ;;  %v6965_v34 = vcombine.low %v5240_v35, %v6939_v48  ;;  %v1536_v14 = vsel %vm521_vm1, %v1531_v63, %v1535_v56  ;;  %v1167_v35 = vrot.slane %v6957_v2, 1 }
  0x8c   : > { %v5476_v56 = vcombine.low %v5256_v59, %v6939_v48  ;;  %v5241_v59 = vld [vmem:[%s6387_s24 + $0x48] sm:$0xe] }
  0x8d   : > { %v6923_v57 = vpop.permute.xlu1 %685  ;;  %v1883_v15 = vrot.slane %v5475_v62, 2  ;;  %v1753_v60 = vshrl.u32 %v6965_v34, 16  ;;  %v1756_v62 = vshll.u32 %v6965_v34, 16 }
  0x8e   : > { %1959 = vrot.lane.b32.xlu1 %v6906_v41, %s6326_s5  ;;  %v6928_v16 = vpop.permute.xlu0 %683 }
  0x8f   : > { %1663 = vrot.lane.b32.xlu0 %v1642_v1, %s6324_s25  ;;  %v1644_v1 = vrot.slane %v6057_v26, 1  ;;  %v1540_v26 = vshll.u32 %v6953_v50, 16  ;;  %v1755_v63 = vrot.slane %v1753_v60, 1 }
  0x91   : > { %v1645_v18 = vsel %vm658_vm0, %v1643_v51, %v1644_v1  ;;  %v1542_v7 = vrot.slane %v1540_v26, 1  ;;  %v7008_v51 = vcombine.low %v5267_v11, %v5268_v58  ;;  %v7032_v58 = vld [vmem:[%s6387_s24 + $0x4c] sm:$0xf] }
  0x92   : > { %1121 = vrot.lane.b32.xlu1 %v1056_v33, %s6325_s4  ;;  %v1884_v33 = vrot.slane %v6899_v53, 2  ;;  %v1065_v53 = vshll.u32 %v6957_v2, 16 }
  0x93   : > { %1409 = vrot.lane.b32.xlu0 %v1389_v4, %s6321_s7  ;;  %v1062_v4 = vrot.slane %v1060_v49, 1  ;;  %9067 = vst [vmem:[#allocation2_spill] sm:$0xff] %v7008_v51  ;;  %v1543_v1 = vor.u32 %v1542_v7, %v1538_v47  ;;  %v1168_v47 = vsel %vm658_vm0, %v1166_v40, %v1167_v35  ;;  %v1647_v40 = vrot.slane %v6960_v52, 1 }
  0x94   : > { %v6944_v37 = vpop.permute.xlu1 %622  ;;  %v1885_v23 = vsel %vm900_vm3, %v1883_v15, %v1884_v33  ;;  %v1886_v33 = vrot.slane %v5476_v56, 2  ;;  %v1758_v15 = vrot.slane %v1756_v62, 2  ;;  %v6086_v56 = vld [vmem:[%s6387_s24 + $0x44] ss:$0 sps:$4 sm:$0x33]   ;;  %v7050_v62 = vcombine.low %v5241_v59, %v7032_v58 }
  0x95   : > { %v6948_v13 = vpop.permute.xlu0 %618  ;;  %v1063_v2 = vor.u32 %v1062_v4, %v1058_v0  ;;  %v7020_v0 = vld [vmem:[%s6387_s24 + $0x44] ss:$0 sps:$4 sm:$0x11]   ;;  %v5221_v4 = vld [vmem:[%s6387_s24 + $0x48] sm:$0xf] }
  0x96   : > { %1185 = vrot.lane.b32.xlu1 %v1165_v6, %s6326_s5  ;;  %v1067_v6 = vrot.slane %v1065_v53, 1  ;;  %v1070_v53 = vshrl.u32 %v6615_v9, 16  ;;  %v5207_v9 = vld [vmem:[%s6387_s24 + $0x3c] sm:$0xc]  ;;  %v1759_v7 = vor.u32 %v1758_v15, %v1755_v63  ;;  %v7060_v63 = vcombine.low %v5221_v4, %v7032_v58 }
  0x97   : > { %1465 = vrot.lane.b32.xlu0 %v5443_v22, %s6320_s29  ;;  %v1545_v22 = vshll.u32 %v6960_v52, 16  ;;  %v1770_v15 = vshrl.u32 %v7050_v62, 16 }
  0x98   : > { %v6970_v8 = vpop.permute.xlu1 %624 }
  0x99   : > { %v6976_v24 = vpop.permute.xlu0 %620  ;;  %v1547_v55 = vrot.slane %v1545_v22, 1  ;;  %v5191_v22 = vld [vmem:[%s6387_s24 + $0x3c] sm:$0xe] }
  0x9a   : > { %1841 = vrot.lane.b32.xlu1 %v1751_v28, %s6323_s21  ;;  %v1764_v28 = vshll.u32 %v6982_v10, 16  ;;  %v1068_v10 = vsel %vm521_vm1, %v1063_v2, %v1067_v6  ;;  %v7044_v6 = vld [vmem:[%s6387_s24 + $0x50] ss:$0 sps:$4 sm:$0x33]   ;;  %v6244_v2 = vld [vmem:[%s6387_s24 + $0x40] sm:$0xf] }
  0x9b   : > { %1601 = vrot.lane.b32.xlu0 %v1536_v14, %s6322_s11  ;;  %v1548_v11 = vsel %vm521_vm1, %v1543_v1, %v1547_v55  ;;  %v7054_v1 = vcombine.low %v5191_v22, %v6244_v2  ;;  %v5437_v35 = vcombine.low %v5207_v9, %v6244_v2  ;;  %v1778_v22 = vshrl.u32 %v7044_v6, 16 }
  0x9c   : > { %v6987_v30 = vpop.permute.xlu1 %628  ;;  %v1766_v14 = vrot.slane %v1764_v28, 2  ;;  %v1888_v28 = vsel %vm900_vm3, %v1886_v33, %v1887_v42  ;;  %v1394_v9 = vrot.slane %v6086_v56, 2 }
  0x9d   : > { %v6996_v29 = vpop.permute.xlu0 %626  ;;  %v1169_v4 = vrot.slane %v7054_v1, 1  ;;  %v1780_v2 = vrot.slane %v1778_v22, 1  ;;  %v5257_v22 = vld [vmem:[%s6387_s24 + $0x48] sm:$0xc] }
  0x9e   : > { %1665 = vrot.lane.b32.xlu1 %v1645_v18, %s6324_s25  ;;  %v1074_v18 = vrot.slane %v1072_v31, 1  ;;  %v5269_v31 = vld [vmem:[%s6387_s24 + $0x48] sm:$0xf]  ;;  %v1767_v55 = vor.u32 %v1766_v14, %v1763_v45 }
  0x9f   : > { %1905 = vrot.lane.b32.xlu0 %v1885_v23, %s6325_s4 }
  0xa0   : > { %v7004_v49 = vpop.permute.xlu1 %632  ;;  %v1768_v33 = vsel %vm723_vm2, %v1759_v7, %v1767_v55  ;;  %v1075_v14 = vor.u32 %v1074_v18, %v1070_v53  ;;  %v1552_v7 = vshll.u32 %v7060_v63, 16  ;;  %v1772_v18 = vrot.slane %v1770_v15, 1  ;;  %v6099_v55 = vld [vmem:[%s9060_s1 + $0xb8] sm:$0xff]  }
  0xa1   : > { %v7011_v48 = vpop.permute.xlu0 %630  ;;  %v1550_v15 = vshrl.u32 %v7060_v63, 16 }
  0xa2   : > { %1411 = vrot.lane.b32.xlu1 %v1392_v36, %s6321_s7  ;;  %v1077_v36 = vshll.u32 %v7020_v0, 16 }
  0xa3   : > { %1961 = vrot.lane.b32.xlu0 %v7008_v51, %s6326_s5  ;;  %v1646_v51 = vrot.slane %v6965_v34, 1  ;;  %v1773_v34 = vshll.u32 %v7050_v62, 16 }
  0xa4   : > { %v7014_v26 = vpop.permute.xlu1 %689  ;;  %v1079_v52 = vrot.slane %v1077_v36, 1 }
  0xa5   : > { %v7028_v60 = vpop.permute.xlu0 %687  ;;  %v1648_v53 = vsel %vm658_vm0, %v1646_v51, %v1647_v40  ;;  %v1775_v36 = vrot.slane %v1773_v34, 2 }
  0xa6   : > { %1467 = vrot.lane.b32.xlu1 %v6953_v50, %s6320_s29  ;;  %v5270_v50 = vld [vmem:[%s6387_s24 + $0x4c] sm:$0xf] }
  0xa7   : > { %1123 = vrot.lane.b32.xlu0 %v1068_v10, %s6325_s4  ;;  %v7064_v42 = vcombine.low %v5269_v31, %v5270_v50  ;;  %v1170_v31 = vrot.slane %v7020_v0, 1  ;;  %v7077_v50 = vld [vmem:[%s6387_s24 + $0x50] ss:$0 sps:$4 sm:$0x11]  }
  0xa8   : > { %v7035_v23 = vpop.permute.xlu1 %693 }
  0xa9   : > { %v692_v61 = vpop.permute.xlu0 %691 }
  0xaa   : > { %1603 = vrot.lane.b32.xlu1 %v1548_v11, %s6322_s11  ;;  %v1781_v11 = vshll.u32 %v7044_v6, 16 }
  0xab   : > { %1187 = vrot.lane.b32.xlu0 %v1168_v47, %s6326_s5  ;;  %v1393_v47 = vrot.slane %v5437_v35, 2 }
  0xac   : > { %v869_v10 = vpop.permute.xlu1 %868  ;;  %v1783_v35 = vrot.slane %v1781_v11, 2 }
  0xad   : > { %v7068_v45 = vpop.permute.xlu0 %695  ;;  %v2025_v0 = vsel %vm2015_vm4, %v692_v61, %v869_v10  ;;  %v1983_v10 = vsel %vm1973_vm5, %v6493_v5, %v6996_v29  ;;  %v1171_v29 = vsel %vm658_vm0, %v1169_v4, %v1170_v31  ;;  %v6104_v4 = vld [vmem:[%s9060_s1 + $0xb0] sm:$0xff]  }
  0xae   : > { %1907 = vrot.lane.b32.xlu1 %v1888_v28, %s6325_s4  ;;  %v1080_v28 = vsel %vm521_vm1, %v1075_v14, %v1079_v52  ;;  %v1554_v14 = vrot.slane %v1552_v7, 1  ;;  %v1557_v52 = vshll.u32 %v7077_v50, 16  ;;  %v2004_v11 = vsel %vm1990_vm8, %v1983_v10, %v692_v61  ;;  %v5208_v7 = vld [vmem:[%s6387_s24 + $0x48] sm:$0xc] }
  0xaf   : > { %1843 = vrot.lane.b32.xlu0 %v1768_v33, %s6323_s21  ;;  %v6103_v33 = vld [vmem:[%s9060_s1 + $0xf0] sm:$0xff]  }
  0xb0   : > { %v7072_v59 = vpop.permute.xlu1 %989 }
  0xb1   : > { %v934_v56 = vpop.permute.xlu0 %933 }
  0xb2   : > { %1963 = vrot.lane.b32.xlu1 %v7064_v42, %s6326_s5  ;;  %v2042_v51 = vsel %vm2032_vm6, %v2025_v0, %v934_v56  ;;  %v1395_v0 = vsel %vm900_vm3, %v1393_v47, %v1394_v9  ;;  %v1784_v56 = vor.u32 %v1783_v35, %v1780_v2  ;;  %v5223_v9 = vld [vmem:[%s6387_s24 + $0x54] sm:$0xf]  ;;  %v7116_v47 = vld [vmem:[%s6387_s24 + $0x58] sm:$0xf]  ;;  %v1559_v2 = vrot.slane %v1557_v52, 1 }
  0xb3   : > { %1667 = vrot.lane.b32.xlu0 %v1648_v53, %s6324_s25  ;;  %v2063_v34 = vsel %vm2049_vm7, %v2042_v51, %v7072_v59  ;;  %v1776_v53 = vor.u32 %v1775_v36, %v1772_v18  ;;  %v1975_v51 = vsel %vm1973_vm5, %v6430_v20, %v6948_v13  ;;  %v1649_v20 = vrot.slane %v7050_v62, 1  ;;  %v7126_v18 = vld [vmem:[%s6387_s24 + $0x50] ss:$0 sps:$4 sm:$0x33]   ;;  %v6106_v36 = vld [vmem:[%s9060_s1 + $0xe8] sm:$0xff]  }
  0xb4   : > { %v926_v40 = vpop.permute.xlu1 %925  ;;  %4603 = vmatprep.mubr.bf16.mxu1 %v2063_v34  ;;  %v5477_v13 = vcombine.low %v5257_v22, %v7032_v58  ;;  %v7135_v35 = vld [vmem:[%s6387_s24 + $0x4c] sm:$0xf]  ;;  %v1992_v10 = vsel %vm1990_vm8, %v1975_v51, %v6928_v16  ;;  %v7149_v52 = vcombine.low %v5223_v9, %v7116_v47  ;;  %v6118_v22 = vld [vmem:[%s9060_s1 + $0x170] sm:$0xff]   ;;  %v1397_v51 = vrot.slane %v7126_v18, 2 }
  0xb5   : > { %4604 = vmatmul.mubr.bf16.vlgmr.msra.gmra.mxu1 %v2004_v11  ;;  %v861_v5 = vpop.permute.xlu0 %860  ;;  %v5438_v62 = vcombine.low %v5208_v7, %v7135_v35  ;;  %v6107_v58 = vld [vmem:[%s9060_s1 + $0xa8] sm:$0xff]   ;;  %v1084_v11 = vshll.u32 %v6675_v19, 16 }
  0xb6   : > { %1125 = vrot.lane.b32.xlu1 %v1080_v28, %s6325_s4  ;;  %v2017_v34 = vsel %vm2015_vm4, %v6928_v16, %v861_v5  ;;  %5713 = vmatpush3.bf16.msra.mxu1 %v6099_v55  ;;  %v1555_v28 = vor.u32 %v1554_v14, %v1550_v15  ;;  %v1785_v15 = vsel %vm723_vm2, %v1776_v53, %v1784_v56  ;;  %v1650_v14 = vrot.slane %v7077_v50, 1  ;;  %v5242_v5 = vld [vmem:[%s6387_s24 + $0x54] sm:$0xe]  ;;  %v6110_v16 = vld [vmem:[%s9060_s1 + $0xe0] sm:$0xff]  }
  0xb7   : > { %1413 = vrot.lane.b32.xlu0 %v1395_v0, %s6321_s7  ;;  %v2034_v31 = vsel %vm2032_vm6, %v2017_v34, %v926_v40  ;;  %5714 = vmatprep.subr.bf16.mxu1 %v6103_v33  ;;  %v6113_v33 = vld [vmem:[%s9060_s1 + $0x138] sm:$0xff]   ;;  %v1889_v50 = vrot.slane %v5477_v13, 2  ;;  %v6120_v53 = vld [vmem:[%s9060_s1 + $0x130] sm:$0xff]   ;;  %v1396_v7 = vrot.slane %v5438_v62, 2  ;;  %v1564_v13 = vshll.u32 %v7149_v52, 16 }
  0xb8   : > { %v7112_v61 = vpop.permute.xlu1 %981  ;;  %v1560_v56 = vsel %vm521_vm1, %v1555_v28, %v1559_v2  ;;  %v7171_v34 = vld [vmem:[%s6387_s24 + $0x50] ss:$0 sps:$4 sm:$0x11]   ;;  %v7184_v18 = vcombine.low %v5242_v5, %v7116_v47  ;;  %v1082_v2 = vshrl.u32 %v6675_v19, 16  ;;  %v6117_v19 = vld [vmem:[%s9060_s1 + $0xd8] sm:$0xff]   ;;  %v1562_v5 = vshrl.u32 %v7149_v52, 16 }
  0xb9   : > { %v2051_v55 = vsel %vm2049_vm7, %v2034_v31, %v7112_v61  ;;  %v871_v40 = vpop.permute.xlu0 %870  ;;  %v1651_v31 = vsel %vm658_vm0, %v1649_v20, %v1650_v14  ;;  %v7192_v62 = vld [vmem:[%s6387_s24 + $0x5c] ss:$0 sps:$4 sm:$0x33]   ;;  %v1985_v20 = vsel %vm1973_vm5, %v6465_v46, %v6987_v30  ;;  %v1086_v14 = vrot.slane %v1084_v11, 1  ;;  %v5272_v30 = vld [vmem:[%s6387_s24 + $0x58] sm:$0xf] }
  0xba   : > { %1189 = vrot.lane.b32.xlu1 %v1171_v29, %s6326_s5  ;;  %4571 = vmatprep.mubr.bf16.mxu0 %v2051_v55  ;;  %v1890_v29 = vrot.slane %v7044_v6, 2  ;;  %v6112_v6 = vld [vmem:[%s9060_s1 + $0xa0] sm:$0xff]   ;;  %v2027_v9 = vsel %vm2015_vm4, %v7035_v23, %v871_v40  ;;  %v1398_v46 = vsel %vm900_vm3, %v1396_v7, %v1397_v51  ;;  %v6127_v7 = vld [vmem:[%s9060_s1 + $0x128] sm:$0xff]   ;;  %v1977_v51 = vsel %vm1973_vm5, %v6461_v44, %v6976_v24 }
  0xbb   : > { %4572 = vmatmul.mubr.bf16.vlgmr.msra.gmra.mxu0 %v1992_v10  ;;  %5715 = vmatpush3.bf16.msra.mxu1 %v6104_v4 }
  0xbc   : > { %v7155_v0 = vpop.permute.xlu1 %991  ;;  %1469 = vrot.lane.b32.xlu0 %v7060_v63, %s6320_s29  ;;  %5716 = vmatprep.subr.bf16.mxu1 %v6106_v36  ;;  %v6125_v63 = vld [vmem:[%s9060_s1 + $0x168] sm:$0xff]   ;;  %v7187_v36 = vld [vmem:[%s6387_s24 + $0x5c] ss:$0 sps:$4 sm:$0x11]   ;;  %v1891_v10 = vsel %vm900_vm3, %v1889_v50, %v1890_v29  ;;  %v1787_v29 = vshrl.u32 %v7184_v18, 16 }
  0xbd   : > { %5777 = vmatpush3.bf16.msra.mxu0 %v6113_v33  ;;  %v936_v4 = vpop.permute.xlu0 %935  ;;  %v5192_v33 = vld [vmem:[%s6387_s24 + $0x48] sm:$0xe]  ;;  %v1569_v50 = vshll.u32 %v7187_v36, 16 }
  0xbe   : > { %1845 = vrot.lane.b32.xlu1 %v1785_v15, %s6323_s21  ;;  %5778 = vmatprep.subr.bf16.mxu0 %v6118_v22  ;;  %v2044_v55 = vsel %vm2032_vm6, %v2027_v9, %v936_v4  ;;  %v5271_v15 = vld [vmem:[%s6387_s24 + $0x54] sm:$0xf]  ;;  %v1089_v22 = vshll.u32 %v7171_v34, 16 }
  0xbf   : > { %5717 = vmatpush3.bf16.msra.mxu1 %v6107_v58  ;;  %v2066_v40 = vsel %vm2049_vm7, %v2044_v55, %v7155_v0  ;;  %v2007_v58 = vsel %vm1990_vm8, %v1985_v20, %v7035_v23  ;;  %v6119_v23 = vld [vmem:[%s9060_s1 + $0x98] sm:$0xff]   ;;  %v1798_v55 = vshll.u32 %v7192_v62, 16  ;;  %v1096_v20 = vshll.u32 %v6717_v39, 16 }
  0xc0   : > { %v928_v28 = vpop.permute.xlu1 %927  ;;  %1605 = vrot.lane.b32.xlu0 %v1560_v56, %s6322_s11  ;;  %5718 = vmatprep.subr.bf16.mxu1 %v6110_v16  ;;  %v1566_v16 = vrot.slane %v1564_v13, 1  ;;  %v1790_v56 = vshll.u32 %v7184_v18, 16  ;;  %v1795_v13 = vshrl.u32 %v7192_v62, 16  ;;  %v7237_v44 = vcombine.low %v5271_v15, %v5272_v30 }
  0xc1   : > { %4611 = vmatprep.mubr.bf16.mxu1 %v2066_v40  ;;  %v863_v11 = vpop.permute.xlu0 %862  ;;  %5779 = vmatpush3.bf16.msra.mxu0 %v6120_v53  ;;  %v7233_v53 = vcombine.low %v5192_v33, %v7135_v35  ;;  %v6124_v40 = vld [vmem:[%s9060_s1 + $0xd0] sm:$0xff]   ;;  %v6131_v33 = vld [vmem:[%s9060_s1 + $0x160] sm:$0xff]   ;;  %v1995_v15 = vsel %vm1990_vm8, %v1977_v51, %v6923_v57  ;;  %v1571_v30 = vrot.slane %v1569_v50, 1  ;;  %v7276_v50 = vld [vmem:[%s6387_s24 + $0x5c] ss:$0 sps:$4 sm:$0x11]  }
  0xc2   : > { %1669 = vrot.lane.b32.xlu1 %v1651_v31, %s6324_s25  ;;  %4612 = vmatmul.mubr.bf16.gmra.mxu1 %v2007_v58  ;;  %v2019_v9 = vsel %vm2015_vm4, %v6923_v57, %v863_v11  ;;  %v5258_v31 = vld [vmem:[%s6387_s24 + $0x54] sm:$0xc]  ;;  %v1108_v58 = vshll.u32 %v6795_v27, 16  ;;  %v7261_v11 = vrot.slane %v1790_v56, 2  ;;  %v7263_v57 = vrot.slane %v1795_v13, 1  ;;  %v6132_v13 = vld [vmem:[%s9060_s1 + $0x88] sm:$0xff]  }
  0xc3   : > { %5719 = vmatpush3.bf16.msra.mxu1 %v6112_v6  ;;  %5780 = vmatprep.subr.bf16.mxu0 %v6125_v63  ;;  %v2036_v24 = vsel %vm2032_vm6, %v2019_v9, %v928_v28  ;;  %v1087_v6 = vor.u32 %v1086_v14, %v1082_v2  ;;  %v1091_v63 = vrot.slane %v1089_v22, 1  ;;  %v6133_v2 = vld [vmem:[%s9060_s1 + $0x120] sm:$0xff]   ;;  %v7259_v22 = vrot.slane %v1787_v29, 1  ;;  %v6130_v29 = vld [vmem:[%s9060_s1 + $0xc8] sm:$0xff]   ;;  %v7282_v56 = vld [vmem:[%s6387_s24 + $0x58] sm:$0xf] }
  0xc4   : > { %v7227_v4 = vpop.permute.xlu1 %983  ;;  %1909 = vrot.lane.b32.xlu0 %v1891_v10, %s6325_s4  ;;  %5720 = vmatprep.subr.bf16.mxu1 %v6117_v19  ;;  %v5193_v10 = vld [vmem:[%s6387_s24 + $0x54] sm:$0xe]  ;;  %v1567_v19 = vor.u32 %v1566_v16, %v1562_v5  ;;  %v7265_v5 = vrot.slane %v1798_v55, 2  ;;  %v6137_v16 = vld [vmem:[%s9060_s1 + $0x158] sm:$0xff]   ;;  %v1172_v51 = vrot.slane %v7233_v53, 1  ;;  %v1173_v9 = vrot.slane %v7171_v34, 1 }
  0xc5   : > { %v2054_v35 = vsel %vm2049_vm7, %v2036_v24, %v7227_v4  ;;  %v873_v28 = vpop.permute.xlu0 %872  ;;  %5781 = vmatpush3.bf16.msra.mxu0 %v6127_v7  ;;  %v1092_v7 = vsel %vm521_vm1, %v1087_v6, %v1091_v63  ;;  %v6139_v55 = vld [vmem:[%s9060_s1 + $0x118] sm:$0xff]   ;;  %v1893_v34 = vrot.slane %v7192_v62, 2  ;;  %v7304_v6 = vld [vmem:[%s6387_s24 + $0x64] sm:$0xf]  ;;  %v5243_v63 = vld [vmem:[%s6387_s24 + $0x60] sm:$0xe] }
  0xc6   : > { %1415 = vrot.lane.b32.xlu1 %v1398_v46, %s6321_s7  ;;  %4579 = vmatprep.mubr.bf16.mxu0 %v2054_v35  ;;  %v5478_v46 = vcombine.low %v5258_v31, %v7116_v47  ;;  %v6126_v47 = vld [vmem:[%s9060_s1 + $0x90] sm:$0xff]   ;;  %v1801_v62 = vor.u32 %v7265_v5, %v7263_v57  ;;  %v7330_v57 = vld [vmem:[%s6387_s24 + $0x5c] ss:$0 sps:$4 sm:$0x33]  }
  0xc7   : > { %4580 = vmatmul.mubr.bf16.gmra.mxu0 %v1995_v15  ;;  %5721 = vmatpush3.bf16.msra.mxu1 %v6119_v23  ;;  %v7285_v23 = vcombine.low %v5193_v10, %v7282_v56  ;;  %v5209_v31 = vld [vmem:[%s6387_s24 + $0x54] sm:$0xc] }
  0xc8   : > { %v7257_v14 = vpop.permute.xlu1 %993  ;;  %1965 = vrot.lane.b32.xlu0 %v7237_v44, %s6326_s5  ;;  %5722 = vmatprep.subr.bf16.mxu1 %v6124_v40  ;;  %v1572_v40 = vsel %vm521_vm1, %v1567_v19, %v1571_v30  ;;  %v1892_v35 = vrot.slane %v5478_v46, 2  ;;  %v5273_v19 = vld [vmem:[%s6387_s24 + $0x60] sm:$0xf]  ;;  %v5274_v30 = vld [vmem:[%s6387_s24 + $0x64] sm:$0xf]  ;;  %v6141_v46 = vld [vmem:[%s9060_s1 + $0x150] sm:$0xff]   ;;  %v5439_v5 = vcombine.low %v5209_v31, %v7282_v56 }
  0xc9   : > { %5782 = vmatprep.subr.bf16.mxu0 %v6131_v33  ;;  %v938_v24 = vpop.permute.xlu0 %937  ;;  %v6136_v33 = vld [vmem:[%s9060_s1 + $0xc0] sm:$0xff]   ;;  %v7347_v56 = vrot.slane %v1108_v58, 1  ;;  %v7360_v58 = vcombine.low %v5273_v19, %v5274_v30 }
  0xca   : > { %1471 = vrot.lane.b32.xlu1 %v7149_v52, %s6320_s29  ;;  %v2029_v52 = vsel %vm2015_vm4, %v7068_v45, %v873_v28  ;;  %5783 = vmatpush3.bf16.msra.mxu0 %v6133_v2  ;;  %v1793_v28 = vor.u32 %v7261_v11, %v7259_v22  ;;  %v1987_v2 = vsel %vm1973_vm5, %v6530_v38, %v7011_v48  ;;  %v1101_v11 = vshll.u32 %v7276_v50, 16 }
  0xcb   : > { %v2046_v10 = vsel %vm2032_vm6, %v2029_v52, %v938_v24  ;;  %5723 = vmatpush3.bf16.msra.mxu1 %v6126_v47  ;;  %5784 = vmatprep.subr.bf16.mxu0 %v6137_v16  ;;  %v5225_v47 = vld [vmem:[%s6387_s24 + $0x60] sm:$0xf]  ;;  %v1106_v16 = vshrl.u32 %v6795_v27, 16  ;;  %v2010_v38 = vsel %vm1990_vm8, %v1987_v2, %v7068_v45  ;;  %v1174_v48 = vsel %vm658_vm0, %v1172_v51, %v1173_v9  ;;  %v7343_v52 = vld [vmem:[%s6387_s24 + $0x68] ss:$0 sps:$4 sm:$0x33]  }
  0xcc   : > { %v7311_v15 = vpop.permute.xlu1 %929  ;;  %1127 = vrot.lane.b32.xlu0 %v1092_v7, %s6325_s4  ;;  %v2069_v22 = vsel %vm2049_vm7, %v2046_v10, %v7257_v14  ;;  %5724 = vmatprep.subr.bf16.mxu1 %v6130_v29  ;;  %v7340_v7 = vcombine.low %v5243_v63, %v7304_v6  ;;  %v5287_v29 = vld [vmem:[%s6387_s24 + $0x24] sm:$0xe]  ;;  %v1894_v24 = vsel %vm900_vm3, %v1892_v35, %v1893_v34  ;;  %v1094_v45 = vshrl.u32 %v6717_v39, 16  ;;  %v6142_v51 = vld [vmem:[%s9060_s1 + $0x110] sm:$0xff]  }
  0xcd   : > { %4619 = vmatprep.mubr.bf16.mxu1 %v2069_v22  ;;  %v865_v31 = vpop.permute.xlu0 %864  ;;  %v5303_v9 = vld [vmem:[%s6387_s24 + $0x24] sm:$0xc]  ;;  %v1652_v10 = vrot.slane %v7184_v18, 1  ;;  %v1653_v2 = vrot.slane %v7187_v36, 1  ;;  %v7365_v35 = vcombine.low %v5225_v47, %v7304_v6  ;;  %v1802_v18 = vsel %vm723_vm2, %v1793_v28, %v1801_v62  ;;  %v6247_v22 = vld [vmem:[%s6387_s24 + $0x28] sm:$0xf] }
  0xce   : > { %1607 = vrot.lane.b32.xlu1 %v1572_v40, %s6322_s11  ;;  %4620 = vmatmul.mubr.bf16.gmra.mxu1 %v2010_v38  ;;  %v1098_v40 = vrot.slane %v1096_v20, 1  ;;  %v6138_v39 = vld [vmem:[%s9060_s1 + $0x80] sm:$0xff]   ;;  %v6148_v20 = vld [vmem:[%s9060_s1 + $0x148] sm:$0xff]   ;;  %v1103_v36 = vrot.slane %v1101_v11, 1  ;;  %v1400_v34 = vrot.slane %v7330_v57, 2  ;;  %v1807_v19 = vshll.u32 %v7340_v7, 16 }
  0xcf   : > { %5785 = vmatpush3.bf16.msra.mxu0 %v6139_v55  ;;  %5725 = vmatpush3.bf16.msra.mxu1 %v6132_v13  ;;  %v1399_v55 = vrot.slane %v5439_v5, 2  ;;  %v1804_v13 = vshrl.u32 %v7340_v7, 16  ;;  %v1812_v30 = vshrl.u32 %v7343_v52, 16  ;;  %v7382_v47 = vcombine.low %v5287_v29, %v6247_v22  ;;  %v7392_v57 = vld [vmem:[%s6387_s24 + $0x68] ss:$0 sps:$4 sm:$0x11]  }
  0xd0   : > { %v7358_v63 = vpop.permute.xlu1 %874  ;;  %5786 = vmatprep.subr.bf16.mxu0 %v6141_v46  ;;  %1191 = vrot.lane.b32.xlu0 %v1174_v48, %s6326_s5  ;;  %v1815_v46 = vshll.u32 %v7343_v52, 16  ;;  %v7384_v28 = vcombine.low %v5303_v9, %v6247_v22  ;;  %v1979_v62 = vsel %vm1973_vm5, %v6420_v17, %v6944_v37  ;;  %v1099_v11 = vor.u32 %v1098_v40, %v1094_v45  ;;  %v6149_v5 = vld [vmem:[%s9060_s1 + $0x108] sm:$0xff]  }
  0xd1   : > { %5726 = vmatprep.subr.bf16.mxu1 %v6136_v33  ;;  %v7389_v33 = vpop.permute.xlu0 %697  ;;  %v1981_v38 = vsel %vm1973_vm5, %v6447_v32, %v6970_v8  ;;  %v2021_v48 = vsel %vm2015_vm4, %v7028_v60, %v865_v31  ;;  %v1654_v17 = vsel %vm658_vm0, %v1652_v10, %v1653_v2  ;;  %v1576_v37 = vshll.u32 %v7365_v35, 16 }
  0xd2   : > { %1911 = vrot.lane.b32.xlu1 %v1894_v24, %s6325_s4  ;;  %v6151_v24 = vld [vmem:[%s9060_s1 + $0x140] sm:$0xff]   ;;  %v1175_v45 = vrot.slane %v7285_v23, 1  ;;  %v1176_v32 = vrot.slane %v7276_v50, 1  ;;  %v1222_v8 = vshrl.u32 %v6790_v25, 16  ;;  %v1225_v31 = vshll.u32 %v6790_v25, 16 }
  0xd3   : > { %5787 = vmatpush3.bf16.msra.mxu0 %v6142_v51  ;;  %5727 = vmatpush3.bf16.msra.mxu1 %v6138_v39  ;;  %v1806_v40 = vrot.slane %v1804_v13, 1  ;;  %v1809_v51 = vrot.slane %v1807_v19, 2  ;;  %v1814_v9 = vrot.slane %v1812_v30, 1  ;;  %v1817_v10 = vrot.slane %v1815_v46, 2  ;;  %v6152_v25 = vld [vmem:[%s9060_s1 + $0x100] sm:$0xff]  }
  0xd4   : > { %v940_v29 = vpop.permute.xlu1 %939  ;;  %5788 = vmatprep.subr.bf16.mxu0 %v6148_v20  ;;  %1847 = vrot.lane.b32.xlu0 %v1802_v18, %s6323_s21  ;;  %v2038_v39 = vsel %vm2032_vm6, %v2021_v48, %v7311_v15  ;;  %v1104_v20 = vsel %vm521_vm1, %v1099_v11, %v1103_v36  ;;  %v1574_v50 = vshrl.u32 %v7365_v35, 16  ;;  %v6248_v18 = vld [vmem:[%s6387_s24 + $0x14] ss:$0 sps:$4 sm:$0x33]   ;;  %v1578_v30 = vrot.slane %v1576_v37, 1 }
  0xd5   : > { %v7414_v2 = vpop.permute.xlu0 %985  ;;  %v1230_v22 = vshrl.u32 %v6248_v18, 16  ;;  %v1233_v46 = vshll.u32 %v6248_v18, 16  ;;  %v1581_v15 = vshll.u32 %v7392_v57, 16  ;;  %v1989_v36 = vsel %vm1973_vm5, %v6507_v21, %v7004_v49  ;;  %v6143_v18 = vld [vmem:[%s6387_s24 + $0x68] ss:$0 sps:$4 sm:$0x33]  }
  0xd6   : > { %1967 = vrot.lane.b32.xlu1 %v7360_v58, %s6326_s5  ;;  %v2057_v13 = vsel %vm2049_vm7, %v2038_v39, %v7414_v2  ;;  %v1998_v11 = vsel %vm1990_vm8, %v1979_v62, %v7028_v60  ;;  %v7434_v48 = vrot.slane %v1222_v8, 1  ;;  %v2031_v37 = vsel %vm2015_vm4, %v7389_v33, %v7358_v63  ;;  %v5210_v39 = vld [vmem:[%s6387_s24 + $0x60] sm:$0xc]  ;;  %v7451_v8 = vld [vmem:[%s6387_s24 + $0x2c] ss:$0 sps:$4 sm:$0x33]  }
  0xd7   : > { %5789 = vmatpush3.bf16.msra.mxu0 %v6149_v5  ;;  %4587 = vmatprep.mubr.bf16.mxu0 %v2057_v13  ;;  %v1401_v5 = vsel %vm900_vm3, %v1399_v55, %v1400_v34  ;;  %v1810_v21 = vor.u32 %v1809_v51, %v1806_v40  ;;  %v1818_v49 = vor.u32 %v1817_v10, %v1814_v9  ;;  %v1232_v63 = vrot.slane %v1230_v22, 1  ;;  %v7469_v22 = vld [vmem:[%s6387_s24 + $0x64] sm:$0xf] }
  0xd8   : > { %v867_v19 = vpop.permute.xlu1 %866  ;;  %5790 = vmatprep.subr.bf16.mxu0 %v6151_v24  ;;  %1671 = vrot.lane.b32.xlu0 %v1654_v17, %s6324_s25  ;;  %v7440_v24 = vrot.slane %v1225_v31, 2  ;;  %v5259_v17 = vld [vmem:[%s6387_s24 + $0x60] sm:$0xc]  ;;  %v2048_v60 = vsel %vm2032_vm6, %v2031_v37, %v940_v29  ;;  %v1177_v55 = vsel %vm658_vm0, %v1175_v45, %v1176_v32  ;;  %v2001_v34 = vsel %vm1990_vm8, %v1981_v38, %v7014_v26 }
  0xd9   : > { %4588 = vmatmul.mubr.bf16.gmra.mxu0 %v1998_v11  ;;  %v7445_v62 = vpop.permute.xlu0 %995  ;;  %v1235_v29 = vrot.slane %v1233_v46, 2  ;;  %v1579_v51 = vor.u32 %v1578_v30, %v1574_v50  ;;  %v1583_v9 = vrot.slane %v1581_v15, 1  ;;  %v2013_v38 = vsel %vm1990_vm8, %v1989_v36, %v7389_v33 }
  0xda   : > { %1129 = vrot.lane.b32.xlu1 %v1104_v20, %s6325_s4  ;;  %v2072_v31 = vsel %vm2049_vm7, %v2048_v60, %v7445_v62  ;;  %v1655_v45 = vrot.slane %v7340_v7, 1  ;;  %v1656_v32 = vrot.slane %v7392_v57, 1  ;;  %v5479_v10 = vcombine.low %v5259_v17, %v7304_v6 }
  0xdb   : > { %5791 = vmatpush3.bf16.msra.mxu0 %v6152_v25  ;;  %4627 = vmatprep.mubr.bf16.mxu1 %v2072_v31  ;;  %v1228_v20 = vor.u32 %v7440_v24, %v7434_v48  ;;  %v1819_v50 = vsel %vm723_vm2, %v1810_v21, %v1818_v49  ;;  %v5440_v25 = vcombine.low %v5210_v39, %v7469_v22  ;;  %v2557_v33 = vshrl.u32 %v7384_v28, 16  ;;  %v6186_v48 = vld [vmem:[%s9060_s1 + $0x1f8] sm:$0xff]   ;;  %v5275_v31 = vld [vmem:[%s6387_s24 + $0x6c] sm:$0xf] }
  0xdc   : > { %v7455_v40 = vpop.permute.xlu1 %987  ;;  %1417 = vrot.lane.b32.xlu0 %v1401_v5, %s6321_s7  ;;  %4628 = vmatmul.mubr.bf16.gmra.mxu1 %v2013_v38  ;;  %v2023_v7 = vsel %vm2015_vm4, %v7014_v26, %v867_v19  ;;  %v2560_v6 = vshll.u32 %v7384_v28, 16  ;;  %v2565_v13 = vshrl.u32 %v7451_v8, 16  ;;  %v2568_v30 = vshll.u32 %v7451_v8, 16 }
  0xdd   : > { %v932_v57 = vpop.permute.xlu0 %931  ;;  %v1236_v36 = vor.u32 %v1235_v29, %v1232_v63  ;;  %v1896_v11 = vrot.slane %v7343_v52, 2  ;;  %v1584_v19 = vsel %vm521_vm1, %v1579_v51, %v1583_v9  ;;  %v1657_v28 = vsel %vm658_vm0, %v1655_v45, %v1656_v32  ;;  %5840 = vmatprep.subr.bf16.mxu1 %v6186_v48  ;;  %v5276_v29 = vld [vmem:[%s6387_s24 + $0x70] sm:$0xf]  ;;  %v7499_v9 = vld [vmem:[%s6387_s24 + $0x68] ss:$0 sps:$4 sm:$0x11]  }
  0xde   : > { %1193 = vrot.lane.b32.xlu1 %v1177_v55, %s6326_s5  ;;  %v2040_v46 = vsel %vm2032_vm6, %v2023_v7, %v932_v57  ;;  %v1895_v5 = vrot.slane %v5479_v10, 2  ;;  %v1402_v52 = vrot.slane %v5440_v25, 2  ;;  %v2559_v37 = vrot.slane %v2557_v33, 1  ;;  %v7531_v48 = vld [vmem:[%s6387_s24 + $0x70] sm:$0xf] }
  0xdf   : > { %v2060_v26 = vsel %vm2049_vm7, %v2040_v46, %v7455_v40  ;;  %v2476_v24 = vrot.slane %v7382_v47, 1  ;;  %v2562_v49 = vrot.slane %v2560_v6, 2  ;;  %v7491_v17 = vrot.slane %v2565_v13, 1  ;;  %v5194_v6 = vld [vmem:[%s6387_s24 + $0x60] sm:$0xe] }
  0xe0   : > { %v1118_v15 = vpop.permute.xlu1 %1117  ;;  %1473 = vrot.lane.b32.xlu0 %v7365_v35, %s6320_s29  ;;  %4595 = vmatprep.mubr.bf16.mxu0 %v2060_v26  ;;  %v1403_v35 = vrot.slane %v6143_v18, 2  ;;  %v2570_v39 = vrot.slane %v2568_v30, 2  ;;  %v1239_v60 = vshrl.u32 %v6861_v43, 16  ;;  %v1237_v55 = vsel %vm723_vm2, %v1228_v20, %v1236_v36  ;;  %v7510_v18 = vld [vmem:[%s6387_s24 + $0x34] sm:$0xf] }
  0xe1   : > { %4596 = vmatmul.mubr.bf16.gmra.mxu0 %v2001_v34  ;;  %v1406_v21 = vpop.permute.xlu0 %1405  ;;  %v1242_v51 = vshll.u32 %v6861_v43, 16  ;;  %v6250_v34 = vld [vmem:[%s6387_s24 + $0x20] ss:$0 sps:$4 sm:$0x33]   ;;  %v2076_v32 = vsel %vm2074_vm9, %v7112_v61, %v1118_v15  ;;  %v1897_v10 = vsel %vm900_vm3, %v1895_v5, %v1896_v11  ;;  %v2563_v7 = vor.u32 %v2562_v49, %v2559_v37  ;;  %v6187_v61 = vld [vmem:[%s9060_s1 + $0x1b8] sm:$0xff]   ;;  %v6189_v11 = vld [vmem:[%s9060_s1 + $0x1f0] sm:$0xff]  }
  0xe2   : > { %1849 = vrot.lane.b32.xlu1 %v1819_v50, %s6323_s21  ;;  %v1247_v38 = vshrl.u32 %v6250_v34, 16  ;;  %v1250_v45 = vshll.u32 %v6250_v34, 16  ;;  %v1404_v20 = vsel %vm900_vm3, %v1402_v52, %v1403_v35  ;;  %v5313_v50 = vld [vmem:[%s6387_s24 + $0x30] sm:$0xf]  ;;  %v2118_v43 = vsel %vm1973_vm5, %v1237_v55, %v1406_v21  ;;  %v5227_v5 = vld [vmem:[%s6387_s24 + $0x6c] sm:$0xf] }
  0xe3   : > { %v2571_v57 = vor.u32 %v2570_v39, %v7491_v17  ;;  %v2477_v46 = vrot.slane %v7451_v8, 1  ;;  %v1241_v15 = vrot.slane %v1239_v60, 1  ;;  %v1244_v36 = vrot.slane %v1242_v51, 2  ;;  %v6190_v37 = vld [vmem:[%s9060_s1 + $0x1b0] sm:$0xff]  }
  0xe4   : > { %v1182_v63 = vpop.permute.xlu1 %1181  ;;  %1609 = vrot.lane.b32.xlu0 %v1584_v19, %s6322_s11  ;;  %v7527_v26 = vcombine.low %v5275_v31, %v5276_v29  ;;  %v1249_v19 = vrot.slane %v1247_v38, 1  ;;  %v7534_v52 = vcombine.low %v5313_v50, %v7510_v18  ;;  %v1113_v35 = vshll.u32 %v7499_v9, 16  ;;  %v7546_v55 = vld [vmem:[%s6387_s24 + $0x2c] ss:$0 sps:$4 sm:$0x11]   ;;  %v6205_v8 = vld [vmem:[%s9060_s1 + $0x190] sm:$0xff]  }
  0xe5   : > { %v2093_v25 = vsel %vm2091_vm10, %v2076_v32, %v1182_v63  ;;  %v1462_v33 = vpop.permute.xlu0 %1461  ;;  %v7542_v21 = vcombine.low %v5194_v6, %v7469_v22  ;;  %v2572_v39 = vsel %vm723_vm2, %v2563_v7, %v2571_v57  ;;  %v6192_v63 = vld [vmem:[%s9060_s1 + $0x1e8] sm:$0xff]   ;;  %v1245_v31 = vor.u32 %v1244_v36, %v1241_v15  ;;  %v6197_v57 = vld [vmem:[%s9060_s1 + $0x1e0] sm:$0xff]  }
  0xe6   : > { %1673 = vrot.lane.b32.xlu1 %v1657_v28, %s6324_s25  ;;  %v2141_v13 = vsel %vm1990_vm8, %v2118_v43, %v1462_v33  ;;  %v1252_v28 = vrot.slane %v1250_v45, 2  ;;  %v1111_v22 = vor.u32 %v7347_v56, %v1106_v16  ;;  %v2765_v51 = vshrl.u32 %v7534_v52, 16  ;;  %v6193_v56 = vld [vmem:[%s9060_s1 + $0x1a8] sm:$0xff]  }
  0xe7   : > { %4668 = vmatprep.mubr.bf16.mxu1 %v2141_v13  ;;  %v2478_v34 = vsel %vm658_vm0, %v2476_v24, %v2477_v46  ;;  %v7564_v38 = vcombine.low %v5227_v5, %v7531_v48  ;;  %v1115_v45 = vrot.slane %v1113_v35, 1  ;;  %v2311_v32 = vshll.u32 %v7382_v47, 16  ;;  %v5244_v50 = vld [vmem:[%s6387_s24 + $0x6c] sm:$0xe] }
  0xe8   : > { %v7520_v30 = vpop.permute.xlu1 %1837  ;;  %1913 = vrot.lane.b32.xlu0 %v1897_v10, %s6325_s4  ;;  %4669 = vmatmul.mubr.bf16.vlgmr.msra.gmra.mxu1 %v2093_v25  ;;  %v1253_v29 = vor.u32 %v1252_v28, %v1249_v19  ;;  %v1178_v27 = vrot.slane %v7542_v21, 1  ;;  %v1179_v16 = vrot.slane %v7499_v9, 1  ;;  %v2309_v24 = vshrl.u32 %v7382_v47, 16 }
  0xe9   : > { %v1598_v49 = vpop.permute.xlu0 %1597  ;;  %5841 = vmatpush3.bf16.msra.mxu1 %v6187_v61  ;;  %v7577_v7 = vrot.slane %v2765_v51, 7  ;;  %v2768_v9 = vshll.u32 %v7534_v52, 16  ;;  %v1116_v47 = vsel %vm521_vm1, %v1111_v22, %v1115_v45  ;;  %v2316_v6 = vshll.u32 %v7546_v55, 16  ;;  %v5304_v51 = vld [vmem:[%s6387_s24 + $0x30] sm:$0xc] }
  0xea   : > { %1419 = vrot.lane.b32.xlu1 %v1404_v20, %s6321_s7  ;;  %5842 = vmatprep.subr.bf16.mxu1 %v6189_v11  ;;  %v2165_v43 = vsel %vm2015_vm4, %v1462_v33, %v1598_v49  ;;  %v1254_v25 = vsel %vm723_vm2, %v1245_v31, %v1253_v29  ;;  %v2313_v33 = vrot.slane %v2311_v32, 1  ;;  %v1180_v36 = vsel %vm658_vm0, %v1178_v27, %v1179_v16  ;;  %v6198_v11 = vld [vmem:[%s9060_s1 + $0x1a0] sm:$0xff]   ;;  %v6251_v45 = vld [vmem:[%s6387_s24 + $0x2c] ss:$0 sps:$4 sm:$0x33]  }
  0xeb   : > { %v7596_v28 = vcombine.low %v5244_v50, %v7531_v48  ;;  %v2318_v29 = vrot.slane %v2316_v6, 1  ;;  %v1256_v22 = vshrl.u32 %v6902_v54, 16  ;;  %v1264_v32 = vshrl.u32 %v6251_v45, 16  ;;  %v5260_v16 = vld [vmem:[%s6387_s24 + $0x6c] sm:$0xc] }
  0xec   : > { %v1662_v60 = vpop.permute.xlu1 %1661  ;;  %1969 = vrot.lane.b32.xlu0 %v7527_v26, %s6326_s5  ;;  %v2314_v31 = vor.u32 %v2313_v33, %v2309_v24  ;;  %v1588_v27 = vshll.u32 %v7564_v38, 16  ;;  %v7624_v50 = vld [vmem:[%s6387_s24 + $0x74] ss:$0 sps:$4 sm:$0x33]   ;;  %v5480_v33 = vcombine.low %v5260_v16, %v7531_v48  ;;  %v2320_v48 = vshrl.u32 %v7546_v55, 16  ;;  %v6206_v55 = vld [vmem:[%s9060_s1 + $0x1c8] sm:$0xff]  }
  0xed   : > { %v1902_v10 = vpop.permute.xlu0 %1901  ;;  %5843 = vmatpush3.bf16.msra.mxu1 %v6190_v37  ;;  %v2181_v61 = vsel %vm2032_vm6, %v2165_v43, %v1662_v60  ;;  %v6201_v37 = vld [vmem:[%s9060_s1 + $0x1d8] sm:$0xff]   ;;  %v1586_v43 = vshrl.u32 %v7564_v38, 16 }
  0xee   : > { %2692 = vrot.lane.b32.xlu1 %v2572_v39, %s6322_s11  ;;  %5844 = vmatprep.subr.bf16.mxu1 %v6192_v63  ;;  %v2221_v13 = vsel %vm2074_vm9, %v7520_v30, %v1902_v10  ;;  %v2197_v49 = vsel %vm2049_vm7, %v2181_v61, %v7520_v30  ;;  %v2770_v39 = vor.u32 %v2768_v9, %v7577_v7  ;;  %v7611_v63 = vld [vmem:[%s6387_s24 + $0x74] ss:$0 sps:$4 sm:$0x11]   ;;  %v1259_v30 = vshll.u32 %v6902_v54, 16  ;;  %v5315_v16 = vld [vmem:[%s6387_s24 + $0x3c] sm:$0xf] }
  0xef   : > { %v1267_v10 = vshll.u32 %v6251_v45, 16  ;;  %v6203_v54 = vld [vmem:[%s9060_s1 + $0x1d0] sm:$0xff]   ;;  %v2319_v24 = vsel %vm521_vm1, %v2314_v31, %v2318_v29  ;;  %v1821_v9 = vshrl.u32 %v7596_v28, 16  ;;  %v1898_v29 = vrot.slane %v5480_v33, 2  ;;  %v5277_v33 = vld [vmem:[%s6387_s24 + $0x78] sm:$0xf] }
  0xf0   : > { %v1408_v20 = vpop.permute.xlu1 %1407  ;;  %2500 = vrot.lane.b32.xlu0 %v2478_v34, %s6320_s29 }
  0xf1   : > { %v1958_v15 = vpop.permute.xlu0 %1957  ;;  %5845 = vmatpush3.bf16.msra.mxu1 %v6193_v56  ;;  %v2121_v19 = vsel %vm1973_vm5, %v1254_v25, %v1408_v20  ;;  %v6202_v56 = vld [vmem:[%s9060_s1 + $0x198] sm:$0xff]   ;;  %v1593_v25 = vshll.u32 %v7611_v63, 16 }
  0xf2   : > { %1475 = vrot.lane.b32.xlu1 %v7564_v38, %s6320_s29  ;;  %v2237_v5 = vsel %vm2091_vm10, %v2221_v13, %v1958_v15  ;;  %5846 = vmatprep.subr.bf16.mxu1 %v6197_v57  ;;  %v1824_v15 = vshll.u32 %v7596_v28, 16 }
  0xf3   : > { %4765 = vmatprep.mubr.bf16.mxu0 %v2237_v5  ;;  %v7661_v5 = vrot.slane %v1264_v32, 1  ;;  %v6208_v32 = vld [vmem:[%s9060_s1 + $0x188] sm:$0xff]  }
  0xf4   : > { %v7599_v35 = vpop.permute.xlu1 %1463  ;;  %1131 = vrot.lane.b32.xlu0 %v1116_v47, %s6325_s4  ;;  %4766 = vmatmul.mubr.bf16.vlgmr.msra.gmra.mxu0 %v2197_v49  ;;  %v1590_v47 = vrot.slane %v1588_v27, 1  ;;  %v1595_v49 = vrot.slane %v1593_v25, 1  ;;  %v5337_v25 = vld [vmem:[%s6387_s24 + $0x30] sm:$0xe] }
  0xf5   : > { %v2144_v60 = vsel %vm1990_vm8, %v2121_v19, %v7599_v35  ;;  %v1120_v34 = vpop.permute.xlu0 %1119  ;;  %5847 = vmatpush3.bf16.msra.mxu1 %v6198_v11  ;;  %v7656_v11 = vrot.slane %v1259_v30, 2  ;;  %v1832_v19 = vshll.u32 %v7624_v50, 16 }
  0xf6   : > { %1195 = vrot.lane.b32.xlu1 %v1180_v36, %s6326_s5  ;;  %4676 = vmatprep.mubr.bf16.mxu1 %v2144_v60  ;;  %v2078_v57 = vsel %vm2074_vm9, %v7227_v4, %v1120_v34  ;;  %v1829_v4 = vshrl.u32 %v7624_v50, 16  ;;  %v7654_v36 = vrot.slane %v1256_v22, 1  ;;  %v1591_v31 = vor.u32 %v1590_v47, %v1586_v43  ;;  %v7670_v22 = vld [vmem:[%s6387_s24 + $0x38] ss:$0 sps:$4 sm:$0x33]  }
  0xf7   : > { %5848 = vmatprep.subr.bf16.mxu1 %v6201_v37  ;;  %v7663_v37 = vrot.slane %v1267_v10, 2  ;;  %v1826_v34 = vrot.slane %v1824_v15, 2  ;;  %v1834_v27 = vrot.slane %v1832_v19, 2  ;;  %v7697_v47 = vld [vmem:[%s6387_s24 + $0x38] ss:$0 sps:$4 sm:$0x11]  }
  0xf8   : > { %v1600_v20 = vpop.permute.xlu1 %1599  ;;  %2820 = vrot.lane.b32.xlu0 %v2770_v39, %s6324_s25  ;;  %v1899_v39 = vrot.slane %v7624_v50, 2  ;;  %v1831_v45 = vrot.slane %v1829_v4, 1  ;;  %v6209_v50 = vld [vmem:[%s9060_s1 + $0x1c0] sm:$0xff]   ;;  %v1659_v4 = vrot.slane %v7611_v63, 1  ;;  %v5278_v19 = vld [vmem:[%s6387_s24 + $0x7c] sm:$0xf] }
  0xf9   : > { %v1184_v61 = vpop.permute.xlu0 %1183  ;;  %5849 = vmatpush3.bf16.msra.mxu1 %v6202_v56  ;;  %v7681_v56 = vld [vmem:[%s6387_s24 + $0x40] sm:$0xf] }
  0xfa   : > { %2502 = vrot.lane.b32.xlu1 %v2477_v46, %s6320_s29  ;;  %v7644_v46 = vld [vmem:[%s6387_s24 + $0x34] sm:$0xf]  ;;  %v2096_v6 = vsel %vm2091_vm10, %v2078_v57, %v1184_v61  ;;  %5850 = vmatprep.subr.bf16.mxu1 %v6203_v54  ;;  %v5288_v54 = vld [vmem:[%s6387_s24 + $0x30] sm:$0xe]  ;;  %v1596_v61 = vsel %vm521_vm1, %v1591_v31, %v1595_v49 }
  0xfb   : > { %v7647_v38 = vcombine.low %v5304_v51, %v7644_v46  ;;  %4677 = vmatmul.mubr.bf16.gmra.mxu1 %v2096_v6  ;;  %v1823_v51 = vrot.slane %v1821_v9, 1  ;;  %v2167_v9 = vsel %vm2015_vm4, %v7599_v35, %v1600_v20  ;;  %v2585_v6 = vshll.u32 %v7670_v22, 16 }
  0xfc   : > { %v1904_v13 = vpop.permute.xlu1 %1903  ;;  %2420 = vrot.lane.b32.xlu0 %v2319_v24, %s6321_s7  ;;  %v1262_v24 = vor.u32 %v7656_v11, %v7654_v36  ;;  %v1270_v35 = vor.u32 %v7663_v37, %v7661_v5  ;;  %v1658_v20 = vrot.slane %v7596_v28, 1  ;;  %v1835_v11 = vor.u32 %v1834_v27, %v1831_v45 }
  0xfd   : > { %v1840_v60 = vpop.permute.xlu0 %1839  ;;  %5851 = vmatpush3.bf16.msra.mxu1 %v6205_v8  ;;  %v2577_v43 = vshll.u32 %v7647_v38, 16  ;;  %v2582_v8 = vshrl.u32 %v7670_v22, 16  ;;  %v1827_v36 = vor.u32 %v1826_v34, %v1823_v51  ;;  %v7716_v5 = vcombine.low %v5315_v16, %v7681_v56 }
  0xfe   : > { %2876 = vrot.lane.b32.xlu1 %v7534_v52, %s6323_s21  ;;  %v2223_v52 = vsel %vm2074_vm9, %v1840_v60, %v1904_v13  ;;  %5852 = vmatprep.subr.bf16.mxu1 %v6206_v55  ;;  %v7719_v28 = vcombine.low %v5337_v25, %v7510_v18  ;;  %v7722_v63 = vcombine.low %v5288_v54, %v7644_v46  ;;  %v2587_v31 = vrot.slane %v2585_v6, 2  ;;  %v7746_v25 = vld [vmem:[%s6387_s24 + $0x38] ss:$0 sps:$4 sm:$0x11]  }
  0xff   : > { %v2579_v55 = vrot.slane %v2577_v43, 2  ;;  %v1900_v37 = vsel %vm900_vm3, %v1898_v29, %v1899_v39  ;;  %v7728_v51 = vcombine.low %v5277_v33, %v5278_v19  ;;  %v1660_v34 = vsel %vm658_vm0, %v1658_v20, %v1659_v4  ;;  %v6253_v29 = vld [vmem:[%s6387_s24 + $0x38] ss:$0 sps:$4 sm:$0x33]  }
 0x100   : > { %v1960_v30 = vpop.permute.xlu1 %1959  ;;  %2694 = vrot.lane.b32.xlu0 %v7491_v17, %s6322_s11  ;;  %v2574_v17 = vshrl.u32 %v7647_v38, 16  ;;  %v6211_v38 = vld [vmem:[%s9060_s1 + $0x180] sm:$0xff]   ;;  %v1273_v45 = vshrl.u32 %v6968_v12, 16  ;;  %v1836_v46 = vsel %vm723_vm2, %v1827_v36, %v1835_v11  ;;  %v1276_v39 = vshll.u32 %v6968_v12, 16  ;;  %v6204_v36 = vld [vmem:[%s9060_s1 + $0x238] sm:$0xff]  }
 0x101   : > { %v2240_v10 = vsel %vm2091_vm10, %v2223_v52, %v1960_v30  ;;  %v1664_v57 = vpop.permute.xlu0 %1663  ;;  %5853 = vmatpush3.bf16.msra.mxu1 %v6208_v32  ;;  %v1271_v52 = vsel %vm723_vm2, %v1262_v24, %v1270_v35  ;;  %9068 = vst [vmem:[#allocation3_spill] sm:$0xff] %v7728_v51  ;;  %v1281_v32 = vshrl.u32 %v6253_v29, 16  ;;  %v2935_v54 = vshll.u32 %v7719_v28, 16 }
 0x102   : > { %2422 = vrot.lane.b32.xlu1 %v2320_v48, %s6321_s7  ;;  %4773 = vmatprep.mubr.bf16.mxu0 %v2240_v10  ;;  %v2183_v13 = vsel %vm2032_vm6, %v2167_v9, %v1664_v57  ;;  %v2576_v49 = vrot.slane %v2574_v17, 1  ;;  %v1284_v10 = vshll.u32 %v6253_v29, 16  ;;  %v2325_v9 = vshll.u32 %v7722_v63, 16 }
 0x103   : > { %5854 = vmatprep.subr.bf16.mxu1 %v6209_v50  ;;  %v2200_v48 = vsel %vm2049_vm7, %v2183_v13, %v1840_v60  ;;  %v7725_v60 = vrot.slane %v2582_v8, 1  ;;  %v2772_v50 = vshrl.u32 %v7716_v5, 16  ;;  %v2480_v33 = vrot.slane %v7670_v22, 1 }
 0x104   : > { %v1122_v15 = vpop.permute.xlu1 %1121  ;;  %2822 = vrot.lane.b32.xlu0 %v7577_v7, %s6324_s25  ;;  %4774 = vmatmul.mubr.bf16.gmra.mxu0 %v2200_v48  ;;  %v2580_v16 = vor.u32 %v2579_v55, %v2576_v49  ;;  %v1275_v8 = vrot.slane %v1273_v45, 1  ;;  %v1278_v6 = vrot.slane %v1276_v39, 2  ;;  %v1286_v13 = vrot.slane %v1284_v10, 2 }
 0x105   : > { %v1410_v7 = vpop.permute.xlu0 %1409  ;;  %5855 = vmatpush3.bf16.msra.mxu1 %v6211_v38  ;;  %v2080_v27 = vsel %vm2074_vm9, %v7414_v2, %v1122_v15  ;;  %v2588_v12 = vor.u32 %v2587_v31, %v7725_v60  ;;  %v1283_v38 = vrot.slane %v1281_v32, 1  ;;  %v2775_v15 = vshll.u32 %v7716_v5, 16 }
 0x106   : > { %1611 = vrot.lane.b32.xlu1 %v1596_v61, %s6322_s11  ;;  %v2124_v24 = vsel %vm1973_vm5, %v1271_v52, %v1410_v7  ;;  %v2479_v61 = vrot.slane %v7722_v63, 1  ;;  %v7758_v35 = vrot.slane %v2772_v50, 7  ;;  %v2933_v20 = vshrl.u32 %v7719_v28, 16  ;;  %v5305_v50 = vld [vmem:[%s6387_s24 + $0x3c] sm:$0xc] }
 0x107   : > { %v2937_v4 = vrot.slane %v2935_v54, 1  ;;  %v2940_v48 = vshll.u32 %v7697_v47, 16  ;;  %v2589_v19 = vsel %vm723_vm2, %v2580_v16, %v2588_v12  ;;  %v2323_v49 = vshrl.u32 %v7722_v63, 16 }
 0x108   : > { %v1186_v30 = vpop.permute.xlu1 %1185  ;;  %2878 = vrot.lane.b32.xlu0 %v7697_v47, %s6323_s21  ;;  %v2327_v55 = vrot.slane %v2325_v9, 1  ;;  %v2330_v7 = vshll.u32 %v7746_v25, 16  ;;  %v1279_v31 = vor.u32 %v1278_v6, %v1275_v8  ;;  %v1287_v52 = vor.u32 %v1286_v13, %v1283_v38  ;;  %v6210_v6 = vld [vmem:[%s9060_s1 + $0x228] sm:$0xff]   ;;  %v6254_v38 = vld [vmem:[%s6387_s24 + $0x40] sm:$0xf] }
 0x109   : > { %v1466_v17 = vpop.permute.xlu0 %1465  ;;  %v2099_v43 = vsel %vm2091_vm10, %v2080_v27, %v1186_v30  ;;  %v7770_v30 = vld [vmem:[%s6387_s24 + $0x38] ss:$0 sps:$4 sm:$0x33]   ;;  %v6327_v45 = vmov 0   ;;  %v2481_v63 = vsel %vm658_vm0, %v2479_v61, %v2480_v33  ;;  %v2938_v39 = vor.u32 %v2937_v4, %v2933_v20  ;;  %v5289_v4 = vld [vmem:[%s6387_s24 + $0x3c] sm:$0xe] }
 0x10a   : > { %1915 = vrot.lane.b32.xlu1 %v1900_v37, %s6325_s4  ;;  %v2147_v2 = vsel %vm1990_vm8, %v2124_v24, %v1466_v17  ;;  %4927 = vmatprep.subr.bf16.mxu0 %v6327_v45  ;;  %v2942_v29 = vrot.slane %v2940_v48, 1  ;;  %v2328_v10 = vor.u32 %v2327_v55, %v2323_v49  ;;  %v2332_v27 = vrot.slane %v2330_v7, 1 }
 0x10b   : > { %4684 = vmatprep.mubr.bf16.mxu1 %v2147_v2  ;;  %4928 = vmatpush1.bf16.msra.mxu0 %v6204_v36  ;;  %v1288_v24 = vsel %vm723_vm2, %v1279_v31, %v1287_v52  ;;  %v3100_v9 = vrot.slane %v7719_v28, 1  ;;  %v3101_v2 = vrot.slane %v7770_v30, 1  ;;  %v5515_v13 = vcombine.low %v5305_v50, %v6254_v38  ;;  %v5317_v50 = vld [vmem:[%s6387_s24 + $0x48] sm:$0xf] }
 0x10c   : > { %v7750_v57 = vpop.permute.xlu1 %1841  ;;  %1851 = vrot.lane.b32.xlu0 %v1836_v46, %s6323_s21  ;;  %4685 = vmatmul.mubr.bf16.gmra.mxu1 %v2099_v43  ;;  %v2777_v46 = vor.u32 %v2775_v15, %v7758_v35  ;;  %v2943_v12 = vsel %vm521_vm1, %v2938_v39, %v2942_v29  ;;  %v2333_v8 = vsel %vm521_vm1, %v2328_v10, %v2332_v27  ;;  %v1290_v55 = vshrl.u32 %v7054_v1, 16 }
 0x10d   : > { %v1602_v11 = vpop.permute.xlu0 %1601  ;;  %4929 = vmatprep.subr.bf16.mxu0 %v6327_v45  ;;  %v3102_v49 = vsel %vm658_vm0, %v3100_v9, %v3101_v2  ;;  %v2591_v39 = vshrl.u32 %v5515_v13, 16  ;;  %v2594_v29 = vshll.u32 %v5515_v13, 16  ;;  %v7830_v10 = vcombine.low %v5289_v4, %v6254_v38 }
 0x10e   : > { %1971 = vrot.lane.b32.xlu1 %v7728_v51, %s6326_s5  ;;  %v2169_v54 = vsel %vm2015_vm4, %v1466_v17, %v1602_v11  ;;  %v7810_v11 = vld [vmem:[%s6387_s24 + $0x44] ss:$0 sps:$4 sm:$0x33]   ;;  %v2944_v27 = vshrl.u32 %v7697_v47, 16  ;;  %v6215_v47 = vld [vmem:[%s9060_s1 + $0x218] sm:$0xff]   ;;  %v3192_v22 = vshll.u32 %v7770_v30, 16 }
 0x110   : > { %v1666_v37 = vpop.permute.xlu1 %1665  ;;  %1675 = vrot.lane.b32.xlu0 %v1660_v34, %s6324_s25  ;;  %v6207_v34 = vld [vmem:[%s9060_s1 + $0x230] sm:$0xff]  }
 0x111   : > { %v1906_v32 = vpop.permute.xlu0 %1905  ;;  %v2185_v43 = vsel %vm2032_vm6, %v2169_v54, %v1666_v37  ;;  %4930 = vmatpush1.bf16.msra.mxu0 %v6207_v34  ;;  %v1293_v37 = vshll.u32 %v7054_v1, 16  ;;  %v2599_v1 = vshrl.u32 %v7810_v11, 16  ;;  %v7839_v54 = vld [vmem:[%s6387_s24 + $0x4c] sm:$0xf] }
 0x112   : > { %2696 = vrot.lane.b32.xlu1 %v2589_v19, %s6322_s11  ;;  %v2225_v17 = vsel %vm2074_vm9, %v7750_v57, %v1906_v32  ;;  %4931 = vmatprep.subr.bf16.mxu0 %v6327_v45  ;;  %v2203_v48 = vsel %vm2049_vm7, %v2185_v43, %v7750_v57  ;;  %v5353_v19 = vld [vmem:[%s6387_s24 + $0x30] sm:$0xc]  ;;  %v6255_v57 = vld [vmem:[%s6387_s24 + $0x44] ss:$0 sps:$4 sm:$0x33]   ;;  %v2602_v32 = vshll.u32 %v7810_v11, 16 }
 0x113   : > { %v1298_v31 = vshrl.u32 %v6255_v57, 16  ;;  %v1301_v52 = vshll.u32 %v6255_v57, 16  ;;  %v5553_v34 = vcombine.low %v5353_v19, %v7510_v18  ;;  %v7843_v43 = vrot.slane %v1293_v37, 2  ;;  %v7879_v57 = vld [vmem:[%s6387_s24 + $0x44] ss:$0 sps:$4 sm:$0x11]  }
 0x114   : > { %v1412_v16 = vpop.permute.xlu1 %1411  ;;  %2504 = vrot.lane.b32.xlu0 %v2481_v63, %s6320_s29  ;;  %v6213_v63 = vld [vmem:[%s9060_s1 + $0x220] sm:$0xff]   ;;  %v7859_v38 = vrot.slane %v2599_v1, 1  ;;  %v2604_v13 = vrot.slane %v2602_v32, 2  ;;  %v2482_v32 = vrot.slane %v7830_v10, 1 }
 0x115   : > { %v1962_v61 = vpop.permute.xlu0 %1961  ;;  %v2127_v28 = vsel %vm1973_vm5, %v1288_v24, %v1412_v16  ;;  %4932 = vmatpush1.bf16.msra.mxu0 %v6210_v6  ;;  %v7835_v16 = vrot.slane %v1290_v55, 1  ;;  %v7847_v9 = vrot.slane %v1301_v52, 2  ;;  %v2593_v6 = vrot.slane %v2591_v39, 1  ;;  %v6219_v55 = vld [vmem:[%s9060_s1 + $0x210] sm:$0xff]  }
 0x116   : > { %2824 = vrot.lane.b32.xlu1 %v2777_v46, %s6324_s25  ;;  %v2243_v15 = vsel %vm2091_vm10, %v2225_v17, %v1962_v61  ;;  %4933 = vmatprep.subr.bf16.mxu0 %v6327_v45  ;;  %v5338_v17 = vld [vmem:[%s6387_s24 + $0x3c] sm:$0xe]  ;;  %v3194_v39 = vrot.slane %v3192_v22, 2  ;;  %v2605_v1 = vor.u32 %v2604_v13, %v7859_v38 }
 0x117   : > { %4781 = vmatprep.mubr.bf16.mxu0 %v2243_v15  ;;  %v3181_v15 = vshrl.u32 %v5553_v34, 16  ;;  %v7866_v4 = vcombine.low %v5338_v17, %v7681_v56  ;;  %v1296_v19 = vor.u32 %v7843_v43, %v7835_v16  ;;  %v2483_v43 = vrot.slane %v7810_v11, 1 }
 0x118   : > { %v7801_v20 = vpop.permute.xlu1 %1467  ;;  %3044 = vrot.lane.b32.xlu0 %v2943_v12, %s6325_s4  ;;  %4782 = vmatmul.mubr.bf16.gmra.mxu0 %v2203_v48  ;;  %v7845_v12 = vrot.slane %v1298_v31, 1  ;;  %v3184_v48 = vshll.u32 %v5553_v34, 16  ;;  %v7882_v31 = vld [vmem:[%s6387_s24 + $0x44] ss:$0 sps:$4 sm:$0x11]  }
 0x119   : > { %v2150_v36 = vsel %vm1990_vm8, %v2127_v28, %v7801_v20  ;;  %v1124_v7 = vpop.permute.xlu0 %1123  ;;  %4934 = vmatpush1.bf16.msra.mxu0 %v6213_v63  ;;  %v7862_v28 = vcombine.low %v5317_v50, %v7839_v54  ;;  %v2949_v16 = vshll.u32 %v7866_v4, 16 }
 0x11a   : > { %2424 = vrot.lane.b32.xlu1 %v2333_v8, %s6321_s7  ;;  %4692 = vmatprep.mubr.bf16.mxu1 %v2150_v36  ;;  %v2082_v18 = vsel %vm2074_vm9, %v7455_v40, %v1124_v7  ;;  %v2334_v8 = vshrl.u32 %v7746_v25, 16  ;;  %v2596_v40 = vrot.slane %v2594_v29, 2  ;;  %v3189_v36 = vshrl.u32 %v7770_v30, 16  ;;  %v6222_v30 = vld [vmem:[%s9060_s1 + $0x208] sm:$0xff]  }
 0x11b   : > { %4935 = vmatprep.subr.bf16.mxu0 %v6327_v45  ;;  %v3183_v7 = vrot.slane %v3181_v15, 1  ;;  %v3186_v52 = vrot.slane %v3184_v48, 2  ;;  %v2947_v15 = vshrl.u32 %v7866_v4, 16  ;;  %v2951_v48 = vrot.slane %v2949_v16, 1 }
 0x11c   : > { %v7823_v46 = vpop.permute.xlu1 %1603  ;;  %3124 = vrot.lane.b32.xlu0 %v3102_v49, %s6326_s5  ;;  %v1304_v49 = vor.u32 %v7847_v9, %v7845_v12  ;;  %v3191_v63 = vrot.slane %v3189_v36, 1  ;;  %v2597_v34 = vor.u32 %v2596_v40, %v2593_v6  ;;  %v2339_v12 = vshll.u32 %v7830_v10, 16 }
 0x11d   : > { %v1188_v24 = vpop.permute.xlu0 %1187  ;;  %4936 = vmatpush1.bf16.msra.mxu0 %v6215_v47  ;;  %v3187_v50 = vor.u32 %v3186_v52, %v3183_v7  ;;  %v2782_v47 = vshll.u32 %v7862_v28, 16  ;;  %v2344_v36 = vshll.u32 %v7882_v31, 16  ;;  %v2952_v16 = vor.u32 %v2951_v48, %v2947_v15  ;;  %v6225_v15 = vld [vmem:[%s9060_s1 + $0x248] sm:$0xff]  }
 0x11e   : > { %2698 = vrot.lane.b32.xlu1 %v7725_v60, %s6322_s11  ;;  %v2102_v60 = vsel %vm2091_vm10, %v2082_v18, %v1188_v24  ;;  %4937 = vmatprep.subr.bf16.mxu0 %v6327_v45  ;;  %v3195_v18 = vor.u32 %v3194_v39, %v3191_v63 }
 0x11f   : > { %4693 = vmatmul.mubr.bf16.gmra.mxu1 %v2102_v60  ;;  %v2954_v60 = vshll.u32 %v7879_v57, 16 }
 0x120   : > { %v1908_v61 = vpop.permute.xlu1 %1907  ;;  %2506 = vrot.lane.b32.xlu0 %v2480_v33, %s6320_s29 }
 0x121   : > { %v1844_v33 = vpop.permute.xlu0 %1843  ;;  %4938 = vmatpush1.bf16.msra.mxu0 %v6219_v55  ;;  %v6223_v55 = vld [vmem:[%s9060_s1 + $0x200] sm:$0xff]   ;;  %v2956_v39 = vrot.slane %v2954_v60, 1 }
 0x122   : > { %3046 = vrot.lane.b32.xlu1 %v2944_v27, %s6325_s4  ;;  %v2227_v56 = vsel %vm2074_vm9, %v1844_v33, %v1908_v61  ;;  %v2779_v27 = vshrl.u32 %v7862_v28, 16  ;;  %4939 = vmatprep.subr.bf16.mxu0 %v6327_v45  ;;  %v2606_v61 = vsel %vm723_vm2, %v2597_v34, %v2605_v1  ;;  %v6256_v34 = vld [vmem:[%s6387_s24 + $0x50] ss:$0 sps:$4 sm:$0x33]  }
 0x123   : > { %v1315_v1 = vshrl.u32 %v6256_v34, 16  ;;  %v2957_v60 = vsel %vm521_vm1, %v2952_v16, %v2956_v39  ;;  %v5339_v16 = vld [vmem:[%s6387_s24 + $0x48] sm:$0xe] }
 0x124   : > { %v1964_v37 = vpop.permute.xlu1 %1963  ;;  %2880 = vrot.lane.b32.xlu0 %v7716_v5, %s6323_s21  ;;  %v2171_v5 = vsel %vm2015_vm4, %v7801_v20, %v7823_v46  ;;  %v3196_v20 = vsel %vm723_vm2, %v3187_v50, %v3195_v18  ;;  %v7914_v13 = vrot.slane %v2779_v27, 7  ;;  %v2346_v50 = vrot.slane %v2344_v36, 1  ;;  %v7938_v18 = vld [vmem:[%s6387_s24 + $0x44] ss:$0 sps:$4 sm:$0x33]  }
 0x125   : > { %v2246_v29 = vsel %vm2091_vm10, %v2227_v56, %v1964_v37  ;;  %v1668_v24 = vpop.permute.xlu0 %1667  ;;  %v3579_v6 = vshrl.u32 %v3196_v20, 16  ;;  %v3581_v40 = vshll.u32 %v3196_v20, 16  ;;  %4940 = vmatpush1.bf16.msra.mxu0 %v6222_v30  ;;  %v1305_v37 = vsel %vm723_vm2, %v1296_v19, %v1304_v49 }
 0x126   : > { %3126 = vrot.lane.b32.xlu1 %v3101_v2, %s6326_s5  ;;  %4789 = vmatprep.mubr.bf16.mxu0 %v2246_v29  ;;  %v3586_v2 = vshll.u32 %v3191_v63, 16  ;;  %v2187_v9 = vsel %vm2032_vm6, %v2171_v5, %v1668_v24  ;;  %v2484_v63 = vsel %vm658_vm0, %v2482_v32, %v2483_v43  ;;  %v1307_v29 = vshrl.u32 %v7233_v53, 16  ;;  %v6224_v24 = vld [vmem:[%s9060_s1 + $0x250] sm:$0xff]  }
 0x127   : > { %v2206_v46 = vsel %vm2049_vm7, %v2187_v9, %v1844_v33  ;;  %v2341_v33 = vrot.slane %v2339_v12, 1  ;;  %v3583_v7 = vrot.slane %v3581_v40, 1  ;;  %4941 = vmatprep.subr.bf16.mxu0 %v6327_v45  ;;  %v1318_v19 = vshll.u32 %v6256_v34, 16  ;;  %v5319_v34 = vld [vmem:[%s6387_s24 + $0x54] sm:$0xf] }
 0x128   : > { %v1126_v17 = vpop.permute.xlu1 %1125  ;;  %2826 = vrot.lane.b32.xlu0 %v7758_v35, %s6324_s25  ;;  %4790 = vmatmul.mubr.bf16.gmra.mxu0 %v2206_v46  ;;  %v2337_v35 = vshrl.u32 %v7830_v10, 16  ;;  %v3588_v56 = vrot.slane %v3586_v2, 1  ;;  %v1310_v10 = vshll.u32 %v7233_v53, 16  ;;  %v2784_v32 = vor.u32 %v2782_v47, %v7914_v13 }
 0x129   : > { %v1414_v22 = vpop.permute.xlu0 %1413  ;;  %v3584_v49 = vor.u32 %v3583_v7, %v3579_v6  ;;  %v2084_v27 = vsel %vm2074_vm9, %v7072_v59, %v1126_v17  ;;  %4942 = vmatpush1.bf16.msra.mxu0 %v6223_v55  ;;  %v1309_v2 = vrot.slane %v1307_v29, 1  ;;  %v1317_v17 = vrot.slane %v1315_v1, 1  ;;  %v7966_v7 = vld [vmem:[%s6387_s24 + $0x50] ss:$0 sps:$4 sm:$0x33]  }
 0x12a   : > { %2882 = vrot.lane.b32.xlu1 %v7879_v57, %s6323_s21  ;;  %v2130_v25 = vsel %vm1973_vm5, %v1305_v37, %v1414_v22  ;;  %v2342_v5 = vor.u32 %v2341_v33, %v2337_v35  ;;  %4953 = vmatprep.subr.bf16.mxu0 %v6327_v45  ;;  %v1312_v9 = vrot.slane %v1310_v10, 2  ;;  %v1320_v47 = vrot.slane %v1318_v19, 2  ;;  %v7981_v1 = vld [vmem:[%s6387_s24 + $0x58] sm:$0xf] }
 0x12b   : > { %v7946_v59 = vsel %vm521_vm1, %v3584_v49, %v3588_v56  ;;  %v3103_v20 = vrot.slane %v7866_v4, 1  ;;  %v3104_v46 = vrot.slane %v7938_v18, 1  ;;  %v6257_v4 = vld [vmem:[%s6387_s24 + $0x4c] sm:$0xf]  ;;  %v6227_v56 = vld [vmem:[%s9060_s1 + $0x240] sm:$0xff]   ;;  %v2958_v29 = vshrl.u32 %v7879_v57, 16 }
 0x12c   : > { %v1190_v52 = vpop.permute.xlu1 %1189  ;;  %2426 = vrot.lane.b32.xlu0 %v2334_v8, %s6321_s7  ;;  %v2347_v40 = vsel %vm521_vm1, %v2342_v5, %v2346_v50  ;;  %v1313_v36 = vor.u32 %v1312_v9, %v1309_v2  ;;  %v1321_v22 = vor.u32 %v1320_v47, %v1317_v17  ;;  %v8000_v5 = vcombine.low %v5319_v34, %v7981_v1 }
 0x12d   : > { %v2105_v53 = vsel %vm2091_vm10, %v2084_v27, %v1190_v52  ;;  %4954 = vmatpush2.bf16.msra.mxu0 %v6224_v24  ;;  %v3105_v33 = vsel %vm658_vm0, %v3103_v20, %v3104_v46  ;;  %v2616_v27 = vshrl.u32 %v7966_v7, 16  ;;  %v8003_v24 = vcombine.low %v5339_v16, %v7839_v54  ;;  %v8012_v54 = vld [vmem:[%s6387_s24 + $0x50] ss:$0 sps:$4 sm:$0x11]  }
 0x12e   : > { %2700 = vrot.lane.b32.xlu1 %v2606_v61, %s6322_s11  ;;  %v1470_v8 = vpop.permute.xlu0 %1469  ;;  %v5306_v61 = vld [vmem:[%s6387_s24 + $0x48] sm:$0xc]  ;;  %4955 = vmatprep.subr.bf16.mxu0 %v6327_v45  ;;  %v1324_v47 = vshrl.u32 %v7285_v23, 16  ;;  %v2786_v20 = vshrl.u32 %v8000_v5, 16 }
 0x12f   : > { %v2153_v12 = vsel %vm1990_vm8, %v2130_v25, %v1470_v8  ;;  %v5516_v35 = vcombine.low %v5306_v61, %v6257_v4  ;;  %v2963_v61 = vshll.u32 %v8003_v24, 16 }
 0x130   : > { %v1846_v30 = vpop.permute.xlu1 %1845  ;;  %2508 = vrot.lane.b32.xlu0 %v2484_v63, %s6320_s29  ;;  %4700 = vmatprep.mubr.bf16.mxu1 %v2153_v12  ;;  %v1322_v63 = vsel %vm723_vm2, %v1313_v36, %v1321_v22 }
 0x131   : > { %4701 = vmatmul.mubr.bf16.gmra.mxu1 %v2105_v53  ;;  %4956 = vmatpush2.bf16.msra.mxu0 %v6225_v15  ;;  %v2608_v10 = vshrl.u32 %v5516_v35, 16  ;;  %v2611_v49 = vshll.u32 %v5516_v35, 16  ;;  %v5290_v53 = vld [vmem:[%s6387_s24 + $0x48] sm:$0xe] }
 0x132   : > { %2828 = vrot.lane.b32.xlu1 %v2784_v32, %s6324_s25  ;;  %v1606_v6 = vpop.permute.xlu0 %1605  ;;  %4957 = vmatprep.subr.bf16.mxu0 %v6327_v45  ;;  %v2619_v32 = vshll.u32 %v7966_v7, 16  ;;  %v5500_v17 = vcombine.low %v5290_v53, %v6257_v4  ;;  %v1327_v4 = vshll.u32 %v7285_v23, 16  ;;  %v2961_v23 = vshrl.u32 %v8003_v24, 16 }
 0x133   : > { %v2173_v52 = vsel %vm2015_vm4, %v1470_v8, %v1606_v6  ;;  %v2610_v11 = vrot.slane %v2608_v10, 1 }
 0x134   : > { %v1670_v48 = vpop.permute.xlu1 %1669  ;;  %3048 = vrot.lane.b32.xlu0 %v2957_v60, %s6325_s4  ;;  %v2621_v2 = vrot.slane %v2619_v32, 2  ;;  %v2348_v60 = vshrl.u32 %v7882_v31, 16  ;;  %v2353_v36 = vshll.u32 %v5500_v17, 16  ;;  %v6258_v31 = vld [vmem:[%s6387_s24 + $0x5c] ss:$0 sps:$4 sm:$0x33]  }
 0x135   : > { %v2189_v39 = vsel %vm2032_vm6, %v2173_v52, %v1670_v48  ;;  %4958 = vmatpush2.bf16.msra.mxu0 %v6227_v56  ;;  %v8021_v48 = vld [vmem:[%s6387_s24 + $0x50] ss:$0 sps:$4 sm:$0x11]   ;;  %v1332_v35 = vshrl.u32 %v6258_v31, 16  ;;  %v1326_v56 = vrot.slane %v1324_v47, 1  ;;  %v8032_v52 = vrot.slane %v2786_v20, 7 }
 0x136   : > { %2428 = vrot.lane.b32.xlu1 %v2347_v40, %s6321_s7  ;;  %v1910_v55 = vpop.permute.xlu0 %1909  ;;  %v2209_v25 = vsel %vm2049_vm7, %v2189_v39, %v1846_v30  ;;  %v2968_v39 = vshll.u32 %v8012_v54, 16  ;;  %v2351_v10 = vshrl.u32 %v5500_v17, 16  ;;  %v2355_v34 = vrot.slane %v2353_v36, 1  ;;  %v5307_v36 = vld [vmem:[%s6387_s24 + $0x54] sm:$0xc] }
 0x137   : > { %v2229_v45 = vsel %vm2074_vm9, %v1846_v30, %v1910_v55  ;;  %v8005_v30 = vrot.slane %v2616_v27, 1  ;;  %v2486_v55 = vrot.slane %v7966_v7, 1  ;;  %v1329_v27 = vrot.slane %v1327_v4, 2 }
 0x138   : > { %v1416_v37 = vpop.permute.xlu1 %1415  ;;  %3128 = vrot.lane.b32.xlu0 %v3105_v33, %s6326_s5  ;;  %v1335_v33 = vshll.u32 %v6258_v31, 16  ;;  %v1334_v32 = vrot.slane %v1332_v35, 1  ;;  %v2970_v53 = vrot.slane %v2968_v39, 1  ;;  %v6259_v31 = vld [vmem:[%s6387_s24 + $0x58] sm:$0xf]  ;;  %v1344_v39 = vshll.u32 %v7542_v21, 16 }
 0x139   : > { %v2133_v50 = vsel %vm1973_vm5, %v1322_v63, %v1416_v37  ;;  %v2789_v37 = vshll.u32 %v8000_v5, 16  ;;  %v2965_v63 = vrot.slane %v2963_v61, 1  ;;  %v1330_v20 = vor.u32 %v1329_v27, %v1326_v56 }
 0x13a   : > { %2702 = vrot.lane.b32.xlu1 %v7859_v38, %s6322_s11  ;;  %v1966_v19 = vpop.permute.xlu0 %1965  ;;  %v1337_v16 = vrot.slane %v1335_v33, 2  ;;  %v5517_v35 = vcombine.low %v5307_v36, %v6259_v31 }
 0x13b   : > { %v2249_v38 = vsel %vm2091_vm10, %v2229_v45, %v1966_v19  ;;  %v2358_v45 = vshll.u32 %v8021_v48, 16 }
 0x13c   : > { %v7989_v57 = vpop.permute.xlu1 %1471  ;;  %2510 = vrot.lane.b32.xlu0 %v2483_v43, %s6320_s29  ;;  %4797 = vmatprep.mubr.bf16.mxu0 %v2249_v38  ;;  %v2613_v43 = vrot.slane %v2611_v49, 2  ;;  %v1338_v61 = vor.u32 %v1337_v16, %v1334_v32  ;;  %v2625_v27 = vshrl.u32 %v5517_v35, 16  ;;  %v2628_v32 = vshll.u32 %v5517_v35, 16 }
 0x13d   : > { %v2156_v8 = vsel %vm1990_vm8, %v2133_v50, %v7989_v57  ;;  %4798 = vmatmul.mubr.bf16.gmra.mxu0 %v2209_v25  ;;  %v2791_v25 = vor.u32 %v2789_v37, %v8032_v52  ;;  %v8070_v37 = vld [vmem:[%s6387_s24 + $0x5c] ss:$0 sps:$4 sm:$0x33]  }
 0x13e   : > { %3050 = vrot.lane.b32.xlu1 %v2958_v29, %s6325_s4  ;;  %v1128_v12 = vpop.permute.xlu0 %1127  ;;  %4708 = vmatprep.mubr.bf16.mxu1 %v2156_v8  ;;  %v2614_v15 = vor.u32 %v2613_v43, %v2610_v11  ;;  %v2966_v8 = vor.u32 %v2965_v63, %v2961_v23  ;;  %v2633_v16 = vshrl.u32 %v8070_v37, 16 }
 0x13f   : > { %v2086_v6 = vsel %vm2074_vm9, %v7155_v0, %v1128_v12  ;;  %v2485_v0 = vrot.slane %v5500_v17, 1  ;;  %v8047_v12 = vld [vmem:[%s6387_s24 + $0x50] ss:$0 sps:$4 sm:$0x33]   ;;  %v2360_v17 = vrot.slane %v2358_v45, 1 }
 0x140   : > { %v1608_v9 = vpop.permute.xlu1 %1607  ;;  %2884 = vrot.lane.b32.xlu0 %v7862_v28, %s6323_s21  ;;  %v2622_v28 = vor.u32 %v2621_v2, %v8005_v30  ;;  %v2356_v2 = vor.u32 %v2355_v34, %v2351_v10  ;;  %v2972_v34 = vshrl.u32 %v8012_v54, 16  ;;  %v5321_v45 = vld [vmem:[%s6387_s24 + $0x60] sm:$0xf] }
 0x141   : > { %v2487_v38 = vsel %vm658_vm0, %v2485_v0, %v2486_v55  ;;  %v2175_v11 = vsel %vm2015_vm4, %v7989_v57, %v1608_v9  ;;  %v3106_v57 = vrot.slane %v8003_v24, 1  ;;  %v3107_v9 = vrot.slane %v8047_v12, 1 }
 0x142   : > { %3130 = vrot.lane.b32.xlu1 %v3104_v46, %s6326_s5  ;;  %v1192_v40 = vpop.permute.xlu0 %1191 }
 0x143   : > { %v2108_v46 = vsel %vm2091_vm10, %v2086_v6, %v1192_v40  ;;  %v2971_v40 = vsel %vm521_vm1, %v2966_v8, %v2970_v53  ;;  %v3108_v24 = vsel %vm658_vm0, %v3106_v57, %v3107_v9  ;;  %v1346_v8 = vrot.slane %v1344_v39, 2 }
 0x144   : > { %v1912_v22 = vpop.permute.xlu1 %1911  ;;  %2830 = vrot.lane.b32.xlu0 %v7914_v13, %s6324_s25  ;;  %4709 = vmatmul.mubr.bf16.gmra.mxu1 %v2108_v46  ;;  %v2623_v13 = vsel %vm723_vm2, %v2614_v15, %v2622_v28  ;;  %v2361_v28 = vsel %vm521_vm1, %v2356_v2, %v2360_v17  ;;  %v1339_v46 = vsel %vm723_vm2, %v1330_v20, %v1338_v61  ;;  %v2627_v17 = vrot.slane %v2625_v27, 1 }
 0x146   : > { %2886 = vrot.lane.b32.xlu1 %v8012_v54, %s6323_s21  ;;  %v1848_v29 = vpop.permute.xlu0 %1847 }
 0x147   : > { %v2231_v19 = vsel %vm2074_vm9, %v1848_v29, %v1912_v22 }
 0x148   : > { %v1968_v49 = vpop.permute.xlu1 %1967  ;;  %2430 = vrot.lane.b32.xlu0 %v2348_v60, %s6321_s7 }
 0x149   : > { %v2252_v50 = vsel %vm2091_vm10, %v2231_v19, %v1968_v49  ;;  %v8082_v19 = vld [vmem:[%s6387_s24 + $0x64] sm:$0xf] }
 0x14a   : > { %2704 = vrot.lane.b32.xlu1 %v2623_v13, %s6322_s11  ;;  %4805 = vmatprep.mubr.bf16.mxu0 %v2252_v50  ;;  %v1672_v43 = vpop.permute.xlu0 %1671  ;;  %v5340_v50 = vld [vmem:[%s6387_s24 + $0x54] sm:$0xe] }
 0x14b   : > { %v2191_v47 = vsel %vm2032_vm6, %v2175_v11, %v1672_v43  ;;  %v8093_v11 = vcombine.low %v5321_v45, %v8082_v19  ;;  %v8096_v43 = vcombine.low %v5340_v50, %v7981_v1  ;;  %v8106_v1 = vld [vmem:[%s6387_s24 + $0x5c] ss:$0 sps:$4 sm:$0x11]  }
 0x14c   : > { %v1130_v60 = vpop.permute.xlu1 %1129  ;;  %2512 = vrot.lane.b32.xlu0 %v2487_v38, %s6320_s29  ;;  %v2212_v6 = vsel %vm2049_vm7, %v2191_v47, %v1848_v29  ;;  %v6260_v29 = vld [vmem:[%s6387_s24 + $0x68] ss:$0 sps:$4 sm:$0x33]   ;;  %v2630_v47 = vrot.slane %v2628_v32, 2 }
 0x14d   : > { %4806 = vmatmul.mubr.bf16.gmra.mxu0 %v2212_v6  ;;  %v2088_v4 = vsel %vm2074_vm9, %v7257_v14, %v1130_v60  ;;  %v1341_v14 = vshrl.u32 %v7542_v21, 16  ;;  %v1349_v13 = vshrl.u32 %v6260_v29, 16  ;;  %v1352_v10 = vshll.u32 %v6260_v29, 16 }
 0x14e   : > { %2832 = vrot.lane.b32.xlu1 %v2791_v25, %s6324_s25  ;;  %v1418_v15 = vpop.permute.xlu0 %1417  ;;  %v2636_v21 = vshll.u32 %v8070_v37, 16  ;;  %v5291_v25 = vld [vmem:[%s6387_s24 + $0x54] sm:$0xe]  ;;  %v8098_v60 = vrot.slane %v2633_v16, 1  ;;  %v2975_v29 = vshrl.u32 %v8096_v43, 16 }
 0x14f   : > { %v2136_v33 = vsel %vm1973_vm5, %v1339_v46, %v1418_v15  ;;  %v1351_v54 = vrot.slane %v1349_v13, 1  ;;  %v1354_v53 = vrot.slane %v1352_v10, 2  ;;  %v2793_v15 = vshrl.u32 %v8093_v11, 16  ;;  %v5308_v16 = vld [vmem:[%s6387_s24 + $0x60] sm:$0xc] }
 0x150   : > { %v1194_v22 = vpop.permute.xlu1 %1193  ;;  %3052 = vrot.lane.b32.xlu0 %v2971_v40, %s6325_s4  ;;  %v2638_v7 = vrot.slane %v2636_v21, 2 }
 0x151   : > { %v2111_v56 = vsel %vm2091_vm10, %v2088_v4, %v1194_v22  ;;  %v1355_v40 = vor.u32 %v1354_v53, %v1351_v54  ;;  %v2631_v22 = vor.u32 %v2630_v47, %v2627_v17  ;;  %v8127_v39 = vrot.slane %v2793_v15, 7  ;;  %v6261_v47 = vld [vmem:[%s6387_s24 + $0x64] sm:$0xf] }
 0x152   : > { %2432 = vrot.lane.b32.xlu1 %v2361_v28, %s6321_s7  ;;  %v1474_v0 = vpop.permute.xlu0 %1473  ;;  %v2977_v28 = vshll.u32 %v8096_v43, 16  ;;  %v2639_v4 = vor.u32 %v2638_v7, %v8098_v60  ;;  %v5518_v7 = vcombine.low %v5308_v16, %v6261_v47 }
 0x153   : > { %v2159_v23 = vsel %vm1990_vm8, %v2136_v33, %v1474_v0 }
 0x154   : > { %v1850_v63 = vpop.permute.xlu1 %1849  ;;  %3132 = vrot.lane.b32.xlu0 %v3108_v24, %s6326_s5  ;;  %4716 = vmatprep.mubr.bf16.mxu1 %v2159_v23  ;;  %v8113_v24 = vld [vmem:[%s6387_s24 + $0x5c] ss:$0 sps:$4 sm:$0x11]   ;;  %v2489_v23 = vrot.slane %v8070_v37, 1  ;;  %v2979_v13 = vrot.slane %v2977_v28, 1 }
 0x155   : > { %4717 = vmatmul.mubr.bf16.gmra.mxu1 %v2111_v56  ;;  %v2372_v45 = vshll.u32 %v8113_v24, 16  ;;  %v5292_v28 = vld [vmem:[%s6387_s24 + $0x60] sm:$0xe] }
 0x156   : > { %2706 = vrot.lane.b32.xlu1 %v8005_v30, %s6322_s11  ;;  %v1610_v49 = vpop.permute.xlu0 %1609  ;;  %v1343_v30 = vrot.slane %v1341_v14, 1  ;;  %v2982_v14 = vshll.u32 %v8106_v1, 16 }
 0x157   : > { %v2177_v61 = vsel %vm2015_vm4, %v1474_v0, %v1610_v49  ;;  %v2374_v53 = vrot.slane %v2372_v45, 1 }
 0x158   : > { %v1674_v38 = vpop.permute.xlu1 %1673  ;;  %2514 = vrot.lane.b32.xlu0 %v2486_v55, %s6320_s29  ;;  %v5501_v55 = vcombine.low %v5291_v25, %v6259_v31  ;;  %v1347_v6 = vor.u32 %v1346_v8, %v1343_v30  ;;  %v2984_v25 = vrot.slane %v2982_v14, 1  ;;  %v8148_v30 = vld [vmem:[%s6387_s24 + $0x5c] ss:$0 sps:$4 sm:$0x33]  }
 0x159   : > { %v2193_v57 = vsel %vm2032_vm6, %v2177_v61, %v1674_v38  ;;  %v2980_v38 = vor.u32 %v2979_v13, %v2975_v29  ;;  %v5341_v13 = vld [vmem:[%s6387_s24 + $0x60] sm:$0xe] }
 0x15a   : > { %3054 = vrot.lane.b32.xlu1 %v2972_v34, %s6325_s4  ;;  %v1914_v2 = vpop.permute.xlu0 %1913  ;;  %v2488_v33 = vrot.slane %v5501_v55, 1  ;;  %v1356_v0 = vsel %vm723_vm2, %v1347_v6, %v1355_v40  ;;  %v2215_v56 = vsel %vm2049_vm7, %v2193_v57, %v1850_v63  ;;  %v2365_v10 = vshrl.u32 %v5501_v55, 16 }
 0x15b   : > { %v2233_v36 = vsel %vm2074_vm9, %v1850_v63, %v1914_v2  ;;  %v2640_v63 = vsel %vm723_vm2, %v2631_v22, %v2639_v4  ;;  %v2985_v61 = vsel %vm521_vm1, %v2980_v38, %v2984_v25  ;;  %v3109_v6 = vrot.slane %v8096_v43, 1  ;;  %v6262_v25 = vld [vmem:[%s6387_s24 + $0x2c] ss:$0 sps:$4 sm:$0x11]  }
 0x15c   : > { %v1420_v20 = vpop.permute.xlu1 %1419  ;;  %2888 = vrot.lane.b32.xlu0 %v8000_v5, %s6323_s21  ;;  %v2367_v5 = vshll.u32 %v5501_v55, 16  ;;  %v2490_v21 = vsel %vm658_vm0, %v2488_v33, %v2489_v23  ;;  %v8177_v33 = vcombine.low %v5292_v28, %v6261_v47  ;;  %v6264_v47 = vld [vmem:[%s6387_s24 + $0x40] sm:$0xf] }
 0x15d   : > { %v2139_v49 = vsel %vm1973_vm5, %v1356_v0, %v1420_v20  ;;  %v8156_v20 = vld [vmem:[%s6387_s24 + $0x68] ss:$0 sps:$4 sm:$0x33]  }
 0x15e   : > { %3134 = vrot.lane.b32.xlu1 %v3107_v9, %s6326_s5  ;;  %v1970_v46 = vpop.permute.xlu0 %1969  ;;  %v2362_v9 = vshrl.u32 %v8021_v48, 16  ;;  %v2796_v48 = vshll.u32 %v8093_v11, 16  ;;  %v2369_v34 = vrot.slane %v2367_v5, 1  ;;  %v2650_v22 = vshrl.u32 %v8156_v20, 16 }
 0x15f   : > { %v2255_v31 = vsel %vm2091_vm10, %v2233_v36, %v1970_v46  ;;  %v2642_v36 = vshrl.u32 %v5518_v7, 16  ;;  %v2645_v46 = vshll.u32 %v5518_v7, 16  ;;  %v2653_v4 = vshll.u32 %v8156_v20, 16 }
 0x160   : > { %v8116_v35 = vpop.permute.xlu1 %2692  ;;  %2834 = vrot.lane.b32.xlu0 %v8032_v52, %s6324_s25  ;;  %4813 = vmatprep.mubr.bf16.mxu0 %v2255_v31  ;;  %v2798_v50 = vor.u32 %v2796_v48, %v8127_v39  ;;  %v2370_v54 = vor.u32 %v2369_v34, %v2365_v10  ;;  %v5323_v31 = vld [vmem:[%s6387_s24 + $0x6c] sm:$0xf]  ;;  %v8182_v48 = vrot.slane %v2650_v22, 1  ;;  %v2986_v34 = vshrl.u32 %v8106_v1, 16 }
 0x161   : > { %4814 = vmatmul.mubr.bf16.gmra.mxu0 %v2215_v56  ;;  %v2644_v56 = vrot.slane %v2642_v36, 1  ;;  %v2647_v14 = vrot.slane %v2645_v46, 2  ;;  %v2655_v29 = vrot.slane %v2653_v4, 2  ;;  %v2376_v36 = vshrl.u32 %v8113_v24, 16 }
 0x162   : > { %2890 = vrot.lane.b32.xlu1 %v8106_v1, %s6323_s21  ;;  %v8131_v52 = vpop.permute.xlu0 %2500  ;;  %v2375_v57 = vsel %vm521_vm1, %v2370_v54, %v2374_v53  ;;  %v8206_v1 = vcombine.low %v5341_v13, %v8082_v19  ;;  %v8218_v54 = vld [vmem:[%s6387_s24 + $0x68] ss:$0 sps:$4 sm:$0x11]   ;;  %v2379_v22 = vshrl.u32 %v8177_v33, 16 }
 0x163   : > { %v2648_v53 = vor.u32 %v2647_v14, %v2644_v56  ;;  %v8258_v24 = vld [vmem:[%s6387_s24 + $0x68] ss:$0 sps:$4 sm:$0x11]  }
 0x164   : > { %v8136_v27 = vpop.permute.xlu1 %1475  ;;  %2434 = vrot.lane.b32.xlu0 %v2362_v9, %s6321_s7  ;;  %v8175_v9 = vld [vmem:[%s6387_s24 + $0x70] sm:$0xf]  ;;  %v2991_v46 = vshll.u32 %v8206_v1, 16  ;;  %v2989_v56 = vshrl.u32 %v8206_v1, 16 }
 0x165   : > { %v2162_v32 = vsel %vm1990_vm8, %v2139_v49, %v8136_v27  ;;  %v8194_v45 = vcombine.low %v5323_v31, %v8175_v9  ;;  %v5309_v49 = vld [vmem:[%s6387_s24 + $0x6c] sm:$0xc] }
 0x166   : > { %2708 = vrot.lane.b32.xlu1 %v2640_v63, %s6322_s11  ;;  %4724 = vmatprep.mubr.bf16.mxu1 %v2162_v32  ;;  %v1132_v8 = vpop.permute.xlu0 %1131  ;;  %v3389_v63 = vsel %vm2015_vm4, %v8131_v52, %v8116_v35 }
 0x167   : > { %v2090_v2 = vsel %vm2074_vm9, %v7445_v62, %v1132_v8  ;;  %v3110_v62 = vrot.slane %v8148_v30, 1  ;;  %v2803_v31 = vshll.u32 %v8194_v45, 16 }
 0x168   : > { %v1196_v17 = vpop.permute.xlu1 %1195  ;;  %2516 = vrot.lane.b32.xlu0 %v2490_v21, %s6320_s29  ;;  %v5354_v21 = vld [vmem:[%s6387_s24 + $0x3c] sm:$0xc] }
 0x169   : > { %v2114_v55 = vsel %vm2091_vm10, %v2090_v2, %v1196_v17  ;;  %v3111_v43 = vsel %vm658_vm0, %v3109_v6, %v3110_v62  ;;  %v2656_v2 = vor.u32 %v2655_v29, %v8182_v48  ;;  %v8222_v17 = vld [vmem:[%s6387_s24 + $0x70] sm:$0xf]  ;;  %v8230_v37 = vcombine.low %v5354_v21, %v6264_v47 }
 0x16a   : > { %2836 = vrot.lane.b32.xlu1 %v2798_v50, %s6324_s25  ;;  %4725 = vmatmul.mubr.bf16.gmra.mxu1 %v2114_v55  ;;  %v2821_v40 = vpop.permute.xlu0 %2820  ;;  %v2492_v50 = vrot.slane %v8156_v20, 1  ;;  %v8225_v19 = vcombine.low %v5309_v49, %v8222_v17  ;;  %v2996_v6 = vshll.u32 %v8218_v54, 16  ;;  %v2386_v47 = vshll.u32 %v8258_v24, 16 }
 0x16b   : > { %v3421_v32 = vsel %vm2032_vm6, %v3389_v63, %v2821_v40  ;;  %v8268_v63 = vld [vmem:[%s6387_s24 + $0x68] ss:$0 sps:$4 sm:$0x33]  }
 0x16c   : > { %v8163_v15 = vpop.permute.xlu1 %2502  ;;  %3056 = vrot.lane.b32.xlu0 %v2985_v61, %s6325_s4  ;;  %v2998_v21 = vrot.slane %v2996_v6, 1 }
 0x16e   : > { %2436 = vrot.lane.b32.xlu1 %v2375_v57, %s6321_s7  ;;  %v2421_v5 = vpop.permute.xlu0 %2420  ;;  %v8240_v57 = vld [vmem:[%s9061_s2] ss:$0 sm:$0xff] }
 0x16f   : > { %v3318_v10 = vsel %vm1973_vm5, %v6864_v3, %v2421_v5 }
 0x170   : > { %v8179_v0 = vpop.permute.xlu1 %2876  ;;  %3136 = vrot.lane.b32.xlu0 %v3111_v43, %s6326_s5  ;;  %v8210_v38 = vsel %vm1990_vm8, %v3318_v10, %v8131_v52  ;;  %v2800_v52 = vshrl.u32 %v8194_v45, 16  ;;  %v2657_v43 = vsel %vm723_vm2, %v2648_v53, %v2656_v2 }
 0x171   : > { %v8201_v35 = vsel %vm2049_vm7, %v3421_v32, %v8179_v0  ;;  %v3550_v40 = vshll.u32 %v8210_v38, 16 }
 0x172   : > { %2710 = vrot.lane.b32.xlu1 %v8098_v60, %s6322_s11  ;;  %v2695_v16 = vpop.permute.xlu0 %2694  ;;  %v2491_v60 = vrot.slane %v8177_v33, 1  ;;  %v3558_v53 = vshrl.u32 %v8201_v35, 16 }
 0x173   : > { %v3391_v14 = vsel %vm2015_vm4, %v8163_v15, %v2695_v16 }
 0x174   : > { %v2423_v3 = vpop.permute.xlu1 %2422  ;;  %2518 = vrot.lane.b32.xlu0 %v2489_v23, %s6320_s29  ;;  %v3560_v23 = vshll.u32 %v8201_v35, 16  ;;  %v8253_v5 = vsel %vm658_vm0, %v2491_v60, %v2492_v50 }
 0x175   : > { %v3320_v8 = vsel %vm1973_vm5, %v6262_v25, %v2423_v3  ;;  %v5688_v55 = vpop.f32.mrf.mxu1  ;;  %v2381_v3 = vshll.u32 %v8177_v33, 16 }
 0x176   : > { %3058 = vrot.lane.b32.xlu1 %v2986_v34, %s6325_s4  ;;  %v3359_v7 = vsel %vm1990_vm8, %v3320_v8, %v8163_v15  ;;  %v2823_v61 = vpop.permute.xlu0 %2822  ;;  %v3562_v10 = vrot.slane %v3560_v23, 1  ;;  %v3552_v15 = vrot.slane %v3550_v40, 1  ;;  %v2993_v8 = vrot.slane %v2991_v46, 1 }
 0x177   : > { %v5689_v4 = vpop.f32.mrf.mxu1  ;;  %v3554_v29 = vshll.u32 %v3359_v7, 16  ;;  %v3423_v34 = vsel %vm2032_vm6, %v3391_v14, %v2823_v61  ;;  %v3112_v23 = vrot.slane %v8206_v1, 1  ;;  %v3548_v7 = vshrl.u32 %v8210_v38, 16 }
 0x178   : > { %v8242_v28 = vpop.permute.xlu1 %1611  ;;  %2892 = vrot.lane.b32.xlu0 %v8093_v11, %s6323_s21  ;;  %v5690_v13 = vadd.f32 %v5689_v4, %v5688_v55  ;;  %v8265_v11 = vrot.slane %v2800_v52, 7  ;;  %v3113_v40 = vrot.slane %v8268_v63, 1  ;;  %v2383_v14 = vrot.slane %v2381_v3, 1 }
 0x179   : > { %v5691_v49 = vpop.f32.mrf.mxu1  ;;  %v3556_v55 = vrot.slane %v3554_v29, 1 }
 0x17a   : > { %3138 = vrot.lane.b32.xlu1 %v3110_v62, %s6326_s5  ;;  %v8271_v32 = vpop.permute.xlu0 %2878  ;;  %v8275_v16 = vadd.f32 %v5690_v13, %v8240_v57  ;;  %v3553_v13 = vor.u32 %v3552_v15, %v3548_v7 }
 0x17b   : > { %v3455_v62 = vsel %vm2049_vm7, %v3423_v34, %v8271_v32  ;;  %v5664_v60 = vpop.f32.mrf.mxu0  ;;  %v5692_v52 = vpop.f32.mrf.mxu1 }
 0x17c   : > { %v1916_v25 = vpop.permute.xlu1 %1915  ;;  %v3564_v2 = vshll.u32 %v3455_v62, 16  ;;  %2838 = vrot.lane.b32.xlu0 %v8127_v39, %s6324_s25  ;;  %v5693_v61 = vadd.f32 %v5692_v52, %v5691_v49  ;;  %v3563_v39 = vor.u32 %v3562_v10, %v3558_v53  ;;  %v2994_v62 = vor.u32 %v2993_v8, %v2989_v56 }
 0x17d   : > { %v5665_v6 = vpop.f32.mrf.mxu0  ;;  %v3198_v10 = vshrl.u32 %v8230_v37, 16  ;;  %v3557_v3 = vsel %vm521_vm1, %v3553_v13, %v3556_v55  ;;  %v3201_v56 = vshll.u32 %v8230_v37, 16  ;;  %v2384_v37 = vor.u32 %v2383_v14, %v2379_v22  ;;  %v5293_v13 = vld [vmem:[%s6387_s24 + $0x6c] sm:$0xe] }
 0x17e   : > { %2894 = vrot.lane.b32.xlu1 %v8218_v54, %s6323_s21  ;;  %v3566_v35 = vrot.slane %v3564_v2, 1  ;;  %v1852_v46 = vpop.permute.xlu0 %1851  ;;  %v8288_v4 = vadd.f32 %v5665_v6, %v5664_v60  ;;  %v8291_v34 = vadd.f32 %v5693_v61, %v8240_v57  ;;  %v2805_v60 = vor.u32 %v2803_v31, %v8265_v11  ;;  %v8299_v6 = vld [vmem:[%s6387_s24 + $0x74] ss:$0 sps:$4 sm:$0x33]  }
 0x17f   : > { %v2235_v38 = vsel %vm2074_vm9, %v1852_v46, %v1916_v25  ;;  %v5667_v29 = vpop.f32.mrf.mxu0  ;;  %v3209_v25 = vshll.u32 %v7938_v18, 16  ;;  %v2179_v31 = vsel %vm2015_vm4, %v8136_v27, %v8242_v28  ;;  %v2662_v27 = vshll.u32 %v8225_v19, 16  ;;  %v5325_v28 = vld [vmem:[%s6387_s24 + $0x78] sm:$0xf] }
 0x180   : > { %9069 = vst [vmem:[#allocation4_spill] sm:$0xff] %v8288_v4  ;;  %v1972_v49 = vpop.permute.xlu1 %1971  ;;  %2438 = vrot.lane.b32.xlu0 %v2376_v36, %s6321_s7  ;;  %v3567_v52 = vsel %vm521_vm1, %v3563_v39, %v3566_v35  ;;  %v3206_v36 = vshrl.u32 %v7938_v18, 16  ;;  %v2999_v18 = vsel %vm521_vm1, %v2994_v62, %v2998_v21  ;;  %v2659_v35 = vshrl.u32 %v8225_v19, 16  ;;  %v8322_v39 = vld [vmem:[%s6387_s24 + $0x7c] sm:$0xf] }
 0x181   : > { %v2258_v2 = vsel %vm2091_vm10, %v2235_v38, %v1972_v49  ;;  %4862 = vmatprep.mubr.bf16.mxu1 %v3567_v52  ;;  %v5668_v15 = vpop.f32.mrf.mxu0  ;;  %v2667_v22 = vshrl.u32 %v8299_v6, 16  ;;  %v3200_v14 = vrot.slane %v3198_v10, 1  ;;  %v3203_v19 = vrot.slane %v3201_v56, 2 }
 0x182   : > { %2712 = vrot.lane.b32.xlu1 %v2657_v43, %s6322_s11  ;;  %v5694_v8 = vpop.f32.mrf.mxu1  ;;  %4863 = vmatmul.mubr.bf16.vlgmr.msra.gmra.mxu1 %v3557_v3  ;;  %v1676_v53 = vpop.permute.xlu0 %1675  ;;  %v8310_v7 = vadd.f32 %v5668_v15, %v5667_v29  ;;  %v2388_v43 = vrot.slane %v2386_v47, 1  ;;  %v2670_v47 = vshll.u32 %v8299_v6, 16  ;;  %v8331_v29 = vrot.slane %v3206_v36, 1 }
 0x183   : > { %4821 = vmatprep.mubr.bf16.mxu0 %v2258_v2  ;;  %v2195_v55 = vsel %vm2032_vm6, %v2179_v31, %v1676_v53  ;;  %v3211_v49 = vrot.slane %v3209_v25, 2  ;;  %v8342_v2 = vcombine.low %v5293_v13, %v8222_v17  ;;  %v2661_v56 = vrot.slane %v2659_v35, 1 }
 0x184   : > { %9070 = vst [vmem:[#allocation5_spill] sm:$0xff] %v8310_v7  ;;  %v8315_v61 = vpop.permute.xlu1 %2696  ;;  %v5695_v38 = vpop.f32.mrf.mxu1  ;;  %2520 = vrot.lane.b32.xlu0 %v8253_v5, %s6320_s29  ;;  %v2218_v33 = vsel %vm2049_vm7, %v2195_v55, %v1852_v46  ;;  %v2389_v5 = vsel %vm521_vm1, %v2384_v37, %v2388_v43  ;;  %v8339_v46 = vcombine.low %v5325_v28, %v8322_v39  ;;  %v2664_v17 = vrot.slane %v2662_v27, 2  ;;  %v5342_v27 = vld [vmem:[%s6387_s24 + $0x6c] sm:$0xe]  ;;  %v5310_v28 = vld [vmem:[%s6387_s24 + $0x78] sm:$0xc] }
 0x185   : > { %v5696_v21 = vadd.f32 %v5695_v38, %v5694_v8  ;;  %4822 = vmatmul.mubr.bf16.gmra.mxu0 %v2218_v33  ;;  %v8355_v36 = vrot.slane %v2667_v22, 1  ;;  %v2672_v8 = vrot.slane %v2670_v47, 2  ;;  %v3204_v53 = vor.u32 %v3203_v19, %v3200_v14  ;;  %v5355_v33 = vld [vmem:[%s6387_s24 + $0x48] sm:$0xc] }
 0x186   : > { %2840 = vrot.lane.b32.xlu1 %v2805_v60, %s6324_s25  ;;  %v5697_v62 = vpop.f32.mrf.mxu1  ;;  %v8333_v52 = vpop.permute.xlu0 %2504  ;;  %5637 = vmatprep.mubr.msk.bf16.mxu0 %vm1973_vm5, %v7946_v59  ;;  %v3114_v59 = vsel %vm658_vm0, %v3112_v23, %v3113_v40  ;;  %v3212_v37 = vor.u32 %v3211_v49, %v8331_v29  ;;  %v2807_v23 = vshrl.u32 %v8339_v46, 16  ;;  %v3000_v13 = vshrl.u32 %v8218_v54, 16  ;;  %v8374_v47 = vld [vmem:[%s6387_s24 + $0x74] ss:$0 sps:$4 sm:$0x11]  }
 0x187   : > { %v8345_v60 = vadd.f32 %v5696_v21, %v8240_v57  ;;  %v5670_v10 = vpop.f32.mrf.mxu0  ;;  %v2494_v38 = vrot.slane %v8342_v2, 1  ;;  %v2665_v14 = vor.u32 %v2664_v17, %v2661_v56  ;;  %v2673_v21 = vor.u32 %v2672_v8, %v8355_v36  ;;  %v6266_v8 = vld [vmem:[%s6387_s24 + $0x4c] sm:$0xf] }
 0x188   : > { %v8347_v3 = vpop.permute.xlu1 %2824  ;;  %v5698_v15 = vpop.f32.mrf.mxu1  ;;  %3060 = vrot.lane.b32.xlu0 %v2999_v18, %s6325_s4  ;;  %v9064_v19 = vrot.slane %v8299_v6, 1  ;;  %v3213_v49 = vsel %vm723_vm2, %v3204_v53, %v3212_v37  ;;  %v8397_v53 = vcombine.low %v5355_v33, %v6266_v8  ;;  %v8415_v33 = vld [vmem:[%s6387_s24 + $0x74] ss:$0 sps:$4 sm:$0x11]  }
 0x189   : > { %v5699_v25 = vadd.f32 %v5698_v15, %v5697_v62  ;;  %v5671_v31 = vpop.f32.mrf.mxu0  ;;  %v2810_v15 = vshll.u32 %v8339_v46, 16 }
 0x18a   : > { %2440 = vrot.lane.b32.xlu1 %v2389_v5, %s6321_s7  ;;  %v3045_v43 = vpop.permute.xlu0 %3044  ;;  %v8359_v1 = vadd.f32 %v5671_v31, %v5670_v10  ;;  %v8381_v10 = vrot.slane %v2807_v23, 7  ;;  %v3010_v31 = vshll.u32 %v8374_v47, 16 }
 0x18b   : > { %v8363_v55 = vadd.f32 %v5699_v25, %v8240_v57  ;;  %v5673_v18 = vpop.f32.mrf.mxu0  ;;  %v3485_v17 = vsel %vm2074_vm9, %v8179_v0, %v3045_v43  ;;  %v2390_v0 = vshrl.u32 %v8258_v24, 16  ;;  %v8407_v43 = vsel %vm723_vm2, %v2665_v14, %v2673_v21  ;;  %v8426_v21 = vld [vmem:[%s6387_s24 + $0x74] ss:$0 sps:$4 sm:$0x33]  }
 0x18c   : > { %v2425_v35 = vpop.permute.xlu1 %2424  ;;  %3140 = vrot.lane.b32.xlu0 %v3114_v59, %s6326_s5  ;;  %v8388_v59 = vld [vmem:[%s6387_s24 + $0x7c] sm:$0xf]  ;;  %v2393_v14 = vshrl.u32 %v8342_v2, 16  ;;  %v8433_v8 = vrot.slane %v3010_v31, 1  ;;  %v2400_v31 = vshll.u32 %v8415_v33, 16 }
 0x18d   : > { %v5674_v22 = vpop.f32.mrf.mxu0  ;;  %v8391_v56 = vcombine.low %v5310_v28, %v8388_v59  ;;  %v8412_v28 = vsel %vm658_vm0, %v2494_v38, %v9064_v19  ;;  %v3323_v38 = vsel %vm1973_vm5, %v6906_v41, %v2425_v35  ;;  %v3621_v19 = vshrl.u32 %v3213_v49, 16 }
 0x18e   : > { %2714 = vrot.lane.b32.xlu1 %v8182_v48, %s6322_s11  ;;  %v5700_v62 = vpop.f32.mrf.mxu1  ;;  %v3125_v54 = vpop.permute.xlu0 %3124  ;;  %v8379_v5 = vadd.f32 %v5674_v22, %v5673_v18  ;;  %v8385_v48 = vcombine.low %v5342_v27, %v8175_v9  ;;  %v2395_v9 = vshll.u32 %v8342_v2, 16  ;;  %v3623_v18 = vshll.u32 %v3213_v49, 16 }
 0x18f   : > { %v3517_v37 = vsel %vm2091_vm10, %v3485_v17, %v3125_v54  ;;  %v8420_v22 = vor.u32 %v2810_v15, %v8381_v10  ;;  %v3628_v2 = vshll.u32 %v8331_v29, 16  ;;  %v3393_v41 = vsel %vm2015_vm4, %v8333_v52, %v8315_v61 }
 0x190   : > { %v2699_v25 = vpop.permute.xlu1 %2698  ;;  %v5701_v23 = vpop.f32.mrf.mxu1  ;;  %2522 = vrot.lane.b32.xlu0 %v2492_v50, %s6320_s29  ;;  %v3005_v24 = vshll.u32 %v8385_v48, 16  ;;  %v8450_v49 = vsel %vm1990_vm8, %v3323_v38, %v8333_v52 }
 0x191   : > { %v5702_v27 = vadd.f32 %v5701_v23, %v5700_v62  ;;  %v3570_v62 = vshll.u32 %v3517_v37, 16  ;;  %v2397_v23 = vrot.slane %v2395_v9, 1  ;;  %v3630_v38 = vrot.slane %v3628_v2, 1 }
 0x192   : > { %3062 = vrot.lane.b32.xlu1 %v3000_v13, %s6325_s4  ;;  %v5703_v20 = vpop.f32.mrf.mxu1  ;;  %v8417_v50 = vpop.permute.xlu0 %2506  ;;  %v3625_v13 = vrot.slane %v3623_v18, 1  ;;  %v3007_v9 = vrot.slane %v3005_v24, 1 }
 0x193   : > { %v8431_v54 = vadd.f32 %v5702_v27, %v8240_v57  ;;  %v3572_v18 = vrot.slane %v3570_v62, 1  ;;  %v3568_v27 = vshrl.u32 %v3517_v37, 16 }
 0x194   : > { %v3047_v17 = vpop.permute.xlu1 %3046  ;;  %v5704_v15 = vpop.f32.mrf.mxu1  ;;  %2896 = vrot.lane.b32.xlu0 %v8194_v45, %s6323_s21  ;;  %v3425_v45 = vsel %vm2032_vm6, %v3393_v41, %v8347_v3  ;;  %v3626_v24 = vor.u32 %v3625_v13, %v3621_v19  ;;  %v3223_v19 = vshrl.u32 %v8047_v12, 16 }
 0x195   : > { %v5705_v35 = vadd.f32 %v5704_v15, %v5703_v20  ;;  %v3573_v13 = vor.u32 %v3572_v18, %v3568_v27 }
 0x196   : > { %3142 = vrot.lane.b32.xlu1 %v3113_v40, %s6326_s5  ;;  %v8452_v29 = vpop.permute.xlu0 %2880  ;;  %v3487_v40 = vsel %vm2074_vm9, %v8271_v32, %v3047_v17  ;;  %v3215_v32 = vshrl.u32 %v8397_v53, 16  ;;  %v3592_v17 = vshll.u32 %v8450_v49, 16 }
 0x197   : > { %v8456_v20 = vadd.f32 %v5705_v35, %v8240_v57  ;;  %v3457_v15 = vsel %vm2049_vm7, %v3425_v45, %v8452_v29  ;;  %v2398_v35 = vor.u32 %v2397_v23, %v2393_v14  ;;  %v3395_v45 = vsel %vm2015_vm4, %v8417_v50, %v2699_v25 }
 0x198   : > { %v3127_v3 = vpop.permute.xlu1 %3126  ;;  %v3602_v41 = vshll.u32 %v3457_v15, 16  ;;  %2842 = vrot.lane.b32.xlu0 %v8265_v11, %s6324_s25  ;;  %v3218_v11 = vshll.u32 %v8397_v53, 16  ;;  %v3631_v23 = vsel %vm521_vm1, %v3626_v24, %v3630_v38  ;;  %v3226_v53 = vshll.u32 %v8047_v12, 16 }
 0x199   : > { %v3519_v52 = vsel %vm2091_vm10, %v3487_v40, %v3127_v3  ;;  %v5676_v62 = vpop.f32.mrf.mxu0  ;;  %v3600_v4 = vshrl.u32 %v3457_v15, 16  ;;  %v8488_v24 = vrot.slane %v3215_v32, 1  ;;  %v8492_v15 = vrot.slane %v3223_v19, 1 }
 0x19a   : > { %v3574_v61 = vshll.u32 %v3519_v52, 16  ;;  %2898 = vrot.lane.b32.xlu1 %v8374_v47, %s6323_s21  ;;  %v2827_v7 = vpop.permute.xlu0 %2826  ;;  %v3604_v37 = vrot.slane %v3602_v41, 1  ;;  %v8490_v12 = vrot.slane %v3218_v11, 2  ;;  %v3594_v38 = vrot.slane %v3592_v17, 1 }
 0x19b   : > { %v3427_v40 = vsel %vm2032_vm6, %v3395_v45, %v2827_v7  ;;  %v5677_v3 = vpop.f32.mrf.mxu0  ;;  %v2402_v45 = vrot.slane %v2400_v31, 1  ;;  %v3228_v17 = vrot.slane %v3226_v53, 2  ;;  %v3590_v11 = vshrl.u32 %v8450_v49, 16 }
 0x19c   : > { %v3576_v2 = vrot.slane %v3574_v61, 1  ;;  %v8474_v52 = vpop.permute.xlu1 %2882  ;;  %v8476_v14 = vadd.f32 %v5677_v3, %v5676_v62  ;;  %2442 = vrot.lane.b32.xlu0 %v2390_v0, %s6321_s7  ;;  %v5706_v61 = vpop.f32.mrf.mxu1  ;;  %v9071_v0 = vshrl.u32 %v8385_v48, 16  ;;  %v2676_v53 = vshrl.u32 %v8391_v56, 16 }
 0x19d   : > { %v3459_v25 = vsel %vm2049_vm7, %v3427_v40, %v8474_v52  ;;  %v5679_v27 = vpop.f32.mrf.mxu0  ;;  %v3605_v40 = vor.u32 %v3604_v37, %v3600_v4  ;;  %v2403_v49 = vsel %vm521_vm1, %v2398_v35, %v2402_v45  ;;  %v5343_v45 = vld [vmem:[%s6387_s24 + $0x78] sm:$0xe] }
 0x19e   : > { %v3606_v18 = vshll.u32 %v3459_v25, 16  ;;  %2716 = vrot.lane.b32.xlu1 %v8407_v43, %s6322_s11  ;;  %v3577_v7 = vsel %vm521_vm1, %v3573_v13, %v3576_v2  ;;  %v3008_v41 = vor.u32 %v3007_v9, %v9071_v0  ;;  %v2427_v62 = vpop.permute.xlu0 %2426  ;;  %v6267_v25 = vld [vmem:[%s6387_s24 + $0x38] ss:$0 sps:$4 sm:$0x11]   ;;  %v5707_v13 = vpop.f32.mrf.mxu1  ;;  %v5327_v0 = vld [vmem:[%s6387_s24 + $0x84] sm:$0xf] }
 0x19f   : > { %4960 = vmatmul.mubr.bf16.vlgmr.msra.gmra.mxu0 %v3577_v7  ;;  %v3325_v43 = vsel %vm1973_vm5, %v6267_v25, %v2427_v62  ;;  %v5680_v51 = vpop.f32.mrf.mxu0  ;;  %v8497_v2 = vld [vmem:[%s6387_s24 + $0x80] ss:$0 sps:$4 sm:$0x33]   ;;  %v5708_v32 = vadd.f32 %v5707_v13, %v5706_v61  ;;  %v3229_v25 = vor.u32 %v3228_v17, %v8492_v15 }
 0x1a0   : > { %v3608_v3 = vrot.slane %v3606_v18, 1  ;;  %5638 = vmatprep.mubr.msk.bf16.mxu0 %vm1973_vm5, %v3631_v23  ;;  %v3363_v31 = vsel %vm1990_vm8, %v3325_v43, %v8417_v50  ;;  %v8502_v9 = vadd.f32 %v5680_v51, %v5679_v27  ;;  %2524 = vrot.lane.b32.xlu0 %v8412_v28, %s6320_s29  ;;  %v8506_v4 = vpop.permute.xlu1 %2700  ;;  %v5709_v37 = vpop.f32.mrf.mxu1  ;;  %v3013_v51 = vsel %vm521_vm1, %v3008_v41, %v8433_v8  ;;  %v8525_v41 = vld [vmem:[%s6387_s24 + $0x88] sm:$0xf] }
 0x1a1   : > { %v3596_v19 = vshll.u32 %v3363_v31, 16  ;;  %v8515_v23 = vadd.f32 %v5708_v32, %v8240_v57  ;;  %v5682_v28 = vpop.f32.mrf.mxu0  ;;  %v3595_v8 = vor.u32 %v3594_v38, %v3590_v11  ;;  %v2684_v7 = vshrl.u32 %v8497_v2, 16  ;;  %v5294_v38 = vld [vmem:[%s6387_s24 + $0x78] sm:$0xe] }
 0x1a2   : > { %2844 = vrot.lane.b32.xlu1 %v8420_v22, %s6324_s25  ;;  %v3609_v50 = vsel %vm521_vm1, %v3605_v40, %v3608_v3  ;;  %v8517_v27 = vpop.permute.xlu0 %2508  ;;  %v2679_v22 = vshll.u32 %v8391_v56, 16  ;;  %v5710_v18 = vpop.f32.mrf.mxu1  ;;  %v2687_v35 = vshll.u32 %v8497_v2, 16  ;;  %v3221_v56 = vor.u32 %v8490_v12, %v8488_v24 }
 0x1a3   : > { %9072 = vst [vmem:[#allocation6_spill] sm:$0xff] %v8515_v23  ;;  %4870 = vmatprep.mubr.bf16.mxu1 %v3609_v50  ;;  %v3598_v61 = vrot.slane %v3596_v19, 1  ;;  %v5711_v62 = vadd.f32 %v5710_v18, %v5709_v37  ;;  %v5683_v40 = vpop.f32.mrf.mxu0  ;;  %v9073_v31 = vrot.slane %v8426_v21, 1  ;;  %v9074_v32 = vrot.slane %v8385_v48, 1 }
 0x1a4   : > { %3064 = vrot.lane.b32.xlu0 %v3013_v51, %s6325_s4  ;;  %v8528_v3 = vpop.permute.xlu1 %2828  ;;  %v5684_v43 = vadd.f32 %v5683_v40, %v5682_v28  ;;  %v8547_v12 = vcombine.low %v5327_v0, %v8525_v41  ;;  %v2678_v51 = vrot.slane %v2676_v53, 1  ;;  %v2681_v50 = vrot.slane %v2679_v22, 2  ;;  %v6269_v23 = vld [vmem:[%s6387_s24 + $0x44] ss:$0 sps:$4 sm:$0x11]  }
 0x1a5   : > { %v3599_v13 = vsel %vm521_vm1, %v3595_v8, %v3598_v61  ;;  %v3117_v11 = vsel %vm658_vm0, %v9074_v32, %v9073_v31  ;;  %v8544_v19 = vadd.f32 %v5711_v62, %v8240_v57  ;;  %v5685_v37 = vpop.f32.mrf.mxu0  ;;  %v8553_v48 = vcombine.low %v5343_v45, %v8322_v39  ;;  %v5356_v39 = vld [vmem:[%s6387_s24 + $0x54] sm:$0xc]  ;;  %v8571_v45 = vld [vmem:[%s6387_s24 + $0x80] ss:$0 sps:$4 sm:$0x11]  }
 0x1a6   : > { %2444 = vrot.lane.b32.xlu1 %v2403_v49, %s6321_s7  ;;  %4871 = vmatmul.mubr.bf16.gmra.mxu1 %v3599_v13  ;;  %v3049_v24 = vpop.permute.xlu0 %3048  ;;  %v8550_v17 = vadd.f32 %v5684_v43, %v8240_v57  ;;  %v8556_v28 = vcombine.low %v5294_v38, %v8388_v59  ;;  %v8559_v18 = vrot.slane %v2684_v7, 1  ;;  %v2689_v8 = vrot.slane %v2687_v35, 2 }
 0x1a7   : > { %9075 = vst [vmem:[#allocation7_spill] sm:$0xff] %v8544_v19  ;;  %v5686_v49 = vpop.f32.mrf.mxu0  ;;  %v3230_v0 = vsel %vm723_vm2, %v3221_v56, %v3229_v25  ;;  %v3014_v53 = vshrl.u32 %v8374_v47, 16  ;;  %v2814_v59 = vshrl.u32 %v8547_v12, 16  ;;  %v2682_v7 = vor.u32 %v2681_v50, %v2678_v51 }
 0x1a8   : > { %3144 = vrot.lane.b32.xlu0 %v3117_v11, %s6326_s5  ;;  %v2429_v61 = vpop.permute.xlu1 %2428  ;;  %v5687_v62 = vadd.f32 %v5686_v49, %v5685_v37  ;;  %v3019_v35 = vshll.u32 %v8553_v48, 16  ;;  %v3665_v56 = vshll.u32 %v3230_v0, 16  ;;  %v3489_v25 = vsel %vm2074_vm9, %v8452_v29, %v3049_v24  ;;  %v6268_v11 = vld [vmem:[%s6387_s24 + $0x58] sm:$0xf] }
 0x1a9   : > { %v2690_v38 = vor.u32 %v2689_v8, %v8559_v18  ;;  %v2497_v43 = vrot.slane %v8556_v28, 1  ;;  %v9066_v13 = vrot.slane %v8497_v2, 1  ;;  %v2817_v32 = vshll.u32 %v8547_v12, 16  ;;  %v8597_v49 = vld [vmem:[%s6387_s24 + $0x80] ss:$0 sps:$4 sm:$0x11]  }
 0x1aa   : > { %2718 = vrot.lane.b32.xlu1 %v8355_v36, %s6322_s11  ;;  %v3129_v22 = vpop.permute.xlu0 %3128  ;;  %v8568_v40 = vadd.f32 %v5687_v62, %v8240_v57  ;;  %v9076_v36 = vrot.slane %v8299_v6, 1  ;;  %v3024_v29 = vshll.u32 %v8571_v45, 16  ;;  %v8587_v37 = vcombine.low %v5356_v39, %v6268_v11  ;;  %v8589_v6 = vpop.f32.mrf.mxu1 }
 0x1ab   : > { %v3521_v31 = vsel %vm2091_vm10, %v3489_v25, %v3129_v22  ;;  %9077 = vst [vmem:[#allocation8_spill] sm:$0xff] %v8589_v6  ;;  %v8593_v51 = vrot.slane %v2814_v59, 7  ;;  %v3017_v50 = vshrl.u32 %v8553_v48, 16  ;;  %v2409_v8 = vshll.u32 %v8556_v28, 16 }
 0x1ac   : > { %2526 = vrot.lane.b32.xlu0 %v9076_v36, %s6320_s29  ;;  %v2703_v47 = vpop.permute.xlu1 %2702  ;;  %v3021_v62 = vrot.slane %v3019_v35, 1  ;;  %v3667_v22 = vrot.slane %v3665_v56, 1  ;;  %v3670_v25 = vshll.u32 %v8492_v15, 16  ;;  %v3612_v36 = vshll.u32 %v3521_v31, 16  ;;  %v9078_v35 = vld [vmem:[#allocation2_spill] sm:$0xff] }
 0x1ad   : > { %v2404_v11 = vshrl.u32 %v8415_v33, 16  ;;  %v2691_v59 = vsel %vm723_vm2, %v2682_v7, %v2690_v38  ;;  %v8608_v6 = vsel %vm658_vm0, %v2497_v43, %v9066_v13  ;;  %v3328_v15 = vsel %vm1973_vm5, %v9078_v35, %v2429_v61  ;;  %v8623_v38 = vpop.f32.mrf.mxu1 }
 0x1ae   : > { %3066 = vrot.lane.b32.xlu1 %v3014_v53, %s6325_s4  ;;  %v8591_v24 = vpop.permute.xlu0 %2510  ;;  %v3663_v53 = vshrl.u32 %v3230_v0, 16  ;;  %v3397_v0 = vsel %vm2015_vm4, %v8517_v27, %v8506_v4  ;;  %v8618_v56 = vrot.slane %v3024_v29, 1  ;;  %v2407_v33 = vshrl.u32 %v8556_v28, 16  ;;  %9080 = vst [vmem:[#allocation2_spill] sm:$0xff] %v8623_v38 }
 0x1af   : > { %v3429_v7 = vsel %vm2032_vm6, %v3397_v0, %v8528_v3  ;;  %v8628_v4 = vor.u32 %v2817_v32, %v8593_v51  ;;  %v2411_v13 = vrot.slane %v2409_v8, 1  ;;  %v2414_v61 = vshll.u32 %v8597_v49, 16 }
 0x1b0   : > { %2900 = vrot.lane.b32.xlu0 %v8339_v46, %s6323_s21  ;;  %v3051_v39 = vpop.permute.xlu1 %3050  ;;  %v9079_v46 = vrot.slane %v8426_v21, 1  ;;  %v3022_v29 = vor.u32 %v3021_v62, %v3017_v50  ;;  %v3672_v19 = vrot.slane %v3670_v25, 1  ;;  %v8635_v28 = vsel %vm1990_vm8, %v3328_v15, %v8517_v27 }
 0x1b1   : > { %v3614_v3 = vrot.slane %v3612_v36, 1  ;;  %v3491_v0 = vsel %vm2074_vm9, %v8474_v52, %v3051_v39  ;;  %v3232_v50 = vshrl.u32 %v8587_v37, 16  ;;  %v3235_v62 = vshll.u32 %v8587_v37, 16 }
 0x1b2   : > { %3146 = vrot.lane.b32.xlu1 %v9079_v46, %s6326_s5  ;;  %v8625_v43 = vpop.permute.xlu0 %2884  ;;  %v3668_v46 = vor.u32 %v3667_v22, %v3663_v53  ;;  %v3240_v27 = vshrl.u32 %v8148_v30, 16  ;;  %v3610_v53 = vshrl.u32 %v3521_v31, 16  ;;  %v8647_v22 = vpop.f32.mrf.mxu1  ;;  %v2412_v36 = vor.u32 %v2411_v13, %v2407_v33 }
 0x1b3   : > { %v3461_v35 = vsel %vm2049_vm7, %v3429_v7, %v8625_v43  ;;  %9081 = vst [vmem:[#allocation9_spill] sm:$0xff] %v8647_v22  ;;  %v3634_v39 = vshll.u32 %v8635_v28, 16  ;;  %v3399_v15 = vsel %vm2015_vm4, %v8591_v24, %v2703_v47  ;;  %v3234_v33 = vrot.slane %v3232_v50, 1 }
 0x1b4   : > { %v3644_v38 = vshll.u32 %v3461_v35, 16  ;;  %2846 = vrot.lane.b32.xlu0 %v8381_v10, %s6324_s25  ;;  %v3131_v32 = vpop.permute.xlu1 %3130  ;;  %v3243_v10 = vshll.u32 %v8148_v30, 16  ;;  %v8653_v7 = vpop.f32.mrf.mxu0  ;;  %v3673_v37 = vsel %vm521_vm1, %v3668_v46, %v3672_v19  ;;  %v8661_v30 = vld [vmem:[%s6387_s24 + $0x80] ss:$0 sps:$4 sm:$0x33]   ;;  %v3237_v19 = vrot.slane %v3235_v62, 2 }
 0x1b5   : > { %v3523_v8 = vsel %vm2091_vm10, %v3491_v0, %v3131_v32  ;;  %9082 = vst [vmem:[#allocation10_spill] sm:$0xff] %v8653_v7  ;;  %v2416_v0 = vrot.slane %v2414_v61, 1  ;;  %v3615_v32 = vor.u32 %v3614_v3, %v3610_v53  ;;  %v8666_v61 = vrot.slane %v3240_v27, 1 }
 0x1b6   : > { %2902 = vrot.lane.b32.xlu1 %v8571_v45, %s6323_s21  ;;  %v3616_v52 = vshll.u32 %v3523_v8, 16  ;;  %v2831_v25 = vpop.permute.xlu0 %2830  ;;  %v3646_v31 = vrot.slane %v3644_v38, 1  ;;  %v8668_v38 = vpop.f32.mrf.mxu1  ;;  %v3642_v46 = vshrl.u32 %v3461_v35, 16 }
 0x1b7   : > { %v3431_v8 = vsel %vm2032_vm6, %v3399_v15, %v2831_v25  ;;  %v3245_v25 = vrot.slane %v3243_v10, 2  ;;  %v3636_v15 = vrot.slane %v3634_v39, 1  ;;  %v8672_v7 = vpop.f32.mrf.mxu0  ;;  %v3119_v10 = vrot.slane %v8661_v30, 1 }
 0x1b8   : > { %v3618_v22 = vrot.slane %v3616_v52, 1  ;;  %2446 = vrot.lane.b32.xlu0 %v2404_v11, %s6321_s7  ;;  %v8658_v13 = vpop.permute.xlu1 %2886  ;;  %v5344_v52 = vld [vmem:[%s6387_s24 + $0x84] sm:$0xe]  ;;  %v3647_v50 = vor.u32 %v3646_v31, %v3642_v46 }
 0x1b9   : > { %v3463_v47 = vsel %vm2049_vm7, %v3431_v8, %v8658_v13  ;;  %v8700_v46 = vpop.f32.mrf.mxu0 }
 0x1ba   : > { %2720 = vrot.lane.b32.xlu1 %v2691_v59, %s6322_s11  ;;  %v3648_v3 = vshll.u32 %v3463_v47, 16  ;;  %v2431_v53 = vpop.permute.xlu0 %2430  ;;  %v3619_v11 = vsel %vm521_vm1, %v3615_v32, %v3618_v22  ;;  %v3118_v59 = vrot.slane %v8553_v48, 1  ;;  %v3027_v48 = vsel %vm521_vm1, %v3022_v29, %v8618_v56 }
 0x1bb   : > { %v3330_v8 = vsel %vm1973_vm5, %v6269_v23, %v2431_v53  ;;  %4968 = vmatmul.mubr.bf16.gmra.mxu0 %v3619_v11  ;;  %v5734_v27 = vpop.f32.mrf.mxu1  ;;  %v3632_v23 = vshrl.u32 %v8635_v28, 16  ;;  %v2417_v47 = vsel %vm521_vm1, %v2412_v36, %v2416_v0  ;;  %v3246_v28 = vor.u32 %v3245_v25, %v8666_v61 }
 0x1bc   : > { %v3650_v62 = vrot.slane %v3648_v3, 1  ;;  %v3367_v35 = vsel %vm1990_vm8, %v3330_v8, %v8591_v24  ;;  %2528 = vrot.lane.b32.xlu0 %v8608_v6, %s6320_s29  ;;  %v8681_v22 = vpop.permute.xlu1 %2704  ;;  %5639 = vmatprep.mubr.msk.bf16.mxu0 %vm1973_vm5, %v3673_v37  ;;  %v8691_v24 = vcombine.low %v5344_v52, %v8525_v41  ;;  %v3238_v37 = vor.u32 %v3237_v19, %v3234_v33 }
 0x1bd   : > { %v3638_v39 = vshll.u32 %v3367_v35, 16  ;;  %v5735_v32 = vpop.f32.mrf.mxu1  ;;  %v3637_v41 = vor.u32 %v3636_v15, %v3632_v23  ;;  %v3120_v0 = vsel %vm658_vm0, %v3118_v59, %v3119_v10  ;;  %v4585_v25 = vadd.f32 %v8379_v5, %v8240_v57  ;;  %v8714_v15 = vpop.f32.mrf.mxu0 }
 0x1be   : > { %2848 = vrot.lane.b32.xlu1 %v8628_v4, %s6324_s25  ;;  %v8693_v6 = vpop.permute.xlu0 %2512  ;;  %v3651_v31 = vsel %vm521_vm1, %v3647_v50, %v3650_v62  ;;  %v4582_v4 = vadd.f32 %v8359_v1, %v8240_v57  ;;  %v5736_v29 = vadd.f32 %v5735_v32, %v5734_v27  ;;  %v8709_v1 = vld [vmem:[%s6387_s24 + $0x8c] ss:$0 sps:$4 sm:$0x11]   ;;  %v3033_v33 = vshll.u32 %v8691_v24, 16 }
 0x1bf   : > { %v3640_v56 = vrot.slane %v3638_v39, 1  ;;  %4878 = vmatprep.mubr.bf16.mxu1 %v3651_v31  ;;  %v5737_v3 = vpop.f32.mrf.mxu1  ;;  %v3247_v50 = vsel %vm723_vm2, %v3238_v37, %v3246_v28  ;;  %v3028_v59 = vshrl.u32 %v8571_v45, 16  ;;  %v3031_v23 = vshrl.u32 %v8691_v24, 16  ;;  %v8724_v32 = vld [vmem:[%s6387_s24 + $0x8c] ss:$0 sps:$4 sm:$0x33]  }
 0x1c0   : > { %3068 = vrot.lane.b32.xlu0 %v3027_v48, %s6325_s4  ;;  %v2833_v53 = vpop.permute.xlu1 %2832  ;;  %v4679_v11 = vadd.f32 %v5736_v29, %v4582_v4  ;;  %v3035_v39 = vrot.slane %v3033_v33, 1  ;;  %v3038_v5 = vshll.u32 %v8709_v1, 16  ;;  %v3707_v31 = vshll.u32 %v3247_v50, 16 }
 0x1c1   : > { %v3641_v36 = vsel %vm521_vm1, %v3637_v41, %v3640_v56  ;;  %v5738_v19 = vpop.f32.mrf.mxu1  ;;  %v9083_v4 = vrot.slane %v8497_v2, 1  ;;  %v5357_v56 = vld [vmem:[%s6387_s24 + $0x60] sm:$0xc]  ;;  %v3122_v33 = vrot.slane %v8724_v32, 1 }
 0x1c2   : > { %2448 = vrot.lane.b32.xlu1 %v2417_v47, %s6321_s7  ;;  %4879 = vmatmul.mubr.bf16.gmra.mxu1 %v3641_v36  ;;  %v3053_v52 = vpop.permute.xlu0 %3052  ;;  %v5739_v8 = vadd.f32 %v5738_v19, %v5737_v3  ;;  %v3036_v41 = vor.u32 %v3035_v39, %v3031_v23  ;;  %v3040_v3 = vrot.slane %v3038_v5, 1  ;;  %v3121_v36 = vrot.slane %v8691_v24, 1 }
 0x1c3   : > { %v3493_v47 = vsel %vm2074_vm9, %v8625_v43, %v3053_v52  ;;  %v3705_v19 = vshrl.u32 %v3247_v50, 16  ;;  %v3709_v52 = vrot.slane %v3707_v31, 1  ;;  %v3401_v24 = vsel %vm2015_vm4, %v8693_v6, %v8681_v22 }
 0x1c4   : > { %3148 = vrot.lane.b32.xlu0 %v3120_v0, %s6326_s5  ;;  %v2433_v62 = vpop.permute.xlu1 %2432  ;;  %v4682_v35 = vadd.f32 %v5739_v8, %v4585_v25  ;;  %v5798_v27 = vpop.f32.mrf.mxu0  ;;  %v3712_v8 = vshll.u32 %v8666_v61, 16  ;;  %v2418_v61 = vshrl.u32 %v8597_v49, 16  ;;  %v3041_v23 = vsel %vm521_vm1, %v3036_v41, %v3040_v3 }
 0x1c5   : > { %v3433_v39 = vsel %vm2032_vm6, %v3401_v24, %v2833_v53  ;;  %v3123_v22 = vsel %vm658_vm0, %v3121_v36, %v3122_v33 }
 0x1c6   : > { %2722 = vrot.lane.b32.xlu1 %v8559_v18, %s6322_s11  ;;  %v3133_v48 = vpop.permute.xlu0 %3132  ;;  %v5799_v37 = vpop.f32.mrf.mxu0 }
 0x1c7   : > { %v3525_v45 = vsel %vm2091_vm10, %v3493_v47, %v3133_v48  ;;  %v5800_v28 = vadd.f32 %v5799_v37, %v5798_v27  ;;  %v6270_v27 = vld [vmem:[%s6387_s24 + $0x64] sm:$0xf]  ;;  %v3714_v37 = vrot.slane %v3712_v8, 1 }
 0x1c8   : > { %2530 = vrot.lane.b32.xlu0 %v9083_v4, %s6320_s29  ;;  %v2707_v18 = vpop.permute.xlu1 %2706  ;;  %v5801_v29 = vpop.f32.mrf.mxu0  ;;  %v3654_v2 = vshll.u32 %v3525_v45, 16  ;;  %v5557_v48 = vcombine.low %v5357_v56, %v6270_v27  ;;  %s5156_s29 = sshll.u32 %s9104_s13, 5 }
 0x1c9   : > { %v8735_v0 = vadd.f32 %v5800_v28, %v4679_v11  ;;  %v3333_v11 = vsel %vm1973_vm5, %v7064_v42, %v2433_v62  ;;  %v3710_v42 = vor.u32 %v3709_v52, %v3705_v19  ;;  %v4590_v62 = vadd.f32 %v8476_v14, %v8240_v57 }
 0x1ca   : > { %3070 = vrot.lane.b32.xlu1 %v3028_v59, %s6325_s4  ;;  %v8737_v43 = vpop.permute.xlu0 %2514  ;;  %v5802_v25 = vpop.f32.mrf.mxu0  ;;  %v3656_v31 = vrot.slane %v3654_v2, 1  ;;  %v3369_v53 = vsel %vm1990_vm8, %v3333_v11, %v8693_v6  ;;  %v3249_v3 = vshrl.u32 %v5557_v48, 16  ;;  %v3252_v36 = vshll.u32 %v5557_v48, 16 }
 0x1cb   : > { %v5803_v47 = vadd.f32 %v5802_v25, %v5801_v29  ;;  %v3652_v29 = vshrl.u32 %v3525_v45, 16  ;;  %v3260_v2 = vshll.u32 %v8268_v63, 16  ;;  %v3676_v25 = vshll.u32 %v3369_v53, 16 }
 0x1cc   : > { %2904 = vrot.lane.b32.xlu0 %v8547_v12, %s6323_s21  ;;  %v3055_v59 = vpop.permute.xlu1 %3054  ;;  %v5740_v50 = vpop.f32.mrf.mxu1  ;;  %v3403_v8 = vsel %vm2015_vm4, %v8737_v43, %v2707_v18  ;;  %v3254_v18 = vrot.slane %v3252_v36, 2 }
 0x1cd   : > { %v8755_v12 = vadd.f32 %v5803_v47, %v4682_v35  ;;  %v3495_v35 = vsel %vm2074_vm9, %v8658_v13, %v3055_v59  ;;  %v3257_v13 = vshrl.u32 %v8268_v63, 16  ;;  %v3657_v45 = vor.u32 %v3656_v31, %v3652_v29 }
 0x1ce   : > { %3150 = vrot.lane.b32.xlu1 %v3119_v10, %s6326_s5  ;;  %v8757_v5 = vpop.permute.xlu0 %2888  ;;  %v5741_v10 = vpop.f32.mrf.mxu1 }
 0x1cf   : > { %v3465_v49 = vsel %vm2049_vm7, %v3433_v39, %v8757_v5  ;;  %v5742_v4 = vadd.f32 %v5741_v10, %v5740_v50 }
 0x1d0   : > { %v3686_v28 = vshll.u32 %v3465_v49, 16  ;;  %2850 = vrot.lane.b32.xlu0 %v8593_v51, %s6324_s25  ;;  %v3135_v56 = vpop.permute.xlu1 %3134  ;;  %v5743_v14 = vpop.f32.mrf.mxu1  ;;  %v4593_v51 = vadd.f32 %v8502_v9, %v8240_v57  ;;  %v3715_v57 = vsel %vm521_vm1, %v3710_v42, %v3714_v37  ;;  %v3251_v9 = vrot.slane %v3249_v3, 1 }
 0x1d1   : > { %v3527_v41 = vsel %vm2091_vm10, %v3495_v35, %v3135_v56  ;;  %v4687_v19 = vadd.f32 %v5742_v4, %v4590_v62  ;;  %v3684_v50 = vshrl.u32 %v3465_v49, 16  ;;  %v3678_v35 = vrot.slane %v3676_v25, 1 }
 0x1d2   : > { %2906 = vrot.lane.b32.xlu1 %v8709_v1, %s6323_s21  ;;  %v3658_v6 = vshll.u32 %v3527_v41, 16  ;;  %v2835_v52 = vpop.permute.xlu0 %2834  ;;  %v5744_v27 = vpop.f32.mrf.mxu1  ;;  %v3688_v47 = vrot.slane %v3686_v28, 1  ;;  %v6271_v28 = vld [vmem:[%s6387_s24 + $0x50] ss:$0 sps:$4 sm:$0x11]   ;;  %v3259_v4 = vrot.slane %v3257_v13, 1 }
 0x1d3   : > { %v3435_v48 = vsel %vm2032_vm6, %v3403_v8, %v2835_v52  ;;  %v5745_v24 = vadd.f32 %v5744_v27, %v5743_v14  ;;  %v3262_v56 = vrot.slane %v3260_v2, 2  ;;  %v3042_v49 = vshrl.u32 %v8709_v1, 16 }
 0x1d4   : > { %v3660_v59 = vrot.slane %v3658_v6, 1  ;;  %2450 = vrot.lane.b32.xlu0 %v2418_v61, %s6321_s7  ;;  %v8783_v11 = vpop.permute.xlu1 %2890  ;;  %v3689_v29 = vor.u32 %v3688_v47, %v3684_v50  ;;  %v3674_v37 = vshrl.u32 %v3369_v53, 16 }
 0x1d5   : > { %v3467_v63 = vsel %vm2049_vm7, %v3435_v48, %v8783_v11  ;;  %v4690_v39 = vadd.f32 %v5745_v24, %v4593_v51  ;;  %v3263_v2 = vor.u32 %v3262_v56, %v3259_v4  ;;  %v3754_v56 = vshll.u32 %v3259_v4, 16 }
 0x1d6   : > { %3152 = vrot.lane.b32.xlu1 %v3123_v22, %s6326_s5  ;;  %v3690_v62 = vshll.u32 %v3467_v63, 16  ;;  %v2435_v31 = vpop.permute.xlu0 %2434  ;;  %v3661_v10 = vsel %vm521_vm1, %v3657_v45, %v3660_v59 }
 0x1d7   : > { %v3335_v61 = vsel %vm1973_vm5, %v6271_v28, %v2435_v31  ;;  %4976 = vmatmul.mubr.bf16.gmra.mxu0 %v3661_v10 }
 0x1d8   : > { %v3692_v14 = vrot.slane %v3690_v62, 1  ;;  %v3371_v22 = vsel %vm1990_vm8, %v3335_v61, %v8737_v43  ;;  %3072 = vrot.lane.b32.xlu0 %v3041_v23, %s6325_s4  ;;  %v2709_v42 = vpop.permute.xlu1 %2708  ;;  %5640 = vmatprep.mubr.msk.bf16.mxu0 %vm1973_vm5, %v3715_v57  ;;  %v5804_v3 = vpop.f32.mrf.mxu0  ;;  %v3679_v43 = vor.u32 %v3678_v35, %v3674_v37  ;;  %v3255_v23 = vor.u32 %v3254_v18, %v3251_v9 }
 0x1d9   : > { %v3680_v41 = vshll.u32 %v3371_v22, 16  ;;  %v5358_v22 = vld [vmem:[%s6387_s24 + $0x6c] sm:$0xc] }
 0x1da   : > { %3154 = vrot.lane.b32.xlu1 %v3122_v33, %s6326_s5  ;;  %v2517_v36 = vpop.permute.xlu0 %2516  ;;  %v3693_v6 = vsel %vm521_vm1, %v3689_v29, %v3692_v14  ;;  %v5805_v13 = vpop.f32.mrf.mxu0  ;;  %v3264_v27 = vsel %vm723_vm2, %v3255_v23, %v3263_v2 }
 0x1db   : > { %v3682_v52 = vrot.slane %v3680_v41, 1  ;;  %4886 = vmatprep.mubr.bf16.mxu1 %v3693_v6  ;;  %v5806_v51 = vadd.f32 %v5805_v13, %v5804_v3  ;;  %v3749_v9 = vshll.u32 %v3264_v27, 16  ;;  %v3747_v61 = vshrl.u32 %v3264_v27, 16 }
 0x1dc   : > { %3074 = vrot.lane.b32.xlu0 %v3042_v49, %s6325_s4  ;;  %v2837_v1 = vpop.permute.xlu1 %2836  ;;  %v5807_v53 = vpop.f32.mrf.mxu0  ;;  %v3405_v37 = vsel %vm2015_vm4, %v2517_v36, %v2709_v42  ;;  %v3756_v13 = vrot.slane %v3754_v56, 1  ;;  %v3274_v56 = vshrl.u32 %v8426_v21, 16 }
 0x1dd   : > { %v3683_v25 = vsel %vm521_vm1, %v3679_v43, %v3682_v52  ;;  %v8803_v45 = vadd.f32 %v5806_v51, %v4687_v19  ;;  %v6272_v43 = vld [vmem:[%s6387_s24 + $0x70] sm:$0xf] }
 0x1de   : > { %4887 = vmatmul.mubr.bf16.gmra.mxu1 %v3683_v25  ;;  %v3057_v33 = vpop.permute.xlu0 %3056  ;;  %v5808_v8 = vpop.f32.mrf.mxu0  ;;  %v5558_v4 = vcombine.low %v5358_v22, %v6272_v43 }
 0x1df   : > { %v5809_v47 = vadd.f32 %v5808_v8, %v5807_v53  ;;  %v5746_v59 = vpop.f32.mrf.mxu1  ;;  %v3497_v18 = vsel %vm2074_vm9, %v8757_v5, %v3057_v33 }
 0x1e0   : > { %v2437_v48 = vpop.permute.xlu1 %2436 }
 0x1e1   : > { %v8806_v24 = vadd.f32 %v5809_v47, %v4690_v39  ;;  %v5747_v63 = vpop.f32.mrf.mxu1  ;;  %v3751_v39 = vrot.slane %v3749_v9, 1  ;;  %v3338_v5 = vsel %vm1973_vm5, %v7237_v44, %v2437_v48 }
 0x1e2   : > { %v3137_v57 = vpop.permute.xlu0 %3136  ;;  %v5748_v50 = vadd.f32 %v5747_v63, %v5746_v59  ;;  %v3373_v42 = vsel %vm1990_vm8, %v3338_v5, %v2517_v36 }
 0x1e3   : > { %v3529_v19 = vsel %vm2091_vm10, %v3497_v18, %v3137_v57  ;;  %v5749_v62 = vpop.f32.mrf.mxu1  ;;  %v3752_v52 = vor.u32 %v3751_v39, %v3747_v61  ;;  %v3718_v63 = vshll.u32 %v3373_v42, 16  ;;  %v3266_v18 = vshrl.u32 %v5558_v4, 16 }
 0x1e4   : > { %v2711_v31 = vpop.permute.xlu1 %2710  ;;  %v4695_v10 = vadd.f32 %v5748_v50, %v8550_v17  ;;  %v3696_v29 = vshll.u32 %v3529_v19, 16  ;;  %v3437_v17 = vsel %vm2032_vm6, %v3405_v37, %v2837_v1  ;;  %v3694_v1 = vshrl.u32 %v3529_v19, 16 }
 0x1e5   : > { %v5750_v35 = vpop.f32.mrf.mxu1  ;;  %v3757_v48 = vsel %vm521_vm1, %v3752_v52, %v3756_v13  ;;  %v3269_v39 = vshll.u32 %v5558_v4, 16  ;;  %v3720_v5 = vrot.slane %v3718_v63, 1 }
 0x1e6   : > { %v2519_v28 = vpop.permute.xlu0 %2518  ;;  %v5751_v14 = vadd.f32 %v5750_v35, %v5749_v62  ;;  %v3698_v23 = vrot.slane %v3696_v29, 1  ;;  %v3277_v29 = vshll.u32 %v8426_v21, 16  ;;  %v3716_v21 = vshrl.u32 %v3373_v42, 16 }
 0x1e7   : > { %v3407_v36 = vsel %vm2015_vm4, %v2519_v28, %v2711_v31 }
 0x1e8   : > { %v3059_v49 = vpop.permute.xlu1 %3058  ;;  %v4698_v41 = vadd.f32 %v5751_v14, %v8568_v40  ;;  %v5810_v3 = vpop.f32.mrf.mxu0  ;;  %v3699_v57 = vor.u32 %v3698_v23, %v3694_v1 }
 0x1e9   : > { %v3499_v44 = vsel %vm2074_vm9, %v8783_v11, %v3059_v49 }
 0x1ea   : > { %v8818_v6 = vpop.permute.xlu0 %2892  ;;  %v5811_v51 = vpop.f32.mrf.mxu0 }
 0x1eb   : > { %v3469_v2 = vsel %vm2049_vm7, %v3437_v17, %v8818_v6  ;;  %v5812_v53 = vadd.f32 %v5811_v51, %v5810_v3  ;;  %v6273_v3 = vld [vmem:[%s6387_s24 + $0x5c] ss:$0 sps:$4 sm:$0x11]  }
 0x1ec   : > { %v3728_v40 = vshll.u32 %v3469_v2, 16  ;;  %v3139_v25 = vpop.permute.xlu1 %3138  ;;  %v5813_v33 = vpop.f32.mrf.mxu0  ;;  %v3726_v31 = vshrl.u32 %v3469_v2, 16 }
 0x1ed   : > { %v3531_v8 = vsel %vm2091_vm10, %v3499_v44, %v3139_v25  ;;  %v8827_v27 = vadd.f32 %v5812_v53, %v4695_v10  ;;  %v3268_v44 = vrot.slane %v3266_v18, 1 }
 0x1ee   : > { %v3700_v47 = vshll.u32 %v3531_v8, 16  ;;  %v2839_v59 = vpop.permute.xlu0 %2838  ;;  %v5814_v9 = vpop.f32.mrf.mxu0  ;;  %v3730_v11 = vrot.slane %v3728_v40, 1  ;;  %v3271_v40 = vrot.slane %v3269_v39, 2  ;;  %v3279_v8 = vrot.slane %v3277_v29, 2 }
 0x1ef   : > { %v3439_v19 = vsel %vm2032_vm6, %v3407_v36, %v2839_v59  ;;  %v5815_v62 = vadd.f32 %v5814_v9, %v5813_v33  ;;  %v3276_v33 = vrot.slane %v3274_v56, 1  ;;  %v5359_v56 = vld [vmem:[%s6387_s24 + $0x78] sm:$0xc] }
 0x1f0   : > { %v3702_v50 = vrot.slane %v3700_v47, 1  ;;  %v8832_v35 = vpop.permute.xlu1 %2894  ;;  %v3731_v13 = vor.u32 %v3730_v11, %v3726_v31  ;;  %v3272_v9 = vor.u32 %v3271_v40, %v3268_v44 }
 0x1f1   : > { %v5752_v10 = vpop.f32.mrf.mxu1  ;;  %v3471_v61 = vsel %vm2049_vm7, %v3439_v19, %v8832_v35  ;;  %v8838_v14 = vadd.f32 %v5815_v62, %v4698_v41 }
 0x1f2   : > { %v3732_v22 = vshll.u32 %v3471_v61, 16  ;;  %v2439_v49 = vpop.permute.xlu0 %2438  ;;  %v3703_v37 = vsel %vm521_vm1, %v3699_v57, %v3702_v50 }
 0x1f3   : > { %v3340_v17 = vsel %vm1973_vm5, %v6273_v3, %v2439_v49  ;;  %v5753_v52 = vpop.f32.mrf.mxu1  ;;  %4984 = vmatmul.mubr.bf16.gmra.mxu0 %v3703_v37  ;;  %v6274_v3 = vld [vmem:[%s6387_s24 + $0x7c] sm:$0xf] }
 0x1f4   : > { %v3734_v43 = vrot.slane %v3732_v22, 1  ;;  %v3375_v4 = vsel %vm1990_vm8, %v3340_v17, %v2519_v28  ;;  %v5754_v23 = vadd.f32 %v5753_v52, %v5752_v10  ;;  %v2713_v51 = vpop.permute.xlu1 %2712  ;;  %5641 = vmatprep.mubr.msk.bf16.mxu0 %vm1973_vm5, %v3757_v48  ;;  %v3721_v28 = vor.u32 %v3720_v5, %v3716_v21 }
 0x1f5   : > { %v3722_v41 = vshll.u32 %v3375_v4, 16  ;;  %v5755_v2 = vpop.f32.mrf.mxu1  ;;  %v3796_v5 = vshll.u32 %v3276_v33, 16  ;;  %v5559_v17 = vcombine.low %v5359_v56, %v6274_v3 }
 0x1f6   : > { %v4703_v53 = vadd.f32 %v5754_v23, %v8275_v16  ;;  %v2521_v25 = vpop.permute.xlu0 %2520  ;;  %v3735_v1 = vsel %vm521_vm1, %v3731_v13, %v3734_v43  ;;  %v3280_v16 = vor.u32 %v3279_v8, %v3276_v33 }
 0x1f7   : > { %v3724_v47 = vrot.slane %v3722_v41, 1  ;;  %v5756_v59 = vpop.f32.mrf.mxu1  ;;  %4894 = vmatprep.mubr.bf16.mxu1 %v3735_v1  ;;  %v3798_v8 = vrot.slane %v3796_v5, 1 }
 0x1f8   : > { %v5757_v63 = vadd.f32 %v5756_v59, %v5755_v2  ;;  %v2841_v57 = vpop.permute.xlu1 %2840  ;;  %v3281_v19 = vsel %vm723_vm2, %v3272_v9, %v3280_v16 }
 0x1f9   : > { %v3725_v42 = vsel %vm521_vm1, %v3721_v28, %v3724_v47  ;;  %v3791_v31 = vshll.u32 %v3281_v19, 16  ;;  %v3789_v21 = vshrl.u32 %v3281_v19, 16 }
 0x1fa   : > { %v4706_v48 = vadd.f32 %v5757_v63, %v8291_v34  ;;  %4895 = vmatmul.mubr.bf16.gmra.mxu1 %v3725_v42  ;;  %v3061_v36 = vpop.permute.xlu0 %3060 }
 0x1fb   : > { %v3501_v10 = vsel %vm2074_vm9, %v8818_v6, %v3061_v36  ;;  %v3409_v6 = vsel %vm2015_vm4, %v2521_v25, %v2713_v51  ;;  %v3793_v41 = vrot.slane %v3791_v31, 1  ;;  %v3283_v36 = vshrl.u32 %v5559_v17, 16 }
 0x1fc   : > { %v2441_v18 = vpop.permute.xlu1 %2440  ;;  %v3441_v2 = vsel %vm2032_vm6, %v3409_v6, %v2841_v57  ;;  %v6275_v6 = vld [vmem:[%s6387_s24 + $0x68] ss:$0 sps:$4 sm:$0x11]  }
 0x1fd   : > { %v5816_v11 = vpop.f32.mrf.mxu0  ;;  %v3343_v23 = vsel %vm1973_vm5, %v7360_v58, %v2441_v18 }
 0x1fe   : > { %v3141_v50 = vpop.permute.xlu0 %3140  ;;  %v3377_v47 = vsel %vm1990_vm8, %v3343_v23, %v2521_v25  ;;  %v3291_v25 = vshrl.u32 %v8661_v30, 16 }
 0x1ff   : > { %v5817_v62 = vpop.f32.mrf.mxu0  ;;  %v3533_v29 = vsel %vm2091_vm10, %v3501_v10, %v3141_v50  ;;  %v3286_v50 = vshll.u32 %v5559_v17, 16  ;;  %v3760_v19 = vshll.u32 %v3377_v47, 16  ;;  %v3294_v10 = vshll.u32 %v8661_v30, 16 }
 0x200   : > { %v5818_v61 = vadd.f32 %v5817_v62, %v5816_v11  ;;  %v2715_v39 = vpop.permute.xlu1 %2714  ;;  %v3738_v52 = vshll.u32 %v3533_v29, 16  ;;  %v3736_v9 = vshrl.u32 %v3533_v29, 16 }
 0x201   : > { %v5819_v34 = vpop.f32.mrf.mxu0 }
 0x202   : > { %v8854_v22 = vadd.f32 %v5818_v61, %v4703_v53  ;;  %v8856_v49 = vpop.permute.xlu0 %2522  ;;  %v3740_v51 = vrot.slane %v3738_v52, 1 }
 0x203   : > { %v5820_v37 = vpop.f32.mrf.mxu0 }
 0x204   : > { %v5821_v13 = vadd.f32 %v5820_v37, %v5819_v34  ;;  %v5758_v43 = vpop.f32.mrf.mxu1  ;;  %v3063_v4 = vpop.permute.xlu1 %3062  ;;  %v3741_v61 = vor.u32 %v3740_v51, %v3736_v9  ;;  %v3758_v51 = vshrl.u32 %v3377_v47, 16 }
 0x205   : > { %v3503_v58 = vsel %vm2074_vm9, %v8832_v35, %v3063_v4  ;;  %v3411_v35 = vsel %vm2015_vm4, %v8856_v49, %v2715_v39  ;;  %v3285_v39 = vrot.slane %v3283_v36, 1  ;;  %v3762_v4 = vrot.slane %v3760_v19, 1 }
 0x206   : > { %v8863_v44 = vadd.f32 %v5821_v13, %v4706_v48  ;;  %v5759_v40 = vpop.f32.mrf.mxu1  ;;  %v8865_v53 = vpop.permute.xlu0 %2896  ;;  %v3794_v48 = vor.u32 %v3793_v41, %v3789_v21  ;;  %v3296_v41 = vrot.slane %v3294_v10, 2 }
 0x207   : > { %v5760_v1 = vadd.f32 %v5759_v40, %v5758_v43  ;;  %v3473_v33 = vsel %vm2049_vm7, %v3441_v2, %v8865_v53  ;;  %v3288_v43 = vrot.slane %v3286_v50, 2  ;;  %v3763_v9 = vor.u32 %v3762_v4, %v3758_v51 }
 0x208   : > { %v3770_v59 = vshll.u32 %v3473_v33, 16  ;;  %v5761_v28 = vpop.f32.mrf.mxu1  ;;  %v3143_v63 = vpop.permute.xlu1 %3142  ;;  %v3799_v3 = vsel %vm521_vm1, %v3794_v48, %v3798_v8  ;;  %v3768_v17 = vshrl.u32 %v3473_v33, 16 }
 0x209   : > { %v4711_v57 = vadd.f32 %v5760_v1, %v8345_v60  ;;  %v3535_v42 = vsel %vm2091_vm10, %v3503_v58, %v3143_v63 }
 0x20a   : > { %v3742_v16 = vshll.u32 %v3535_v42, 16  ;;  %v5762_v18 = vpop.f32.mrf.mxu1  ;;  %v2843_v11 = vpop.permute.xlu0 %2842  ;;  %v3772_v60 = vrot.slane %v3770_v59, 1 }
 0x20b   : > { %v5763_v62 = vadd.f32 %v5762_v18, %v5761_v28  ;;  %v3443_v34 = vsel %vm2032_vm6, %v3411_v35, %v2843_v11  ;;  %v3289_v11 = vor.u32 %v3288_v43, %v3285_v39 }
 0x20c   : > { %v3744_v56 = vrot.slane %v3742_v16, 1  ;;  %v8879_v29 = vpop.permute.xlu1 %2898  ;;  %v3773_v2 = vor.u32 %v3772_v60, %v3768_v17 }
 0x20d   : > { %v4714_v31 = vadd.f32 %v5763_v62, %v8363_v55  ;;  %v5822_v37 = vpop.f32.mrf.mxu0  ;;  %v3475_v5 = vsel %vm2049_vm7, %v3443_v34, %v8879_v29  ;;  %v3293_v55 = vrot.slane %v3291_v25, 1 }
 0x20e   : > { %v3774_v52 = vshll.u32 %v3475_v5, 16  ;;  %v2443_v30 = vpop.permute.xlu0 %2442  ;;  %v3745_v13 = vsel %vm521_vm1, %v3741_v61, %v3744_v56 }
 0x20f   : > { %v3345_v23 = vsel %vm1973_vm5, %v6275_v6, %v2443_v30  ;;  %v5823_v21 = vpop.f32.mrf.mxu0  ;;  %4992 = vmatmul.mubr.bf16.gmra.mxu0 %v3745_v13  ;;  %v5360_v30 = vld [vmem:[%s6387_s24 + $0x84] sm:$0xc]  ;;  %v3838_v6 = vshll.u32 %v3293_v55, 16 }
 0x210   : > { %v3776_v40 = vrot.slane %v3774_v52, 1  ;;  %v3379_v1 = vsel %vm1990_vm8, %v3345_v23, %v8856_v49  ;;  %v5824_v8 = vadd.f32 %v5823_v21, %v5822_v37  ;;  %v2717_v33 = vpop.permute.xlu1 %2716  ;;  %5642 = vmatprep.mubr.msk.bf16.mxu0 %vm1973_vm5, %v3799_v3  ;;  %v3297_v49 = vor.u32 %v3296_v41, %v3293_v55  ;;  %v6276_v41 = vld [vmem:[%s6387_s24 + $0x88] sm:$0xf] }
 0x211   : > { %v3764_v58 = vshll.u32 %v3379_v1, 16  ;;  %v5825_v59 = vpop.f32.mrf.mxu0  ;;  %v3840_v55 = vrot.slane %v3838_v6, 1  ;;  %v6277_v6 = vld [vmem:[%s6387_s24 + $0x74] ss:$0 sps:$4 sm:$0x11]  }
 0x212   : > { %v8891_v28 = vadd.f32 %v5824_v8, %v4711_v57  ;;  %v2525_v63 = vpop.permute.xlu0 %2524  ;;  %v3777_v42 = vsel %vm521_vm1, %v3773_v2, %v3776_v40  ;;  %v3298_v10 = vsel %vm723_vm2, %v3289_v11, %v3297_v49  ;;  %v5560_v2 = vcombine.low %v5360_v30, %v6276_v41 }
 0x213   : > { %v3766_v48 = vrot.slane %v3764_v58, 1  ;;  %v5826_v36 = vpop.f32.mrf.mxu0  ;;  %4902 = vmatprep.mubr.bf16.mxu1 %v3777_v42  ;;  %v3833_v5 = vshll.u32 %v3298_v10, 16  ;;  %v3831_v43 = vshrl.u32 %v3298_v10, 16  ;;  %v3413_v23 = vsel %vm2015_vm4, %v2525_v63, %v2717_v33 }
 0x214   : > { %v5827_v16 = vadd.f32 %v5826_v36, %v5825_v59  ;;  %v2845_v18 = vpop.permute.xlu1 %2844 }
 0x215   : > { %v5764_v50 = vpop.f32.mrf.mxu1  ;;  %v3767_v25 = vsel %vm521_vm1, %v3763_v9, %v3766_v48  ;;  %v3835_v4 = vrot.slane %v3833_v5, 1  ;;  %v3445_v40 = vsel %vm2032_vm6, %v3413_v23, %v2845_v18  ;;  %v3308_v5 = vshrl.u32 %v8724_v32, 16 }
 0x216   : > { %v8895_v19 = vadd.f32 %v5827_v16, %v4714_v31  ;;  %4903 = vmatmul.mubr.bf16.gmra.mxu1 %v3767_v25  ;;  %v3065_v47 = vpop.permute.xlu0 %3064 }
 0x217   : > { %v5765_v57 = vpop.f32.mrf.mxu1  ;;  %v3505_v34 = vsel %vm2074_vm9, %v8865_v53, %v3065_v47  ;;  %v3836_v58 = vor.u32 %v3835_v4, %v3831_v43 }
 0x218   : > { %v5766_v35 = vadd.f32 %v5765_v57, %v5764_v50  ;;  %v2445_v62 = vpop.permute.xlu1 %2444  ;;  %v3300_v50 = vshrl.u32 %v5560_v2, 16 }
 0x219   : > { %v5767_v61 = vpop.f32.mrf.mxu1  ;;  %v3348_v53 = vsel %vm1973_vm5, %v7527_v26, %v2445_v62 }
 0x21a   : > { %v4719_v60 = vadd.f32 %v5766_v35, %v8431_v54  ;;  %v3145_v56 = vpop.permute.xlu0 %3144  ;;  %v3381_v59 = vsel %vm1990_vm8, %v3348_v53, %v2525_v63  ;;  %v3841_v35 = vsel %vm521_vm1, %v3836_v58, %v3840_v55  ;;  %v9084_v58 = vld [vmem:[#allocation6_spill] sm:$0xff] }
 0x21b   : > { %v5768_v37 = vpop.f32.mrf.mxu1  ;;  %v3537_v31 = vsel %vm2091_vm10, %v3505_v34, %v3145_v56  ;;  %v3802_v25 = vshll.u32 %v3381_v59, 16 }
 0x21c   : > { %v5769_v3 = vadd.f32 %v5768_v37, %v5767_v61  ;;  %v2719_v39 = vpop.permute.xlu1 %2718  ;;  %v3780_v13 = vshll.u32 %v3537_v31, 16  ;;  %v3778_v36 = vshrl.u32 %v3537_v31, 16  ;;  %v3303_v37 = vshll.u32 %v5560_v2, 16 }
 0x21d   : > { %v3311_v31 = vshll.u32 %v8724_v32, 16  ;;  %v3804_v4 = vrot.slane %v3802_v25, 1  ;;  %v3800_v32 = vshrl.u32 %v3381_v59, 16 }
 0x21e   : > { %v4722_v17 = vadd.f32 %v5769_v3, %v8456_v20  ;;  %v2527_v52 = vpop.permute.xlu0 %2526  ;;  %v3782_v20 = vrot.slane %v3780_v13, 1 }
 0x21f   : > { %v3415_v57 = vsel %vm2015_vm4, %v2527_v52, %v2719_v39 }
 0x220   : > { %v3067_v54 = vpop.permute.xlu1 %3066  ;;  %v3783_v47 = vor.u32 %v3782_v20, %v3778_v36 }
 0x221   : > { %v5828_v21 = vpop.f32.mrf.mxu0  ;;  %v3507_v33 = vsel %vm2074_vm9, %v8879_v29, %v3067_v54 }
 0x222   : > { %v8909_v1 = vpop.permute.xlu0 %2900 }
 0x223   : > { %v3477_v8 = vsel %vm2049_vm7, %v3445_v40, %v8909_v1  ;;  %v5829_v51 = vpop.f32.mrf.mxu0 }
 0x224   : > { %v3812_v26 = vshll.u32 %v3477_v8, 16  ;;  %v5830_v42 = vadd.f32 %v5829_v51, %v5828_v21  ;;  %v3147_v48 = vpop.permute.xlu1 %3146  ;;  %v3810_v3 = vshrl.u32 %v3477_v8, 16  ;;  %v3302_v8 = vrot.slane %v3300_v50, 1 }
 0x225   : > { %v5831_v9 = vpop.f32.mrf.mxu0  ;;  %v3539_v16 = vsel %vm2091_vm10, %v3507_v33, %v3147_v48  ;;  %v3305_v51 = vrot.slane %v3303_v37, 2  ;;  %v3313_v48 = vrot.slane %v3311_v31, 2 }
 0x226   : > { %v8917_v18 = vadd.f32 %v5830_v42, %v4719_v60  ;;  %v3784_v11 = vshll.u32 %v3539_v16, 16  ;;  %v2847_v49 = vpop.permute.xlu0 %2846  ;;  %v3814_v29 = vrot.slane %v3812_v26, 1  ;;  %v3310_v42 = vrot.slane %v3308_v5, 1 }
 0x227   : > { %v5832_v63 = vpop.f32.mrf.mxu0  ;;  %v3447_v10 = vsel %vm2032_vm6, %v3415_v57, %v2847_v49  ;;  %v9085_v49 = vld [vmem:[#allocation7_spill] sm:$0xff] }
 0x228   : > { %v3786_v62 = vrot.slane %v3784_v11, 1  ;;  %v5833_v61 = vadd.f32 %v5832_v63, %v5831_v9  ;;  %v8922_v56 = vpop.permute.xlu1 %2902  ;;  %v3815_v53 = vor.u32 %v3814_v29, %v3810_v3  ;;  %v3805_v9 = vor.u32 %v3804_v4, %v3800_v32 }
 0x229   : > { %v3479_v60 = vsel %vm2049_vm7, %v3447_v10, %v8922_v56  ;;  %v3314_v57 = vor.u32 %v3313_v48, %v3310_v42  ;;  %v3880_v4 = vshll.u32 %v3310_v42, 16 }
 0x22a   : > { %v5770_v34 = vpop.f32.mrf.mxu1  ;;  %v8928_v39 = vadd.f32 %v5833_v61, %v4722_v17  ;;  %v3816_v30 = vshll.u32 %v3479_v60, 16  ;;  %v2447_v13 = vpop.permute.xlu0 %2446  ;;  %v3787_v43 = vsel %vm521_vm1, %v3783_v47, %v3786_v62  ;;  %v3306_v47 = vor.u32 %v3305_v51, %v3302_v8 }
 0x22b   : > { %v3350_v54 = vsel %vm1973_vm5, %v6277_v6, %v2447_v13  ;;  %5000 = vmatmul.mubr.bf16.gmra.mxu0 %v3787_v43 }
 0x22c   : > { %v5771_v23 = vpop.f32.mrf.mxu1  ;;  %v3818_v21 = vrot.slane %v3816_v30, 1  ;;  %v3383_v41 = vsel %vm1990_vm8, %v3350_v54, %v2527_v52  ;;  %v2721_v2 = vpop.permute.xlu1 %2720  ;;  %5643 = vmatprep.mubr.msk.bf16.mxu0 %vm1973_vm5, %v3841_v35  ;;  %v3315_v29 = vsel %vm723_vm2, %v3306_v47, %v3314_v57  ;;  %v9086_v30 = vld [vmem:[#allocation3_spill] sm:$0xff]  ;;  %v6278_v57 = vld [vmem:[%s6387_s24 + $0x80] ss:$0 sps:$4 sm:$0x11]   ;;  %s5154_s24 = sshll.u32 %s6302_s12, 3 }
 0x22d   : > { %v5772_v40 = vadd.f32 %v5771_v23, %v5770_v34  ;;  %v3806_v17 = vshll.u32 %v3383_v41, 16  ;;  %v3875_v60 = vshll.u32 %v3315_v29, 16  ;;  %v3873_v31 = vshrl.u32 %v3315_v29, 16  ;;  %p188_p6 = scmp.lt.s32.totalorder %s5154_s24, 15 }
 0x22e   : > { %v5773_v20 = vpop.f32.mrf.mxu1  ;;  %v2529_v33 = vpop.permute.xlu0 %2528  ;;  %v3819_v26 = vsel %vm521_vm1, %v3815_v53, %v3818_v21 }
 0x22f   : > { %v8936_v55 = vadd.f32 %v5772_v40, %v9084_v58  ;;  %v3808_v36 = vrot.slane %v3806_v17, 1  ;;  %4910 = vmatprep.mubr.bf16.mxu1 %v3819_v26  ;;  %v3417_v3 = vsel %vm2015_vm4, %v2529_v33, %v2721_v2  ;;  %v3877_v43 = vrot.slane %v3875_v60, 1  ;;  %s9106_s24 = smov (!%p188_p6, %s5154_s24), 15 }
 0x230   : > { %v5774_v52 = vpop.f32.mrf.mxu1  ;;  %v2849_v16 = vpop.permute.xlu1 %2848  ;;  %v3882_v17 = vrot.slane %v3880_v4, 1  ;;  %s5155_s12 = sshll.u32 %s9106_s24, 1 }
 0x231   : > { %v5775_v11 = vadd.f32 %v5774_v52, %v5773_v20  ;;  %v3809_v59 = vsel %vm521_vm1, %v3805_v9, %v3808_v36  ;;  %v3449_v6 = vsel %vm2032_vm6, %v3417_v3, %v2849_v16  ;;  %v3878_v32 = vor.u32 %v3877_v43, %v3873_v31  ;;  %s192_s21 = sadd.s32 %s5156_s29, %s5155_s12 }
 0x232   : > { %4911 = vmatmul.mubr.bf16.gmra.mxu1 %v3809_v59  ;;  %v3069_v50 = vpop.permute.xlu0 %3068  ;;  %s5157_s13 = sshll.u32 %s192_s21, 3 }
 0x233   : > { %v8941_v25 = vadd.f32 %v5775_v11, %v9085_v49  ;;  %v3509_v62 = vsel %vm2074_vm9, %v8909_v1, %v3069_v50  ;;  %v3883_v16 = vsel %vm521_vm1, %v3878_v32, %v3882_v17  ;;  %s8996_s5 = scalar_lea.vmem %s9062_s3, %s5157_s13 }
 0x234   : > { %v2449_v63 = vpop.permute.xlu1 %2448 }
 0x235   : > { %v3353_v13 = vsel %vm1973_vm5, %v9086_v30, %v2449_v63 }
 0x236   : > { %v3149_v35 = vpop.permute.xlu0 %3148  ;;  %v3385_v23 = vsel %vm1990_vm8, %v3353_v13, %v2529_v33 }
 0x237   : > { %v3541_v61 = vsel %vm2091_vm10, %v3509_v62, %v3149_v35  ;;  %v3844_v58 = vshll.u32 %v3385_v23, 16 }
 0x238   : > { %v2723_v10 = vpop.permute.xlu1 %2722  ;;  %v3822_v37 = vshll.u32 %v3541_v61, 16  ;;  %v3820_v20 = vshrl.u32 %v3541_v61, 16 }
 0x239   : > { %v3846_v47 = vrot.slane %v3844_v58, 1 }
 0x23a   : > { %v2531_v34 = vpop.permute.xlu0 %2530  ;;  %v3824_v53 = vrot.slane %v3822_v37, 1  ;;  %v3842_v37 = vshrl.u32 %v3385_v23, 16 }
 0x23b   : > { %v3419_v26 = vsel %vm2015_vm4, %v2531_v34, %v2723_v10 }
 0x23c   : > { %v3071_v5 = vpop.permute.xlu1 %3070  ;;  %v3825_v42 = vor.u32 %v3824_v53, %v3820_v20 }
 0x23d   : > { %v3511_v21 = vsel %vm2074_vm9, %v8922_v56, %v3071_v5 }
 0x23e   : > { %v2905_v54 = vpop.permute.xlu0 %2904 }
 0x23f   : > { %v3481_v1 = vsel %vm2049_vm7, %v3449_v6, %v2905_v54 }
 0x240   : > { %v3854_v41 = vshll.u32 %v3481_v1, 16  ;;  %v3151_v40 = vpop.permute.xlu1 %3150  ;;  %v3852_v11 = vshrl.u32 %v3481_v1, 16 }
 0x241   : > { %v3543_v2 = vsel %vm2091_vm10, %v3511_v21, %v3151_v40 }
 0x242   : > { %v3826_v8 = vshll.u32 %v3543_v2, 16  ;;  %v2851_v51 = vpop.permute.xlu0 %2850  ;;  %v3856_v48 = vrot.slane %v3854_v41, 1 }
 0x243   : > { %v3451_v36 = vsel %vm2032_vm6, %v3419_v26, %v2851_v51 }
 0x244   : > { %v3828_v33 = vrot.slane %v3826_v8, 1  ;;  %v2907_v52 = vpop.permute.xlu1 %2906  ;;  %v3857_v29 = vor.u32 %v3856_v48, %v3852_v11  ;;  %v9088_v48 = vld [vmem:[#allocation2_spill] sm:$0xff] }
 0x245   : > { %v5834_v56 = vpop.f32.mrf.mxu0  ;;  %v3483_v9 = vsel %vm2049_vm7, %v3451_v36, %v2907_v52 }
 0x246   : > { %v3858_v59 = vshll.u32 %v3483_v9, 16  ;;  %v2451_v49 = vpop.permute.xlu0 %2450  ;;  %v3829_v50 = vsel %vm521_vm1, %v3825_v42, %v3828_v33  ;;  %v9087_v42 = vld [vmem:[#allocation8_spill] sm:$0xff] }
 0x247   : > { %v3355_v63 = vsel %vm1973_vm5, %v6278_v57, %v2451_v49  ;;  %v5835_v35 = vpop.f32.mrf.mxu0  ;;  %5008 = vmatmul.mubr.bf16.gmra.mxu0 %v3829_v50  ;;  %v5730_v33 = vadd.f32 %v9088_v48, %v9087_v42  ;;  %v9091_v49 = vld [vmem:[#allocation9_spill] sm:$0xff] }
 0x248   : > { %v3860_v62 = vrot.slane %v3858_v59, 1  ;;  %v3387_v10 = vsel %vm1990_vm8, %v3355_v63, %v2531_v34  ;;  %v5836_v61 = vadd.f32 %v5835_v35, %v5834_v56  ;;  %v3153_v60 = vpop.permute.xlu1 %3152  ;;  %5644 = vmatprep.mubr.msk.bf16.mxu0 %vm1973_vm5, %v3883_v16  ;;  %v3847_v34 = vor.u32 %v3846_v47, %v3842_v37  ;;  %v9089_v56 = vld [vmem:[#allocation4_spill] sm:$0xff]  ;;  %v9090_v16 = vld [vmem:[#allocation10_spill] sm:$0xff]  ;;  %v9092_v63 = vld [vmem:[#allocation5_spill] sm:$0xff] }
 0x249   : > { %v3848_v5 = vshll.u32 %v3387_v10, 16  ;;  %v5837_v31 = vpop.f32.mrf.mxu0  ;;  %v5794_v11 = vadd.f32 %v8672_v7, %v9090_v16  ;;  %v5733_v50 = vadd.f32 %v8668_v38, %v9091_v49 }
 0x24a   : > { %v8966_v3 = vadd.f32 %v5836_v61, %v8936_v55  ;;  %v3073_v30 = vpop.permute.xlu0 %3072  ;;  %v3861_v13 = vsel %vm521_vm1, %v3857_v29, %v3860_v62  ;;  %v5856_v55 = vpop.f32.mrf.mxu1  ;;  %v5797_v62 = vadd.f32 %v8714_v15, %v8700_v46 }
 0x24b   : > { %v3850_v43 = vrot.slane %v3848_v5, 1  ;;  %v3513_v4 = vsel %vm2074_vm9, %v2905_v54, %v3073_v30  ;;  %v5838_v6 = vpop.f32.mrf.mxu0  ;;  %4918 = vmatprep.mubr.bf16.mxu1 %v3861_v13 }
 0x24c   : > { %v3545_v1 = vsel %vm2091_vm10, %v3513_v4, %v3153_v60  ;;  %v5839_v53 = vadd.f32 %v5838_v6, %v5837_v31  ;;  %v3155_v41 = vpop.permute.xlu1 %3154  ;;  %v5857_v51 = vpop.f32.mrf.mxu1 }
 0x24d   : > { %v3864_v21 = vshll.u32 %v3545_v1, 16  ;;  %v3851_v23 = vsel %vm521_vm1, %v3847_v34, %v3850_v43  ;;  %v3862_v20 = vshrl.u32 %v3545_v1, 16  ;;  %v5858_v47 = vadd.f32 %v5857_v51, %v5856_v55 }
 0x24e   : > { %v8974_v40 = vadd.f32 %v5839_v53, %v8941_v25  ;;  %4919 = vmatmul.mubr.bf16.gmra.mxu1 %v3851_v23  ;;  %v3075_v2 = vpop.permute.xlu0 %3074  ;;  %v5859_v25 = vpop.f32.mrf.mxu1 }
 0x24f   : > { %v3866_v32 = vrot.slane %v3864_v21, 1  ;;  %v3515_v54 = vsel %vm2074_vm9, %v2907_v52, %v3075_v2  ;;  %v6279_v52 = vld [vmem:[%s9061_s2] ss:$0 sm:$0xff] }
 0x250   : > { %v3547_v17 = vsel %vm2091_vm10, %v3515_v54, %v3155_v41  ;;  %v4574_v9 = vadd.f32 %v6279_v52, %v9089_v56  ;;  %v5860_v57 = vpop.f32.mrf.mxu1  ;;  %v4577_v35 = vadd.f32 %v6279_v52, %v9092_v63 }
 0x251   : > { %v3868_v8 = vshll.u32 %v3547_v17, 16  ;;  %v3867_v58 = vor.u32 %v3866_v32, %v3862_v20  ;;  %v5861_v61 = vadd.f32 %v5860_v57, %v5859_v25 }
 0x252   : > { %v4671_v59 = vadd.f32 %v5730_v33, %v4574_v9  ;;  %v4674_v10 = vadd.f32 %v5733_v50, %v4577_v35 }
 0x253   : > { %v3870_v26 = vrot.slane %v3868_v8, 1 }
 0x254   : > { %v4768_v29 = vadd.f32 %v5794_v11, %v4671_v59  ;;  %v4771_v38 = vadd.f32 %v5797_v62, %v4674_v10 }
 0x255   : > { %v3871_v36 = vsel %vm521_vm1, %v3867_v58, %v3870_v26 }
 0x256   : > { %5016 = vmatmul.mubr.bf16.gmra.mxu0 %v3871_v36  ;;  %v4865_v60 = vadd.f32 %v5858_v47, %v4768_v29  ;;  %v4868_v31 = vadd.f32 %v5861_v61, %v4771_v38 }
 0x25f   : > { %v4961_v7 = vpop.f32.mrf.mxu0 }
 0x260   : > { %v4962_v37 = vadd.f32 %v4961_v7, %v4865_v60 }
 0x261   : > { %v4963_v5 = vpop.f32.mrf.mxu0 }
 0x262   : > { %5024 = vst.msk [vmem:[%s8996_s5] sm:$0xff] %vm2032_vm6, %v4962_v37 }
 0x263   : > { %v4964_v46 = vpop.f32.mrf.mxu0 }
 0x264   : > { %v4965_v15 = vadd.f32 %v4964_v46, %v4868_v31 }
 0x265   : > { %v4966_v30 = vpop.f32.mrf.mxu0 }
 0x266   : > { %5025 = vst.msk [vmem:[%s8996_s5 + $0x8] sm:$0xff] %vm2032_vm6, %v4965_v15  ;;  %v5862_v13 = vpop.f32.mrf.mxu1 }
 0x268   : > { %v5863_v43 = vpop.f32.mrf.mxu1 }
 0x269   : > { %v5864_v6 = vadd.f32 %v5863_v43, %v5862_v13 }
 0x26a   : > { %v5865_v4 = vpop.f32.mrf.mxu1 }
 0x26b   : > { %v4873_v53 = vadd.f32 %v5864_v6, %v8735_v0 }
 0x26c   : > { %v5866_v34 = vpop.f32.mrf.mxu1 }
 0x26d   : > { %v5867_v1 = vadd.f32 %v5866_v34, %v5865_v4 }
 0x26f   : > { %v4876_v55 = vadd.f32 %v5867_v1, %v8755_v12 }
 0x27b   : > { %v4969_v21 = vpop.f32.mrf.mxu0 }
 0x27c   : > { %v4970_v23 = vadd.f32 %v4969_v21, %v4873_v53 }
 0x27d   : > { %v4971_v41 = vpop.f32.mrf.mxu0 }
 0x27e   : > { %5026 = vst.msk [vmem:[%s8996_s5 + $0x10] sm:$0xff] %vm2032_vm6, %v4970_v23 }
 0x27f   : > { %v4972_v2 = vpop.f32.mrf.mxu0 }
 0x280   : > { %v4973_v32 = vadd.f32 %v4972_v2, %v4876_v55 }
 0x281   : > { %v4974_v54 = vpop.f32.mrf.mxu0 }
 0x282   : > { %5027 = vst.msk [vmem:[%s8996_s5 + $0x18] sm:$0xff] %vm2032_vm6, %v4973_v32  ;;  %v5868_v17 = vpop.f32.mrf.mxu1 }
 0x284   : > { %v5869_v20 = vpop.f32.mrf.mxu1 }
 0x285   : > { %v5870_v51 = vadd.f32 %v5869_v20, %v5868_v17 }
 0x286   : > { %v5871_v8 = vpop.f32.mrf.mxu1 }
 0x287   : > { %v4881_v26 = vadd.f32 %v5870_v51, %v8803_v45 }
 0x288   : > { %v5872_v58 = vpop.f32.mrf.mxu1 }
 0x289   : > { %v5873_v0 = vadd.f32 %v5872_v58, %v5871_v8 }
 0x28b   : > { %v4884_v12 = vadd.f32 %v5873_v0, %v8806_v24 }
 0x297   : > { %v4977_v42 = vpop.f32.mrf.mxu0 }
 0x298   : > { %v4978_v48 = vadd.f32 %v4977_v42, %v4881_v26 }
 0x299   : > { %v4979_v33 = vpop.f32.mrf.mxu0 }
 0x29a   : > { %5028 = vst.msk [vmem:[%s8996_s5 + $0x20] sm:$0xff] %vm2032_vm6, %v4978_v48 }
 0x29b   : > { %v4980_v36 = vpop.f32.mrf.mxu0 }
 0x29c   : > { %v4981_v25 = vadd.f32 %v4980_v36, %v4884_v12 }
 0x29d   : > { %v4982_v52 = vpop.f32.mrf.mxu0 }
 0x29e   : > { %5029 = vst.msk [vmem:[%s8996_s5 + $0x28] sm:$0xff] %vm2032_vm6, %v4981_v25  ;;  %v5874_v56 = vpop.f32.mrf.mxu1 }
 0x2a0   : > { %v5875_v9 = vpop.f32.mrf.mxu1 }
 0x2a1   : > { %v5876_v11 = vadd.f32 %v5875_v9, %v5874_v56 }
 0x2a2   : > { %v5877_v16 = vpop.f32.mrf.mxu1 }
 0x2a3   : > { %v4889_v49 = vadd.f32 %v5876_v11, %v8827_v27 }
 0x2a4   : > { %v5878_v59 = vpop.f32.mrf.mxu1 }
 0x2a5   : > { %v5879_v45 = vadd.f32 %v5878_v59, %v5877_v16 }
 0x2a7   : > { %v4892_v24 = vadd.f32 %v5879_v45, %v8838_v14 }
 0x2b3   : > { %v4985_v50 = vpop.f32.mrf.mxu0 }
 0x2b4   : > { %v4986_v47 = vadd.f32 %v4985_v50, %v4889_v49 }
 0x2b5   : > { %v4987_v57 = vpop.f32.mrf.mxu0 }
 0x2b6   : > { %5030 = vst.msk [vmem:[%s8996_s5 + $0x30] sm:$0xff] %vm2032_vm6, %v4986_v47 }
 0x2b7   : > { %v4988_v63 = vpop.f32.mrf.mxu0 }
 0x2b8   : > { %v4989_v35 = vadd.f32 %v4988_v63, %v4892_v24 }
 0x2b9   : > { %v4990_v29 = vpop.f32.mrf.mxu0 }
 0x2ba   : > { %5031 = vst.msk [vmem:[%s8996_s5 + $0x38] sm:$0xff] %vm2032_vm6, %v4989_v35  ;;  %v5880_v62 = vpop.f32.mrf.mxu1 }
 0x2bc   : > { %v5881_v10 = vpop.f32.mrf.mxu1 }
 0x2bd   : > { %v5882_v60 = vadd.f32 %v5881_v10, %v5880_v62 }
 0x2be   : > { %v5883_v61 = vpop.f32.mrf.mxu1 }
 0x2bf   : > { %v4897_v38 = vadd.f32 %v5882_v60, %v8854_v22 }
 0x2c0   : > { %v5884_v7 = vpop.f32.mrf.mxu1 }
 0x2c1   : > { %v5885_v27 = vadd.f32 %v5884_v7, %v5883_v61 }
 0x2c3   : > { %v4900_v14 = vadd.f32 %v5885_v27, %v8863_v44 }
 0x2cf   : > { %v4993_v37 = vpop.f32.mrf.mxu0 }
 0x2d0   : > { %v4994_v5 = vadd.f32 %v4993_v37, %v4897_v38 }
 0x2d1   : > { %v4995_v31 = vpop.f32.mrf.mxu0 }
 0x2d2   : > { %5032 = vst.msk [vmem:[%s8996_s5 + $0x40] sm:$0xff] %vm2032_vm6, %v4994_v5 }
 0x2d3   : > { %v4996_v46 = vpop.f32.mrf.mxu0 }
 0x2d4   : > { %v4997_v15 = vadd.f32 %v4996_v46, %v4900_v14 }
 0x2d5   : > { %v4998_v30 = vpop.f32.mrf.mxu0 }
 0x2d6   : > { %5033 = vst.msk [vmem:[%s8996_s5 + $0x48] sm:$0xff] %vm2032_vm6, %v4997_v15  ;;  %v5886_v13 = vpop.f32.mrf.mxu1 }
 0x2d8   : > { %v5887_v43 = vpop.f32.mrf.mxu1 }
 0x2d9   : > { %v5888_v6 = vadd.f32 %v5887_v43, %v5886_v13 }
 0x2da   : > { %v5889_v4 = vpop.f32.mrf.mxu1 }
 0x2db   : > { %v4905_v1 = vadd.f32 %v5888_v6, %v8891_v28 }
 0x2dc   : > { %v5890_v34 = vpop.f32.mrf.mxu1 }
 0x2dd   : > { %v5891_v22 = vadd.f32 %v5890_v34, %v5889_v4 }
 0x2df   : > { %v4908_v44 = vadd.f32 %v5891_v22, %v8895_v19 }
 0x2eb   : > { %v5001_v53 = vpop.f32.mrf.mxu0 }
 0x2ec   : > { %v5002_v21 = vadd.f32 %v5001_v53, %v4905_v1 }
 0x2ed   : > { %v5003_v23 = vpop.f32.mrf.mxu0 }
 0x2ee   : > { %5034 = vst.msk [vmem:[%s8996_s5 + $0x50] sm:$0xff] %vm2032_vm6, %v5002_v21 }
 0x2ef   : > { %v5004_v41 = vpop.f32.mrf.mxu0 }
 0x2f0   : > { %v5005_v55 = vadd.f32 %v5004_v41, %v4908_v44 }
 0x2f1   : > { %v5006_v2 = vpop.f32.mrf.mxu0 }
 0x2f2   : > { %5035 = vst.msk [vmem:[%s8996_s5 + $0x58] sm:$0xff] %vm2032_vm6, %v5005_v55  ;;  %v5892_v32 = vpop.f32.mrf.mxu1 }
 0x2f4   : > { %v5893_v54 = vpop.f32.mrf.mxu1 }
 0x2f5   : > { %v5894_v20 = vadd.f32 %v5893_v54, %v5892_v32 }
 0x2f6   : > { %v5895_v17 = vpop.f32.mrf.mxu1 }
 0x2f7   : > { %v4913_v51 = vadd.f32 %v5894_v20, %v8917_v18 }
 0x2f8   : > { %v5896_v8 = vpop.f32.mrf.mxu1 }
 0x2f9   : > { %v5897_v28 = vadd.f32 %v5896_v8, %v5895_v17 }
 0x2fb   : > { %v4916_v19 = vadd.f32 %v5897_v28, %v8928_v39 }
 0x307   : > { %v5009_v58 = vpop.f32.mrf.mxu0 }
 0x308   : > { %v5010_v0 = vadd.f32 %v5009_v58, %v4913_v51 }
 0x309   : > { %v5011_v26 = vpop.f32.mrf.mxu0 }
 0x30a   : > { %5036 = vst.msk [vmem:[%s8996_s5 + $0x60] sm:$0xff] %vm2032_vm6, %v5010_v0 }
 0x30b   : > { %v5012_v42 = vpop.f32.mrf.mxu0 }
 0x30c   : > { %v5013_v48 = vadd.f32 %v5012_v42, %v4916_v19 }
 0x30d   : > { %v5014_v33 = vpop.f32.mrf.mxu0 }
 0x30e   : > { %5037 = vst.msk [vmem:[%s8996_s5 + $0x68] sm:$0xff] %vm2032_vm6, %v5013_v48  ;;  %v5898_v12 = vpop.f32.mrf.mxu1 }
 0x310   : > { %v5899_v36 = vpop.f32.mrf.mxu1 }
 0x311   : > { %v5900_v25 = vadd.f32 %v5899_v36, %v5898_v12 }
 0x312   : > { %v5901_v52 = vpop.f32.mrf.mxu1 }
 0x313   : > { %v4921_v9 = vadd.f32 %v5900_v25, %v8966_v3 }
 0x314   : > { %v5902_v56 = vpop.f32.mrf.mxu1 }
 0x315   : > { %v5903_v18 = vadd.f32 %v5902_v56, %v5901_v52 }
 0x316   : > { %v5017_v16 = vpop.f32.mrf.mxu0 }
 0x317   : > { %v5018_v11 = vadd.f32 %v5017_v16, %v4921_v9  ;;  %v4924_v39 = vadd.f32 %v5903_v18, %v8974_v40 }
 0x318   : > { %v5019_v59 = vpop.f32.mrf.mxu0 }
 0x319   : > { %5038 = vst.msk [vmem:[%s8996_s5 + $0x70] sm:$0xff] %vm2032_vm6, %v5018_v11 }
 0x31a   : > { %v5020_v45 = vpop.f32.mrf.mxu0 }
 0x31b   : > { %v5021_v49 = vadd.f32 %v5020_v45, %v4924_v39 }
 0x31c   : > { %v5022_v50 = vpop.f32.mrf.mxu0 }
 0x31d   : > { %5039 = vst.msk [vmem:[%s8996_s5 + $0x78] sm:$0xff] %vm2032_vm6, %v5021_v49 }
 0x31e PF: > { %s13_s16 = sadd.s32 1, %s6318_s16   ;;  %s9093_s12 = smov %s6310_s14 }
 0x31f   : > { %p10_p7 = scmp.ge.s32.totalorder %s13_s16, 6   ;;  %s9094_s13 = smov %s6314_s15 }
 0x320   : > { %s9095_s14 = smov %s9098_s17  ;;  %s9096_s15 = smov %s9102_s18 }
 0x321   :  { %12 = sbr.rel (!%p10_p7) target bundleno = 3 (0x3), region = 67 }

</bundles_post_ra>
